<compile_context>
chip_gen: v6e
topology: v6e:2x2x1
jax: 0.10.0
libtpu: 0.0.40
codegen_flags: <defaults>
</compile_context>

<pallas_src>
from functools import partial

import jax
import jax.numpy as jnp
from jax.experimental import pallas as pl
from jax.experimental.pallas import tpu as pltpu

# ---------------- constants matching the PyTorch module ----------------
MEAN_STATS = (103.939, 116.779, 123.68)          # BGR means (Keras "caffe" preprocessing)
EPOCHS = 100
LR = 0.01
DECODER_LOSS_WEIGHT = 1.0
VGG16_LOSS_WEIGHT = 5e-05
ENCODER_LOSS_WEIGHT = 2.0
ADAM_B1, ADAM_B2, ADAM_EPS = 0.9, 0.999, 1e-8     # torch.optim.Adam defaults
W_DIM = 512                                       # w-code width of the synthetic encoder/decoder

_VMEM = pltpu.MemorySpace.VMEM
_SMEM = pltpu.MemorySpace.SMEM

# VGG16 layers 0..22 (output_layer_idx=23 -> stop before the 4th maxpool).
VGG_CFG = [(3, 64), (64, 64), 'M',
           (64, 128), (128, 128), 'M',
           (128, 256), (256, 256), (256, 256), 'M',
           (256, 512), (512, 512), (512, 512)]

_MATMUL_SEM = pltpu.CompilerParams(
    dimension_semantics=("parallel", "parallel", "arbitrary"))


# ======================================================================
# Tile pickers: legal Pallas block dims (last dim: %128 or full;
# second-to-last: %8 or full), always dividing the array evenly.
# ======================================================================
def _lane_tile(dim, cap):
    if dim <= cap:
        return dim
    best = 0
    t = 128
    while t <= cap:
        if dim % t == 0:
            best = t
        t += 128
    return best if best else dim


def _sub_tile(dim, cap):
    if dim <= cap:
        return dim
    best = 0
    t = 8
    while t <= cap:
        if dim % t == 0:
            best = t
        t += 8
    return best if best else dim


# ======================================================================
# Pallas kernel 1: tiled fused dense  y = act(x @ w + b)
#   grid = (M/tm, N/tn, K/tk); bf16 MXU operands, f32 accumulator.
# ======================================================================
def _dense_fwd_kernel(x_ref, w_ref, b_ref, o_ref, acc_ref, *, act):
    @pl.when(pl.program_id(2) == 0)
    def _():
        acc_ref[...] = jnp.zeros_like(acc_ref)

    acc_ref[...] += jnp.dot(x_ref[...].astype(jnp.bfloat16),
                            w_ref[...].astype(jnp.bfloat16),
                            preferred_element_type=jnp.float32)

    @pl.when(pl.program_id(2) == pl.num_programs(2) - 1)
    def _():
        y = acc_ref[...] + b_ref[...]          # f32 epilogue (VPU/EUP)
        if act == 'relu':
            y = jnp.maximum(y, 0.0)
        elif act == 'tanh':
            y = jnp.tanh(y)
        o_ref[...] = y


def _dense_fwd_raw(x, w, b, act):
    m, k = x.shape
    n = w.shape[1]
    tm, tn, tk = _sub_tile(m, 256), _lane_tile(n, 256), _lane_tile(k, 512)
    return pl.pallas_call(
        partial(_dense_fwd_kernel, act=act),
        grid=(m // tm, n // tn, k // tk),
        out_shape=jax.ShapeDtypeStruct((m, n), jnp.float32),
        in_specs=[pl.BlockSpec((tm, tk), lambda i, j, kk: (i, kk)),
                  pl.BlockSpec((tk, tn), lambda i, j, kk: (kk, j)),
                  pl.BlockSpec((1, tn), lambda i, j, kk: (0, j))],
        out_specs=pl.BlockSpec((tm, tn), lambda i, j, kk: (i, j)),
        scratch_shapes=[pltpu.VMEM((tm, tn), jnp.float32)],
        compiler_params=_MATMUL_SEM,
    )(x, w, b)


# Backward (d loss / d input) with the activation-gradient mask fused in.
def _dense_bwd_kernel(g_ref, y_ref, wt_ref, o_ref, acc_ref, *, act):
    @pl.when(pl.program_id(2) == 0)
    def _():
        acc_ref[...] = jnp.zeros_like(acc_ref)

    g = g_ref[...]
    if act == 'relu':
        g = jnp.where(y_ref[...] > 0.0, g, 0.0)
    elif act == 'tanh':
        yv = y_ref[...]
        g = g * (1.0 - yv * yv)
    acc_ref[...] += jnp.dot(g.astype(jnp.bfloat16),
                            wt_ref[...].astype(jnp.bfloat16),
                            preferred_element_type=jnp.float32)

    @pl.when(pl.program_id(2) == pl.num_programs(2) - 1)
    def _():
        o_ref[...] = acc_ref[...]


def _dense_bwd_raw(g, y, wt, act):
    m, n = g.shape
    kdim = wt.shape[1]
    tm, tn, tk = _sub_tile(m, 256), _lane_tile(kdim, 256), _lane_tile(n, 512)
    return pl.pallas_call(
        partial(_dense_bwd_kernel, act=act),
        grid=(m // tm, kdim // tn, n // tk),
        out_shape=jax.ShapeDtypeStruct((m, kdim), jnp.float32),
        in_specs=[pl.BlockSpec((tm, tk), lambda i, j, kk: (i, kk)),
                  pl.BlockSpec((tm, tk), lambda i, j, kk: (i, kk)),
                  pl.BlockSpec((tk, tn), lambda i, j, kk: (kk, j))],
        out_specs=pl.BlockSpec((tm, tn), lambda i, j, kk: (i, j)),
        scratch_shapes=[pltpu.VMEM((tm, tn), jnp.float32)],
        compiler_params=_MATMUL_SEM,
    )(g, y, wt)


@partial(jax.custom_vjp, nondiff_argnums=(4,))
def dense(x, w, wt, b, act):
    return _dense_fwd_raw(x, w, b, act)


def _dense_vjp_fwd(x, w, wt, b, act):
    y = _dense_fwd_raw(x, w, b, act)
    return y, (wt, y)


def _dense_vjp_bwd(act, res, g):
    wt, y = res
    gx = _dense_bwd_raw(g, y, wt, act)
    # Weights/biases are frozen during refinement (only the w-code is optimized),
    # so their cotangents are never consumed -> return zeros (DCE'd by XLA).
    gw = jnp.zeros((wt.shape[1], wt.shape[0]), wt.dtype)
    gwt = jnp.zeros_like(wt)
    gb = jnp.zeros((1, wt.shape[0]), jnp.float32)
    return gx, gw, gwt, gb


dense.defvjp(_dense_vjp_fwd, _dense_vjp_bwd)


# ======================================================================
# Pallas kernel 2: fused 2x2 max-pool (forward + backward)
#   operates on a free reshape (B*H/2, 2, W/2, 2C) of the NHWC tensor.
# ======================================================================
def _pool_fwd_kernel(x_ref, o_ref, *, c):
    x = x_ref[...]                                   # (tm, 2, w2, 2c)
    h = jnp.maximum(x[:, 0], x[:, 1])                # rows 2i vs 2i+1
    o_ref[...] = jnp.maximum(h[..., :c], h[..., c:])  # cols 2j vs 2j+1


def _pool_bwd_kernel(x_ref, y_ref, g_ref, o_ref, *, c):
    x = x_ref[...]                                   # (tm, 2, w2, 2c)
    y = y_ref[...]
    g = g_ref[...]
    a = x[:, 0, :, :c]
    b = x[:, 0, :, c:]
    cc = x[:, 1, :, :c]
    d = x[:, 1, :, c:]
    # first-max-in-window (row-major) tie breaking, like PyTorch's MaxPool2d argmax
    ma = a == y
    mb = (b == y) & (~ma)
    mc = (cc == y) & (~ma) & (~mb)
    md = (d == y) & (~ma) & (~mb) & (~mc)
    o_ref[:, 0] = jnp.concatenate(
        [jnp.where(ma, g, 0.0), jnp.where(mb, g, 0.0)], axis=-1)
    o_ref[:, 1] = jnp.concatenate(
        [jnp.where(mc, g, 0.0), jnp.where(md, g, 0.0)], axis=-1)


def _pool_view(x):
    B, H, W, C = x.shape
    return x.reshape(B * (H // 2), 2, W // 2, 2 * C), (B, H, W, C)


def _pool_fwd_raw(x):
    x6, (B, H, W, C) = _pool_view(x)
    rows = x6.shape[0]
    tm = _sub_tile(rows, 256)
    y = pl.pallas_call(
        partial(_pool_fwd_kernel, c=C),
        grid=(rows // tm,),
        out_shape=jax.ShapeDtypeStruct((rows, W // 2, C), jnp.float32),
        in_specs=[pl.BlockSpec((tm, 2, W // 2, 2 * C), lambda i: (i, 0, 0, 0))],
        out_specs=pl.BlockSpec((tm, W // 2, C), lambda i: (i, 0, 0)),
        compiler_params=pltpu.CompilerParams(dimension_semantics=("parallel",)),
    )(x6)
    return y.reshape(B, H // 2, W // 2, C)


def _pool_bwd_raw(x, y, g):
    x6, (B, H, W, C) = _pool_view(x)
    rows = x6.shape[0]
    tm = _sub_tile(rows, 256)
    y2 = y.reshape(rows, W // 2, C)
    g2 = g.reshape(rows, W // 2, C)
    gx = pl.pallas_call(
        partial(_pool_bwd_kernel, c=C),
        grid=(rows // tm,),
        out_shape=jax.ShapeDtypeStruct(x6.shape, jnp.float32),
        in_specs=[pl.BlockSpec((tm, 2, W // 2, 2 * C), lambda i: (i, 0, 0, 0)),
                  pl.BlockSpec((tm, W // 2, C), lambda i: (i, 0, 0)),
                  pl.BlockSpec((tm, W // 2, C), lambda i: (i, 0, 0))],
        out_specs=pl.BlockSpec((tm, 2, W // 2, 2 * C), lambda i: (i, 0, 0, 0)),
        compiler_params=pltpu.CompilerParams(dimension_semantics=("parallel",)),
    )(x6, y2, g2)
    return gx.reshape(B, H, W, C)


@jax.custom_vjp
def maxpool2x2(x):
    return _pool_fwd_raw(x)


def _maxpool_vjp_fwd(x):
    y = _pool_fwd_raw(x)
    return y, (x, y)


def _maxpool_vjp_bwd(res, g):
    x, y = res
    return (_pool_bwd_raw(x, y, g),)


maxpool2x2.defvjp(_maxpool_vjp_fwd, _maxpool_vjp_bwd)


# ======================================================================
# Pallas kernel 3: mean squared error (gridded, lane-dense, accumulating)
# ======================================================================
def _mse_kernel(a_ref, b_ref, o_ref, *, inv_n):
    @pl.when(pl.program_id(0) == 0)
    def _():
        o_ref[...] = jnp.zeros_like(o_ref)
    d = a_ref[...] - b_ref[...]
    s = jnp.sum(d * d, axis=1, keepdims=True)        # (tr, 1)
    o_ref[...] += jnp.sum(s, axis=0, keepdims=True) * inv_n


def _mse_raw(a, b):
    n = a.size
    r = -(-n // 128)                  # rows of the lane-dense (-1, 128) layout
    tr = min(r, 512)
    rp = -(-r // tr) * tr             # pad rows so the tile divides evenly
    pad = rp * 128 - n                # zero padding contributes 0 to the sum
    af = jnp.pad(a.reshape(-1), (0, pad)).reshape(rp, 128)
    bf = jnp.pad(b.reshape(-1), (0, pad)).reshape(rp, 128)
    out = pl.pallas_call(
        partial(_mse_kernel, inv_n=1.0 / n),
        grid=(rp // tr,),
        out_shape=jax.ShapeDtypeStruct((1, 1), jnp.float32),
        in_specs=[pl.BlockSpec((tr, 128), lambda i: (i, 0))] * 2,
        out_specs=pl.BlockSpec((1, 1), lambda i: (0, 0)),
        compiler_params=pltpu.CompilerParams(dimension_semantics=("arbitrary",)),
    )(af, bf)
    return out[0, 0]


@jax.custom_vjp
def mse(a, b):
    return _mse_raw(a, b)


def _mse_vjp_fwd(a, b):
    return _mse_raw(a, b), (a, b)


def _mse_vjp_bwd(res, g):
    a, b = res
    d = (a - b) * (g * (2.0 / a.size))
    return d, -d


mse.defvjp(_mse_vjp_fwd, _mse_vjp_bwd)


# ======================================================================
# Pallas kernel 4: Adam update of the w-code (torch.optim.Adam semantics)
# ======================================================================
def _adam_kernel(c_ref, w_ref, g_ref, m_ref, v_ref, wo_ref, mo_ref, vo_ref):
    g = g_ref[...]
    m = ADAM_B1 * m_ref[...] + (1.0 - ADAM_B1) * g
    v = ADAM_B2 * v_ref[...] + (1.0 - ADAM_B2) * g * g
    mhat = m / c_ref[0]               # c_ref[0] = 1 - beta1**t
    vhat = v / c_ref[1]               # c_ref[1] = 1 - beta2**t
    wo_ref[...] = w_ref[...] - LR * mhat / (jnp.sqrt(vhat) + ADAM_EPS)
    mo_ref[...] = m
    vo_ref[...] = v


def adam_update(w, g, m, v, c1, c2):
    c = jnp.stack([c1, c2]).astype(jnp.float32)
    s = jax.ShapeDtypeStruct(w.shape, jnp.float32)
    return pl.pallas_call(
        _adam_kernel,
        out_shape=(s, s, s),
        in_specs=[pl.BlockSpec(memory_space=_SMEM)] +
                 [pl.BlockSpec(memory_space=_VMEM)] * 4,
        out_specs=(pl.BlockSpec(memory_space=_VMEM),) * 3,
    )(c, w, g, m, v)


# ======================================================================
# Model pieces built from the kernels
# ======================================================================
def conv3x3_relu(x, params):
    """3x3 same-padding conv + ReLU on NHWC via im2col + tiled Pallas matmul."""
    # TODO(synk): stream the 9 taps through the matmul accumulator (manual halo DMA)
    #             instead of materializing the 9x im2col concat in HBM.
    w, wt, b = params
    B, H, W, Cin = x.shape
    xp = jnp.pad(x, ((0, 0), (1, 1), (1, 1), (0, 0)))
    cols = jnp.concatenate(
        [xp[:, ky:ky + H, kx:kx + W, :] for ky in range(3) for kx in range(3)],
        axis=-1)
    y = dense(cols.reshape(B * H * W, 9 * Cin), w, wt, b, 'relu')
    return y.reshape(B, H, W, -1)


def vgg16_features(img, vgg_params):
    """VGG16 layers 0..22 (block4_conv3 + ReLU), NHWC, input range [-1, 1]."""
    x = (img - (-1.0)) * 255.0 / (1.0 - (-1.0))               # [-1,1] -> [0,255]
    x = x[..., ::-1]                                          # RGB -> BGR (channel-last)
    x = x - jnp.asarray(MEAN_STATS, jnp.float32).reshape(1, 1, 1, 3)
    pi = 0
    for item in VGG_CFG:
        if item == 'M':
            x = maxpool2x2(x)
        else:
            x = conv3x3_relu(x, vgg_params[pi])
            pi += 1
    return x


def encoder(img_nhwc, enc_params):
    w, wt, b = enc_params
    flat = img_nhwc.reshape(img_nhwc.shape[0], -1)
    return dense(flat, w, wt, b, 'none')


def decoder(wcode, dec_params, bhw):
    B, H, W = bhw
    w, wt, b = dec_params
    y = dense(wcode, w, wt, b, 'tanh')                        # keep output in [-1, 1]
    return y.reshape(B, H, W, 3)


# ======================================================================
# The refiner forward pass (latent optimization loop)
# ======================================================================
@jax.jit
def stylegan_refiner_forward(x_nchw, enc_p, dec_p, vgg_p):
    x = jnp.transpose(x_nchw, (0, 2, 3, 1)).astype(jnp.float32)   # NCHW -> NHWC
    B, H, W, _ = x.shape

    w0 = encoder(x, enc_p)                    # torch: computed under no_grad
    x_feat = vgg16_features(x, vgg_p)         # identical value every step; hoisted

    def loss_fn(wc):
        y = decoder(wc, dec_p, (B, H, W))
        loss = DECODER_LOSS_WEIGHT * mse(x, y)
        y_feat = vgg16_features(y, vgg_p)
        loss = loss + VGG16_LOSS_WEIGHT * mse(x_feat, y_feat)
        w_rec = encoder(y, enc_p)
        loss = loss + ENCODER_LOSS_WEIGHT * mse(wc, w_rec)
        return loss

    def step(t, carry):
        wc, m, v = carry
        g = jax.grad(loss_fn)(wc)
        tf = t.astype(jnp.float32)
        c1 = 1.0 - jnp.power(jnp.float32(ADAM_B1), tf)
        c2 = 1.0 - jnp.power(jnp.float32(ADAM_B2), tf)
        return adam_update(wc, g, m, v, c1, c2)

    init = (w0, jnp.zeros_like(w0), jnp.zeros_like(w0))
    wc, _, _ = jax.lax.fori_loop(1, EPOCHS + 1, step, init)
    return wc


# ======================================================================
# Deterministic parameter initialization (synthetic weights, no checkpoint)
# ======================================================================
def _make_dense(key, fan_in, fan_out, std):
    w = jax.random.normal(key, (fan_in, fan_out), jnp.float32) * std
    # Weights are frozen -> store bf16 (MXU-native) plus a transpose precomputed
    # once for the backward matmul (no per-step HBM transpose).
    return (w.astype(jnp.bfloat16),
            jnp.transpose(w).astype(jnp.bfloat16),
            jnp.zeros((1, fan_out), jnp.float32))


def init_params(key, H, W):
    vgg = []
    for item in VGG_CFG:
        if item == 'M':
            continue
        cin, cout = item
        key, sub = jax.random.split(key)
        std = (2.0 / (9 * cin)) ** 0.5
        vgg.append(_make_dense(sub, 9 * cin, cout, std))
    img_dim = 3 * H * W
    key, k1, k2 = jax.random.split(key, 3)
    # TODO(synk): StyleGANEncoder / StyleGANDecoder are undefined in the reference;
    #             deterministic affine stand-ins with a 512-d w-code are used.
    enc = _make_dense(k1, img_dim, W_DIM, 0.02)
    dec = _make_dense(k2, W_DIM, img_dim, 0.02)
    return enc, dec, vgg


if __name__ == "__main__":
    key = jax.random.PRNGKey(0)
    key, kx = jax.random.split(key)
    B, H, W = 2, 16, 16
    x = jax.random.uniform(kx, (B, 3, H, W), jnp.float32, minval=-1.0, maxval=1.0)

    enc_p, dec_p, vgg_p = init_params(key, H, W)

    wcode = stylegan_refiner_forward(x, enc_p, dec_p, vgg_p)
    wcode = jax.block_until_ready(wcode)

    assert wcode.shape == (B, W_DIM)
    assert bool(jnp.all(jnp.isfinite(wcode)))
    print("KERNEL_OK")
</pallas_src>

<mosaic_0001>
module attributes {stable_mosaic.version = 11 : i64} {
  func.func @_dense_fwd_kernel(%arg0: i32, %arg1: i32, %arg2: i32, %arg3: memref<256x27xf32, #tpu.memory_space<vmem>>, %arg4: memref<27x64xbf16, #tpu.memory_space<vmem>>, %arg5: memref<1x64xf32, #tpu.memory_space<vmem>>, %arg6: memref<256x64xf32, #tpu.memory_space<vmem>>, %arg7: memref<256x64xf32, #tpu.memory_space<vmem>>) attributes {dimension_semantics = [#tpu.dimension_semantics<parallel>, #tpu.dimension_semantics<parallel>, #tpu.dimension_semantics<arbitrary>], iteration_bounds = array<i64: 2, 1, 1>, scalar_prefetch = 0 : i64, scratch_operands = 1 : i64, tpu.core_type = #tpu.core_type<tc>, window_params = [{transform_indices = @transform_0, window_bounds = array<i64: 256, 27>}, {transform_indices = @transform_1, window_bounds = array<i64: 27, 64>}, {transform_indices = @transform_2, window_bounds = array<i64: 1, 64>}, {transform_indices = @transform_3, window_bounds = array<i64: 256, 64>}]} {
    %c0_i32 = arith.constant 0 : i32
    %0 = arith.cmpi eq, %arg2, %c0_i32 : i32
    %1 = arith.extui %0 : i1 to i32
    %c0_i32_0 = arith.constant 0 : i32
    %2 = arith.cmpi ne, %1, %c0_i32_0 : i32
    scf.if %2 {
      %cst_10 = arith.constant 0.000000e+00 : f32
      %13 = vector.broadcast %cst_10 : f32 to vector<256x64xf32>
      %c0_11 = arith.constant 0 : index
      %c0_12 = arith.constant 0 : index
      %14 = vector.load %arg7[%c0_11, %c0_12] : memref<256x64xf32, #tpu.memory_space<vmem>>, vector<256x64xf32>
      tpu.vector_store %arg7[%c0_11, %c0_12], %13 {strides = array<i32>} : memref<256x64xf32, #tpu.memory_space<vmem>>, vector<256x64xf32>,
    } else {
    }
    %c0 = arith.constant 0 : index
    %c0_1 = arith.constant 0 : index
    %3 = vector.load %arg7[%c0, %c0_1] : memref<256x64xf32, #tpu.memory_space<vmem>>, vector<256x64xf32>
    %c0_2 = arith.constant 0 : index
    %c0_3 = arith.constant 0 : index
    %4 = vector.load %arg3[%c0_2, %c0_3] : memref<256x27xf32, #tpu.memory_space<vmem>>, vector<256x27xf32>
    %5 = arith.truncf %4 : vector<256x27xf32> to vector<256x27xbf16>
    %c0_4 = arith.constant 0 : index
    %c0_5 = arith.constant 0 : index
    %6 = vector.load %arg4[%c0_4, %c0_5] : memref<27x64xbf16, #tpu.memory_space<vmem>>, vector<27x64xbf16>
    %cst = arith.constant dense<0.000000e+00> : vector<256x64xf32>
    %7 = tpu.matmul %5, %6, %cst {dimension_numbers = #tpu.dot_dimension_numbers<[1], [0], [0], [1], [0, 0, 1, 1], [], []>} : vector<256x27xbf16>, vector<27x64xbf16>, vector<256x64xf32> -> vector<256x64xf32>
    %8 = arith.addf %3, %7 : vector<256x64xf32>
    %c0_6 = arith.constant 0 : index
    %c0_7 = arith.constant 0 : index
    %9 = vector.load %arg7[%c0_6, %c0_7] : memref<256x64xf32, #tpu.memory_space<vmem>>, vector<256x64xf32>
    tpu.vector_store %arg7[%c0_6, %c0_7], %8 {strides = array<i32>} : memref<256x64xf32, #tpu.memory_space<vmem>>, vector<256x64xf32>,
    %c0_i32_8 = arith.constant 0 : i32
    %10 = arith.cmpi eq, %arg2, %c0_i32_8 : i32
    %11 = arith.extui %10 : i1 to i32
    %c0_i32_9 = arith.constant 0 : i32
    %12 = arith.cmpi ne, %11, %c0_i32_9 : i32
    scf.if %12 {
      %c0_10 = arith.constant 0 : index
      %c0_11 = arith.constant 0 : index
      %13 = vector.load %arg7[%c0_10, %c0_11] : memref<256x64xf32, #tpu.memory_space<vmem>>, vector<256x64xf32>
      %c0_12 = arith.constant 0 : index
      %c0_13 = arith.constant 0 : index
      %14 = vector.load %arg5[%c0_12, %c0_13] : memref<1x64xf32, #tpu.memory_space<vmem>>, vector<1x64xf32>
      %15 = vector.broadcast %14 : vector<1x64xf32> to vector<256x64xf32>
      %16 = arith.addf %13, %15 : vector<256x64xf32>
      %cst_14 = arith.constant 0.000000e+00 : f32
      %17 = vector.broadcast %cst_14 : f32 to vector<256x64xf32>
      %18 = arith.maximumf %16, %17 : vector<256x64xf32>
      %c0_15 = arith.constant 0 : index
      %c0_16 = arith.constant 0 : index
      %19 = vector.load %arg6[%c0_15, %c0_16] : memref<256x64xf32, #tpu.memory_space<vmem>>, vector<256x64xf32>
      tpu.vector_store %arg6[%c0_15, %c0_16], %18 {strides = array<i32>} : memref<256x64xf32, #tpu.memory_space<vmem>>, vector<256x64xf32>,
    } else {
    }
    return
  }
  func.func @transform_0(%arg0: i32, %arg1: i32, %arg2: i32) -> (i32, i32) {
    %c0_i32 = arith.constant 0 : i32
    return %arg0, %arg2 : i32, i32
  }
  func.func @transform_1(%arg0: i32, %arg1: i32, %arg2: i32) -> (i32, i32) {
    %c0_i32 = arith.constant 0 : i32
    return %arg2, %arg1 : i32, i32
  }
  func.func @transform_2(%arg0: i32, %arg1: i32, %arg2: i32) -> (i32, i32) {
    %c0_i32 = arith.constant 0 : i32
    %c0_i32_0 = arith.constant 0 : i32
    return %c0_i32, %arg1 : i32, i32
  }
  func.func @transform_3(%arg0: i32, %arg1: i32, %arg2: i32) -> (i32, i32) {
    %c0_i32 = arith.constant 0 : i32
    return %arg0, %arg1 : i32, i32
  }
}

module attributes {stable_mosaic.version = 11 : i64} {
  func.func @_dense_fwd_kernel(%arg0: i32, %arg1: i32, %arg2: i32, %arg3: memref<256x576xf32, #tpu.memory_space<vmem>>, %arg4: memref<576x64xbf16, #tpu.memory_space<vmem>>, %arg5: memref<1x64xf32, #tpu.memory_space<vmem>>, %arg6: memref<256x64xf32, #tpu.memory_space<vmem>>, %arg7: memref<256x64xf32, #tpu.memory_space<vmem>>) attributes {dimension_semantics = [#tpu.dimension_semantics<parallel>, #tpu.dimension_semantics<parallel>, #tpu.dimension_semantics<arbitrary>], iteration_bounds = array<i64: 2, 1, 1>, scalar_prefetch = 0 : i64, scratch_operands = 1 : i64, tpu.core_type = #tpu.core_type<tc>, window_params = [{transform_indices = @transform_0, window_bounds = array<i64: 256, 576>}, {transform_indices = @transform_1, window_bounds = array<i64: 576, 64>}, {transform_indices = @transform_2, window_bounds = array<i64: 1, 64>}, {transform_indices = @transform_3, window_bounds = array<i64: 256, 64>}]} {
    %c0_i32 = arith.constant 0 : i32
    %0 = arith.cmpi eq, %arg2, %c0_i32 : i32
    %1 = arith.extui %0 : i1 to i32
    %c0_i32_0 = arith.constant 0 : i32
    %2 = arith.cmpi ne, %1, %c0_i32_0 : i32
    scf.if %2 {
      %cst_10 = arith.constant 0.000000e+00 : f32
      %13 = vector.broadcast %cst_10 : f32 to vector<256x64xf32>
      %c0_11 = arith.constant 0 : index
      %c0_12 = arith.constant 0 : index
      %14 = vector.load %arg7[%c0_11, %c0_12] : memref<256x64xf32, #tpu.memory_space<vmem>>, vector<256x64xf32>
      tpu.vector_store %arg7[%c0_11, %c0_12], %13 {strides = array<i32>} : memref<256x64xf32, #tpu.memory_space<vmem>>, vector<256x64xf32>,
    } else {
    }
    %c0 = arith.constant 0 : index
    %c0_1 = arith.constant 0 : index
    %3 = vector.load %arg7[%c0, %c0_1] : memref<256x64xf32, #tpu.memory_space<vmem>>, vector<256x64xf32>
    %c0_2 = arith.constant 0 : index
    %c0_3 = arith.constant 0 : index
    %4 = vector.load %arg3[%c0_2, %c0_3] : memref<256x576xf32, #tpu.memory_space<vmem>>, vector<256x576xf32>
    %5 = arith.truncf %4 : vector<256x576xf32> to vector<256x576xbf16>
    %c0_4 = arith.constant 0 : index
    %c0_5 = arith.constant 0 : index
    %6 = vector.load %arg4[%c0_4, %c0_5] : memref<576x64xbf16, #tpu.memory_space<vmem>>, vector<576x64xbf16>
    %cst = arith.constant dense<0.000000e+00> : vector<256x64xf32>
    %7 = tpu.matmul %5, %6, %cst {dimension_numbers = #tpu.dot_dimension_numbers<[1], [0], [0], [1], [0, 0, 1, 1], [], []>} : vector<256x576xbf16>, vector<576x64xbf16>, vector<256x64xf32> -> vector<256x64xf32>
    %8 = arith.addf %3, %7 : vector<256x64xf32>
    %c0_6 = arith.constant 0 : index
    %c0_7 = arith.constant 0 : index
    %9 = vector.load %arg7[%c0_6, %c0_7] : memref<256x64xf32, #tpu.memory_space<vmem>>, vector<256x64xf32>
    tpu.vector_store %arg7[%c0_6, %c0_7], %8 {strides = array<i32>} : memref<256x64xf32, #tpu.memory_space<vmem>>, vector<256x64xf32>,
    %c0_i32_8 = arith.constant 0 : i32
    %10 = arith.cmpi eq, %arg2, %c0_i32_8 : i32
    %11 = arith.extui %10 : i1 to i32
    %c0_i32_9 = arith.constant 0 : i32
    %12 = arith.cmpi ne, %11, %c0_i32_9 : i32
    scf.if %12 {
      %c0_10 = arith.constant 0 : index
      %c0_11 = arith.constant 0 : index
      %13 = vector.load %arg7[%c0_10, %c0_11] : memref<256x64xf32, #tpu.memory_space<vmem>>, vector<256x64xf32>
      %c0_12 = arith.constant 0 : index
      %c0_13 = arith.constant 0 : index
      %14 = vector.load %arg5[%c0_12, %c0_13] : memref<1x64xf32, #tpu.memory_space<vmem>>, vector<1x64xf32>
      %15 = vector.broadcast %14 : vector<1x64xf32> to vector<256x64xf32>
      %16 = arith.addf %13, %15 : vector<256x64xf32>
      %cst_14 = arith.constant 0.000000e+00 : f32
      %17 = vector.broadcast %cst_14 : f32 to vector<256x64xf32>
      %18 = arith.maximumf %16, %17 : vector<256x64xf32>
      %c0_15 = arith.constant 0 : index
      %c0_16 = arith.constant 0 : index
      %19 = vector.load %arg6[%c0_15, %c0_16] : memref<256x64xf32, #tpu.memory_space<vmem>>, vector<256x64xf32>
      tpu.vector_store %arg6[%c0_15, %c0_16], %18 {strides = array<i32>} : memref<256x64xf32, #tpu.memory_space<vmem>>, vector<256x64xf32>,
    } else {
    }
    return
  }
  func.func @transform_0(%arg0: i32, %arg1: i32, %arg2: i32) -> (i32, i32) {
    %c0_i32 = arith.constant 0 : i32
    return %arg0, %arg2 : i32, i32
  }
  func.func @transform_1(%arg0: i32, %arg1: i32, %arg2: i32) -> (i32, i32) {
    %c0_i32 = arith.constant 0 : i32
    return %arg2, %arg1 : i32, i32
  }
  func.func @transform_2(%arg0: i32, %arg1: i32, %arg2: i32) -> (i32, i32) {
    %c0_i32 = arith.constant 0 : i32
    %c0_i32_0 = arith.constant 0 : i32
    return %c0_i32, %arg1 : i32, i32
  }
  func.func @transform_3(%arg0: i32, %arg1: i32, %arg2: i32) -> (i32, i32) {
    %c0_i32 = arith.constant 0 : i32
    return %arg0, %arg1 : i32, i32
  }
}

module attributes {stable_mosaic.version = 11 : i64} {
  func.func @_pool_fwd_kernel(%arg0: i32, %arg1: memref<16x2x8x128xf32, #tpu.memory_space<vmem>>, %arg2: memref<16x8x64xf32, #tpu.memory_space<vmem>>) attributes {dimension_semantics = [#tpu.dimension_semantics<parallel>], iteration_bounds = array<i64: 1>, scalar_prefetch = 0 : i64, scratch_operands = 0 : i64, tpu.core_type = #tpu.core_type<tc>, window_params = [{transform_indices = @transform_0, window_bounds = array<i64: 16, 2, 8, 128>}, {transform_indices = @transform_1, window_bounds = array<i64: 16, 8, 64>}]} {
    %c0 = arith.constant 0 : index
    %c0_0 = arith.constant 0 : index
    %c0_1 = arith.constant 0 : index
    %c0_2 = arith.constant 0 : index
    %0 = vector.load %arg1[%c0, %c0_0, %c0_1, %c0_2] : memref<16x2x8x128xf32, #tpu.memory_space<vmem>>, vector<16x2x8x128xf32>
    %1 = vector.extract_strided_slice %0 {offsets = [0, 0, 0, 0], sizes = [16, 1, 8, 128], strides = [1, 1, 1, 1]} : vector<16x2x8x128xf32> to vector<16x1x8x128xf32>
    %2 = vector.shape_cast %1 : vector<16x1x8x128xf32> to vector<16x8x128xf32>
    %3 = vector.extract_strided_slice %0 {offsets = [0, 1, 0, 0], sizes = [16, 1, 8, 128], strides = [1, 1, 1, 1]} : vector<16x2x8x128xf32> to vector<16x1x8x128xf32>
    %4 = vector.shape_cast %3 : vector<16x1x8x128xf32> to vector<16x8x128xf32>
    %5 = arith.maximumf %2, %4 : vector<16x8x128xf32>
    %6 = vector.extract_strided_slice %5 {offsets = [0, 0, 0], sizes = [16, 8, 64], strides = [1, 1, 1]} : vector<16x8x128xf32> to vector<16x8x64xf32>
    %7 = vector.extract_strided_slice %5 {offsets = [0, 0, 64], sizes = [16, 8, 64], strides = [1, 1, 1]} : vector<16x8x128xf32> to vector<16x8x64xf32>
    %8 = arith.maximumf %6, %7 : vector<16x8x64xf32>
    %c0_3 = arith.constant 0 : index
    %c0_4 = arith.constant 0 : index
    %c0_5 = arith.constant 0 : index
    %9 = vector.load %arg2[%c0_3, %c0_4, %c0_5] : memref<16x8x64xf32, #tpu.memory_space<vmem>>, vector<16x8x64xf32>
    tpu.vector_store %arg2[%c0_3, %c0_4, %c0_5], %8 {strides = array<i32>} : memref<16x8x64xf32, #tpu.memory_space<vmem>>, vector<16x8x64xf32>,
    return
  }
  func.func @transform_0(%arg0: i32) -> (i32, i32, i32, i32) {
    %c0_i32 = arith.constant 0 : i32
    %c0_i32_0 = arith.constant 0 : i32
    %c0_i32_1 = arith.constant 0 : i32
    %c0_i32_2 = arith.constant 0 : i32
    return %arg0, %c0_i32, %c0_i32_0, %c0_i32_1 : i32, i32, i32, i32
  }
  func.func @transform_1(%arg0: i32) -> (i32, i32, i32) {
    %c0_i32 = arith.constant 0 : i32
    %c0_i32_0 = arith.constant 0 : i32
    %c0_i32_1 = arith.constant 0 : i32
    return %arg0, %c0_i32, %c0_i32_0 : i32, i32, i32
  }
}

module attributes {stable_mosaic.version = 11 : i64} {
  func.func @_dense_fwd_kernel(%arg0: i32, %arg1: i32, %arg2: i32, %arg3: memref<128x576xf32, #tpu.memory_space<vmem>>, %arg4: memref<576x128xbf16, #tpu.memory_space<vmem>>, %arg5: memref<1x128xf32, #tpu.memory_space<vmem>>, %arg6: memref<128x128xf32, #tpu.memory_space<vmem>>, %arg7: memref<128x128xf32, #tpu.memory_space<vmem>>) attributes {dimension_semantics = [#tpu.dimension_semantics<parallel>, #tpu.dimension_semantics<parallel>, #tpu.dimension_semantics<arbitrary>], iteration_bounds = array<i64: 1, 1, 1>, scalar_prefetch = 0 : i64, scratch_operands = 1 : i64, tpu.core_type = #tpu.core_type<tc>, window_params = [{transform_indices = @transform_0, window_bounds = array<i64: 128, 576>}, {transform_indices = @transform_1, window_bounds = array<i64: 576, 128>}, {transform_indices = @transform_2, window_bounds = array<i64: 1, 128>}, {transform_indices = @transform_3, window_bounds = array<i64: 128, 128>}]} {
    %c0_i32 = arith.constant 0 : i32
    %0 = arith.cmpi eq, %arg2, %c0_i32 : i32
    %1 = arith.extui %0 : i1 to i32
    %c0_i32_0 = arith.constant 0 : i32
    %2 = arith.cmpi ne, %1, %c0_i32_0 : i32
    scf.if %2 {
      %cst_10 = arith.constant 0.000000e+00 : f32
      %13 = vector.broadcast %cst_10 : f32 to vector<128x128xf32>
      %c0_11 = arith.constant 0 : index
      %c0_12 = arith.constant 0 : index
      %14 = vector.load %arg7[%c0_11, %c0_12] : memref<128x128xf32, #tpu.memory_space<vmem>>, vector<128x128xf32>
      tpu.vector_store %arg7[%c0_11, %c0_12], %13 {strides = array<i32>} : memref<128x128xf32, #tpu.memory_space<vmem>>, vector<128x128xf32>,
    } else {
    }
    %c0 = arith.constant 0 : index
    %c0_1 = arith.constant 0 : index
    %3 = vector.load %arg7[%c0, %c0_1] : memref<128x128xf32, #tpu.memory_space<vmem>>, vector<128x128xf32>
    %c0_2 = arith.constant 0 : index
    %c0_3 = arith.constant 0 : index
    %4 = vector.load %arg3[%c0_2, %c0_3] : memref<128x576xf32, #tpu.memory_space<vmem>>, vector<128x576xf32>
    %5 = arith.truncf %4 : vector<128x576xf32> to vector<128x576xbf16>
    %c0_4 = arith.constant 0 : index
    %c0_5 = arith.constant 0 : index
    %6 = vector.load %arg4[%c0_4, %c0_5] : memref<576x128xbf16, #tpu.memory_space<vmem>>, vector<576x128xbf16>
    %cst = arith.constant dense<0.000000e+00> : vector<128x128xf32>
    %7 = tpu.matmul %5, %6, %cst {dimension_numbers = #tpu.dot_dimension_numbers<[1], [0], [0], [1], [0, 0, 1, 1], [], []>} : vector<128x576xbf16>, vector<576x128xbf16>, vector<128x128xf32> -> vector<128x128xf32>
    %8 = arith.addf %3, %7 : vector<128x128xf32>
    %c0_6 = arith.constant 0 : index
    %c0_7 = arith.constant 0 : index
    %9 = vector.load %arg7[%c0_6, %c0_7] : memref<128x128xf32, #tpu.memory_space<vmem>>, vector<128x128xf32>
    tpu.vector_store %arg7[%c0_6, %c0_7], %8 {strides = array<i32>} : memref<128x128xf32, #tpu.memory_space<vmem>>, vector<128x128xf32>,
    %c0_i32_8 = arith.constant 0 : i32
    %10 = arith.cmpi eq, %arg2, %c0_i32_8 : i32
    %11 = arith.extui %10 : i1 to i32
    %c0_i32_9 = arith.constant 0 : i32
    %12 = arith.cmpi ne, %11, %c0_i32_9 : i32
    scf.if %12 {
      %c0_10 = arith.constant 0 : index
      %c0_11 = arith.constant 0 : index
      %13 = vector.load %arg7[%c0_10, %c0_11] : memref<128x128xf32, #tpu.memory_space<vmem>>, vector<128x128xf32>
      %c0_12 = arith.constant 0 : index
      %c0_13 = arith.constant 0 : index
      %14 = vector.load %arg5[%c0_12, %c0_13] : memref<1x128xf32, #tpu.memory_space<vmem>>, vector<1x128xf32>
      %15 = vector.broadcast %14 : vector<1x128xf32> to vector<128x128xf32>
      %16 = arith.addf %13, %15 : vector<128x128xf32>
      %cst_14 = arith.constant 0.000000e+00 : f32
      %17 = vector.broadcast %cst_14 : f32 to vector<128x128xf32>
      %18 = arith.maximumf %16, %17 : vector<128x128xf32>
      %c0_15 = arith.constant 0 : index
      %c0_16 = arith.constant 0 : index
      %19 = vector.load %arg6[%c0_15, %c0_16] : memref<128x128xf32, #tpu.memory_space<vmem>>, vector<128x128xf32>
      tpu.vector_store %arg6[%c0_15, %c0_16], %18 {strides = array<i32>} : memref<128x128xf32, #tpu.memory_space<vmem>>, vector<128x128xf32>,
    } else {
    }
    return
  }
  func.func @transform_0(%arg0: i32, %arg1: i32, %arg2: i32) -> (i32, i32) {
    %c0_i32 = arith.constant 0 : i32
    return %arg0, %arg2 : i32, i32
  }
  func.func @transform_1(%arg0: i32, %arg1: i32, %arg2: i32) -> (i32, i32) {
    %c0_i32 = arith.constant 0 : i32
    return %arg2, %arg1 : i32, i32
  }
  func.func @transform_2(%arg0: i32, %arg1: i32, %arg2: i32) -> (i32, i32) {
    %c0_i32 = arith.constant 0 : i32
    %c0_i32_0 = arith.constant 0 : i32
    return %c0_i32, %arg1 : i32, i32
  }
  func.func @transform_3(%arg0: i32, %arg1: i32, %arg2: i32) -> (i32, i32) {
    %c0_i32 = arith.constant 0 : i32
    return %arg0, %arg1 : i32, i32
  }
}

module attributes {stable_mosaic.version = 11 : i64} {
  func.func @_dense_fwd_kernel(%arg0: i32, %arg1: i32, %arg2: i32, %arg3: memref<128x384xf32, #tpu.memory_space<vmem>>, %arg4: memref<384x128xbf16, #tpu.memory_space<vmem>>, %arg5: memref<1x128xf32, #tpu.memory_space<vmem>>, %arg6: memref<128x128xf32, #tpu.memory_space<vmem>>, %arg7: memref<128x128xf32, #tpu.memory_space<vmem>>) attributes {dimension_semantics = [#tpu.dimension_semantics<parallel>, #tpu.dimension_semantics<parallel>, #tpu.dimension_semantics<arbitrary>], iteration_bounds = array<i64: 1, 1, 3>, scalar_prefetch = 0 : i64, scratch_operands = 1 : i64, tpu.core_type = #tpu.core_type<tc>, window_params = [{transform_indices = @transform_0, window_bounds = array<i64: 128, 384>}, {transform_indices = @transform_1, window_bounds = array<i64: 384, 128>}, {transform_indices = @transform_2, window_bounds = array<i64: 1, 128>}, {transform_indices = @transform_3, window_bounds = array<i64: 128, 128>}]} {
    %c0_i32 = arith.constant 0 : i32
    %0 = arith.cmpi eq, %arg2, %c0_i32 : i32
    %1 = arith.extui %0 : i1 to i32
    %c0_i32_0 = arith.constant 0 : i32
    %2 = arith.cmpi ne, %1, %c0_i32_0 : i32
    scf.if %2 {
      %cst_9 = arith.constant 0.000000e+00 : f32
      %13 = vector.broadcast %cst_9 : f32 to vector<128x128xf32>
      %c0_10 = arith.constant 0 : index
      %c0_11 = arith.constant 0 : index
      %14 = vector.load %arg7[%c0_10, %c0_11] : memref<128x128xf32, #tpu.memory_space<vmem>>, vector<128x128xf32>
      tpu.vector_store %arg7[%c0_10, %c0_11], %13 {strides = array<i32>} : memref<128x128xf32, #tpu.memory_space<vmem>>, vector<128x128xf32>,
    } else {
    }
    %c0 = arith.constant 0 : index
    %c0_1 = arith.constant 0 : index
    %3 = vector.load %arg7[%c0, %c0_1] : memref<128x128xf32, #tpu.memory_space<vmem>>, vector<128x128xf32>
    %c0_2 = arith.constant 0 : index
    %c0_3 = arith.constant 0 : index
    %4 = vector.load %arg3[%c0_2, %c0_3] : memref<128x384xf32, #tpu.memory_space<vmem>>, vector<128x384xf32>
    %5 = arith.truncf %4 : vector<128x384xf32> to vector<128x384xbf16>
    %c0_4 = arith.constant 0 : index
    %c0_5 = arith.constant 0 : index
    %6 = vector.load %arg4[%c0_4, %c0_5] : memref<384x128xbf16, #tpu.memory_space<vmem>>, vector<384x128xbf16>
    %cst = arith.constant dense<0.000000e+00> : vector<128x128xf32>
    %7 = tpu.matmul %5, %6, %cst {dimension_numbers = #tpu.dot_dimension_numbers<[1], [0], [0], [1], [0, 0, 1, 1], [], []>} : vector<128x384xbf16>, vector<384x128xbf16>, vector<128x128xf32> -> vector<128x128xf32>
    %8 = arith.addf %3, %7 : vector<128x128xf32>
    %c0_6 = arith.constant 0 : index
    %c0_7 = arith.constant 0 : index
    %9 = vector.load %arg7[%c0_6, %c0_7] : memref<128x128xf32, #tpu.memory_space<vmem>>, vector<128x128xf32>
    tpu.vector_store %arg7[%c0_6, %c0_7], %8 {strides = array<i32>} : memref<128x128xf32, #tpu.memory_space<vmem>>, vector<128x128xf32>,
    %c2_i32 = arith.constant 2 : i32
    %10 = arith.cmpi eq, %arg2, %c2_i32 : i32
    %11 = arith.extui %10 : i1 to i32
    %c0_i32_8 = arith.constant 0 : i32
    %12 = arith.cmpi ne, %11, %c0_i32_8 : i32
    scf.if %12 {
      %c0_9 = arith.constant 0 : index
      %c0_10 = arith.constant 0 : index
      %13 = vector.load %arg7[%c0_9, %c0_10] : memref<128x128xf32, #tpu.memory_space<vmem>>, vector<128x128xf32>
      %c0_11 = arith.constant 0 : index
      %c0_12 = arith.constant 0 : index
      %14 = vector.load %arg5[%c0_11, %c0_12] : memref<1x128xf32, #tpu.memory_space<vmem>>, vector<1x128xf32>
      %15 = vector.broadcast %14 : vector<1x128xf32> to vector<128x128xf32>
      %16 = arith.addf %13, %15 : vector<128x128xf32>
      %cst_13 = arith.constant 0.000000e+00 : f32
      %17 = vector.broadcast %cst_13 : f32 to vector<128x128xf32>
      %18 = arith.maximumf %16, %17 : vector<128x128xf32>
      %c0_14 = arith.constant 0 : index
      %c0_15 = arith.constant 0 : index
      %19 = vector.load %arg6[%c0_14, %c0_15] : memref<128x128xf32, #tpu.memory_space<vmem>>, vector<128x128xf32>
      tpu.vector_store %arg6[%c0_14, %c0_15], %18 {strides = array<i32>} : memref<128x128xf32, #tpu.memory_space<vmem>>, vector<128x128xf32>,
    } else {
    }
    return
  }
  func.func @transform_0(%arg0: i32, %arg1: i32, %arg2: i32) -> (i32, i32) {
    %c0_i32 = arith.constant 0 : i32
    return %arg0, %arg2 : i32, i32
  }
  func.func @transform_1(%arg0: i32, %arg1: i32, %arg2: i32) -> (i32, i32) {
    %c0_i32 = arith.constant 0 : i32
    return %arg2, %arg1 : i32, i32
  }
  func.func @transform_2(%arg0: i32, %arg1: i32, %arg2: i32) -> (i32, i32) {
    %c0_i32 = arith.constant 0 : i32
    %c0_i32_0 = arith.constant 0 : i32
    return %c0_i32, %arg1 : i32, i32
  }
  func.func @transform_3(%arg0: i32, %arg1: i32, %arg2: i32) -> (i32, i32) {
    %c0_i32 = arith.constant 0 : i32
    return %arg0, %arg1 : i32, i32
  }
}

module attributes {stable_mosaic.version = 11 : i64} {
  func.func @_pool_fwd_kernel(%arg0: i32, %arg1: memref<8x2x4x256xf32, #tpu.memory_space<vmem>>, %arg2: memref<8x4x128xf32, #tpu.memory_space<vmem>>) attributes {dimension_semantics = [#tpu.dimension_semantics<parallel>], iteration_bounds = array<i64: 1>, scalar_prefetch = 0 : i64, scratch_operands = 0 : i64, tpu.core_type = #tpu.core_type<tc>, window_params = [{transform_indices = @transform_0, window_bounds = array<i64: 8, 2, 4, 256>}, {transform_indices = @transform_1, window_bounds = array<i64: 8, 4, 128>}]} {
    %c0 = arith.constant 0 : index
    %c0_0 = arith.constant 0 : index
    %c0_1 = arith.constant 0 : index
    %c0_2 = arith.constant 0 : index
    %0 = vector.load %arg1[%c0, %c0_0, %c0_1, %c0_2] : memref<8x2x4x256xf32, #tpu.memory_space<vmem>>, vector<8x2x4x256xf32>
    %1 = vector.extract_strided_slice %0 {offsets = [0, 0, 0, 0], sizes = [8, 1, 4, 256], strides = [1, 1, 1, 1]} : vector<8x2x4x256xf32> to vector<8x1x4x256xf32>
    %2 = vector.shape_cast %1 : vector<8x1x4x256xf32> to vector<8x4x256xf32>
    %3 = vector.extract_strided_slice %0 {offsets = [0, 1, 0, 0], sizes = [8, 1, 4, 256], strides = [1, 1, 1, 1]} : vector<8x2x4x256xf32> to vector<8x1x4x256xf32>
    %4 = vector.shape_cast %3 : vector<8x1x4x256xf32> to vector<8x4x256xf32>
    %5 = arith.maximumf %2, %4 : vector<8x4x256xf32>
    %6 = vector.extract_strided_slice %5 {offsets = [0, 0, 0], sizes = [8, 4, 128], strides = [1, 1, 1]} : vector<8x4x256xf32> to vector<8x4x128xf32>
    %7 = vector.extract_strided_slice %5 {offsets = [0, 0, 128], sizes = [8, 4, 128], strides = [1, 1, 1]} : vector<8x4x256xf32> to vector<8x4x128xf32>
    %8 = arith.maximumf %6, %7 : vector<8x4x128xf32>
    %c0_3 = arith.constant 0 : index
    %c0_4 = arith.constant 0 : index
    %c0_5 = arith.constant 0 : index
    %9 = vector.load %arg2[%c0_3, %c0_4, %c0_5] : memref<8x4x128xf32, #tpu.memory_space<vmem>>, vector<8x4x128xf32>
    tpu.vector_store %arg2[%c0_3, %c0_4, %c0_5], %8 {strides = array<i32>} : memref<8x4x128xf32, #tpu.memory_space<vmem>>, vector<8x4x128xf32>,
    return
  }
  func.func @transform_0(%arg0: i32) -> (i32, i32, i32, i32) {
    %c0_i32 = arith.constant 0 : i32
    %c0_i32_0 = arith.constant 0 : i32
    %c0_i32_1 = arith.constant 0 : i32
    %c0_i32_2 = arith.constant 0 : i32
    return %arg0, %c0_i32, %c0_i32_0, %c0_i32_1 : i32, i32, i32, i32
  }
  func.func @transform_1(%arg0: i32) -> (i32, i32, i32) {
    %c0_i32 = arith.constant 0 : i32
    %c0_i32_0 = arith.constant 0 : i32
    %c0_i32_1 = arith.constant 0 : i32
    return %arg0, %c0_i32, %c0_i32_0 : i32, i32, i32
  }
}

module attributes {stable_mosaic.version = 11 : i64} {
  func.func @_dense_fwd_kernel(%arg0: i32, %arg1: i32, %arg2: i32, %arg3: memref<32x384xf32, #tpu.memory_space<vmem>>, %arg4: memref<384x256xbf16, #tpu.memory_space<vmem>>, %arg5: memref<1x256xf32, #tpu.memory_space<vmem>>, %arg6: memref<32x256xf32, #tpu.memory_space<vmem>>, %arg7: memref<32x256xf32, #tpu.memory_space<vmem>>) attributes {dimension_semantics = [#tpu.dimension_semantics<parallel>, #tpu.dimension_semantics<parallel>, #tpu.dimension_semantics<arbitrary>], iteration_bounds = array<i64: 1, 1, 3>, scalar_prefetch = 0 : i64, scratch_operands = 1 : i64, tpu.core_type = #tpu.core_type<tc>, window_params = [{transform_indices = @transform_0, window_bounds = array<i64: 32, 384>}, {transform_indices = @transform_1, window_bounds = array<i64: 384, 256>}, {transform_indices = @transform_2, window_bounds = array<i64: 1, 256>}, {transform_indices = @transform_3, window_bounds = array<i64: 32, 256>}]} {
    %c0_i32 = arith.constant 0 : i32
    %0 = arith.cmpi eq, %arg2, %c0_i32 : i32
    %1 = arith.extui %0 : i1 to i32
    %c0_i32_0 = arith.constant 0 : i32
    %2 = arith.cmpi ne, %1, %c0_i32_0 : i32
    scf.if %2 {
      %cst_9 = arith.constant 0.000000e+00 : f32
      %13 = vector.broadcast %cst_9 : f32 to vector<32x256xf32>
      %c0_10 = arith.constant 0 : index
      %c0_11 = arith.constant 0 : index
      %14 = vector.load %arg7[%c0_10, %c0_11] : memref<32x256xf32, #tpu.memory_space<vmem>>, vector<32x256xf32>
      tpu.vector_store %arg7[%c0_10, %c0_11], %13 {strides = array<i32>} : memref<32x256xf32, #tpu.memory_space<vmem>>, vector<32x256xf32>,
    } else {
    }
    %c0 = arith.constant 0 : index
    %c0_1 = arith.constant 0 : index
    %3 = vector.load %arg7[%c0, %c0_1] : memref<32x256xf32, #tpu.memory_space<vmem>>, vector<32x256xf32>
    %c0_2 = arith.constant 0 : index
    %c0_3 = arith.constant 0 : index
    %4 = vector.load %arg3[%c0_2, %c0_3] : memref<32x384xf32, #tpu.memory_space<vmem>>, vector<32x384xf32>
    %5 = arith.truncf %4 : vector<32x384xf32> to vector<32x384xbf16>
    %c0_4 = arith.constant 0 : index
    %c0_5 = arith.constant 0 : index
    %6 = vector.load %arg4[%c0_4, %c0_5] : memref<384x256xbf16, #tpu.memory_space<vmem>>, vector<384x256xbf16>
    %cst = arith.constant dense<0.000000e+00> : vector<32x256xf32>
    %7 = tpu.matmul %5, %6, %cst {dimension_numbers = #tpu.dot_dimension_numbers<[1], [0], [0], [1], [0, 0, 1, 1], [], []>} : vector<32x384xbf16>, vector<384x256xbf16>, vector<32x256xf32> -> vector<32x256xf32>
    %8 = arith.addf %3, %7 : vector<32x256xf32>
    %c0_6 = arith.constant 0 : index
    %c0_7 = arith.constant 0 : index
    %9 = vector.load %arg7[%c0_6, %c0_7] : memref<32x256xf32, #tpu.memory_space<vmem>>, vector<32x256xf32>
    tpu.vector_store %arg7[%c0_6, %c0_7], %8 {strides = array<i32>} : memref<32x256xf32, #tpu.memory_space<vmem>>, vector<32x256xf32>,
    %c2_i32 = arith.constant 2 : i32
    %10 = arith.cmpi eq, %arg2, %c2_i32 : i32
    %11 = arith.extui %10 : i1 to i32
    %c0_i32_8 = arith.constant 0 : i32
    %12 = arith.cmpi ne, %11, %c0_i32_8 : i32
    scf.if %12 {
      %c0_9 = arith.constant 0 : index
      %c0_10 = arith.constant 0 : index
      %13 = vector.load %arg7[%c0_9, %c0_10] : memref<32x256xf32, #tpu.memory_space<vmem>>, vector<32x256xf32>
      %c0_11 = arith.constant 0 : index
      %c0_12 = arith.constant 0 : index
      %14 = vector.load %arg5[%c0_11, %c0_12] : memref<1x256xf32, #tpu.memory_space<vmem>>, vector<1x256xf32>
      %15 = vector.broadcast %14 : vector<1x256xf32> to vector<32x256xf32>
      %16 = arith.addf %13, %15 : vector<32x256xf32>
      %cst_13 = arith.constant 0.000000e+00 : f32
      %17 = vector.broadcast %cst_13 : f32 to vector<32x256xf32>
      %18 = arith.maximumf %16, %17 : vector<32x256xf32>
      %c0_14 = arith.constant 0 : index
      %c0_15 = arith.constant 0 : index
      %19 = vector.load %arg6[%c0_14, %c0_15] : memref<32x256xf32, #tpu.memory_space<vmem>>, vector<32x256xf32>
      tpu.vector_store %arg6[%c0_14, %c0_15], %18 {strides = array<i32>} : memref<32x256xf32, #tpu.memory_space<vmem>>, vector<32x256xf32>,
    } else {
    }
    return
  }
  func.func @transform_0(%arg0: i32, %arg1: i32, %arg2: i32) -> (i32, i32) {
    %c0_i32 = arith.constant 0 : i32
    return %arg0, %arg2 : i32, i32
  }
  func.func @transform_1(%arg0: i32, %arg1: i32, %arg2: i32) -> (i32, i32) {
    %c0_i32 = arith.constant 0 : i32
    return %arg2, %arg1 : i32, i32
  }
  func.func @transform_2(%arg0: i32, %arg1: i32, %arg2: i32) -> (i32, i32) {
    %c0_i32 = arith.constant 0 : i32
    %c0_i32_0 = arith.constant 0 : i32
    return %c0_i32, %arg1 : i32, i32
  }
  func.func @transform_3(%arg0: i32, %arg1: i32, %arg2: i32) -> (i32, i32) {
    %c0_i32 = arith.constant 0 : i32
    return %arg0, %arg1 : i32, i32
  }
}

module attributes {stable_mosaic.version = 11 : i64} {
  func.func @_dense_fwd_kernel(%arg0: i32, %arg1: i32, %arg2: i32, %arg3: memref<32x384xf32, #tpu.memory_space<vmem>>, %arg4: memref<384x256xbf16, #tpu.memory_space<vmem>>, %arg5: memref<1x256xf32, #tpu.memory_space<vmem>>, %arg6: memref<32x256xf32, #tpu.memory_space<vmem>>, %arg7: memref<32x256xf32, #tpu.memory_space<vmem>>) attributes {dimension_semantics = [#tpu.dimension_semantics<parallel>, #tpu.dimension_semantics<parallel>, #tpu.dimension_semantics<arbitrary>], iteration_bounds = array<i64: 1, 1, 6>, scalar_prefetch = 0 : i64, scratch_operands = 1 : i64, tpu.core_type = #tpu.core_type<tc>, window_params = [{transform_indices = @transform_0, window_bounds = array<i64: 32, 384>}, {transform_indices = @transform_1, window_bounds = array<i64: 384, 256>}, {transform_indices = @transform_2, window_bounds = array<i64: 1, 256>}, {transform_indices = @transform_3, window_bounds = array<i64: 32, 256>}]} {
    %c0_i32 = arith.constant 0 : i32
    %0 = arith.cmpi eq, %arg2, %c0_i32 : i32
    %1 = arith.extui %0 : i1 to i32
    %c0_i32_0 = arith.constant 0 : i32
    %2 = arith.cmpi ne, %1, %c0_i32_0 : i32
    scf.if %2 {
      %cst_9 = arith.constant 0.000000e+00 : f32
      %13 = vector.broadcast %cst_9 : f32 to vector<32x256xf32>
      %c0_10 = arith.constant 0 : index
      %c0_11 = arith.constant 0 : index
      %14 = vector.load %arg7[%c0_10, %c0_11] : memref<32x256xf32, #tpu.memory_space<vmem>>, vector<32x256xf32>
      tpu.vector_store %arg7[%c0_10, %c0_11], %13 {strides = array<i32>} : memref<32x256xf32, #tpu.memory_space<vmem>>, vector<32x256xf32>,
    } else {
    }
    %c0 = arith.constant 0 : index
    %c0_1 = arith.constant 0 : index
    %3 = vector.load %arg7[%c0, %c0_1] : memref<32x256xf32, #tpu.memory_space<vmem>>, vector<32x256xf32>
    %c0_2 = arith.constant 0 : index
    %c0_3 = arith.constant 0 : index
    %4 = vector.load %arg3[%c0_2, %c0_3] : memref<32x384xf32, #tpu.memory_space<vmem>>, vector<32x384xf32>
    %5 = arith.truncf %4 : vector<32x384xf32> to vector<32x384xbf16>
    %c0_4 = arith.constant 0 : index
    %c0_5 = arith.constant 0 : index
    %6 = vector.load %arg4[%c0_4, %c0_5] : memref<384x256xbf16, #tpu.memory_space<vmem>>, vector<384x256xbf16>
    %cst = arith.constant dense<0.000000e+00> : vector<32x256xf32>
    %7 = tpu.matmul %5, %6, %cst {dimension_numbers = #tpu.dot_dimension_numbers<[1], [0], [0], [1], [0, 0, 1, 1], [], []>} : vector<32x384xbf16>, vector<384x256xbf16>, vector<32x256xf32> -> vector<32x256xf32>
    %8 = arith.addf %3, %7 : vector<32x256xf32>
    %c0_6 = arith.constant 0 : index
    %c0_7 = arith.constant 0 : index
    %9 = vector.load %arg7[%c0_6, %c0_7] : memref<32x256xf32, #tpu.memory_space<vmem>>, vector<32x256xf32>
    tpu.vector_store %arg7[%c0_6, %c0_7], %8 {strides = array<i32>} : memref<32x256xf32, #tpu.memory_space<vmem>>, vector<32x256xf32>,
    %c5_i32 = arith.constant 5 : i32
    %10 = arith.cmpi eq, %arg2, %c5_i32 : i32
    %11 = arith.extui %10 : i1 to i32
    %c0_i32_8 = arith.constant 0 : i32
    %12 = arith.cmpi ne, %11, %c0_i32_8 : i32
    scf.if %12 {
      %c0_9 = arith.constant 0 : index
      %c0_10 = arith.constant 0 : index
      %13 = vector.load %arg7[%c0_9, %c0_10] : memref<32x256xf32, #tpu.memory_space<vmem>>, vector<32x256xf32>
      %c0_11 = arith.constant 0 : index
      %c0_12 = arith.constant 0 : index
      %14 = vector.load %arg5[%c0_11, %c0_12] : memref<1x256xf32, #tpu.memory_space<vmem>>, vector<1x256xf32>
      %15 = vector.broadcast %14 : vector<1x256xf32> to vector<32x256xf32>
      %16 = arith.addf %13, %15 : vector<32x256xf32>
      %cst_13 = arith.constant 0.000000e+00 : f32
      %17 = vector.broadcast %cst_13 : f32 to vector<32x256xf32>
      %18 = arith.maximumf %16, %17 : vector<32x256xf32>
      %c0_14 = arith.constant 0 : index
      %c0_15 = arith.constant 0 : index
      %19 = vector.load %arg6[%c0_14, %c0_15] : memref<32x256xf32, #tpu.memory_space<vmem>>, vector<32x256xf32>
      tpu.vector_store %arg6[%c0_14, %c0_15], %18 {strides = array<i32>} : memref<32x256xf32, #tpu.memory_space<vmem>>, vector<32x256xf32>,
    } else {
    }
    return
  }
  func.func @transform_0(%arg0: i32, %arg1: i32, %arg2: i32) -> (i32, i32) {
    %c0_i32 = arith.constant 0 : i32
    return %arg0, %arg2 : i32, i32
  }
  func.func @transform_1(%arg0: i32, %arg1: i32, %arg2: i32) -> (i32, i32) {
    %c0_i32 = arith.constant 0 : i32
    return %arg2, %arg1 : i32, i32
  }
  func.func @transform_2(%arg0: i32, %arg1: i32, %arg2: i32) -> (i32, i32) {
    %c0_i32 = arith.constant 0 : i32
    %c0_i32_0 = arith.constant 0 : i32
    return %c0_i32, %arg1 : i32, i32
  }
  func.func @transform_3(%arg0: i32, %arg1: i32, %arg2: i32) -> (i32, i32) {
    %c0_i32 = arith.constant 0 : i32
    return %arg0, %arg1 : i32, i32
  }
}

module attributes {stable_mosaic.version = 11 : i64} {
  func.func @_pool_fwd_kernel(%arg0: i32, %arg1: memref<4x2x2x512xf32, #tpu.memory_space<vmem>>, %arg2: memref<4x2x256xf32, #tpu.memory_space<vmem>>) attributes {dimension_semantics = [#tpu.dimension_semantics<parallel>], iteration_bounds = array<i64: 1>, scalar_prefetch = 0 : i64, scratch_operands = 0 : i64, tpu.core_type = #tpu.core_type<tc>, window_params = [{transform_indices = @transform_0, window_bounds = array<i64: 4, 2, 2, 512>}, {transform_indices = @transform_1, window_bounds = array<i64: 4, 2, 256>}]} {
    %c0 = arith.constant 0 : index
    %c0_0 = arith.constant 0 : index
    %c0_1 = arith.constant 0 : index
    %c0_2 = arith.constant 0 : index
    %0 = vector.load %arg1[%c0, %c0_0, %c0_1, %c0_2] : memref<4x2x2x512xf32, #tpu.memory_space<vmem>>, vector<4x2x2x512xf32>
    %1 = vector.extract_strided_slice %0 {offsets = [0, 0, 0, 0], sizes = [4, 1, 2, 512], strides = [1, 1, 1, 1]} : vector<4x2x2x512xf32> to vector<4x1x2x512xf32>
    %2 = vector.shape_cast %1 : vector<4x1x2x512xf32> to vector<4x2x512xf32>
    %3 = vector.extract_strided_slice %0 {offsets = [0, 1, 0, 0], sizes = [4, 1, 2, 512], strides = [1, 1, 1, 1]} : vector<4x2x2x512xf32> to vector<4x1x2x512xf32>
    %4 = vector.shape_cast %3 : vector<4x1x2x512xf32> to vector<4x2x512xf32>
    %5 = arith.maximumf %2, %4 : vector<4x2x512xf32>
    %6 = vector.extract_strided_slice %5 {offsets = [0, 0, 0], sizes = [4, 2, 256], strides = [1, 1, 1]} : vector<4x2x512xf32> to vector<4x2x256xf32>
    %7 = vector.extract_strided_slice %5 {offsets = [0, 0, 256], sizes = [4, 2, 256], strides = [1, 1, 1]} : vector<4x2x512xf32> to vector<4x2x256xf32>
    %8 = arith.maximumf %6, %7 : vector<4x2x256xf32>
    %c0_3 = arith.constant 0 : index
    %c0_4 = arith.constant 0 : index
    %c0_5 = arith.constant 0 : index
    %9 = vector.load %arg2[%c0_3, %c0_4, %c0_5] : memref<4x2x256xf32, #tpu.memory_space<vmem>>, vector<4x2x256xf32>
    tpu.vector_store %arg2[%c0_3, %c0_4, %c0_5], %8 {strides = array<i32>} : memref<4x2x256xf32, #tpu.memory_space<vmem>>, vector<4x2x256xf32>,
    return
  }
  func.func @transform_0(%arg0: i32) -> (i32, i32, i32, i32) {
    %c0_i32 = arith.constant 0 : i32
    %c0_i32_0 = arith.constant 0 : i32
    %c0_i32_1 = arith.constant 0 : i32
    %c0_i32_2 = arith.constant 0 : i32
    return %arg0, %c0_i32, %c0_i32_0, %c0_i32_1 : i32, i32, i32, i32
  }
  func.func @transform_1(%arg0: i32) -> (i32, i32, i32) {
    %c0_i32 = arith.constant 0 : i32
    %c0_i32_0 = arith.constant 0 : i32
    %c0_i32_1 = arith.constant 0 : i32
    return %arg0, %c0_i32, %c0_i32_0 : i32, i32, i32
  }
}

module attributes {stable_mosaic.version = 11 : i64} {
  func.func @_dense_fwd_kernel(%arg0: i32, %arg1: i32, %arg2: i32, %arg3: memref<8x384xf32, #tpu.memory_space<vmem>>, %arg4: memref<384x256xbf16, #tpu.memory_space<vmem>>, %arg5: memref<1x256xf32, #tpu.memory_space<vmem>>, %arg6: memref<8x256xf32, #tpu.memory_space<vmem>>, %arg7: memref<8x256xf32, #tpu.memory_space<vmem>>) attributes {dimension_semantics = [#tpu.dimension_semantics<parallel>, #tpu.dimension_semantics<parallel>, #tpu.dimension_semantics<arbitrary>], iteration_bounds = array<i64: 1, 2, 6>, scalar_prefetch = 0 : i64, scratch_operands = 1 : i64, tpu.core_type = #tpu.core_type<tc>, window_params = [{transform_indices = @transform_0, window_bounds = array<i64: 8, 384>}, {transform_indices = @transform_1, window_bounds = array<i64: 384, 256>}, {transform_indices = @transform_2, window_bounds = array<i64: 1, 256>}, {transform_indices = @transform_3, window_bounds = array<i64: 8, 256>}]} {
    %c0_i32 = arith.constant 0 : i32
    %0 = arith.cmpi eq, %arg2, %c0_i32 : i32
    %1 = arith.extui %0 : i1 to i32
    %c0_i32_0 = arith.constant 0 : i32
    %2 = arith.cmpi ne, %1, %c0_i32_0 : i32
    scf.if %2 {
      %cst_9 = arith.constant 0.000000e+00 : f32
      %13 = vector.broadcast %cst_9 : f32 to vector<8x256xf32>
      %c0_10 = arith.constant 0 : index
      %c0_11 = arith.constant 0 : index
      %14 = vector.load %arg7[%c0_10, %c0_11] : memref<8x256xf32, #tpu.memory_space<vmem>>, vector<8x256xf32>
      tpu.vector_store %arg7[%c0_10, %c0_11], %13 {strides = array<i32>} : memref<8x256xf32, #tpu.memory_space<vmem>>, vector<8x256xf32>,
    } else {
    }
    %c0 = arith.constant 0 : index
    %c0_1 = arith.constant 0 : index
    %3 = vector.load %arg7[%c0, %c0_1] : memref<8x256xf32, #tpu.memory_space<vmem>>, vector<8x256xf32>
    %c0_2 = arith.constant 0 : index
    %c0_3 = arith.constant 0 : index
    %4 = vector.load %arg3[%c0_2, %c0_3] : memref<8x384xf32, #tpu.memory_space<vmem>>, vector<8x384xf32>
    %5 = arith.truncf %4 : vector<8x384xf32> to vector<8x384xbf16>
    %c0_4 = arith.constant 0 : index
    %c0_5 = arith.constant 0 : index
    %6 = vector.load %arg4[%c0_4, %c0_5] : memref<384x256xbf16, #tpu.memory_space<vmem>>, vector<384x256xbf16>
    %cst = arith.constant dense<0.000000e+00> : vector<8x256xf32>
    %7 = tpu.matmul %5, %6, %cst {dimension_numbers = #tpu.dot_dimension_numbers<[1], [0], [0], [1], [0, 0, 1, 1], [], []>} : vector<8x384xbf16>, vector<384x256xbf16>, vector<8x256xf32> -> vector<8x256xf32>
    %8 = arith.addf %3, %7 : vector<8x256xf32>
    %c0_6 = arith.constant 0 : index
    %c0_7 = arith.constant 0 : index
    %9 = vector.load %arg7[%c0_6, %c0_7] : memref<8x256xf32, #tpu.memory_space<vmem>>, vector<8x256xf32>
    tpu.vector_store %arg7[%c0_6, %c0_7], %8 {strides = array<i32>} : memref<8x256xf32, #tpu.memory_space<vmem>>, vector<8x256xf32>,
    %c5_i32 = arith.constant 5 : i32
    %10 = arith.cmpi eq, %arg2, %c5_i32 : i32
    %11 = arith.extui %10 : i1 to i32
    %c0_i32_8 = arith.constant 0 : i32
    %12 = arith.cmpi ne, %11, %c0_i32_8 : i32
    scf.if %12 {
      %c0_9 = arith.constant 0 : index
      %c0_10 = arith.constant 0 : index
      %13 = vector.load %arg7[%c0_9, %c0_10] : memref<8x256xf32, #tpu.memory_space<vmem>>, vector<8x256xf32>
      %c0_11 = arith.constant 0 : index
      %c0_12 = arith.constant 0 : index
      %14 = vector.load %arg5[%c0_11, %c0_12] : memref<1x256xf32, #tpu.memory_space<vmem>>, vector<1x256xf32>
      %15 = vector.broadcast %14 : vector<1x256xf32> to vector<8x256xf32>
      %16 = arith.addf %13, %15 : vector<8x256xf32>
      %cst_13 = arith.constant 0.000000e+00 : f32
      %17 = vector.broadcast %cst_13 : f32 to vector<8x256xf32>
      %18 = arith.maximumf %16, %17 : vector<8x256xf32>
      %c0_14 = arith.constant 0 : index
      %c0_15 = arith.constant 0 : index
      %19 = vector.load %arg6[%c0_14, %c0_15] : memref<8x256xf32, #tpu.memory_space<vmem>>, vector<8x256xf32>
      tpu.vector_store %arg6[%c0_14, %c0_15], %18 {strides = array<i32>} : memref<8x256xf32, #tpu.memory_space<vmem>>, vector<8x256xf32>,
    } else {
    }
    return
  }
  func.func @transform_0(%arg0: i32, %arg1: i32, %arg2: i32) -> (i32, i32) {
    %c0_i32 = arith.constant 0 : i32
    return %arg0, %arg2 : i32, i32
  }
  func.func @transform_1(%arg0: i32, %arg1: i32, %arg2: i32) -> (i32, i32) {
    %c0_i32 = arith.constant 0 : i32
    return %arg2, %arg1 : i32, i32
  }
  func.func @transform_2(%arg0: i32, %arg1: i32, %arg2: i32) -> (i32, i32) {
    %c0_i32 = arith.constant 0 : i32
    %c0_i32_0 = arith.constant 0 : i32
    return %c0_i32, %arg1 : i32, i32
  }
  func.func @transform_3(%arg0: i32, %arg1: i32, %arg2: i32) -> (i32, i32) {
    %c0_i32 = arith.constant 0 : i32
    return %arg0, %arg1 : i32, i32
  }
}

module attributes {stable_mosaic.version = 11 : i64} {
  func.func @_dense_fwd_kernel(%arg0: i32, %arg1: i32, %arg2: i32, %arg3: memref<2x384xf32, #tpu.memory_space<vmem>>, %arg4: memref<384x256xbf16, #tpu.memory_space<vmem>>, %arg5: memref<1x256xf32, #tpu.memory_space<vmem>>, %arg6: memref<2x256xf32, #tpu.memory_space<vmem>>, %arg7: memref<2x256xf32, #tpu.memory_space<vmem>>) attributes {dimension_semantics = [#tpu.dimension_semantics<parallel>, #tpu.dimension_semantics<parallel>, #tpu.dimension_semantics<arbitrary>], iteration_bounds = array<i64: 1, 2, 2>, scalar_prefetch = 0 : i64, scratch_operands = 1 : i64, tpu.core_type = #tpu.core_type<tc>, window_params = [{transform_indices = @transform_0, window_bounds = array<i64: 2, 384>}, {transform_indices = @transform_1, window_bounds = array<i64: 384, 256>}, {transform_indices = @transform_2, window_bounds = array<i64: 1, 256>}, {transform_indices = @transform_3, window_bounds = array<i64: 2, 256>}]} {
    %c0_i32 = arith.constant 0 : i32
    %0 = arith.cmpi eq, %arg2, %c0_i32 : i32
    %1 = arith.extui %0 : i1 to i32
    %c0_i32_0 = arith.constant 0 : i32
    %2 = arith.cmpi ne, %1, %c0_i32_0 : i32
    scf.if %2 {
      %cst_9 = arith.constant 0.000000e+00 : f32
      %13 = vector.broadcast %cst_9 : f32 to vector<2x256xf32>
      %c0_10 = arith.constant 0 : index
      %c0_11 = arith.constant 0 : index
      %14 = vector.load %arg7[%c0_10, %c0_11] : memref<2x256xf32, #tpu.memory_space<vmem>>, vector<2x256xf32>
      tpu.vector_store %arg7[%c0_10, %c0_11], %13 {strides = array<i32>} : memref<2x256xf32, #tpu.memory_space<vmem>>, vector<2x256xf32>,
    } else {
    }
    %c0 = arith.constant 0 : index
    %c0_1 = arith.constant 0 : index
    %3 = vector.load %arg7[%c0, %c0_1] : memref<2x256xf32, #tpu.memory_space<vmem>>, vector<2x256xf32>
    %c0_2 = arith.constant 0 : index
    %c0_3 = arith.constant 0 : index
    %4 = vector.load %arg3[%c0_2, %c0_3] : memref<2x384xf32, #tpu.memory_space<vmem>>, vector<2x384xf32>
    %5 = arith.truncf %4 : vector<2x384xf32> to vector<2x384xbf16>
    %c0_4 = arith.constant 0 : index
    %c0_5 = arith.constant 0 : index
    %6 = vector.load %arg4[%c0_4, %c0_5] : memref<384x256xbf16, #tpu.memory_space<vmem>>, vector<384x256xbf16>
    %cst = arith.constant dense<0.000000e+00> : vector<2x256xf32>
    %7 = tpu.matmul %5, %6, %cst {dimension_numbers = #tpu.dot_dimension_numbers<[1], [0], [0], [1], [0, 0, 1, 1], [], []>} : vector<2x384xbf16>, vector<384x256xbf16>, vector<2x256xf32> -> vector<2x256xf32>
    %8 = arith.addf %3, %7 : vector<2x256xf32>
    %c0_6 = arith.constant 0 : index
    %c0_7 = arith.constant 0 : index
    %9 = vector.load %arg7[%c0_6, %c0_7] : memref<2x256xf32, #tpu.memory_space<vmem>>, vector<2x256xf32>
    tpu.vector_store %arg7[%c0_6, %c0_7], %8 {strides = array<i32>} : memref<2x256xf32, #tpu.memory_space<vmem>>, vector<2x256xf32>,
    %c1_i32 = arith.constant 1 : i32
    %10 = arith.cmpi eq, %arg2, %c1_i32 : i32
    %11 = arith.extui %10 : i1 to i32
    %c0_i32_8 = arith.constant 0 : i32
    %12 = arith.cmpi ne, %11, %c0_i32_8 : i32
    scf.if %12 {
      %c0_9 = arith.constant 0 : index
      %c0_10 = arith.constant 0 : index
      %13 = vector.load %arg7[%c0_9, %c0_10] : memref<2x256xf32, #tpu.memory_space<vmem>>, vector<2x256xf32>
      %c0_11 = arith.constant 0 : index
      %c0_12 = arith.constant 0 : index
      %14 = vector.load %arg5[%c0_11, %c0_12] : memref<1x256xf32, #tpu.memory_space<vmem>>, vector<1x256xf32>
      %15 = vector.broadcast %14 : vector<1x256xf32> to vector<2x256xf32>
      %16 = arith.addf %13, %15 : vector<2x256xf32>
      %c0_13 = arith.constant 0 : index
      %c0_14 = arith.constant 0 : index
      %17 = vector.load %arg6[%c0_13, %c0_14] : memref<2x256xf32, #tpu.memory_space<vmem>>, vector<2x256xf32>
      tpu.vector_store %arg6[%c0_13, %c0_14], %16 {strides = array<i32>} : memref<2x256xf32, #tpu.memory_space<vmem>>, vector<2x256xf32>,
    } else {
    }
    return
  }
  func.func @transform_0(%arg0: i32, %arg1: i32, %arg2: i32) -> (i32, i32) {
    %c0_i32 = arith.constant 0 : i32
    return %arg0, %arg2 : i32, i32
  }
  func.func @transform_1(%arg0: i32, %arg1: i32, %arg2: i32) -> (i32, i32) {
    %c0_i32 = arith.constant 0 : i32
    return %arg2, %arg1 : i32, i32
  }
  func.func @transform_2(%arg0: i32, %arg1: i32, %arg2: i32) -> (i32, i32) {
    %c0_i32 = arith.constant 0 : i32
    %c0_i32_0 = arith.constant 0 : i32
    return %c0_i32, %arg1 : i32, i32
  }
  func.func @transform_3(%arg0: i32, %arg1: i32, %arg2: i32) -> (i32, i32) {
    %c0_i32 = arith.constant 0 : i32
    return %arg0, %arg1 : i32, i32
  }
}

module attributes {stable_mosaic.version = 11 : i64} {
  func.func @_dense_fwd_kernel(%arg0: i32, %arg1: i32, %arg2: i32, %arg3: memref<8x512xf32, #tpu.memory_space<vmem>>, %arg4: memref<512x256xbf16, #tpu.memory_space<vmem>>, %arg5: memref<1x256xf32, #tpu.memory_space<vmem>>, %arg6: memref<8x256xf32, #tpu.memory_space<vmem>>, %arg7: memref<8x256xf32, #tpu.memory_space<vmem>>) attributes {dimension_semantics = [#tpu.dimension_semantics<parallel>, #tpu.dimension_semantics<parallel>, #tpu.dimension_semantics<arbitrary>], iteration_bounds = array<i64: 1, 2, 9>, scalar_prefetch = 0 : i64, scratch_operands = 1 : i64, tpu.core_type = #tpu.core_type<tc>, window_params = [{transform_indices = @transform_0, window_bounds = array<i64: 8, 512>}, {transform_indices = @transform_1, window_bounds = array<i64: 512, 256>}, {transform_indices = @transform_2, window_bounds = array<i64: 1, 256>}, {transform_indices = @transform_3, window_bounds = array<i64: 8, 256>}]} {
    %c0_i32 = arith.constant 0 : i32
    %0 = arith.cmpi eq, %arg2, %c0_i32 : i32
    %1 = arith.extui %0 : i1 to i32
    %c0_i32_0 = arith.constant 0 : i32
    %2 = arith.cmpi ne, %1, %c0_i32_0 : i32
    scf.if %2 {
      %cst_9 = arith.constant 0.000000e+00 : f32
      %13 = vector.broadcast %cst_9 : f32 to vector<8x256xf32>
      %c0_10 = arith.constant 0 : index
      %c0_11 = arith.constant 0 : index
      %14 = vector.load %arg7[%c0_10, %c0_11] : memref<8x256xf32, #tpu.memory_space<vmem>>, vector<8x256xf32>
      tpu.vector_store %arg7[%c0_10, %c0_11], %13 {strides = array<i32>} : memref<8x256xf32, #tpu.memory_space<vmem>>, vector<8x256xf32>,
    } else {
    }
    %c0 = arith.constant 0 : index
    %c0_1 = arith.constant 0 : index
    %3 = vector.load %arg7[%c0, %c0_1] : memref<8x256xf32, #tpu.memory_space<vmem>>, vector<8x256xf32>
    %c0_2 = arith.constant 0 : index
    %c0_3 = arith.constant 0 : index
    %4 = vector.load %arg3[%c0_2, %c0_3] : memref<8x512xf32, #tpu.memory_space<vmem>>, vector<8x512xf32>
    %5 = arith.truncf %4 : vector<8x512xf32> to vector<8x512xbf16>
    %c0_4 = arith.constant 0 : index
    %c0_5 = arith.constant 0 : index
    %6 = vector.load %arg4[%c0_4, %c0_5] : memref<512x256xbf16, #tpu.memory_space<vmem>>, vector<512x256xbf16>
    %cst = arith.constant dense<0.000000e+00> : vector<8x256xf32>
    %7 = tpu.matmul %5, %6, %cst {dimension_numbers = #tpu.dot_dimension_numbers<[1], [0], [0], [1], [0, 0, 1, 1], [], []>} : vector<8x512xbf16>, vector<512x256xbf16>, vector<8x256xf32> -> vector<8x256xf32>
    %8 = arith.addf %3, %7 : vector<8x256xf32>
    %c0_6 = arith.constant 0 : index
    %c0_7 = arith.constant 0 : index
    %9 = vector.load %arg7[%c0_6, %c0_7] : memref<8x256xf32, #tpu.memory_space<vmem>>, vector<8x256xf32>
    tpu.vector_store %arg7[%c0_6, %c0_7], %8 {strides = array<i32>} : memref<8x256xf32, #tpu.memory_space<vmem>>, vector<8x256xf32>,
    %c8_i32 = arith.constant 8 : i32
    %10 = arith.cmpi eq, %arg2, %c8_i32 : i32
    %11 = arith.extui %10 : i1 to i32
    %c0_i32_8 = arith.constant 0 : i32
    %12 = arith.cmpi ne, %11, %c0_i32_8 : i32
    scf.if %12 {
      %c0_9 = arith.constant 0 : index
      %c0_10 = arith.constant 0 : index
      %13 = vector.load %arg7[%c0_9, %c0_10] : memref<8x256xf32, #tpu.memory_space<vmem>>, vector<8x256xf32>
      %c0_11 = arith.constant 0 : index
      %c0_12 = arith.constant 0 : index
      %14 = vector.load %arg5[%c0_11, %c0_12] : memref<1x256xf32, #tpu.memory_space<vmem>>, vector<1x256xf32>
      %15 = vector.broadcast %14 : vector<1x256xf32> to vector<8x256xf32>
      %16 = arith.addf %13, %15 : vector<8x256xf32>
      %cst_13 = arith.constant 0.000000e+00 : f32
      %17 = vector.broadcast %cst_13 : f32 to vector<8x256xf32>
      %18 = arith.maximumf %16, %17 : vector<8x256xf32>
      %c0_14 = arith.constant 0 : index
      %c0_15 = arith.constant 0 : index
      %19 = vector.load %arg6[%c0_14, %c0_15] : memref<8x256xf32, #tpu.memory_space<vmem>>, vector<8x256xf32>
      tpu.vector_store %arg6[%c0_14, %c0_15], %18 {strides = array<i32>} : memref<8x256xf32, #tpu.memory_space<vmem>>, vector<8x256xf32>,
    } else {
    }
    return
  }
  func.func @transform_0(%arg0: i32, %arg1: i32, %arg2: i32) -> (i32, i32) {
    %c0_i32 = arith.constant 0 : i32
    return %arg0, %arg2 : i32, i32
  }
  func.func @transform_1(%arg0: i32, %arg1: i32, %arg2: i32) -> (i32, i32) {
    %c0_i32 = arith.constant 0 : i32
    return %arg2, %arg1 : i32, i32
  }
  func.func @transform_2(%arg0: i32, %arg1: i32, %arg2: i32) -> (i32, i32) {
    %c0_i32 = arith.constant 0 : i32
    %c0_i32_0 = arith.constant 0 : i32
    return %c0_i32, %arg1 : i32, i32
  }
  func.func @transform_3(%arg0: i32, %arg1: i32, %arg2: i32) -> (i32, i32) {
    %c0_i32 = arith.constant 0 : i32
    return %arg0, %arg1 : i32, i32
  }
}

module attributes {stable_mosaic.version = 11 : i64} {
  func.func @_dense_fwd_kernel(%arg0: i32, %arg1: i32, %arg2: i32, %arg3: memref<2x512xf32, #tpu.memory_space<vmem>>, %arg4: memref<512x256xbf16, #tpu.memory_space<vmem>>, %arg5: memref<1x256xf32, #tpu.memory_space<vmem>>, %arg6: memref<2x256xf32, #tpu.memory_space<vmem>>, %arg7: memref<2x256xf32, #tpu.memory_space<vmem>>) attributes {dimension_semantics = [#tpu.dimension_semantics<parallel>, #tpu.dimension_semantics<parallel>, #tpu.dimension_semantics<arbitrary>], iteration_bounds = array<i64: 1, 3, 1>, scalar_prefetch = 0 : i64, scratch_operands = 1 : i64, tpu.core_type = #tpu.core_type<tc>, window_params = [{transform_indices = @transform_0, window_bounds = array<i64: 2, 512>}, {transform_indices = @transform_1, window_bounds = array<i64: 512, 256>}, {transform_indices = @transform_2, window_bounds = array<i64: 1, 256>}, {transform_indices = @transform_3, window_bounds = array<i64: 2, 256>}]} {
    %c0_i32 = arith.constant 0 : i32
    %0 = arith.cmpi eq, %arg2, %c0_i32 : i32
    %1 = arith.extui %0 : i1 to i32
    %c0_i32_0 = arith.constant 0 : i32
    %2 = arith.cmpi ne, %1, %c0_i32_0 : i32
    scf.if %2 {
      %cst_10 = arith.constant 0.000000e+00 : f32
      %13 = vector.broadcast %cst_10 : f32 to vector<2x256xf32>
      %c0_11 = arith.constant 0 : index
      %c0_12 = arith.constant 0 : index
      %14 = vector.load %arg7[%c0_11, %c0_12] : memref<2x256xf32, #tpu.memory_space<vmem>>, vector<2x256xf32>
      tpu.vector_store %arg7[%c0_11, %c0_12], %13 {strides = array<i32>} : memref<2x256xf32, #tpu.memory_space<vmem>>, vector<2x256xf32>,
    } else {
    }
    %c0 = arith.constant 0 : index
    %c0_1 = arith.constant 0 : index
    %3 = vector.load %arg7[%c0, %c0_1] : memref<2x256xf32, #tpu.memory_space<vmem>>, vector<2x256xf32>
    %c0_2 = arith.constant 0 : index
    %c0_3 = arith.constant 0 : index
    %4 = vector.load %arg3[%c0_2, %c0_3] : memref<2x512xf32, #tpu.memory_space<vmem>>, vector<2x512xf32>
    %5 = arith.truncf %4 : vector<2x512xf32> to vector<2x512xbf16>
    %c0_4 = arith.constant 0 : index
    %c0_5 = arith.constant 0 : index
    %6 = vector.load %arg4[%c0_4, %c0_5] : memref<512x256xbf16, #tpu.memory_space<vmem>>, vector<512x256xbf16>
    %cst = arith.constant dense<0.000000e+00> : vector<2x256xf32>
    %7 = tpu.matmul %5, %6, %cst {dimension_numbers = #tpu.dot_dimension_numbers<[1], [0], [0], [1], [0, 0, 1, 1], [], []>} : vector<2x512xbf16>, vector<512x256xbf16>, vector<2x256xf32> -> vector<2x256xf32>
    %8 = arith.addf %3, %7 : vector<2x256xf32>
    %c0_6 = arith.constant 0 : index
    %c0_7 = arith.constant 0 : index
    %9 = vector.load %arg7[%c0_6, %c0_7] : memref<2x256xf32, #tpu.memory_space<vmem>>, vector<2x256xf32>
    tpu.vector_store %arg7[%c0_6, %c0_7], %8 {strides = array<i32>} : memref<2x256xf32, #tpu.memory_space<vmem>>, vector<2x256xf32>,
    %c0_i32_8 = arith.constant 0 : i32
    %10 = arith.cmpi eq, %arg2, %c0_i32_8 : i32
    %11 = arith.extui %10 : i1 to i32
    %c0_i32_9 = arith.constant 0 : i32
    %12 = arith.cmpi ne, %11, %c0_i32_9 : i32
    scf.if %12 {
      %c0_10 = arith.constant 0 : index
      %c0_11 = arith.constant 0 : index
      %13 = vector.load %arg7[%c0_10, %c0_11] : memref<2x256xf32, #tpu.memory_space<vmem>>, vector<2x256xf32>
      %c0_12 = arith.constant 0 : index
      %c0_13 = arith.constant 0 : index
      %14 = vector.load %arg5[%c0_12, %c0_13] : memref<1x256xf32, #tpu.memory_space<vmem>>, vector<1x256xf32>
      %15 = vector.broadcast %14 : vector<1x256xf32> to vector<2x256xf32>
      %16 = arith.addf %13, %15 : vector<2x256xf32>
      %17 = math.tanh %16 : vector<2x256xf32>
      %c0_14 = arith.constant 0 : index
      %c0_15 = arith.constant 0 : index
      %18 = vector.load %arg6[%c0_14, %c0_15] : memref<2x256xf32, #tpu.memory_space<vmem>>, vector<2x256xf32>
      tpu.vector_store %arg6[%c0_14, %c0_15], %17 {strides = array<i32>} : memref<2x256xf32, #tpu.memory_space<vmem>>, vector<2x256xf32>,
    } else {
    }
    return
  }
  func.func @transform_0(%arg0: i32, %arg1: i32, %arg2: i32) -> (i32, i32) {
    %c0_i32 = arith.constant 0 : i32
    return %arg0, %arg2 : i32, i32
  }
  func.func @transform_1(%arg0: i32, %arg1: i32, %arg2: i32) -> (i32, i32) {
    %c0_i32 = arith.constant 0 : i32
    return %arg2, %arg1 : i32, i32
  }
  func.func @transform_2(%arg0: i32, %arg1: i32, %arg2: i32) -> (i32, i32) {
    %c0_i32 = arith.constant 0 : i32
    %c0_i32_0 = arith.constant 0 : i32
    return %c0_i32, %arg1 : i32, i32
  }
  func.func @transform_3(%arg0: i32, %arg1: i32, %arg2: i32) -> (i32, i32) {
    %c0_i32 = arith.constant 0 : i32
    return %arg0, %arg1 : i32, i32
  }
}

module attributes {stable_mosaic.version = 11 : i64} {
  func.func @_dense_bwd_kernel(%arg0: i32, %arg1: i32, %arg2: i32, %arg3: memref<8x512xf32, #tpu.memory_space<vmem>>, %arg4: memref<8x512xf32, #tpu.memory_space<vmem>>, %arg5: memref<512x256xbf16, #tpu.memory_space<vmem>>, %arg6: memref<8x256xf32, #tpu.memory_space<vmem>>, %arg7: memref<8x256xf32, #tpu.memory_space<vmem>>) attributes {dimension_semantics = [#tpu.dimension_semantics<parallel>, #tpu.dimension_semantics<parallel>, #tpu.dimension_semantics<arbitrary>], iteration_bounds = array<i64: 1, 18, 1>, scalar_prefetch = 0 : i64, scratch_operands = 1 : i64, tpu.core_type = #tpu.core_type<tc>, window_params = [{transform_indices = @transform_0, window_bounds = array<i64: 8, 512>}, {transform_indices = @transform_1, window_bounds = array<i64: 8, 512>}, {transform_indices = @transform_2, window_bounds = array<i64: 512, 256>}, {transform_indices = @transform_3, window_bounds = array<i64: 8, 256>}]} {
    %c0_i32 = arith.constant 0 : i32
    %0 = arith.cmpi eq, %arg2, %c0_i32 : i32
    %1 = arith.extui %0 : i1 to i32
    %c0_i32_0 = arith.constant 0 : i32
    %2 = arith.cmpi ne, %1, %c0_i32_0 : i32
    scf.if %2 {
      %cst_14 = arith.constant 0.000000e+00 : f32
      %18 = vector.broadcast %cst_14 : f32 to vector<8x256xf32>
      %c0_15 = arith.constant 0 : index
      %c0_16 = arith.constant 0 : index
      %19 = vector.load %arg7[%c0_15, %c0_16] : memref<8x256xf32, #tpu.memory_space<vmem>>, vector<8x256xf32>
      tpu.vector_store %arg7[%c0_15, %c0_16], %18 {strides = array<i32>} : memref<8x256xf32, #tpu.memory_space<vmem>>, vector<8x256xf32>,
    } else {
    }
    %c0 = arith.constant 0 : index
    %c0_1 = arith.constant 0 : index
    %3 = vector.load %arg3[%c0, %c0_1] : memref<8x512xf32, #tpu.memory_space<vmem>>, vector<8x512xf32>
    %c0_2 = arith.constant 0 : index
    %c0_3 = arith.constant 0 : index
    %4 = vector.load %arg4[%c0_2, %c0_3] : memref<8x512xf32, #tpu.memory_space<vmem>>, vector<8x512xf32>
    %cst = arith.constant 0.000000e+00 : f32
    %5 = vector.broadcast %cst : f32 to vector<8x512xf32>
    %6 = arith.cmpf ogt, %4, %5 : vector<8x512xf32>
    %cst_4 = arith.constant 0.000000e+00 : f32
    %7 = vector.broadcast %cst_4 : f32 to vector<8x512xf32>
    %8 = arith.select %6, %3, %7 : vector<8x512xi1>, vector<8x512xf32>
    %c0_5 = arith.constant 0 : index
    %c0_6 = arith.constant 0 : index
    %9 = vector.load %arg7[%c0_5, %c0_6] : memref<8x256xf32, #tpu.memory_space<vmem>>, vector<8x256xf32>
    %10 = arith.truncf %8 : vector<8x512xf32> to vector<8x512xbf16>
    %c0_7 = arith.constant 0 : index
    %c0_8 = arith.constant 0 : index
    %11 = vector.load %arg5[%c0_7, %c0_8] : memref<512x256xbf16, #tpu.memory_space<vmem>>, vector<512x256xbf16>
    %cst_9 = arith.constant dense<0.000000e+00> : vector<8x256xf32>
    %12 = tpu.matmul %10, %11, %cst_9 {dimension_numbers = #tpu.dot_dimension_numbers<[1], [0], [0], [1], [0, 0, 1, 1], [], []>} : vector<8x512xbf16>, vector<512x256xbf16>, vector<8x256xf32> -> vector<8x256xf32>
    %13 = arith.addf %9, %12 : vector<8x256xf32>
    %c0_10 = arith.constant 0 : index
    %c0_11 = arith.constant 0 : index
    %14 = vector.load %arg7[%c0_10, %c0_11] : memref<8x256xf32, #tpu.memory_space<vmem>>, vector<8x256xf32>
    tpu.vector_store %arg7[%c0_10, %c0_11], %13 {strides = array<i32>} : memref<8x256xf32, #tpu.memory_space<vmem>>, vector<8x256xf32>,
    %c0_i32_12 = arith.constant 0 : i32
    %15 = arith.cmpi eq, %arg2, %c0_i32_12 : i32
    %16 = arith.extui %15 : i1 to i32
    %c0_i32_13 = arith.constant 0 : i32
    %17 = arith.cmpi ne, %16, %c0_i32_13 : i32
    scf.if %17 {
      %c0_14 = arith.constant 0 : index
      %c0_15 = arith.constant 0 : index
      %18 = vector.load %arg7[%c0_14, %c0_15] : memref<8x256xf32, #tpu.memory_space<vmem>>, vector<8x256xf32>
      %c0_16 = arith.constant 0 : index
      %c0_17 = arith.constant 0 : index
      %19 = vector.load %arg6[%c0_16, %c0_17] : memref<8x256xf32, #tpu.memory_space<vmem>>, vector<8x256xf32>
      tpu.vector_store %arg6[%c0_16, %c0_17], %18 {strides = array<i32>} : memref<8x256xf32, #tpu.memory_space<vmem>>, vector<8x256xf32>,
    } else {
    }
    return
  }
  func.func @transform_0(%arg0: i32, %arg1: i32, %arg2: i32) -> (i32, i32) {
    %c0_i32 = arith.constant 0 : i32
    return %arg0, %arg2 : i32, i32
  }
  func.func @transform_1(%arg0: i32, %arg1: i32, %arg2: i32) -> (i32, i32) {
    %c0_i32 = arith.constant 0 : i32
    return %arg0, %arg2 : i32, i32
  }
  func.func @transform_2(%arg0: i32, %arg1: i32, %arg2: i32) -> (i32, i32) {
    %c0_i32 = arith.constant 0 : i32
    return %arg2, %arg1 : i32, i32
  }
  func.func @transform_3(%arg0: i32, %arg1: i32, %arg2: i32) -> (i32, i32) {
    %c0_i32 = arith.constant 0 : i32
    return %arg0, %arg1 : i32, i32
  }
}

module attributes {stable_mosaic.version = 11 : i64} {
  func.func @_dense_bwd_kernel(%arg0: i32, %arg1: i32, %arg2: i32, %arg3: memref<8x512xf32, #tpu.memory_space<vmem>>, %arg4: memref<8x512xf32, #tpu.memory_space<vmem>>, %arg5: memref<512x256xbf16, #tpu.memory_space<vmem>>, %arg6: memref<8x256xf32, #tpu.memory_space<vmem>>, %arg7: memref<8x256xf32, #tpu.memory_space<vmem>>) attributes {dimension_semantics = [#tpu.dimension_semantics<parallel>, #tpu.dimension_semantics<parallel>, #tpu.dimension_semantics<arbitrary>], iteration_bounds = array<i64: 1, 9, 1>, scalar_prefetch = 0 : i64, scratch_operands = 1 : i64, tpu.core_type = #tpu.core_type<tc>, window_params = [{transform_indices = @transform_0, window_bounds = array<i64: 8, 512>}, {transform_indices = @transform_1, window_bounds = array<i64: 8, 512>}, {transform_indices = @transform_2, window_bounds = array<i64: 512, 256>}, {transform_indices = @transform_3, window_bounds = array<i64: 8, 256>}]} {
    %c0_i32 = arith.constant 0 : i32
    %0 = arith.cmpi eq, %arg2, %c0_i32 : i32
    %1 = arith.extui %0 : i1 to i32
    %c0_i32_0 = arith.constant 0 : i32
    %2 = arith.cmpi ne, %1, %c0_i32_0 : i32
    scf.if %2 {
      %cst_14 = arith.constant 0.000000e+00 : f32
      %18 = vector.broadcast %cst_14 : f32 to vector<8x256xf32>
      %c0_15 = arith.constant 0 : index
      %c0_16 = arith.constant 0 : index
      %19 = vector.load %arg7[%c0_15, %c0_16] : memref<8x256xf32, #tpu.memory_space<vmem>>, vector<8x256xf32>
      tpu.vector_store %arg7[%c0_15, %c0_16], %18 {strides = array<i32>} : memref<8x256xf32, #tpu.memory_space<vmem>>, vector<8x256xf32>,
    } else {
    }
    %c0 = arith.constant 0 : index
    %c0_1 = arith.constant 0 : index
    %3 = vector.load %arg3[%c0, %c0_1] : memref<8x512xf32, #tpu.memory_space<vmem>>, vector<8x512xf32>
    %c0_2 = arith.constant 0 : index
    %c0_3 = arith.constant 0 : index
    %4 = vector.load %arg4[%c0_2, %c0_3] : memref<8x512xf32, #tpu.memory_space<vmem>>, vector<8x512xf32>
    %cst = arith.constant 0.000000e+00 : f32
    %5 = vector.broadcast %cst : f32 to vector<8x512xf32>
    %6 = arith.cmpf ogt, %4, %5 : vector<8x512xf32>
    %cst_4 = arith.constant 0.000000e+00 : f32
    %7 = vector.broadcast %cst_4 : f32 to vector<8x512xf32>
    %8 = arith.select %6, %3, %7 : vector<8x512xi1>, vector<8x512xf32>
    %c0_5 = arith.constant 0 : index
    %c0_6 = arith.constant 0 : index
    %9 = vector.load %arg7[%c0_5, %c0_6] : memref<8x256xf32, #tpu.memory_space<vmem>>, vector<8x256xf32>
    %10 = arith.truncf %8 : vector<8x512xf32> to vector<8x512xbf16>
    %c0_7 = arith.constant 0 : index
    %c0_8 = arith.constant 0 : index
    %11 = vector.load %arg5[%c0_7, %c0_8] : memref<512x256xbf16, #tpu.memory_space<vmem>>, vector<512x256xbf16>
    %cst_9 = arith.constant dense<0.000000e+00> : vector<8x256xf32>
    %12 = tpu.matmul %10, %11, %cst_9 {dimension_numbers = #tpu.dot_dimension_numbers<[1], [0], [0], [1], [0, 0, 1, 1], [], []>} : vector<8x512xbf16>, vector<512x256xbf16>, vector<8x256xf32> -> vector<8x256xf32>
    %13 = arith.addf %9, %12 : vector<8x256xf32>
    %c0_10 = arith.constant 0 : index
    %c0_11 = arith.constant 0 : index
    %14 = vector.load %arg7[%c0_10, %c0_11] : memref<8x256xf32, #tpu.memory_space<vmem>>, vector<8x256xf32>
    tpu.vector_store %arg7[%c0_10, %c0_11], %13 {strides = array<i32>} : memref<8x256xf32, #tpu.memory_space<vmem>>, vector<8x256xf32>,
    %c0_i32_12 = arith.constant 0 : i32
    %15 = arith.cmpi eq, %arg2, %c0_i32_12 : i32
    %16 = arith.extui %15 : i1 to i32
    %c0_i32_13 = arith.constant 0 : i32
    %17 = arith.cmpi ne, %16, %c0_i32_13 : i32
    scf.if %17 {
      %c0_14 = arith.constant 0 : index
      %c0_15 = arith.constant 0 : index
      %18 = vector.load %arg7[%c0_14, %c0_15] : memref<8x256xf32, #tpu.memory_space<vmem>>, vector<8x256xf32>
      %c0_16 = arith.constant 0 : index
      %c0_17 = arith.constant 0 : index
      %19 = vector.load %arg6[%c0_16, %c0_17] : memref<8x256xf32, #tpu.memory_space<vmem>>, vector<8x256xf32>
      tpu.vector_store %arg6[%c0_16, %c0_17], %18 {strides = array<i32>} : memref<8x256xf32, #tpu.memory_space<vmem>>, vector<8x256xf32>,
    } else {
    }
    return
  }
  func.func @transform_0(%arg0: i32, %arg1: i32, %arg2: i32) -> (i32, i32) {
    %c0_i32 = arith.constant 0 : i32
    return %arg0, %arg2 : i32, i32
  }
  func.func @transform_1(%arg0: i32, %arg1: i32, %arg2: i32) -> (i32, i32) {
    %c0_i32 = arith.constant 0 : i32
    return %arg0, %arg2 : i32, i32
  }
  func.func @transform_2(%arg0: i32, %arg1: i32, %arg2: i32) -> (i32, i32) {
    %c0_i32 = arith.constant 0 : i32
    return %arg2, %arg1 : i32, i32
  }
  func.func @transform_3(%arg0: i32, %arg1: i32, %arg2: i32) -> (i32, i32) {
    %c0_i32 = arith.constant 0 : i32
    return %arg0, %arg1 : i32, i32
  }
}

module attributes {stable_mosaic.version = 11 : i64} {
  func.func @_pool_bwd_kernel(%arg0: i32, %arg1: memref<4x2x2x512xf32, #tpu.memory_space<vmem>>, %arg2: memref<4x2x256xf32, #tpu.memory_space<vmem>>, %arg3: memref<4x2x256xf32, #tpu.memory_space<vmem>>, %arg4: memref<4x2x2x512xf32, #tpu.memory_space<vmem>>) attributes {dimension_semantics = [#tpu.dimension_semantics<parallel>], iteration_bounds = array<i64: 1>, scalar_prefetch = 0 : i64, scratch_operands = 0 : i64, tpu.core_type = #tpu.core_type<tc>, window_params = [{transform_indices = @transform_0, window_bounds = array<i64: 4, 2, 2, 512>}, {transform_indices = @transform_1, window_bounds = array<i64: 4, 2, 256>}, {transform_indices = @transform_2, window_bounds = array<i64: 4, 2, 256>}, {transform_indices = @transform_3, window_bounds = array<i64: 4, 2, 2, 512>}]} {
    %c0 = arith.constant 0 : index
    %c0_0 = arith.constant 0 : index
    %c0_1 = arith.constant 0 : index
    %c0_2 = arith.constant 0 : index
    %0 = vector.load %arg1[%c0, %c0_0, %c0_1, %c0_2] : memref<4x2x2x512xf32, #tpu.memory_space<vmem>>, vector<4x2x2x512xf32>
    %c0_3 = arith.constant 0 : index
    %c0_4 = arith.constant 0 : index
    %c0_5 = arith.constant 0 : index
    %1 = vector.load %arg2[%c0_3, %c0_4, %c0_5] : memref<4x2x256xf32, #tpu.memory_space<vmem>>, vector<4x2x256xf32>
    %c0_6 = arith.constant 0 : index
    %c0_7 = arith.constant 0 : index
    %c0_8 = arith.constant 0 : index
    %2 = vector.load %arg3[%c0_6, %c0_7, %c0_8] : memref<4x2x256xf32, #tpu.memory_space<vmem>>, vector<4x2x256xf32>
    %3 = vector.extract_strided_slice %0 {offsets = [0, 0, 0, 0], sizes = [4, 1, 2, 256], strides = [1, 1, 1, 1]} : vector<4x2x2x512xf32> to vector<4x1x2x256xf32>
    %4 = vector.shape_cast %3 : vector<4x1x2x256xf32> to vector<4x2x256xf32>
    %5 = vector.extract_strided_slice %0 {offsets = [0, 0, 0, 256], sizes = [4, 1, 2, 256], strides = [1, 1, 1, 1]} : vector<4x2x2x512xf32> to vector<4x1x2x256xf32>
    %6 = vector.shape_cast %5 : vector<4x1x2x256xf32> to vector<4x2x256xf32>
    %7 = vector.extract_strided_slice %0 {offsets = [0, 1, 0, 0], sizes = [4, 1, 2, 256], strides = [1, 1, 1, 1]} : vector<4x2x2x512xf32> to vector<4x1x2x256xf32>
    %8 = vector.shape_cast %7 : vector<4x1x2x256xf32> to vector<4x2x256xf32>
    %9 = vector.extract_strided_slice %0 {offsets = [0, 1, 0, 256], sizes = [4, 1, 2, 256], strides = [1, 1, 1, 1]} : vector<4x2x2x512xf32> to vector<4x1x2x256xf32>
    %10 = vector.shape_cast %9 : vector<4x1x2x256xf32> to vector<4x2x256xf32>
    %11 = arith.cmpf oeq, %4, %1 : vector<4x2x256xf32>
    %12 = arith.cmpf oeq, %6, %1 : vector<4x2x256xf32>
    %cst = arith.constant dense<true> : vector<4x2x256xi1>
    %13 = arith.xori %11, %cst : vector<4x2x256xi1>
    %14 = arith.andi %12, %13 : vector<4x2x256xi1>
    %15 = arith.cmpf oeq, %8, %1 : vector<4x2x256xf32>
    %cst_9 = arith.constant dense<true> : vector<4x2x256xi1>
    %16 = arith.xori %11, %cst_9 : vector<4x2x256xi1>
    %17 = arith.andi %15, %16 : vector<4x2x256xi1>
    %cst_10 = arith.constant dense<true> : vector<4x2x256xi1>
    %18 = arith.xori %14, %cst_10 : vector<4x2x256xi1>
    %19 = arith.andi %17, %18 : vector<4x2x256xi1>
    %20 = arith.cmpf oeq, %10, %1 : vector<4x2x256xf32>
    %cst_11 = arith.constant dense<true> : vector<4x2x256xi1>
    %21 = arith.xori %11, %cst_11 : vector<4x2x256xi1>
    %22 = arith.andi %20, %21 : vector<4x2x256xi1>
    %cst_12 = arith.constant dense<true> : vector<4x2x256xi1>
    %23 = arith.xori %14, %cst_12 : vector<4x2x256xi1>
    %24 = arith.andi %22, %23 : vector<4x2x256xi1>
    %cst_13 = arith.constant dense<true> : vector<4x2x256xi1>
    %25 = arith.xori %19, %cst_13 : vector<4x2x256xi1>
    %26 = arith.andi %24, %25 : vector<4x2x256xi1>
    %cst_14 = arith.constant 0.000000e+00 : f32
    %27 = vector.broadcast %cst_14 : f32 to vector<4x2x256xf32>
    %28 = arith.select %11, %2, %27 : vector<4x2x256xi1>, vector<4x2x256xf32>
    %cst_15 = arith.constant 0.000000e+00 : f32
    %29 = vector.broadcast %cst_15 : f32 to vector<4x2x256xf32>
    %30 = arith.select %14, %2, %29 : vector<4x2x256xi1>, vector<4x2x256xf32>
    %31 = tpu.concatenate %28, %30 in 2 : vector<4x2x256xf32>, vector<4x2x256xf32> -> vector<4x2x512xf32>
    %c0_16 = arith.constant 0 : index
    %c0_17 = arith.constant 0 : index
    %c0_18 = arith.constant 0 : index
    %c0_19 = arith.constant 0 : index
    %32 = vector.load %arg4[%c0_16, %c0_17, %c0_18, %c0_19] : memref<4x2x2x512xf32, #tpu.memory_space<vmem>>, vector<4x1x2x512xf32>
    %33 = vector.shape_cast %32 : vector<4x1x2x512xf32> to vector<4x2x512xf32>
    %34 = vector.shape_cast %31 : vector<4x2x512xf32> to vector<4x1x2x512xf32>
    tpu.vector_store %arg4[%c0_16, %c0_17, %c0_18, %c0_19], %34 {strides = array<i32>} : memref<4x2x2x512xf32, #tpu.memory_space<vmem>>, vector<4x1x2x512xf32>,
    %cst_20 = arith.constant 0.000000e+00 : f32
    %35 = vector.broadcast %cst_20 : f32 to vector<4x2x256xf32>
    %36 = arith.select %19, %2, %35 : vector<4x2x256xi1>, vector<4x2x256xf32>
    %cst_21 = arith.constant 0.000000e+00 : f32
    %37 = vector.broadcast %cst_21 : f32 to vector<4x2x256xf32>
    %38 = arith.select %26, %2, %37 : vector<4x2x256xi1>, vector<4x2x256xf32>
    %39 = tpu.concatenate %36, %38 in 2 : vector<4x2x256xf32>, vector<4x2x256xf32> -> vector<4x2x512xf32>
    %c0_22 = arith.constant 0 : index
    %c1 = arith.constant 1 : index
    %c0_23 = arith.constant 0 : index
    %c0_24 = arith.constant 0 : index
    %40 = vector.load %arg4[%c0_22, %c1, %c0_23, %c0_24] : memref<4x2x2x512xf32, #tpu.memory_space<vmem>>, vector<4x1x2x512xf32>
    %41 = vector.shape_cast %40 : vector<4x1x2x512xf32> to vector<4x2x512xf32>
    %42 = vector.shape_cast %39 : vector<4x2x512xf32> to vector<4x1x2x512xf32>
    tpu.vector_store %arg4[%c0_22, %c1, %c0_23, %c0_24], %42 {strides = array<i32>} : memref<4x2x2x512xf32, #tpu.memory_space<vmem>>, vector<4x1x2x512xf32>,
    return
  }
  func.func @transform_0(%arg0: i32) -> (i32, i32, i32, i32) {
    %c0_i32 = arith.constant 0 : i32
    %c0_i32_0 = arith.constant 0 : i32
    %c0_i32_1 = arith.constant 0 : i32
    %c0_i32_2 = arith.constant 0 : i32
    return %arg0, %c0_i32, %c0_i32_0, %c0_i32_1 : i32, i32, i32, i32
  }
  func.func @transform_1(%arg0: i32) -> (i32, i32, i32) {
    %c0_i32 = arith.constant 0 : i32
    %c0_i32_0 = arith.constant 0 : i32
    %c0_i32_1 = arith.constant 0 : i32
    return %arg0, %c0_i32, %c0_i32_0 : i32, i32, i32
  }
  func.func @transform_2(%arg0: i32) -> (i32, i32, i32) {
    %c0_i32 = arith.constant 0 : i32
    %c0_i32_0 = arith.constant 0 : i32
    %c0_i32_1 = arith.constant 0 : i32
    return %arg0, %c0_i32, %c0_i32_0 : i32, i32, i32
  }
  func.func @transform_3(%arg0: i32) -> (i32, i32, i32, i32) {
    %c0_i32 = arith.constant 0 : i32
    %c0_i32_0 = arith.constant 0 : i32
    %c0_i32_1 = arith.constant 0 : i32
    %c0_i32_2 = arith.constant 0 : i32
    return %arg0, %c0_i32, %c0_i32_0, %c0_i32_1 : i32, i32, i32, i32
  }
}

module attributes {stable_mosaic.version = 11 : i64} {
  func.func @_dense_bwd_kernel(%arg0: i32, %arg1: i32, %arg2: i32, %arg3: memref<32x256xf32, #tpu.memory_space<vmem>>, %arg4: memref<32x256xf32, #tpu.memory_space<vmem>>, %arg5: memref<256x256xbf16, #tpu.memory_space<vmem>>, %arg6: memref<32x256xf32, #tpu.memory_space<vmem>>, %arg7: memref<32x256xf32, #tpu.memory_space<vmem>>) attributes {dimension_semantics = [#tpu.dimension_semantics<parallel>, #tpu.dimension_semantics<parallel>, #tpu.dimension_semantics<arbitrary>], iteration_bounds = array<i64: 1, 9, 1>, scalar_prefetch = 0 : i64, scratch_operands = 1 : i64, tpu.core_type = #tpu.core_type<tc>, window_params = [{transform_indices = @transform_0, window_bounds = array<i64: 32, 256>}, {transform_indices = @transform_1, window_bounds = array<i64: 32, 256>}, {transform_indices = @transform_2, window_bounds = array<i64: 256, 256>}, {transform_indices = @transform_3, window_bounds = array<i64: 32, 256>}]} {
    %c0_i32 = arith.constant 0 : i32
    %0 = arith.cmpi eq, %arg2, %c0_i32 : i32
    %1 = arith.extui %0 : i1 to i32
    %c0_i32_0 = arith.constant 0 : i32
    %2 = arith.cmpi ne, %1, %c0_i32_0 : i32
    scf.if %2 {
      %cst_14 = arith.constant 0.000000e+00 : f32
      %18 = vector.broadcast %cst_14 : f32 to vector<32x256xf32>
      %c0_15 = arith.constant 0 : index
      %c0_16 = arith.constant 0 : index
      %19 = vector.load %arg7[%c0_15, %c0_16] : memref<32x256xf32, #tpu.memory_space<vmem>>, vector<32x256xf32>
      tpu.vector_store %arg7[%c0_15, %c0_16], %18 {strides = array<i32>} : memref<32x256xf32, #tpu.memory_space<vmem>>, vector<32x256xf32>,
    } else {
    }
    %c0 = arith.constant 0 : index
    %c0_1 = arith.constant 0 : index
    %3 = vector.load %arg3[%c0, %c0_1] : memref<32x256xf32, #tpu.memory_space<vmem>>, vector<32x256xf32>
    %c0_2 = arith.constant 0 : index
    %c0_3 = arith.constant 0 : index
    %4 = vector.load %arg4[%c0_2, %c0_3] : memref<32x256xf32, #tpu.memory_space<vmem>>, vector<32x256xf32>
    %cst = arith.constant 0.000000e+00 : f32
    %5 = vector.broadcast %cst : f32 to vector<32x256xf32>
    %6 = arith.cmpf ogt, %4, %5 : vector<32x256xf32>
    %cst_4 = arith.constant 0.000000e+00 : f32
    %7 = vector.broadcast %cst_4 : f32 to vector<32x256xf32>
    %8 = arith.select %6, %3, %7 : vector<32x256xi1>, vector<32x256xf32>
    %c0_5 = arith.constant 0 : index
    %c0_6 = arith.constant 0 : index
    %9 = vector.load %arg7[%c0_5, %c0_6] : memref<32x256xf32, #tpu.memory_space<vmem>>, vector<32x256xf32>
    %10 = arith.truncf %8 : vector<32x256xf32> to vector<32x256xbf16>
    %c0_7 = arith.constant 0 : index
    %c0_8 = arith.constant 0 : index
    %11 = vector.load %arg5[%c0_7, %c0_8] : memref<256x256xbf16, #tpu.memory_space<vmem>>, vector<256x256xbf16>
    %cst_9 = arith.constant dense<0.000000e+00> : vector<32x256xf32>
    %12 = tpu.matmul %10, %11, %cst_9 {dimension_numbers = #tpu.dot_dimension_numbers<[1], [0], [0], [1], [0, 0, 1, 1], [], []>} : vector<32x256xbf16>, vector<256x256xbf16>, vector<32x256xf32> -> vector<32x256xf32>
    %13 = arith.addf %9, %12 : vector<32x256xf32>
    %c0_10 = arith.constant 0 : index
    %c0_11 = arith.constant 0 : index
    %14 = vector.load %arg7[%c0_10, %c0_11] : memref<32x256xf32, #tpu.memory_space<vmem>>, vector<32x256xf32>
    tpu.vector_store %arg7[%c0_10, %c0_11], %13 {strides = array<i32>} : memref<32x256xf32, #tpu.memory_space<vmem>>, vector<32x256xf32>,
    %c0_i32_12 = arith.constant 0 : i32
    %15 = arith.cmpi eq, %arg2, %c0_i32_12 : i32
    %16 = arith.extui %15 : i1 to i32
    %c0_i32_13 = arith.constant 0 : i32
    %17 = arith.cmpi ne, %16, %c0_i32_13 : i32
    scf.if %17 {
      %c0_14 = arith.constant 0 : index
      %c0_15 = arith.constant 0 : index
      %18 = vector.load %arg7[%c0_14, %c0_15] : memref<32x256xf32, #tpu.memory_space<vmem>>, vector<32x256xf32>
      %c0_16 = arith.constant 0 : index
      %c0_17 = arith.constant 0 : index
      %19 = vector.load %arg6[%c0_16, %c0_17] : memref<32x256xf32, #tpu.memory_space<vmem>>, vector<32x256xf32>
      tpu.vector_store %arg6[%c0_16, %c0_17], %18 {strides = array<i32>} : memref<32x256xf32, #tpu.memory_space<vmem>>, vector<32x256xf32>,
    } else {
    }
    return
  }
  func.func @transform_0(%arg0: i32, %arg1: i32, %arg2: i32) -> (i32, i32) {
    %c0_i32 = arith.constant 0 : i32
    return %arg0, %arg2 : i32, i32
  }
  func.func @transform_1(%arg0: i32, %arg1: i32, %arg2: i32) -> (i32, i32) {
    %c0_i32 = arith.constant 0 : i32
    return %arg0, %arg2 : i32, i32
  }
  func.func @transform_2(%arg0: i32, %arg1: i32, %arg2: i32) -> (i32, i32) {
    %c0_i32 = arith.constant 0 : i32
    return %arg2, %arg1 : i32, i32
  }
  func.func @transform_3(%arg0: i32, %arg1: i32, %arg2: i32) -> (i32, i32) {
    %c0_i32 = arith.constant 0 : i32
    return %arg0, %arg1 : i32, i32
  }
}

module attributes {stable_mosaic.version = 11 : i64} {
  func.func @_dense_bwd_kernel(%arg0: i32, %arg1: i32, %arg2: i32, %arg3: memref<32x256xf32, #tpu.memory_space<vmem>>, %arg4: memref<32x256xf32, #tpu.memory_space<vmem>>, %arg5: memref<256x128xbf16, #tpu.memory_space<vmem>>, %arg6: memref<32x128xf32, #tpu.memory_space<vmem>>, %arg7: memref<32x128xf32, #tpu.memory_space<vmem>>) attributes {dimension_semantics = [#tpu.dimension_semantics<parallel>, #tpu.dimension_semantics<parallel>, #tpu.dimension_semantics<arbitrary>], iteration_bounds = array<i64: 1, 9, 1>, scalar_prefetch = 0 : i64, scratch_operands = 1 : i64, tpu.core_type = #tpu.core_type<tc>, window_params = [{transform_indices = @transform_0, window_bounds = array<i64: 32, 256>}, {transform_indices = @transform_1, window_bounds = array<i64: 32, 256>}, {transform_indices = @transform_2, window_bounds = array<i64: 256, 128>}, {transform_indices = @transform_3, window_bounds = array<i64: 32, 128>}]} {
    %c0_i32 = arith.constant 0 : i32
    %0 = arith.cmpi eq, %arg2, %c0_i32 : i32
    %1 = arith.extui %0 : i1 to i32
    %c0_i32_0 = arith.constant 0 : i32
    %2 = arith.cmpi ne, %1, %c0_i32_0 : i32
    scf.if %2 {
      %cst_14 = arith.constant 0.000000e+00 : f32
      %18 = vector.broadcast %cst_14 : f32 to vector<32x128xf32>
      %c0_15 = arith.constant 0 : index
      %c0_16 = arith.constant 0 : index
      %19 = vector.load %arg7[%c0_15, %c0_16] : memref<32x128xf32, #tpu.memory_space<vmem>>, vector<32x128xf32>
      tpu.vector_store %arg7[%c0_15, %c0_16], %18 {strides = array<i32>} : memref<32x128xf32, #tpu.memory_space<vmem>>, vector<32x128xf32>,
    } else {
    }
    %c0 = arith.constant 0 : index
    %c0_1 = arith.constant 0 : index
    %3 = vector.load %arg3[%c0, %c0_1] : memref<32x256xf32, #tpu.memory_space<vmem>>, vector<32x256xf32>
    %c0_2 = arith.constant 0 : index
    %c0_3 = arith.constant 0 : index
    %4 = vector.load %arg4[%c0_2, %c0_3] : memref<32x256xf32, #tpu.memory_space<vmem>>, vector<32x256xf32>
    %cst = arith.constant 0.000000e+00 : f32
    %5 = vector.broadcast %cst : f32 to vector<32x256xf32>
    %6 = arith.cmpf ogt, %4, %5 : vector<32x256xf32>
    %cst_4 = arith.constant 0.000000e+00 : f32
    %7 = vector.broadcast %cst_4 : f32 to vector<32x256xf32>
    %8 = arith.select %6, %3, %7 : vector<32x256xi1>, vector<32x256xf32>
    %c0_5 = arith.constant 0 : index
    %c0_6 = arith.constant 0 : index
    %9 = vector.load %arg7[%c0_5, %c0_6] : memref<32x128xf32, #tpu.memory_space<vmem>>, vector<32x128xf32>
    %10 = arith.truncf %8 : vector<32x256xf32> to vector<32x256xbf16>
    %c0_7 = arith.constant 0 : index
    %c0_8 = arith.constant 0 : index
    %11 = vector.load %arg5[%c0_7, %c0_8] : memref<256x128xbf16, #tpu.memory_space<vmem>>, vector<256x128xbf16>
    %cst_9 = arith.constant dense<0.000000e+00> : vector<32x128xf32>
    %12 = tpu.matmul %10, %11, %cst_9 {dimension_numbers = #tpu.dot_dimension_numbers<[1], [0], [0], [1], [0, 0, 1, 1], [], []>} : vector<32x256xbf16>, vector<256x128xbf16>, vector<32x128xf32> -> vector<32x128xf32>
    %13 = arith.addf %9, %12 : vector<32x128xf32>
    %c0_10 = arith.constant 0 : index
    %c0_11 = arith.constant 0 : index
    %14 = vector.load %arg7[%c0_10, %c0_11] : memref<32x128xf32, #tpu.memory_space<vmem>>, vector<32x128xf32>
    tpu.vector_store %arg7[%c0_10, %c0_11], %13 {strides = array<i32>} : memref<32x128xf32, #tpu.memory_space<vmem>>, vector<32x128xf32>,
    %c0_i32_12 = arith.constant 0 : i32
    %15 = arith.cmpi eq, %arg2, %c0_i32_12 : i32
    %16 = arith.extui %15 : i1 to i32
    %c0_i32_13 = arith.constant 0 : i32
    %17 = arith.cmpi ne, %16, %c0_i32_13 : i32
    scf.if %17 {
      %c0_14 = arith.constant 0 : index
      %c0_15 = arith.constant 0 : index
      %18 = vector.load %arg7[%c0_14, %c0_15] : memref<32x128xf32, #tpu.memory_space<vmem>>, vector<32x128xf32>
      %c0_16 = arith.constant 0 : index
      %c0_17 = arith.constant 0 : index
      %19 = vector.load %arg6[%c0_16, %c0_17] : memref<32x128xf32, #tpu.memory_space<vmem>>, vector<32x128xf32>
      tpu.vector_store %arg6[%c0_16, %c0_17], %18 {strides = array<i32>} : memref<32x128xf32, #tpu.memory_space<vmem>>, vector<32x128xf32>,
    } else {
    }
    return
  }
  func.func @transform_0(%arg0: i32, %arg1: i32, %arg2: i32) -> (i32, i32) {
    %c0_i32 = arith.constant 0 : i32
    return %arg0, %arg2 : i32, i32
  }
  func.func @transform_1(%arg0: i32, %arg1: i32, %arg2: i32) -> (i32, i32) {
    %c0_i32 = arith.constant 0 : i32
    return %arg0, %arg2 : i32, i32
  }
  func.func @transform_2(%arg0: i32, %arg1: i32, %arg2: i32) -> (i32, i32) {
    %c0_i32 = arith.constant 0 : i32
    return %arg2, %arg1 : i32, i32
  }
  func.func @transform_3(%arg0: i32, %arg1: i32, %arg2: i32) -> (i32, i32) {
    %c0_i32 = arith.constant 0 : i32
    return %arg0, %arg1 : i32, i32
  }
}

module attributes {stable_mosaic.version = 11 : i64} {
  func.func @_pool_bwd_kernel(%arg0: i32, %arg1: memref<8x2x4x256xf32, #tpu.memory_space<vmem>>, %arg2: memref<8x4x128xf32, #tpu.memory_space<vmem>>, %arg3: memref<8x4x128xf32, #tpu.memory_space<vmem>>, %arg4: memref<8x2x4x256xf32, #tpu.memory_space<vmem>>) attributes {dimension_semantics = [#tpu.dimension_semantics<parallel>], iteration_bounds = array<i64: 1>, scalar_prefetch = 0 : i64, scratch_operands = 0 : i64, tpu.core_type = #tpu.core_type<tc>, window_params = [{transform_indices = @transform_0, window_bounds = array<i64: 8, 2, 4, 256>}, {transform_indices = @transform_1, window_bounds = array<i64: 8, 4, 128>}, {transform_indices = @transform_2, window_bounds = array<i64: 8, 4, 128>}, {transform_indices = @transform_3, window_bounds = array<i64: 8, 2, 4, 256>}]} {
    %c0 = arith.constant 0 : index
    %c0_0 = arith.constant 0 : index
    %c0_1 = arith.constant 0 : index
    %c0_2 = arith.constant 0 : index
    %0 = vector.load %arg1[%c0, %c0_0, %c0_1, %c0_2] : memref<8x2x4x256xf32, #tpu.memory_space<vmem>>, vector<8x2x4x256xf32>
    %c0_3 = arith.constant 0 : index
    %c0_4 = arith.constant 0 : index
    %c0_5 = arith.constant 0 : index
    %1 = vector.load %arg2[%c0_3, %c0_4, %c0_5] : memref<8x4x128xf32, #tpu.memory_space<vmem>>, vector<8x4x128xf32>
    %c0_6 = arith.constant 0 : index
    %c0_7 = arith.constant 0 : index
    %c0_8 = arith.constant 0 : index
    %2 = vector.load %arg3[%c0_6, %c0_7, %c0_8] : memref<8x4x128xf32, #tpu.memory_space<vmem>>, vector<8x4x128xf32>
    %3 = vector.extract_strided_slice %0 {offsets = [0, 0, 0, 0], sizes = [8, 1, 4, 128], strides = [1, 1, 1, 1]} : vector<8x2x4x256xf32> to vector<8x1x4x128xf32>
    %4 = vector.shape_cast %3 : vector<8x1x4x128xf32> to vector<8x4x128xf32>
    %5 = vector.extract_strided_slice %0 {offsets = [0, 0, 0, 128], sizes = [8, 1, 4, 128], strides = [1, 1, 1, 1]} : vector<8x2x4x256xf32> to vector<8x1x4x128xf32>
    %6 = vector.shape_cast %5 : vector<8x1x4x128xf32> to vector<8x4x128xf32>
    %7 = vector.extract_strided_slice %0 {offsets = [0, 1, 0, 0], sizes = [8, 1, 4, 128], strides = [1, 1, 1, 1]} : vector<8x2x4x256xf32> to vector<8x1x4x128xf32>
    %8 = vector.shape_cast %7 : vector<8x1x4x128xf32> to vector<8x4x128xf32>
    %9 = vector.extract_strided_slice %0 {offsets = [0, 1, 0, 128], sizes = [8, 1, 4, 128], strides = [1, 1, 1, 1]} : vector<8x2x4x256xf32> to vector<8x1x4x128xf32>
    %10 = vector.shape_cast %9 : vector<8x1x4x128xf32> to vector<8x4x128xf32>
    %11 = arith.cmpf oeq, %4, %1 : vector<8x4x128xf32>
    %12 = arith.cmpf oeq, %6, %1 : vector<8x4x128xf32>
    %cst = arith.constant dense<true> : vector<8x4x128xi1>
    %13 = arith.xori %11, %cst : vector<8x4x128xi1>
    %14 = arith.andi %12, %13 : vector<8x4x128xi1>
    %15 = arith.cmpf oeq, %8, %1 : vector<8x4x128xf32>
    %cst_9 = arith.constant dense<true> : vector<8x4x128xi1>
    %16 = arith.xori %11, %cst_9 : vector<8x4x128xi1>
    %17 = arith.andi %15, %16 : vector<8x4x128xi1>
    %cst_10 = arith.constant dense<true> : vector<8x4x128xi1>
    %18 = arith.xori %14, %cst_10 : vector<8x4x128xi1>
    %19 = arith.andi %17, %18 : vector<8x4x128xi1>
    %20 = arith.cmpf oeq, %10, %1 : vector<8x4x128xf32>
    %cst_11 = arith.constant dense<true> : vector<8x4x128xi1>
    %21 = arith.xori %11, %cst_11 : vector<8x4x128xi1>
    %22 = arith.andi %20, %21 : vector<8x4x128xi1>
    %cst_12 = arith.constant dense<true> : vector<8x4x128xi1>
    %23 = arith.xori %14, %cst_12 : vector<8x4x128xi1>
    %24 = arith.andi %22, %23 : vector<8x4x128xi1>
    %cst_13 = arith.constant dense<true> : vector<8x4x128xi1>
    %25 = arith.xori %19, %cst_13 : vector<8x4x128xi1>
    %26 = arith.andi %24, %25 : vector<8x4x128xi1>
    %cst_14 = arith.constant 0.000000e+00 : f32
    %27 = vector.broadcast %cst_14 : f32 to vector<8x4x128xf32>
    %28 = arith.select %11, %2, %27 : vector<8x4x128xi1>, vector<8x4x128xf32>
    %cst_15 = arith.constant 0.000000e+00 : f32
    %29 = vector.broadcast %cst_15 : f32 to vector<8x4x128xf32>
    %30 = arith.select %14, %2, %29 : vector<8x4x128xi1>, vector<8x4x128xf32>
    %31 = tpu.concatenate %28, %30 in 2 : vector<8x4x128xf32>, vector<8x4x128xf32> -> vector<8x4x256xf32>
    %c0_16 = arith.constant 0 : index
    %c0_17 = arith.constant 0 : index
    %c0_18 = arith.constant 0 : index
    %c0_19 = arith.constant 0 : index
    %32 = vector.load %arg4[%c0_16, %c0_17, %c0_18, %c0_19] : memref<8x2x4x256xf32, #tpu.memory_space<vmem>>, vector<8x1x4x256xf32>
    %33 = vector.shape_cast %32 : vector<8x1x4x256xf32> to vector<8x4x256xf32>
    %34 = vector.shape_cast %31 : vector<8x4x256xf32> to vector<8x1x4x256xf32>
    tpu.vector_store %arg4[%c0_16, %c0_17, %c0_18, %c0_19], %34 {strides = array<i32>} : memref<8x2x4x256xf32, #tpu.memory_space<vmem>>, vector<8x1x4x256xf32>,
    %cst_20 = arith.constant 0.000000e+00 : f32
    %35 = vector.broadcast %cst_20 : f32 to vector<8x4x128xf32>
    %36 = arith.select %19, %2, %35 : vector<8x4x128xi1>, vector<8x4x128xf32>
    %cst_21 = arith.constant 0.000000e+00 : f32
    %37 = vector.broadcast %cst_21 : f32 to vector<8x4x128xf32>
    %38 = arith.select %26, %2, %37 : vector<8x4x128xi1>, vector<8x4x128xf32>
    %39 = tpu.concatenate %36, %38 in 2 : vector<8x4x128xf32>, vector<8x4x128xf32> -> vector<8x4x256xf32>
    %c0_22 = arith.constant 0 : index
    %c1 = arith.constant 1 : index
    %c0_23 = arith.constant 0 : index
    %c0_24 = arith.constant 0 : index
    %40 = vector.load %arg4[%c0_22, %c1, %c0_23, %c0_24] : memref<8x2x4x256xf32, #tpu.memory_space<vmem>>, vector<8x1x4x256xf32>
    %41 = vector.shape_cast %40 : vector<8x1x4x256xf32> to vector<8x4x256xf32>
    %42 = vector.shape_cast %39 : vector<8x4x256xf32> to vector<8x1x4x256xf32>
    tpu.vector_store %arg4[%c0_22, %c1, %c0_23, %c0_24], %42 {strides = array<i32>} : memref<8x2x4x256xf32, #tpu.memory_space<vmem>>, vector<8x1x4x256xf32>,
    return
  }
  func.func @transform_0(%arg0: i32) -> (i32, i32, i32, i32) {
    %c0_i32 = arith.constant 0 : i32
    %c0_i32_0 = arith.constant 0 : i32
    %c0_i32_1 = arith.constant 0 : i32
    %c0_i32_2 = arith.constant 0 : i32
    return %arg0, %c0_i32, %c0_i32_0, %c0_i32_1 : i32, i32, i32, i32
  }
  func.func @transform_1(%arg0: i32) -> (i32, i32, i32) {
    %c0_i32 = arith.constant 0 : i32
    %c0_i32_0 = arith.constant 0 : i32
    %c0_i32_1 = arith.constant 0 : i32
    return %arg0, %c0_i32, %c0_i32_0 : i32, i32, i32
  }
  func.func @transform_2(%arg0: i32) -> (i32, i32, i32) {
    %c0_i32 = arith.constant 0 : i32
    %c0_i32_0 = arith.constant 0 : i32
    %c0_i32_1 = arith.constant 0 : i32
    return %arg0, %c0_i32, %c0_i32_0 : i32, i32, i32
  }
  func.func @transform_3(%arg0: i32) -> (i32, i32, i32, i32) {
    %c0_i32 = arith.constant 0 : i32
    %c0_i32_0 = arith.constant 0 : i32
    %c0_i32_1 = arith.constant 0 : i32
    %c0_i32_2 = arith.constant 0 : i32
    return %arg0, %c0_i32, %c0_i32_0, %c0_i32_1 : i32, i32, i32, i32
  }
}

module attributes {stable_mosaic.version = 11 : i64} {
  func.func @_dense_bwd_kernel(%arg0: i32, %arg1: i32, %arg2: i32, %arg3: memref<128x128xf32, #tpu.memory_space<vmem>>, %arg4: memref<128x128xf32, #tpu.memory_space<vmem>>, %arg5: memref<128x128xbf16, #tpu.memory_space<vmem>>, %arg6: memref<128x128xf32, #tpu.memory_space<vmem>>, %arg7: memref<128x128xf32, #tpu.memory_space<vmem>>) attributes {dimension_semantics = [#tpu.dimension_semantics<parallel>, #tpu.dimension_semantics<parallel>, #tpu.dimension_semantics<arbitrary>], iteration_bounds = array<i64: 1, 9, 1>, scalar_prefetch = 0 : i64, scratch_operands = 1 : i64, tpu.core_type = #tpu.core_type<tc>, window_params = [{transform_indices = @transform_0, window_bounds = array<i64: 128, 128>}, {transform_indices = @transform_1, window_bounds = array<i64: 128, 128>}, {transform_indices = @transform_2, window_bounds = array<i64: 128, 128>}, {transform_indices = @transform_3, window_bounds = array<i64: 128, 128>}]} {
    %c0_i32 = arith.constant 0 : i32
    %0 = arith.cmpi eq, %arg2, %c0_i32 : i32
    %1 = arith.extui %0 : i1 to i32
    %c0_i32_0 = arith.constant 0 : i32
    %2 = arith.cmpi ne, %1, %c0_i32_0 : i32
    scf.if %2 {
      %cst_14 = arith.constant 0.000000e+00 : f32
      %18 = vector.broadcast %cst_14 : f32 to vector<128x128xf32>
      %c0_15 = arith.constant 0 : index
      %c0_16 = arith.constant 0 : index
      %19 = vector.load %arg7[%c0_15, %c0_16] : memref<128x128xf32, #tpu.memory_space<vmem>>, vector<128x128xf32>
      tpu.vector_store %arg7[%c0_15, %c0_16], %18 {strides = array<i32>} : memref<128x128xf32, #tpu.memory_space<vmem>>, vector<128x128xf32>,
    } else {
    }
    %c0 = arith.constant 0 : index
    %c0_1 = arith.constant 0 : index
    %3 = vector.load %arg3[%c0, %c0_1] : memref<128x128xf32, #tpu.memory_space<vmem>>, vector<128x128xf32>
    %c0_2 = arith.constant 0 : index
    %c0_3 = arith.constant 0 : index
    %4 = vector.load %arg4[%c0_2, %c0_3] : memref<128x128xf32, #tpu.memory_space<vmem>>, vector<128x128xf32>
    %cst = arith.constant 0.000000e+00 : f32
    %5 = vector.broadcast %cst : f32 to vector<128x128xf32>
    %6 = arith.cmpf ogt, %4, %5 : vector<128x128xf32>
    %cst_4 = arith.constant 0.000000e+00 : f32
    %7 = vector.broadcast %cst_4 : f32 to vector<128x128xf32>
    %8 = arith.select %6, %3, %7 : vector<128x128xi1>, vector<128x128xf32>
    %c0_5 = arith.constant 0 : index
    %c0_6 = arith.constant 0 : index
    %9 = vector.load %arg7[%c0_5, %c0_6] : memref<128x128xf32, #tpu.memory_space<vmem>>, vector<128x128xf32>
    %10 = arith.truncf %8 : vector<128x128xf32> to vector<128x128xbf16>
    %c0_7 = arith.constant 0 : index
    %c0_8 = arith.constant 0 : index
    %11 = vector.load %arg5[%c0_7, %c0_8] : memref<128x128xbf16, #tpu.memory_space<vmem>>, vector<128x128xbf16>
    %cst_9 = arith.constant dense<0.000000e+00> : vector<128x128xf32>
    %12 = tpu.matmul %10, %11, %cst_9 {dimension_numbers = #tpu.dot_dimension_numbers<[1], [0], [0], [1], [0, 0, 1, 1], [], []>} : vector<128x128xbf16>, vector<128x128xbf16>, vector<128x128xf32> -> vector<128x128xf32>
    %13 = arith.addf %9, %12 : vector<128x128xf32>
    %c0_10 = arith.constant 0 : index
    %c0_11 = arith.constant 0 : index
    %14 = vector.load %arg7[%c0_10, %c0_11] : memref<128x128xf32, #tpu.memory_space<vmem>>, vector<128x128xf32>
    tpu.vector_store %arg7[%c0_10, %c0_11], %13 {strides = array<i32>} : memref<128x128xf32, #tpu.memory_space<vmem>>, vector<128x128xf32>,
    %c0_i32_12 = arith.constant 0 : i32
    %15 = arith.cmpi eq, %arg2, %c0_i32_12 : i32
    %16 = arith.extui %15 : i1 to i32
    %c0_i32_13 = arith.constant 0 : i32
    %17 = arith.cmpi ne, %16, %c0_i32_13 : i32
    scf.if %17 {
      %c0_14 = arith.constant 0 : index
      %c0_15 = arith.constant 0 : index
      %18 = vector.load %arg7[%c0_14, %c0_15] : memref<128x128xf32, #tpu.memory_space<vmem>>, vector<128x128xf32>
      %c0_16 = arith.constant 0 : index
      %c0_17 = arith.constant 0 : index
      %19 = vector.load %arg6[%c0_16, %c0_17] : memref<128x128xf32, #tpu.memory_space<vmem>>, vector<128x128xf32>
      tpu.vector_store %arg6[%c0_16, %c0_17], %18 {strides = array<i32>} : memref<128x128xf32, #tpu.memory_space<vmem>>, vector<128x128xf32>,
    } else {
    }
    return
  }
  func.func @transform_0(%arg0: i32, %arg1: i32, %arg2: i32) -> (i32, i32) {
    %c0_i32 = arith.constant 0 : i32
    return %arg0, %arg2 : i32, i32
  }
  func.func @transform_1(%arg0: i32, %arg1: i32, %arg2: i32) -> (i32, i32) {
    %c0_i32 = arith.constant 0 : i32
    return %arg0, %arg2 : i32, i32
  }
  func.func @transform_2(%arg0: i32, %arg1: i32, %arg2: i32) -> (i32, i32) {
    %c0_i32 = arith.constant 0 : i32
    return %arg2, %arg1 : i32, i32
  }
  func.func @transform_3(%arg0: i32, %arg1: i32, %arg2: i32) -> (i32, i32) {
    %c0_i32 = arith.constant 0 : i32
    return %arg0, %arg1 : i32, i32
  }
}

module attributes {stable_mosaic.version = 11 : i64} {
  func.func @_dense_bwd_kernel(%arg0: i32, %arg1: i32, %arg2: i32, %arg3: memref<128x128xf32, #tpu.memory_space<vmem>>, %arg4: memref<128x128xf32, #tpu.memory_space<vmem>>, %arg5: memref<128x576xbf16, #tpu.memory_space<vmem>>, %arg6: memref<128x576xf32, #tpu.memory_space<vmem>>, %arg7: memref<128x576xf32, #tpu.memory_space<vmem>>) attributes {dimension_semantics = [#tpu.dimension_semantics<parallel>, #tpu.dimension_semantics<parallel>, #tpu.dimension_semantics<arbitrary>], iteration_bounds = array<i64: 1, 1, 1>, scalar_prefetch = 0 : i64, scratch_operands = 1 : i64, tpu.core_type = #tpu.core_type<tc>, window_params = [{transform_indices = @transform_0, window_bounds = array<i64: 128, 128>}, {transform_indices = @transform_1, window_bounds = array<i64: 128, 128>}, {transform_indices = @transform_2, window_bounds = array<i64: 128, 576>}, {transform_indices = @transform_3, window_bounds = array<i64: 128, 576>}]} {
    %c0_i32 = arith.constant 0 : i32
    %0 = arith.cmpi eq, %arg2, %c0_i32 : i32
    %1 = arith.extui %0 : i1 to i32
    %c0_i32_0 = arith.constant 0 : i32
    %2 = arith.cmpi ne, %1, %c0_i32_0 : i32
    scf.if %2 {
      %cst_14 = arith.constant 0.000000e+00 : f32
      %18 = vector.broadcast %cst_14 : f32 to vector<128x576xf32>
      %c0_15 = arith.constant 0 : index
      %c0_16 = arith.constant 0 : index
      %19 = vector.load %arg7[%c0_15, %c0_16] : memref<128x576xf32, #tpu.memory_space<vmem>>, vector<128x576xf32>
      tpu.vector_store %arg7[%c0_15, %c0_16], %18 {strides = array<i32>} : memref<128x576xf32, #tpu.memory_space<vmem>>, vector<128x576xf32>,
    } else {
    }
    %c0 = arith.constant 0 : index
    %c0_1 = arith.constant 0 : index
    %3 = vector.load %arg3[%c0, %c0_1] : memref<128x128xf32, #tpu.memory_space<vmem>>, vector<128x128xf32>
    %c0_2 = arith.constant 0 : index
    %c0_3 = arith.constant 0 : index
    %4 = vector.load %arg4[%c0_2, %c0_3] : memref<128x128xf32, #tpu.memory_space<vmem>>, vector<128x128xf32>
    %cst = arith.constant 0.000000e+00 : f32
    %5 = vector.broadcast %cst : f32 to vector<128x128xf32>
    %6 = arith.cmpf ogt, %4, %5 : vector<128x128xf32>
    %cst_4 = arith.constant 0.000000e+00 : f32
    %7 = vector.broadcast %cst_4 : f32 to vector<128x128xf32>
    %8 = arith.select %6, %3, %7 : vector<128x128xi1>, vector<128x128xf32>
    %c0_5 = arith.constant 0 : index
    %c0_6 = arith.constant 0 : index
    %9 = vector.load %arg7[%c0_5, %c0_6] : memref<128x576xf32, #tpu.memory_space<vmem>>, vector<128x576xf32>
    %10 = arith.truncf %8 : vector<128x128xf32> to vector<128x128xbf16>
    %c0_7 = arith.constant 0 : index
    %c0_8 = arith.constant 0 : index
    %11 = vector.load %arg5[%c0_7, %c0_8] : memref<128x576xbf16, #tpu.memory_space<vmem>>, vector<128x576xbf16>
    %cst_9 = arith.constant dense<0.000000e+00> : vector<128x576xf32>
    %12 = tpu.matmul %10, %11, %cst_9 {dimension_numbers = #tpu.dot_dimension_numbers<[1], [0], [0], [1], [0, 0, 1, 1], [], []>} : vector<128x128xbf16>, vector<128x576xbf16>, vector<128x576xf32> -> vector<128x576xf32>
    %13 = arith.addf %9, %12 : vector<128x576xf32>
    %c0_10 = arith.constant 0 : index
    %c0_11 = arith.constant 0 : index
    %14 = vector.load %arg7[%c0_10, %c0_11] : memref<128x576xf32, #tpu.memory_space<vmem>>, vector<128x576xf32>
    tpu.vector_store %arg7[%c0_10, %c0_11], %13 {strides = array<i32>} : memref<128x576xf32, #tpu.memory_space<vmem>>, vector<128x576xf32>,
    %c0_i32_12 = arith.constant 0 : i32
    %15 = arith.cmpi eq, %arg2, %c0_i32_12 : i32
    %16 = arith.extui %15 : i1 to i32
    %c0_i32_13 = arith.constant 0 : i32
    %17 = arith.cmpi ne, %16, %c0_i32_13 : i32
    scf.if %17 {
      %c0_14 = arith.constant 0 : index
      %c0_15 = arith.constant 0 : index
      %18 = vector.load %arg7[%c0_14, %c0_15] : memref<128x576xf32, #tpu.memory_space<vmem>>, vector<128x576xf32>
      %c0_16 = arith.constant 0 : index
      %c0_17 = arith.constant 0 : index
      %19 = vector.load %arg6[%c0_16, %c0_17] : memref<128x576xf32, #tpu.memory_space<vmem>>, vector<128x576xf32>
      tpu.vector_store %arg6[%c0_16, %c0_17], %18 {strides = array<i32>} : memref<128x576xf32, #tpu.memory_space<vmem>>, vector<128x576xf32>,
    } else {
    }
    return
  }
  func.func @transform_0(%arg0: i32, %arg1: i32, %arg2: i32) -> (i32, i32) {
    %c0_i32 = arith.constant 0 : i32
    return %arg0, %arg2 : i32, i32
  }
  func.func @transform_1(%arg0: i32, %arg1: i32, %arg2: i32) -> (i32, i32) {
    %c0_i32 = arith.constant 0 : i32
    return %arg0, %arg2 : i32, i32
  }
  func.func @transform_2(%arg0: i32, %arg1: i32, %arg2: i32) -> (i32, i32) {
    %c0_i32 = arith.constant 0 : i32
    return %arg2, %arg1 : i32, i32
  }
  func.func @transform_3(%arg0: i32, %arg1: i32, %arg2: i32) -> (i32, i32) {
    %c0_i32 = arith.constant 0 : i32
    return %arg0, %arg1 : i32, i32
  }
}

module attributes {stable_mosaic.version = 11 : i64} {
  func.func @_pool_bwd_kernel(%arg0: i32, %arg1: memref<16x2x8x128xf32, #tpu.memory_space<vmem>>, %arg2: memref<16x8x64xf32, #tpu.memory_space<vmem>>, %arg3: memref<16x8x64xf32, #tpu.memory_space<vmem>>, %arg4: memref<16x2x8x128xf32, #tpu.memory_space<vmem>>) attributes {dimension_semantics = [#tpu.dimension_semantics<parallel>], iteration_bounds = array<i64: 1>, scalar_prefetch = 0 : i64, scratch_operands = 0 : i64, tpu.core_type = #tpu.core_type<tc>, window_params = [{transform_indices = @transform_0, window_bounds = array<i64: 16, 2, 8, 128>}, {transform_indices = @transform_1, window_bounds = array<i64: 16, 8, 64>}, {transform_indices = @transform_2, window_bounds = array<i64: 16, 8, 64>}, {transform_indices = @transform_3, window_bounds = array<i64: 16, 2, 8, 128>}]} {
    %c0 = arith.constant 0 : index
    %c0_0 = arith.constant 0 : index
    %c0_1 = arith.constant 0 : index
    %c0_2 = arith.constant 0 : index
    %0 = vector.load %arg1[%c0, %c0_0, %c0_1, %c0_2] : memref<16x2x8x128xf32, #tpu.memory_space<vmem>>, vector<16x2x8x128xf32>
    %c0_3 = arith.constant 0 : index
    %c0_4 = arith.constant 0 : index
    %c0_5 = arith.constant 0 : index
    %1 = vector.load %arg2[%c0_3, %c0_4, %c0_5] : memref<16x8x64xf32, #tpu.memory_space<vmem>>, vector<16x8x64xf32>
    %c0_6 = arith.constant 0 : index
    %c0_7 = arith.constant 0 : index
    %c0_8 = arith.constant 0 : index
    %2 = vector.load %arg3[%c0_6, %c0_7, %c0_8] : memref<16x8x64xf32, #tpu.memory_space<vmem>>, vector<16x8x64xf32>
    %3 = vector.extract_strided_slice %0 {offsets = [0, 0, 0, 0], sizes = [16, 1, 8, 64], strides = [1, 1, 1, 1]} : vector<16x2x8x128xf32> to vector<16x1x8x64xf32>
    %4 = vector.shape_cast %3 : vector<16x1x8x64xf32> to vector<16x8x64xf32>
    %5 = vector.extract_strided_slice %0 {offsets = [0, 0, 0, 64], sizes = [16, 1, 8, 64], strides = [1, 1, 1, 1]} : vector<16x2x8x128xf32> to vector<16x1x8x64xf32>
    %6 = vector.shape_cast %5 : vector<16x1x8x64xf32> to vector<16x8x64xf32>
    %7 = vector.extract_strided_slice %0 {offsets = [0, 1, 0, 0], sizes = [16, 1, 8, 64], strides = [1, 1, 1, 1]} : vector<16x2x8x128xf32> to vector<16x1x8x64xf32>
    %8 = vector.shape_cast %7 : vector<16x1x8x64xf32> to vector<16x8x64xf32>
    %9 = vector.extract_strided_slice %0 {offsets = [0, 1, 0, 64], sizes = [16, 1, 8, 64], strides = [1, 1, 1, 1]} : vector<16x2x8x128xf32> to vector<16x1x8x64xf32>
    %10 = vector.shape_cast %9 : vector<16x1x8x64xf32> to vector<16x8x64xf32>
    %11 = arith.cmpf oeq, %4, %1 : vector<16x8x64xf32>
    %12 = arith.cmpf oeq, %6, %1 : vector<16x8x64xf32>
    %cst = arith.constant dense<true> : vector<16x8x64xi1>
    %13 = arith.xori %11, %cst : vector<16x8x64xi1>
    %14 = arith.andi %12, %13 : vector<16x8x64xi1>
    %15 = arith.cmpf oeq, %8, %1 : vector<16x8x64xf32>
    %cst_9 = arith.constant dense<true> : vector<16x8x64xi1>
    %16 = arith.xori %11, %cst_9 : vector<16x8x64xi1>
    %17 = arith.andi %15, %16 : vector<16x8x64xi1>
    %cst_10 = arith.constant dense<true> : vector<16x8x64xi1>
    %18 = arith.xori %14, %cst_10 : vector<16x8x64xi1>
    %19 = arith.andi %17, %18 : vector<16x8x64xi1>
    %20 = arith.cmpf oeq, %10, %1 : vector<16x8x64xf32>
    %cst_11 = arith.constant dense<true> : vector<16x8x64xi1>
    %21 = arith.xori %11, %cst_11 : vector<16x8x64xi1>
    %22 = arith.andi %20, %21 : vector<16x8x64xi1>
    %cst_12 = arith.constant dense<true> : vector<16x8x64xi1>
    %23 = arith.xori %14, %cst_12 : vector<16x8x64xi1>
    %24 = arith.andi %22, %23 : vector<16x8x64xi1>
    %cst_13 = arith.constant dense<true> : vector<16x8x64xi1>
    %25 = arith.xori %19, %cst_13 : vector<16x8x64xi1>
    %26 = arith.andi %24, %25 : vector<16x8x64xi1>
    %cst_14 = arith.constant 0.000000e+00 : f32
    %27 = vector.broadcast %cst_14 : f32 to vector<16x8x64xf32>
    %28 = arith.select %11, %2, %27 : vector<16x8x64xi1>, vector<16x8x64xf32>
    %cst_15 = arith.constant 0.000000e+00 : f32
    %29 = vector.broadcast %cst_15 : f32 to vector<16x8x64xf32>
    %30 = arith.select %14, %2, %29 : vector<16x8x64xi1>, vector<16x8x64xf32>
    %31 = tpu.concatenate %28, %30 in 2 : vector<16x8x64xf32>, vector<16x8x64xf32> -> vector<16x8x128xf32>
    %c0_16 = arith.constant 0 : index
    %c0_17 = arith.constant 0 : index
    %c0_18 = arith.constant 0 : index
    %c0_19 = arith.constant 0 : index
    %32 = vector.load %arg4[%c0_16, %c0_17, %c0_18, %c0_19] : memref<16x2x8x128xf32, #tpu.memory_space<vmem>>, vector<16x1x8x128xf32>
    %33 = vector.shape_cast %32 : vector<16x1x8x128xf32> to vector<16x8x128xf32>
    %34 = vector.shape_cast %31 : vector<16x8x128xf32> to vector<16x1x8x128xf32>
    tpu.vector_store %arg4[%c0_16, %c0_17, %c0_18, %c0_19], %34 {strides = array<i32>} : memref<16x2x8x128xf32, #tpu.memory_space<vmem>>, vector<16x1x8x128xf32>,
    %cst_20 = arith.constant 0.000000e+00 : f32
    %35 = vector.broadcast %cst_20 : f32 to vector<16x8x64xf32>
    %36 = arith.select %19, %2, %35 : vector<16x8x64xi1>, vector<16x8x64xf32>
    %cst_21 = arith.constant 0.000000e+00 : f32
    %37 = vector.broadcast %cst_21 : f32 to vector<16x8x64xf32>
    %38 = arith.select %26, %2, %37 : vector<16x8x64xi1>, vector<16x8x64xf32>
    %39 = tpu.concatenate %36, %38 in 2 : vector<16x8x64xf32>, vector<16x8x64xf32> -> vector<16x8x128xf32>
    %c0_22 = arith.constant 0 : index
    %c1 = arith.constant 1 : index
    %c0_23 = arith.constant 0 : index
    %c0_24 = arith.constant 0 : index
    %40 = vector.load %arg4[%c0_22, %c1, %c0_23, %c0_24] : memref<16x2x8x128xf32, #tpu.memory_space<vmem>>, vector<16x1x8x128xf32>
    %41 = vector.shape_cast %40 : vector<16x1x8x128xf32> to vector<16x8x128xf32>
    %42 = vector.shape_cast %39 : vector<16x8x128xf32> to vector<16x1x8x128xf32>
    tpu.vector_store %arg4[%c0_22, %c1, %c0_23, %c0_24], %42 {strides = array<i32>} : memref<16x2x8x128xf32, #tpu.memory_space<vmem>>, vector<16x1x8x128xf32>,
    return
  }
  func.func @transform_0(%arg0: i32) -> (i32, i32, i32, i32) {
    %c0_i32 = arith.constant 0 : i32
    %c0_i32_0 = arith.constant 0 : i32
    %c0_i32_1 = arith.constant 0 : i32
    %c0_i32_2 = arith.constant 0 : i32
    return %arg0, %c0_i32, %c0_i32_0, %c0_i32_1 : i32, i32, i32, i32
  }
  func.func @transform_1(%arg0: i32) -> (i32, i32, i32) {
    %c0_i32 = arith.constant 0 : i32
    %c0_i32_0 = arith.constant 0 : i32
    %c0_i32_1 = arith.constant 0 : i32
    return %arg0, %c0_i32, %c0_i32_0 : i32, i32, i32
  }
  func.func @transform_2(%arg0: i32) -> (i32, i32, i32) {
    %c0_i32 = arith.constant 0 : i32
    %c0_i32_0 = arith.constant 0 : i32
    %c0_i32_1 = arith.constant 0 : i32
    return %arg0, %c0_i32, %c0_i32_0 : i32, i32, i32
  }
  func.func @transform_3(%arg0: i32) -> (i32, i32, i32, i32) {
    %c0_i32 = arith.constant 0 : i32
    %c0_i32_0 = arith.constant 0 : i32
    %c0_i32_1 = arith.constant 0 : i32
    %c0_i32_2 = arith.constant 0 : i32
    return %arg0, %c0_i32, %c0_i32_0, %c0_i32_1 : i32, i32, i32, i32
  }
}

module attributes {stable_mosaic.version = 11 : i64} {
  func.func @_dense_bwd_kernel(%arg0: i32, %arg1: i32, %arg2: i32, %arg3: memref<256x64xf32, #tpu.memory_space<vmem>>, %arg4: memref<256x64xf32, #tpu.memory_space<vmem>>, %arg5: memref<64x576xbf16, #tpu.memory_space<vmem>>, %arg6: memref<256x576xf32, #tpu.memory_space<vmem>>, %arg7: memref<256x576xf32, #tpu.memory_space<vmem>>) attributes {dimension_semantics = [#tpu.dimension_semantics<parallel>, #tpu.dimension_semantics<parallel>, #tpu.dimension_semantics<arbitrary>], iteration_bounds = array<i64: 2, 1, 1>, scalar_prefetch = 0 : i64, scratch_operands = 1 : i64, tpu.core_type = #tpu.core_type<tc>, window_params = [{transform_indices = @transform_0, window_bounds = array<i64: 256, 64>}, {transform_indices = @transform_1, window_bounds = array<i64: 256, 64>}, {transform_indices = @transform_2, window_bounds = array<i64: 64, 576>}, {transform_indices = @transform_3, window_bounds = array<i64: 256, 576>}]} {
    %c0_i32 = arith.constant 0 : i32
    %0 = arith.cmpi eq, %arg2, %c0_i32 : i32
    %1 = arith.extui %0 : i1 to i32
    %c0_i32_0 = arith.constant 0 : i32
    %2 = arith.cmpi ne, %1, %c0_i32_0 : i32
    scf.if %2 {
      %cst_14 = arith.constant 0.000000e+00 : f32
      %18 = vector.broadcast %cst_14 : f32 to vector<256x576xf32>
      %c0_15 = arith.constant 0 : index
      %c0_16 = arith.constant 0 : index
      %19 = vector.load %arg7[%c0_15, %c0_16] : memref<256x576xf32, #tpu.memory_space<vmem>>, vector<256x576xf32>
      tpu.vector_store %arg7[%c0_15, %c0_16], %18 {strides = array<i32>} : memref<256x576xf32, #tpu.memory_space<vmem>>, vector<256x576xf32>,
    } else {
    }
    %c0 = arith.constant 0 : index
    %c0_1 = arith.constant 0 : index
    %3 = vector.load %arg3[%c0, %c0_1] : memref<256x64xf32, #tpu.memory_space<vmem>>, vector<256x64xf32>
    %c0_2 = arith.constant 0 : index
    %c0_3 = arith.constant 0 : index
    %4 = vector.load %arg4[%c0_2, %c0_3] : memref<256x64xf32, #tpu.memory_space<vmem>>, vector<256x64xf32>
    %cst = arith.constant 0.000000e+00 : f32
    %5 = vector.broadcast %cst : f32 to vector<256x64xf32>
    %6 = arith.cmpf ogt, %4, %5 : vector<256x64xf32>
    %cst_4 = arith.constant 0.000000e+00 : f32
    %7 = vector.broadcast %cst_4 : f32 to vector<256x64xf32>
    %8 = arith.select %6, %3, %7 : vector<256x64xi1>, vector<256x64xf32>
    %c0_5 = arith.constant 0 : index
    %c0_6 = arith.constant 0 : index
    %9 = vector.load %arg7[%c0_5, %c0_6] : memref<256x576xf32, #tpu.memory_space<vmem>>, vector<256x576xf32>
    %10 = arith.truncf %8 : vector<256x64xf32> to vector<256x64xbf16>
    %c0_7 = arith.constant 0 : index
    %c0_8 = arith.constant 0 : index
    %11 = vector.load %arg5[%c0_7, %c0_8] : memref<64x576xbf16, #tpu.memory_space<vmem>>, vector<64x576xbf16>
    %cst_9 = arith.constant dense<0.000000e+00> : vector<256x576xf32>
    %12 = tpu.matmul %10, %11, %cst_9 {dimension_numbers = #tpu.dot_dimension_numbers<[1], [0], [0], [1], [0, 0, 1, 1], [], []>} : vector<256x64xbf16>, vector<64x576xbf16>, vector<256x576xf32> -> vector<256x576xf32>
    %13 = arith.addf %9, %12 : vector<256x576xf32>
    %c0_10 = arith.constant 0 : index
    %c0_11 = arith.constant 0 : index
    %14 = vector.load %arg7[%c0_10, %c0_11] : memref<256x576xf32, #tpu.memory_space<vmem>>, vector<256x576xf32>
    tpu.vector_store %arg7[%c0_10, %c0_11], %13 {strides = array<i32>} : memref<256x576xf32, #tpu.memory_space<vmem>>, vector<256x576xf32>,
    %c0_i32_12 = arith.constant 0 : i32
    %15 = arith.cmpi eq, %arg2, %c0_i32_12 : i32
    %16 = arith.extui %15 : i1 to i32
    %c0_i32_13 = arith.constant 0 : i32
    %17 = arith.cmpi ne, %16, %c0_i32_13 : i32
    scf.if %17 {
      %c0_14 = arith.constant 0 : index
      %c0_15 = arith.constant 0 : index
      %18 = vector.load %arg7[%c0_14, %c0_15] : memref<256x576xf32, #tpu.memory_space<vmem>>, vector<256x576xf32>
      %c0_16 = arith.constant 0 : index
      %c0_17 = arith.constant 0 : index
      %19 = vector.load %arg6[%c0_16, %c0_17] : memref<256x576xf32, #tpu.memory_space<vmem>>, vector<256x576xf32>
      tpu.vector_store %arg6[%c0_16, %c0_17], %18 {strides = array<i32>} : memref<256x576xf32, #tpu.memory_space<vmem>>, vector<256x576xf32>,
    } else {
    }
    return
  }
  func.func @transform_0(%arg0: i32, %arg1: i32, %arg2: i32) -> (i32, i32) {
    %c0_i32 = arith.constant 0 : i32
    return %arg0, %arg2 : i32, i32
  }
  func.func @transform_1(%arg0: i32, %arg1: i32, %arg2: i32) -> (i32, i32) {
    %c0_i32 = arith.constant 0 : i32
    return %arg0, %arg2 : i32, i32
  }
  func.func @transform_2(%arg0: i32, %arg1: i32, %arg2: i32) -> (i32, i32) {
    %c0_i32 = arith.constant 0 : i32
    return %arg2, %arg1 : i32, i32
  }
  func.func @transform_3(%arg0: i32, %arg1: i32, %arg2: i32) -> (i32, i32) {
    %c0_i32 = arith.constant 0 : i32
    return %arg0, %arg1 : i32, i32
  }
}

module attributes {stable_mosaic.version = 11 : i64} {
  func.func @_dense_bwd_kernel(%arg0: i32, %arg1: i32, %arg2: i32, %arg3: memref<256x64xf32, #tpu.memory_space<vmem>>, %arg4: memref<256x64xf32, #tpu.memory_space<vmem>>, %arg5: memref<64x27xbf16, #tpu.memory_space<vmem>>, %arg6: memref<256x27xf32, #tpu.memory_space<vmem>>, %arg7: memref<256x27xf32, #tpu.memory_space<vmem>>) attributes {dimension_semantics = [#tpu.dimension_semantics<parallel>, #tpu.dimension_semantics<parallel>, #tpu.dimension_semantics<arbitrary>], iteration_bounds = array<i64: 2, 1, 1>, scalar_prefetch = 0 : i64, scratch_operands = 1 : i64, tpu.core_type = #tpu.core_type<tc>, window_params = [{transform_indices = @transform_0, window_bounds = array<i64: 256, 64>}, {transform_indices = @transform_1, window_bounds = array<i64: 256, 64>}, {transform_indices = @transform_2, window_bounds = array<i64: 64, 27>}, {transform_indices = @transform_3, window_bounds = array<i64: 256, 27>}]} {
    %c0_i32 = arith.constant 0 : i32
    %0 = arith.cmpi eq, %arg2, %c0_i32 : i32
    %1 = arith.extui %0 : i1 to i32
    %c0_i32_0 = arith.constant 0 : i32
    %2 = arith.cmpi ne, %1, %c0_i32_0 : i32
    scf.if %2 {
      %cst_14 = arith.constant 0.000000e+00 : f32
      %18 = vector.broadcast %cst_14 : f32 to vector<256x27xf32>
      %c0_15 = arith.constant 0 : index
      %c0_16 = arith.constant 0 : index
      %19 = vector.load %arg7[%c0_15, %c0_16] : memref<256x27xf32, #tpu.memory_space<vmem>>, vector<256x27xf32>
      tpu.vector_store %arg7[%c0_15, %c0_16], %18 {strides = array<i32>} : memref<256x27xf32, #tpu.memory_space<vmem>>, vector<256x27xf32>,
    } else {
    }
    %c0 = arith.constant 0 : index
    %c0_1 = arith.constant 0 : index
    %3 = vector.load %arg3[%c0, %c0_1] : memref<256x64xf32, #tpu.memory_space<vmem>>, vector<256x64xf32>
    %c0_2 = arith.constant 0 : index
    %c0_3 = arith.constant 0 : index
    %4 = vector.load %arg4[%c0_2, %c0_3] : memref<256x64xf32, #tpu.memory_space<vmem>>, vector<256x64xf32>
    %cst = arith.constant 0.000000e+00 : f32
    %5 = vector.broadcast %cst : f32 to vector<256x64xf32>
    %6 = arith.cmpf ogt, %4, %5 : vector<256x64xf32>
    %cst_4 = arith.constant 0.000000e+00 : f32
    %7 = vector.broadcast %cst_4 : f32 to vector<256x64xf32>
    %8 = arith.select %6, %3, %7 : vector<256x64xi1>, vector<256x64xf32>
    %c0_5 = arith.constant 0 : index
    %c0_6 = arith.constant 0 : index
    %9 = vector.load %arg7[%c0_5, %c0_6] : memref<256x27xf32, #tpu.memory_space<vmem>>, vector<256x27xf32>
    %10 = arith.truncf %8 : vector<256x64xf32> to vector<256x64xbf16>
    %c0_7 = arith.constant 0 : index
    %c0_8 = arith.constant 0 : index
    %11 = vector.load %arg5[%c0_7, %c0_8] : memref<64x27xbf16, #tpu.memory_space<vmem>>, vector<64x27xbf16>
    %cst_9 = arith.constant dense<0.000000e+00> : vector<256x27xf32>
    %12 = tpu.matmul %10, %11, %cst_9 {dimension_numbers = #tpu.dot_dimension_numbers<[1], [0], [0], [1], [0, 0, 1, 1], [], []>} : vector<256x64xbf16>, vector<64x27xbf16>, vector<256x27xf32> -> vector<256x27xf32>
    %13 = arith.addf %9, %12 : vector<256x27xf32>
    %c0_10 = arith.constant 0 : index
    %c0_11 = arith.constant 0 : index
    %14 = vector.load %arg7[%c0_10, %c0_11] : memref<256x27xf32, #tpu.memory_space<vmem>>, vector<256x27xf32>
    tpu.vector_store %arg7[%c0_10, %c0_11], %13 {strides = array<i32>} : memref<256x27xf32, #tpu.memory_space<vmem>>, vector<256x27xf32>,
    %c0_i32_12 = arith.constant 0 : i32
    %15 = arith.cmpi eq, %arg2, %c0_i32_12 : i32
    %16 = arith.extui %15 : i1 to i32
    %c0_i32_13 = arith.constant 0 : i32
    %17 = arith.cmpi ne, %16, %c0_i32_13 : i32
    scf.if %17 {
      %c0_14 = arith.constant 0 : index
      %c0_15 = arith.constant 0 : index
      %18 = vector.load %arg7[%c0_14, %c0_15] : memref<256x27xf32, #tpu.memory_space<vmem>>, vector<256x27xf32>
      %c0_16 = arith.constant 0 : index
      %c0_17 = arith.constant 0 : index
      %19 = vector.load %arg6[%c0_16, %c0_17] : memref<256x27xf32, #tpu.memory_space<vmem>>, vector<256x27xf32>
      tpu.vector_store %arg6[%c0_16, %c0_17], %18 {strides = array<i32>} : memref<256x27xf32, #tpu.memory_space<vmem>>, vector<256x27xf32>,
    } else {
    }
    return
  }
  func.func @transform_0(%arg0: i32, %arg1: i32, %arg2: i32) -> (i32, i32) {
    %c0_i32 = arith.constant 0 : i32
    return %arg0, %arg2 : i32, i32
  }
  func.func @transform_1(%arg0: i32, %arg1: i32, %arg2: i32) -> (i32, i32) {
    %c0_i32 = arith.constant 0 : i32
    return %arg0, %arg2 : i32, i32
  }
  func.func @transform_2(%arg0: i32, %arg1: i32, %arg2: i32) -> (i32, i32) {
    %c0_i32 = arith.constant 0 : i32
    return %arg2, %arg1 : i32, i32
  }
  func.func @transform_3(%arg0: i32, %arg1: i32, %arg2: i32) -> (i32, i32) {
    %c0_i32 = arith.constant 0 : i32
    return %arg0, %arg1 : i32, i32
  }
}

module attributes {stable_mosaic.version = 11 : i64} {
  func.func @_dense_bwd_kernel(%arg0: i32, %arg1: i32, %arg2: i32, %arg3: memref<2x512xf32, #tpu.memory_space<vmem>>, %arg4: memref<2x512xf32, #tpu.memory_space<vmem>>, %arg5: memref<512x256xbf16, #tpu.memory_space<vmem>>, %arg6: memref<2x256xf32, #tpu.memory_space<vmem>>, %arg7: memref<2x256xf32, #tpu.memory_space<vmem>>) attributes {dimension_semantics = [#tpu.dimension_semantics<parallel>, #tpu.dimension_semantics<parallel>, #tpu.dimension_semantics<arbitrary>], iteration_bounds = array<i64: 1, 3, 1>, scalar_prefetch = 0 : i64, scratch_operands = 1 : i64, tpu.core_type = #tpu.core_type<tc>, window_params = [{transform_indices = @transform_0, window_bounds = array<i64: 2, 512>}, {transform_indices = @transform_1, window_bounds = array<i64: 2, 512>}, {transform_indices = @transform_2, window_bounds = array<i64: 512, 256>}, {transform_indices = @transform_3, window_bounds = array<i64: 2, 256>}]} {
    %c0_i32 = arith.constant 0 : i32
    %0 = arith.cmpi eq, %arg2, %c0_i32 : i32
    %1 = arith.extui %0 : i1 to i32
    %c0_i32_0 = arith.constant 0 : i32
    %2 = arith.cmpi ne, %1, %c0_i32_0 : i32
    scf.if %2 {
      %cst_10 = arith.constant 0.000000e+00 : f32
      %13 = vector.broadcast %cst_10 : f32 to vector<2x256xf32>
      %c0_11 = arith.constant 0 : index
      %c0_12 = arith.constant 0 : index
      %14 = vector.load %arg7[%c0_11, %c0_12] : memref<2x256xf32, #tpu.memory_space<vmem>>, vector<2x256xf32>
      tpu.vector_store %arg7[%c0_11, %c0_12], %13 {strides = array<i32>} : memref<2x256xf32, #tpu.memory_space<vmem>>, vector<2x256xf32>,
    } else {
    }
    %c0 = arith.constant 0 : index
    %c0_1 = arith.constant 0 : index
    %3 = vector.load %arg3[%c0, %c0_1] : memref<2x512xf32, #tpu.memory_space<vmem>>, vector<2x512xf32>
    %c0_2 = arith.constant 0 : index
    %c0_3 = arith.constant 0 : index
    %4 = vector.load %arg7[%c0_2, %c0_3] : memref<2x256xf32, #tpu.memory_space<vmem>>, vector<2x256xf32>
    %5 = arith.truncf %3 : vector<2x512xf32> to vector<2x512xbf16>
    %c0_4 = arith.constant 0 : index
    %c0_5 = arith.constant 0 : index
    %6 = vector.load %arg5[%c0_4, %c0_5] : memref<512x256xbf16, #tpu.memory_space<vmem>>, vector<512x256xbf16>
    %cst = arith.constant dense<0.000000e+00> : vector<2x256xf32>
    %7 = tpu.matmul %5, %6, %cst {dimension_numbers = #tpu.dot_dimension_numbers<[1], [0], [0], [1], [0, 0, 1, 1], [], []>} : vector<2x512xbf16>, vector<512x256xbf16>, vector<2x256xf32> -> vector<2x256xf32>
    %8 = arith.addf %4, %7 : vector<2x256xf32>
    %c0_6 = arith.constant 0 : index
    %c0_7 = arith.constant 0 : index
    %9 = vector.load %arg7[%c0_6, %c0_7] : memref<2x256xf32, #tpu.memory_space<vmem>>, vector<2x256xf32>
    tpu.vector_store %arg7[%c0_6, %c0_7], %8 {strides = array<i32>} : memref<2x256xf32, #tpu.memory_space<vmem>>, vector<2x256xf32>,
    %c0_i32_8 = arith.constant 0 : i32
    %10 = arith.cmpi eq, %arg2, %c0_i32_8 : i32
    %11 = arith.extui %10 : i1 to i32
    %c0_i32_9 = arith.constant 0 : i32
    %12 = arith.cmpi ne, %11, %c0_i32_9 : i32
    scf.if %12 {
      %c0_10 = arith.constant 0 : index
      %c0_11 = arith.constant 0 : index
      %13 = vector.load %arg7[%c0_10, %c0_11] : memref<2x256xf32, #tpu.memory_space<vmem>>, vector<2x256xf32>
      %c0_12 = arith.constant 0 : index
      %c0_13 = arith.constant 0 : index
      %14 = vector.load %arg6[%c0_12, %c0_13] : memref<2x256xf32, #tpu.memory_space<vmem>>, vector<2x256xf32>
      tpu.vector_store %arg6[%c0_12, %c0_13], %13 {strides = array<i32>} : memref<2x256xf32, #tpu.memory_space<vmem>>, vector<2x256xf32>,
    } else {
    }
    return
  }
  func.func @transform_0(%arg0: i32, %arg1: i32, %arg2: i32) -> (i32, i32) {
    %c0_i32 = arith.constant 0 : i32
    return %arg0, %arg2 : i32, i32
  }
  func.func @transform_1(%arg0: i32, %arg1: i32, %arg2: i32) -> (i32, i32) {
    %c0_i32 = arith.constant 0 : i32
    return %arg0, %arg2 : i32, i32
  }
  func.func @transform_2(%arg0: i32, %arg1: i32, %arg2: i32) -> (i32, i32) {
    %c0_i32 = arith.constant 0 : i32
    return %arg2, %arg1 : i32, i32
  }
  func.func @transform_3(%arg0: i32, %arg1: i32, %arg2: i32) -> (i32, i32) {
    %c0_i32 = arith.constant 0 : i32
    return %arg0, %arg1 : i32, i32
  }
}

module attributes {stable_mosaic.version = 11 : i64} {
  func.func @_dense_bwd_kernel(%arg0: i32, %arg1: i32, %arg2: i32, %arg3: memref<2x384xf32, #tpu.memory_space<vmem>>, %arg4: memref<2x384xf32, #tpu.memory_space<vmem>>, %arg5: memref<384x256xbf16, #tpu.memory_space<vmem>>, %arg6: memref<2x256xf32, #tpu.memory_space<vmem>>, %arg7: memref<2x256xf32, #tpu.memory_space<vmem>>) attributes {dimension_semantics = [#tpu.dimension_semantics<parallel>, #tpu.dimension_semantics<parallel>, #tpu.dimension_semantics<arbitrary>], iteration_bounds = array<i64: 1, 2, 2>, scalar_prefetch = 0 : i64, scratch_operands = 1 : i64, tpu.core_type = #tpu.core_type<tc>, window_params = [{transform_indices = @transform_0, window_bounds = array<i64: 2, 384>}, {transform_indices = @transform_1, window_bounds = array<i64: 2, 384>}, {transform_indices = @transform_2, window_bounds = array<i64: 384, 256>}, {transform_indices = @transform_3, window_bounds = array<i64: 2, 256>}]} {
    %c0_i32 = arith.constant 0 : i32
    %0 = arith.cmpi eq, %arg2, %c0_i32 : i32
    %1 = arith.extui %0 : i1 to i32
    %c0_i32_0 = arith.constant 0 : i32
    %2 = arith.cmpi ne, %1, %c0_i32_0 : i32
    scf.if %2 {
      %cst_12 = arith.constant 0.000000e+00 : f32
      %18 = vector.broadcast %cst_12 : f32 to vector<2x256xf32>
      %c0_13 = arith.constant 0 : index
      %c0_14 = arith.constant 0 : index
      %19 = vector.load %arg7[%c0_13, %c0_14] : memref<2x256xf32, #tpu.memory_space<vmem>>, vector<2x256xf32>
      tpu.vector_store %arg7[%c0_13, %c0_14], %18 {strides = array<i32>} : memref<2x256xf32, #tpu.memory_space<vmem>>, vector<2x256xf32>,
    } else {
    }
    %c0 = arith.constant 0 : index
    %c0_1 = arith.constant 0 : index
    %3 = vector.load %arg3[%c0, %c0_1] : memref<2x384xf32, #tpu.memory_space<vmem>>, vector<2x384xf32>
    %c0_2 = arith.constant 0 : index
    %c0_3 = arith.constant 0 : index
    %4 = vector.load %arg4[%c0_2, %c0_3] : memref<2x384xf32, #tpu.memory_space<vmem>>, vector<2x384xf32>
    %5 = arith.mulf %4, %4 : vector<2x384xf32>
    %cst = arith.constant 1.000000e+00 : f32
    %6 = vector.broadcast %cst : f32 to vector<2x384xf32>
    %7 = arith.subf %6, %5 : vector<2x384xf32>
    %8 = arith.mulf %3, %7 : vector<2x384xf32>
    %c0_4 = arith.constant 0 : index
    %c0_5 = arith.constant 0 : index
    %9 = vector.load %arg7[%c0_4, %c0_5] : memref<2x256xf32, #tpu.memory_space<vmem>>, vector<2x256xf32>
    %10 = arith.truncf %8 : vector<2x384xf32> to vector<2x384xbf16>
    %c0_6 = arith.constant 0 : index
    %c0_7 = arith.constant 0 : index
    %11 = vector.load %arg5[%c0_6, %c0_7] : memref<384x256xbf16, #tpu.memory_space<vmem>>, vector<384x256xbf16>
    %cst_8 = arith.constant dense<0.000000e+00> : vector<2x256xf32>
    %12 = tpu.matmul %10, %11, %cst_8 {dimension_numbers = #tpu.dot_dimension_numbers<[1], [0], [0], [1], [0, 0, 1, 1], [], []>} : vector<2x384xbf16>, vector<384x256xbf16>, vector<2x256xf32> -> vector<2x256xf32>
    %13 = arith.addf %9, %12 : vector<2x256xf32>
    %c0_9 = arith.constant 0 : index
    %c0_10 = arith.constant 0 : index
    %14 = vector.load %arg7[%c0_9, %c0_10] : memref<2x256xf32, #tpu.memory_space<vmem>>, vector<2x256xf32>
    tpu.vector_store %arg7[%c0_9, %c0_10], %13 {strides = array<i32>} : memref<2x256xf32, #tpu.memory_space<vmem>>, vector<2x256xf32>,
    %c1_i32 = arith.constant 1 : i32
    %15 = arith.cmpi eq, %arg2, %c1_i32 : i32
    %16 = arith.extui %15 : i1 to i32
    %c0_i32_11 = arith.constant 0 : i32
    %17 = arith.cmpi ne, %16, %c0_i32_11 : i32
    scf.if %17 {
      %c0_12 = arith.constant 0 : index
      %c0_13 = arith.constant 0 : index
      %18 = vector.load %arg7[%c0_12, %c0_13] : memref<2x256xf32, #tpu.memory_space<vmem>>, vector<2x256xf32>
      %c0_14 = arith.constant 0 : index
      %c0_15 = arith.constant 0 : index
      %19 = vector.load %arg6[%c0_14, %c0_15] : memref<2x256xf32, #tpu.memory_space<vmem>>, vector<2x256xf32>
      tpu.vector_store %arg6[%c0_14, %c0_15], %18 {strides = array<i32>} : memref<2x256xf32, #tpu.memory_space<vmem>>, vector<2x256xf32>,
    } else {
    }
    return
  }
  func.func @transform_0(%arg0: i32, %arg1: i32, %arg2: i32) -> (i32, i32) {
    %c0_i32 = arith.constant 0 : i32
    return %arg0, %arg2 : i32, i32
  }
  func.func @transform_1(%arg0: i32, %arg1: i32, %arg2: i32) -> (i32, i32) {
    %c0_i32 = arith.constant 0 : i32
    return %arg0, %arg2 : i32, i32
  }
  func.func @transform_2(%arg0: i32, %arg1: i32, %arg2: i32) -> (i32, i32) {
    %c0_i32 = arith.constant 0 : i32
    return %arg2, %arg1 : i32, i32
  }
  func.func @transform_3(%arg0: i32, %arg1: i32, %arg2: i32) -> (i32, i32) {
    %c0_i32 = arith.constant 0 : i32
    return %arg0, %arg1 : i32, i32
  }
}

module attributes {stable_mosaic.version = 11 : i64} {
  func.func @_adam_kernel(%arg0: memref<2xf32, #tpu.memory_space<smem>>, %arg1: memref<2x512xf32, #tpu.memory_space<vmem>>, %arg2: memref<2x512xf32, #tpu.memory_space<vmem>>, %arg3: memref<2x512xf32, #tpu.memory_space<vmem>>, %arg4: memref<2x512xf32, #tpu.memory_space<vmem>>, %arg5: memref<2x512xf32, #tpu.memory_space<vmem>>, %arg6: memref<2x512xf32, #tpu.memory_space<vmem>>, %arg7: memref<2x512xf32, #tpu.memory_space<vmem>>) attributes {dimension_semantics = [], scalar_prefetch = 0 : i64, scratch_operands = 0 : i64, tpu.core_type = #tpu.core_type<tc>} {
    %c0 = arith.constant 0 : index
    %c0_0 = arith.constant 0 : index
    %0 = vector.load %arg2[%c0, %c0_0] : memref<2x512xf32, #tpu.memory_space<vmem>>, vector<2x512xf32>
    %c0_1 = arith.constant 0 : index
    %c0_2 = arith.constant 0 : index
    %1 = vector.load %arg3[%c0_1, %c0_2] : memref<2x512xf32, #tpu.memory_space<vmem>>, vector<2x512xf32>
    %cst = arith.constant 0.899999976 : f32
    %2 = vector.broadcast %cst : f32 to vector<2x512xf32>
    %3 = arith.mulf %2, %1 : vector<2x512xf32>
    %cst_3 = arith.constant 1.000000e-01 : f32
    %4 = vector.broadcast %cst_3 : f32 to vector<2x512xf32>
    %5 = arith.mulf %4, %0 : vector<2x512xf32>
    %6 = arith.addf %3, %5 : vector<2x512xf32>
    %c0_4 = arith.constant 0 : index
    %c0_5 = arith.constant 0 : index
    %7 = vector.load %arg4[%c0_4, %c0_5] : memref<2x512xf32, #tpu.memory_space<vmem>>, vector<2x512xf32>
    %cst_6 = arith.constant 9.990000e-01 : f32
    %8 = vector.broadcast %cst_6 : f32 to vector<2x512xf32>
    %9 = arith.mulf %8, %7 : vector<2x512xf32>
    %cst_7 = arith.constant 1.000000e-03 : f32
    %10 = vector.broadcast %cst_7 : f32 to vector<2x512xf32>
    %11 = arith.mulf %10, %0 : vector<2x512xf32>
    %12 = arith.mulf %11, %0 : vector<2x512xf32>
    %13 = arith.addf %9, %12 : vector<2x512xf32>
    %c0_8 = arith.constant 0 : index
    %14 = memref.load %arg0[%c0_8] : memref<2xf32, #tpu.memory_space<smem>>
    %15 = vector.broadcast %14 : f32 to vector<2x512xf32>
    %16 = arith.divf %6, %15 : vector<2x512xf32>
    %c1 = arith.constant 1 : index
    %17 = memref.load %arg0[%c1] : memref<2xf32, #tpu.memory_space<smem>>
    %18 = vector.broadcast %17 : f32 to vector<2x512xf32>
    %19 = arith.divf %13, %18 : vector<2x512xf32>
    %c0_9 = arith.constant 0 : index
    %c0_10 = arith.constant 0 : index
    %20 = vector.load %arg1[%c0_9, %c0_10] : memref<2x512xf32, #tpu.memory_space<vmem>>, vector<2x512xf32>
    %cst_11 = arith.constant 0.00999999977 : f32
    %21 = vector.broadcast %cst_11 : f32 to vector<2x512xf32>
    %22 = arith.mulf %21, %16 : vector<2x512xf32>
    %23 = math.sqrt %19 : vector<2x512xf32>
    %cst_12 = arith.constant 9.99999993E-9 : f32
    %24 = vector.broadcast %cst_12 : f32 to vector<2x512xf32>
    %25 = arith.addf %23, %24 : vector<2x512xf32>
    %26 = arith.divf %22, %25 : vector<2x512xf32>
    %27 = arith.subf %20, %26 : vector<2x512xf32>
    %c0_13 = arith.constant 0 : index
    %c0_14 = arith.constant 0 : index
    %28 = vector.load %arg5[%c0_13, %c0_14] : memref<2x512xf32, #tpu.memory_space<vmem>>, vector<2x512xf32>
    tpu.vector_store %arg5[%c0_13, %c0_14], %27 {strides = array<i32>} : memref<2x512xf32, #tpu.memory_space<vmem>>, vector<2x512xf32>,
    %c0_15 = arith.constant 0 : index
    %c0_16 = arith.constant 0 : index
    %29 = vector.load %arg6[%c0_15, %c0_16] : memref<2x512xf32, #tpu.memory_space<vmem>>, vector<2x512xf32>
    tpu.vector_store %arg6[%c0_15, %c0_16], %6 {strides = array<i32>} : memref<2x512xf32, #tpu.memory_space<vmem>>, vector<2x512xf32>,
    %c0_17 = arith.constant 0 : index
    %c0_18 = arith.constant 0 : index
    %30 = vector.load %arg7[%c0_17, %c0_18] : memref<2x512xf32, #tpu.memory_space<vmem>>, vector<2x512xf32>
    tpu.vector_store %arg7[%c0_17, %c0_18], %13 {strides = array<i32>} : memref<2x512xf32, #tpu.memory_space<vmem>>, vector<2x512xf32>,
    return
  }
}

</mosaic_0001>

<bundles_post_ra>
// kernel: reverse.3
= control target key start
LH: loop header
LB: loop body
LE: loop exit
PB: predicated region body
PF: predicated region fallthrough
CT: control target
= control target key end

     0   :  { %v2_v0 = vlaneseq  ;;  %s1422_s0 = inlined_call_operand.vmem [shape: f32[2,16,16,3], index: 0, kind: input, shape index: {}]   ;;  %s1423_s1 = inlined_call_operand.vmem [shape: f32[2,16,16,3], index: 1, kind: output, shape index: {}]  }
   0x1   :  { %v163_v2 = vld [vmem:[%s1422_s0 + $0x10] sm:$0xff]  ;;  %v159_v3 = vld [vmem:[%s1422_s0] sm:$0xff]  ;;  %v165_v4 = vld [vmem:[%s1422_s0 + $0x18] sm:$0xff] }
   0x2   :  { %v3_v1 = vsub.s32 2, %v2_v0  ;;  %v161_v5 = vld [vmem:[%s1422_s0 + $0x8] sm:$0xff]  ;;  %v167_v7 = vld [vmem:[%s1422_s0 + $0x20] sm:$0xff]  ;;  %v173_v8 = vld [vmem:[%s1422_s0 + $0x38] sm:$0xff] }
   0x3   :  { %v169_v6 = vld [vmem:[%s1422_s0 + $0x28] sm:$0xff]  ;;  %v171_v9 = vld [vmem:[%s1422_s0 + $0x30] sm:$0xff]  ;;  %v175_v11 = vld [vmem:[%s1422_s0 + $0x40] sm:$0xff] }
   0x4   :  { %4 = vset.pattern.permute.xlu0 %v3_v1  ;;  %1027 = vset.pattern.permute.xlu1 %v3_v1  ;;  %v177_v10 = vld [vmem:[%s1422_s0 + $0x48] sm:$0xff]  ;;  %v181_v12 = vld [vmem:[%s1422_s0 + $0x58] sm:$0xff]  ;;  %v179_v13 = vld [vmem:[%s1422_s0 + $0x50] sm:$0xff] }
   0x5   :  { %303 = vperm.xlu1 %1027, %v163_v2   ;;  %291 = vperm.xlu0 %4, %v159_v3   ;;  %v185_v14 = vld [vmem:[%s1422_s0 + $0x68] sm:$0xff]  ;;  %v183_v15 = vld [vmem:[%s1422_s0 + $0x60] sm:$0xff]  ;;  %v189_v16 = vld [vmem:[%s1422_s0 + $0x78] sm:$0xff] }
   0x6   :  { %v187_v17 = vld [vmem:[%s1422_s0 + $0x70] sm:$0xff]  ;;  %v193_v18 = vld [vmem:[%s1422_s0 + $0x88] sm:$0xff]  ;;  %v191_v19 = vld [vmem:[%s1422_s0 + $0x80] sm:$0xff] }
   0x7   :  { %v197_v20 = vld [vmem:[%s1422_s0 + $0x98] sm:$0xff]  ;;  %v195_v21 = vld [vmem:[%s1422_s0 + $0x90] sm:$0xff]  ;;  %v201_v22 = vld [vmem:[%s1422_s0 + $0xa8] sm:$0xff] }
   0x8   :  { %v199_v23 = vld [vmem:[%s1422_s0 + $0xa0] sm:$0xff]  ;;  %v205_v24 = vld [vmem:[%s1422_s0 + $0xb8] sm:$0xff]  ;;  %v203_v25 = vld [vmem:[%s1422_s0 + $0xb0] sm:$0xff] }
   0x9   :  { %309 = vperm.xlu1 %1027, %v165_v4   ;;  %297 = vperm.xlu0 %4, %v161_v5   ;;  %v209_v26 = vld [vmem:[%s1422_s0 + $0xc8] sm:$0xff]  ;;  %v207_v27 = vld [vmem:[%s1422_s0 + $0xc0] sm:$0xff]  ;;  %v213_v28 = vld [vmem:[%s1422_s0 + $0xd8] sm:$0xff] }
   0xa   :  { %v211_v29 = vld [vmem:[%s1422_s0 + $0xd0] sm:$0xff]  ;;  %v217_v30 = vld [vmem:[%s1422_s0 + $0xe8] sm:$0xff]  ;;  %v215_v31 = vld [vmem:[%s1422_s0 + $0xe0] sm:$0xff] }
   0xb   :  { %v221_v32 = vld [vmem:[%s1422_s0 + $0xf8] sm:$0xff]  ;;  %v219_v33 = vld [vmem:[%s1422_s0 + $0xf0] sm:$0xff]  ;;  %v225_v34 = vld [vmem:[%s1422_s0 + $0x108] sm:$0xff] }
   0xc   :  { %v223_v35 = vld [vmem:[%s1422_s0 + $0x100] sm:$0xff]  ;;  %v229_v36 = vld [vmem:[%s1422_s0 + $0x118] sm:$0xff]  ;;  %v227_v37 = vld [vmem:[%s1422_s0 + $0x110] sm:$0xff] }
   0xd   :  { %321 = vperm.xlu1 %1027, %v169_v6   ;;  %315 = vperm.xlu0 %4, %v167_v7   ;;  %v233_v38 = vld [vmem:[%s1422_s0 + $0x128] sm:$0xff]  ;;  %v231_v39 = vld [vmem:[%s1422_s0 + $0x120] sm:$0xff]  ;;  %v237_v40 = vld [vmem:[%s1422_s0 + $0x138] sm:$0xff] }
   0xe   :  { %v235_v41 = vld [vmem:[%s1422_s0 + $0x130] sm:$0xff]  ;;  %v241_v42 = vld [vmem:[%s1422_s0 + $0x148] sm:$0xff]  ;;  %v239_v43 = vld [vmem:[%s1422_s0 + $0x140] sm:$0xff] }
   0xf   :  { %v245_v44 = vld [vmem:[%s1422_s0 + $0x158] sm:$0xff]  ;;  %v243_v45 = vld [vmem:[%s1422_s0 + $0x150] sm:$0xff]  ;;  %v249_v46 = vld [vmem:[%s1422_s0 + $0x168] sm:$0xff] }
  0x10   :  { %v247_v47 = vld [vmem:[%s1422_s0 + $0x160] sm:$0xff]  ;;  %v253_v48 = vld [vmem:[%s1422_s0 + $0x178] sm:$0xff]  ;;  %v251_v49 = vld [vmem:[%s1422_s0 + $0x170] sm:$0xff] }
  0x11   :  { %333 = vperm.xlu1 %1027, %v173_v8   ;;  %327 = vperm.xlu0 %4, %v171_v9   ;;  %v257_v50 = vld [vmem:[%s1422_s0 + $0x188] sm:$0xff]  ;;  %v255_v51 = vld [vmem:[%s1422_s0 + $0x180] sm:$0xff]  ;;  %v261_v52 = vld [vmem:[%s1422_s0 + $0x198] sm:$0xff] }
  0x12   :  { %v259_v53 = vld [vmem:[%s1422_s0 + $0x190] sm:$0xff]  ;;  %v265_v54 = vld [vmem:[%s1422_s0 + $0x1a8] sm:$0xff]  ;;  %v263_v55 = vld [vmem:[%s1422_s0 + $0x1a0] sm:$0xff] }
  0x13   :  { %v269_v56 = vld [vmem:[%s1422_s0 + $0x1b8] sm:$0xff]  ;;  %v267_v57 = vld [vmem:[%s1422_s0 + $0x1b0] sm:$0xff]  ;;  %v273_v58 = vld [vmem:[%s1422_s0 + $0x1c8] sm:$0xff] }
  0x14   :  { %v271_v59 = vld [vmem:[%s1422_s0 + $0x1c0] sm:$0xff]  ;;  %v277_v60 = vld [vmem:[%s1422_s0 + $0x1d8] sm:$0xff]  ;;  %v275_v61 = vld [vmem:[%s1422_s0 + $0x1d0] sm:$0xff] }
  0x15   :  { %345 = vperm.xlu1 %1027, %v177_v10   ;;  %339 = vperm.xlu0 %4, %v175_v11   ;;  %v281_v62 = vld [vmem:[%s1422_s0 + $0x1e8] sm:$0xff]  ;;  %v279_v63 = vld [vmem:[%s1422_s0 + $0x1e0] sm:$0xff]  ;;  %v285_v0 = vld [vmem:[%s1422_s0 + $0x1f8] sm:$0xff] }
  0x16   :  { %v283_v1 = vld [vmem:[%s1422_s0 + $0x1f0] sm:$0xff] }
  0x19   :  { %357 = vperm.xlu1 %1027, %v181_v12   ;;  %351 = vperm.xlu0 %4, %v179_v13  }
  0x1d   :  { %369 = vperm.xlu1 %1027, %v185_v14   ;;  %363 = vperm.xlu0 %4, %v183_v15  }
  0x21   :  { %381 = vperm.xlu1 %1027, %v189_v16   ;;  %375 = vperm.xlu0 %4, %v187_v17  }
  0x25   :  { %393 = vperm.xlu1 %1027, %v193_v18   ;;  %387 = vperm.xlu0 %4, %v191_v19  }
  0x29   :  { %405 = vperm.xlu1 %1027, %v197_v20   ;;  %399 = vperm.xlu0 %4, %v195_v21  }
  0x2d   :  { %417 = vperm.xlu1 %1027, %v201_v22   ;;  %411 = vperm.xlu0 %4, %v199_v23  }
  0x31   :  { %429 = vperm.xlu1 %1027, %v205_v24   ;;  %423 = vperm.xlu0 %4, %v203_v25  }
  0x35   :  { %441 = vperm.xlu1 %1027, %v209_v26   ;;  %435 = vperm.xlu0 %4, %v207_v27  }
  0x39   :  { %453 = vperm.xlu1 %1027, %v213_v28   ;;  %447 = vperm.xlu0 %4, %v211_v29  }
  0x3d   :  { %465 = vperm.xlu1 %1027, %v217_v30   ;;  %459 = vperm.xlu0 %4, %v215_v31  }
  0x41   :  { %477 = vperm.xlu1 %1027, %v221_v32   ;;  %471 = vperm.xlu0 %4, %v219_v33  }
  0x45   :  { %489 = vperm.xlu1 %1027, %v225_v34   ;;  %483 = vperm.xlu0 %4, %v223_v35  }
  0x49   :  { %501 = vperm.xlu1 %1027, %v229_v36   ;;  %495 = vperm.xlu0 %4, %v227_v37  }
  0x4d   :  { %513 = vperm.xlu1 %1027, %v233_v38   ;;  %507 = vperm.xlu0 %4, %v231_v39  }
  0x51   :  { %525 = vperm.xlu1 %1027, %v237_v40   ;;  %519 = vperm.xlu0 %4, %v235_v41  }
  0x55   :  { %537 = vperm.xlu1 %1027, %v241_v42   ;;  %531 = vperm.xlu0 %4, %v239_v43  }
  0x59   :  { %549 = vperm.xlu1 %1027, %v245_v44   ;;  %543 = vperm.xlu0 %4, %v243_v45  }
  0x5d   :  { %561 = vperm.xlu1 %1027, %v249_v46   ;;  %555 = vperm.xlu0 %4, %v247_v47  }
  0x61   :  { %573 = vperm.xlu1 %1027, %v253_v48   ;;  %567 = vperm.xlu0 %4, %v251_v49  }
  0x65   :  { %585 = vperm.xlu1 %1027, %v257_v50   ;;  %579 = vperm.xlu0 %4, %v255_v51  }
  0x69   :  { %597 = vperm.xlu1 %1027, %v261_v52   ;;  %591 = vperm.xlu0 %4, %v259_v53  }
  0x6d   :  { %609 = vperm.xlu1 %1027, %v265_v54   ;;  %603 = vperm.xlu0 %4, %v263_v55  }
  0x71   :  { %621 = vperm.xlu1 %1027, %v269_v56   ;;  %615 = vperm.xlu0 %4, %v267_v57  }
  0x75   :  { %633 = vperm.xlu1 %1027, %v273_v58   ;;  %627 = vperm.xlu0 %4, %v271_v59  }
  0x79   :  { %645 = vperm.xlu1 %1027, %v277_v60   ;;  %639 = vperm.xlu0 %4, %v275_v61  }
  0x7d   :  { %657 = vperm.xlu1 %1027, %v281_v62   ;;  %651 = vperm.xlu0 %4, %v279_v63  }
  0x80   :  { %v304_v2 = vpop.permute.xlu1 %303  ;;  %v292_v3 = vpop.permute.xlu0 %291 }
  0x81   :  { %831 = vst [vmem:[%s1423_s1 + $0x10] sm:$0xff] %v304_v2  ;;  %827 = vst [vmem:[%s1423_s1] sm:$0xff] %v292_v3  ;;  %669 = vperm.xlu1 %1027, %v285_v0   ;;  %663 = vperm.xlu0 %4, %v283_v1  }
  0x84   :  { %v310_v4 = vpop.permute.xlu1 %309  ;;  %v298_v5 = vpop.permute.xlu0 %297 }
  0x85   :  { %833 = vst [vmem:[%s1423_s1 + $0x18] sm:$0xff] %v310_v4  ;;  %829 = vst [vmem:[%s1423_s1 + $0x8] sm:$0xff] %v298_v5 }
  0x88   :  { %v322_v6 = vpop.permute.xlu1 %321  ;;  %v316_v7 = vpop.permute.xlu0 %315 }
  0x89   :  { %837 = vst [vmem:[%s1423_s1 + $0x28] sm:$0xff] %v322_v6  ;;  %835 = vst [vmem:[%s1423_s1 + $0x20] sm:$0xff] %v316_v7 }
  0x8c   :  { %v334_v8 = vpop.permute.xlu1 %333  ;;  %v328_v9 = vpop.permute.xlu0 %327 }
  0x8d   :  { %841 = vst [vmem:[%s1423_s1 + $0x38] sm:$0xff] %v334_v8  ;;  %839 = vst [vmem:[%s1423_s1 + $0x30] sm:$0xff] %v328_v9 }
  0x90   :  { %v346_v10 = vpop.permute.xlu1 %345  ;;  %v340_v11 = vpop.permute.xlu0 %339 }
  0x91   :  { %845 = vst [vmem:[%s1423_s1 + $0x48] sm:$0xff] %v346_v10  ;;  %843 = vst [vmem:[%s1423_s1 + $0x40] sm:$0xff] %v340_v11 }
  0x94   :  { %v358_v12 = vpop.permute.xlu1 %357  ;;  %v352_v13 = vpop.permute.xlu0 %351 }
  0x95   :  { %849 = vst [vmem:[%s1423_s1 + $0x58] sm:$0xff] %v358_v12  ;;  %847 = vst [vmem:[%s1423_s1 + $0x50] sm:$0xff] %v352_v13 }
  0x98   :  { %v370_v14 = vpop.permute.xlu1 %369  ;;  %v364_v15 = vpop.permute.xlu0 %363 }
  0x99   :  { %853 = vst [vmem:[%s1423_s1 + $0x68] sm:$0xff] %v370_v14  ;;  %851 = vst [vmem:[%s1423_s1 + $0x60] sm:$0xff] %v364_v15 }
  0x9c   :  { %v382_v16 = vpop.permute.xlu1 %381  ;;  %v376_v17 = vpop.permute.xlu0 %375 }
  0x9d   :  { %857 = vst [vmem:[%s1423_s1 + $0x78] sm:$0xff] %v382_v16  ;;  %855 = vst [vmem:[%s1423_s1 + $0x70] sm:$0xff] %v376_v17 }
  0xa0   :  { %v394_v18 = vpop.permute.xlu1 %393  ;;  %v388_v19 = vpop.permute.xlu0 %387 }
  0xa1   :  { %861 = vst [vmem:[%s1423_s1 + $0x88] sm:$0xff] %v394_v18  ;;  %859 = vst [vmem:[%s1423_s1 + $0x80] sm:$0xff] %v388_v19 }
  0xa4   :  { %v406_v20 = vpop.permute.xlu1 %405  ;;  %v400_v21 = vpop.permute.xlu0 %399 }
  0xa5   :  { %865 = vst [vmem:[%s1423_s1 + $0x98] sm:$0xff] %v406_v20  ;;  %863 = vst [vmem:[%s1423_s1 + $0x90] sm:$0xff] %v400_v21 }
  0xa8   :  { %v418_v22 = vpop.permute.xlu1 %417  ;;  %v412_v23 = vpop.permute.xlu0 %411 }
  0xa9   :  { %869 = vst [vmem:[%s1423_s1 + $0xa8] sm:$0xff] %v418_v22  ;;  %867 = vst [vmem:[%s1423_s1 + $0xa0] sm:$0xff] %v412_v23 }
  0xac   :  { %v430_v24 = vpop.permute.xlu1 %429  ;;  %v424_v25 = vpop.permute.xlu0 %423 }
  0xad   :  { %873 = vst [vmem:[%s1423_s1 + $0xb8] sm:$0xff] %v430_v24  ;;  %871 = vst [vmem:[%s1423_s1 + $0xb0] sm:$0xff] %v424_v25 }
  0xb0   :  { %v442_v26 = vpop.permute.xlu1 %441  ;;  %v436_v27 = vpop.permute.xlu0 %435 }
  0xb1   :  { %877 = vst [vmem:[%s1423_s1 + $0xc8] sm:$0xff] %v442_v26  ;;  %875 = vst [vmem:[%s1423_s1 + $0xc0] sm:$0xff] %v436_v27 }
  0xb4   :  { %v454_v28 = vpop.permute.xlu1 %453  ;;  %v448_v29 = vpop.permute.xlu0 %447 }
  0xb5   :  { %881 = vst [vmem:[%s1423_s1 + $0xd8] sm:$0xff] %v454_v28  ;;  %879 = vst [vmem:[%s1423_s1 + $0xd0] sm:$0xff] %v448_v29 }
  0xb8   :  { %v466_v30 = vpop.permute.xlu1 %465  ;;  %v460_v31 = vpop.permute.xlu0 %459 }
  0xb9   :  { %885 = vst [vmem:[%s1423_s1 + $0xe8] sm:$0xff] %v466_v30  ;;  %883 = vst [vmem:[%s1423_s1 + $0xe0] sm:$0xff] %v460_v31 }
  0xbc   :  { %v478_v32 = vpop.permute.xlu1 %477  ;;  %v472_v33 = vpop.permute.xlu0 %471 }
  0xbd   :  { %889 = vst [vmem:[%s1423_s1 + $0xf8] sm:$0xff] %v478_v32  ;;  %887 = vst [vmem:[%s1423_s1 + $0xf0] sm:$0xff] %v472_v33 }
  0xc0   :  { %v490_v34 = vpop.permute.xlu1 %489  ;;  %v484_v35 = vpop.permute.xlu0 %483 }
  0xc1   :  { %893 = vst [vmem:[%s1423_s1 + $0x108] sm:$0xff] %v490_v34  ;;  %891 = vst [vmem:[%s1423_s1 + $0x100] sm:$0xff] %v484_v35 }
  0xc4   :  { %v502_v36 = vpop.permute.xlu1 %501  ;;  %v496_v37 = vpop.permute.xlu0 %495 }
  0xc5   :  { %897 = vst [vmem:[%s1423_s1 + $0x118] sm:$0xff] %v502_v36  ;;  %895 = vst [vmem:[%s1423_s1 + $0x110] sm:$0xff] %v496_v37 }
  0xc8   :  { %v514_v38 = vpop.permute.xlu1 %513  ;;  %v508_v39 = vpop.permute.xlu0 %507 }
  0xc9   :  { %901 = vst [vmem:[%s1423_s1 + $0x128] sm:$0xff] %v514_v38  ;;  %899 = vst [vmem:[%s1423_s1 + $0x120] sm:$0xff] %v508_v39 }
  0xcc   :  { %v526_v40 = vpop.permute.xlu1 %525  ;;  %v520_v41 = vpop.permute.xlu0 %519 }
  0xcd   :  { %905 = vst [vmem:[%s1423_s1 + $0x138] sm:$0xff] %v526_v40  ;;  %903 = vst [vmem:[%s1423_s1 + $0x130] sm:$0xff] %v520_v41 }
  0xd0   :  { %v538_v42 = vpop.permute.xlu1 %537  ;;  %v532_v43 = vpop.permute.xlu0 %531 }
  0xd1   :  { %909 = vst [vmem:[%s1423_s1 + $0x148] sm:$0xff] %v538_v42  ;;  %907 = vst [vmem:[%s1423_s1 + $0x140] sm:$0xff] %v532_v43 }
  0xd4   :  { %v550_v44 = vpop.permute.xlu1 %549  ;;  %v544_v45 = vpop.permute.xlu0 %543 }
  0xd5   :  { %913 = vst [vmem:[%s1423_s1 + $0x158] sm:$0xff] %v550_v44  ;;  %911 = vst [vmem:[%s1423_s1 + $0x150] sm:$0xff] %v544_v45 }
  0xd8   :  { %v562_v46 = vpop.permute.xlu1 %561  ;;  %v556_v47 = vpop.permute.xlu0 %555 }
  0xd9   :  { %917 = vst [vmem:[%s1423_s1 + $0x168] sm:$0xff] %v562_v46  ;;  %915 = vst [vmem:[%s1423_s1 + $0x160] sm:$0xff] %v556_v47 }
  0xdc   :  { %v574_v48 = vpop.permute.xlu1 %573  ;;  %v568_v49 = vpop.permute.xlu0 %567 }
  0xdd   :  { %921 = vst [vmem:[%s1423_s1 + $0x178] sm:$0xff] %v574_v48  ;;  %919 = vst [vmem:[%s1423_s1 + $0x170] sm:$0xff] %v568_v49 }
  0xe0   :  { %v586_v50 = vpop.permute.xlu1 %585  ;;  %v580_v51 = vpop.permute.xlu0 %579 }
  0xe1   :  { %925 = vst [vmem:[%s1423_s1 + $0x188] sm:$0xff] %v586_v50  ;;  %923 = vst [vmem:[%s1423_s1 + $0x180] sm:$0xff] %v580_v51 }
  0xe4   :  { %v598_v52 = vpop.permute.xlu1 %597  ;;  %v592_v53 = vpop.permute.xlu0 %591 }
  0xe5   :  { %929 = vst [vmem:[%s1423_s1 + $0x198] sm:$0xff] %v598_v52  ;;  %927 = vst [vmem:[%s1423_s1 + $0x190] sm:$0xff] %v592_v53 }
  0xe8   :  { %v610_v54 = vpop.permute.xlu1 %609  ;;  %v604_v55 = vpop.permute.xlu0 %603 }
  0xe9   :  { %933 = vst [vmem:[%s1423_s1 + $0x1a8] sm:$0xff] %v610_v54  ;;  %931 = vst [vmem:[%s1423_s1 + $0x1a0] sm:$0xff] %v604_v55 }
  0xec   :  { %v622_v56 = vpop.permute.xlu1 %621  ;;  %v616_v57 = vpop.permute.xlu0 %615 }
  0xed   :  { %937 = vst [vmem:[%s1423_s1 + $0x1b8] sm:$0xff] %v622_v56  ;;  %935 = vst [vmem:[%s1423_s1 + $0x1b0] sm:$0xff] %v616_v57 }
  0xf0   :  { %v634_v58 = vpop.permute.xlu1 %633  ;;  %v628_v59 = vpop.permute.xlu0 %627 }
  0xf1   :  { %941 = vst [vmem:[%s1423_s1 + $0x1c8] sm:$0xff] %v634_v58  ;;  %939 = vst [vmem:[%s1423_s1 + $0x1c0] sm:$0xff] %v628_v59 }
  0xf4   :  { %v646_v60 = vpop.permute.xlu1 %645  ;;  %v640_v61 = vpop.permute.xlu0 %639 }
  0xf5   :  { %945 = vst [vmem:[%s1423_s1 + $0x1d8] sm:$0xff] %v646_v60  ;;  %943 = vst [vmem:[%s1423_s1 + $0x1d0] sm:$0xff] %v640_v61 }
  0xf8   :  { %v658_v62 = vpop.permute.xlu1 %657  ;;  %v652_v63 = vpop.permute.xlu0 %651 }
  0xf9   :  { %949 = vst [vmem:[%s1423_s1 + $0x1e8] sm:$0xff] %v658_v62  ;;  %947 = vst [vmem:[%s1423_s1 + $0x1e0] sm:$0xff] %v652_v63 }
  0xfc   :  { %v670_v0 = vpop.permute.xlu1 %669  ;;  %v664_v1 = vpop.permute.xlu0 %663 }
  0xfd   :  { %953 = vst [vmem:[%s1423_s1 + $0x1f8] sm:$0xff] %v670_v0  ;;  %951 = vst [vmem:[%s1423_s1 + $0x1f0] sm:$0xff] %v664_v1 }

// kernel: stylegan_refiner_forward.15
= control target key start
LH: loop header
LB: loop body
LE: loop exit
PB: predicated region body
PF: predicated region fallthrough
CT: control target
= control target key end

     0   :  { %s1087_s12 = smov 0   ;;  %s1089_s13 = smov 0   ;;  %s1363_s0 = inlined_call_operand.vmem [shape: f32[512,27], index: 0, kind: input, shape index: {}]   ;;  %s1364_s1 = inlined_call_operand.vmem [shape: bf16[27,64], index: 1, kind: input, shape index: {}]   ;;  %s1365_s2 = inlined_call_operand.vmem [shape: f32[1,64], index: 2, kind: input, shape index: {}]   ;;  %s1366_s3 = inlined_call_operand.vmem [shape: f32[512,64], index: 3, kind: output, shape index: {}]  }
   0x1   :  { %s1091_s14 = smov 0  }
   0x2 LB: > { %s32_s15 = sadd.s32 1, %s1059_s13  ;;  %p929_p0 = scmp.ge.s32.totalorder %s1063_s14, 1  ;;  %s1063_s14 = sphi %s1091_s14, %s13_s14   ;;  %s1059_s13 = sphi %s1089_s13, %s1369_s13   ;;  %s1055_s12 = sphi %s1087_s12, %s1368_s12  }
   0x3   : > { %p34_p1 = scmp.ge.s32.totalorder %s32_s15, 2  ;;  %p188_p2 = scmp.lt.s32.totalorder %s1063_s14, 3 }
   0x5   : > { %s1371_s15 = smov (%p34_p1, %s32_s15), 0  ;;  %p189_p3 = pnand %p929_p0, %p188_p2 }
   0x6   : > { %s930_s18 = sshll.u32 (!%p189_p3), %s1055_s12, 5 }
   0x7   : > { %192 = sbr.rel (%p189_p3) target bundleno = 264 (0x108), region = 32  ;;  %p1113_p4 = scmp.lt.s32.totalorder (!%p189_p3), %s930_s18, 63 }
   0xc   : > { %v1039_v0 = vld [vmem:[%s1364_s1 + $0x8] sm:$0x3f]   ;;  %vm441_vm0 = vcmask 1044480   ;;  %vm442_vm1 = vcmask 1045504   ;;  %v1065_v1 = vmov 65535   ;;  %vm264_vm2 = vcmask 523264  }
   0xd   : > { %v443_v2 = vsel %vm441_vm0, 4294967295, %v1065_v1  ;;  %v1040_v5 = vld [vmem:[%s1364_s1] sm:$0xff]   ;;  %v1066_v6 = vmov 0.0   ;;  %s1373_s18 = smov (!%p1113_p4, %s930_s18), 63  ;;  %vm392_vm3 = vcmask 220160  }
   0xe   : > { %v444_v3 = vsel %vm442_vm1, %v443_v2, 0  ;;  %267 = vst.msk [vmem:[#allocation2 + $0x10] sm:$0xff] %vm264_vm2, %v1066_v6  ;;  %265 = vst.msk [vmem:[#allocation2] sm:$0xff] %vm264_vm2, %v1066_v6  ;;  %s931_s22 = sshll.u32 %s1373_s18, 3 }
   0xf   : > { %v446_v4 = vand.u32 %v1039_v0, %v444_v3  ;;  %266 = vst.msk [vmem:[#allocation2 + $0x8] sm:$0xff] %vm264_vm2, %v1066_v6  ;;  %268 = vst.msk [vmem:[#allocation2 + $0x18] sm:$0xff] %vm264_vm2, %v1066_v6  ;;  %s1164_s25 = scalar_lea.vmem %s1363_s0, %s931_s22  ;;  %s1236_s30 = scalar_lea.vmem %s1366_s3, %s931_s22 }
  0x10   : > { %269 = vst.msk [vmem:[#allocation2 + $0x20] sm:$0xff] %vm264_vm2, %v1066_v6  ;;  %270 = vst.msk [vmem:[#allocation2 + $0x28] sm:$0xff] %vm264_vm2, %v1066_v6  ;;  %v329_v7 = vld [vmem:[%s1164_s25] sm:$0xff]  ;;  %v330_v8 = vld [vmem:[%s1164_s25 + $0x8] sm:$0xff] }
  0x11   : > { %271 = vst.msk [vmem:[#allocation2 + $0x30] sm:$0xff] %vm264_vm2, %v1066_v6  ;;  %272 = vst.msk [vmem:[#allocation2 + $0x38] sm:$0xff] %vm264_vm2, %v1066_v6  ;;  %973 = vmatprep.subr.bf16.mxu0 %v446_v4  ;;  %1009 = vmatprep.subr.bf16.mxu1 %v446_v4  ;;  %v345_v9 = vld [vmem:[%s1164_s25 + $0x80] sm:$0xff]  ;;  %v361_v10 = vpack.c.bf16 %v330_v8, %v329_v7  ;;  %v346_v11 = vld [vmem:[%s1164_s25 + $0x88] sm:$0xff] }
  0x12   : > { %273 = vst.msk [vmem:[#allocation2 + $0x40] sm:$0xff] %vm264_vm2, %v1066_v6  ;;  %274 = vst.msk [vmem:[#allocation2 + $0x48] sm:$0xff] %vm264_vm2, %v1066_v6  ;;  %974 = vmatpush3.bf16.msra.mxu0 %v446_v4  ;;  %1011 = vmatpush3.bf16.msra.mxu1 %v446_v4  ;;  %v331_v12 = vld [vmem:[%s1164_s25 + $0x10] sm:$0xff]  ;;  %v332_v13 = vld [vmem:[%s1164_s25 + $0x18] sm:$0xff]  ;;  %v369_v14 = vpack.c.bf16 %v346_v11, %v345_v9 }
  0x13   : > { %275 = vst.msk [vmem:[#allocation2 + $0x50] sm:$0xff] %vm264_vm2, %v1066_v6  ;;  %276 = vst.msk [vmem:[#allocation2 + $0x58] sm:$0xff] %vm264_vm2, %v1066_v6  ;;  %975 = vmatprep.subr.bf16.mxu0 %v1040_v5  ;;  %1010 = vmatprep.subr.bf16.mxu1 %v1040_v5  ;;  %v362_v15 = vpack.c.bf16 %v332_v13, %v331_v12  ;;  %v347_v16 = vld [vmem:[%s1164_s25 + $0x90] sm:$0xff]  ;;  %v348_v17 = vld [vmem:[%s1164_s25 + $0x98] sm:$0xff] }
  0x14   : > { %277 = vst.msk [vmem:[#allocation2 + $0x60] sm:$0xff] %vm264_vm2, %v1066_v6  ;;  %278 = vst.msk [vmem:[#allocation2 + $0x68] sm:$0xff] %vm264_vm2, %v1066_v6  ;;  %v333_v18 = vld [vmem:[%s1164_s25 + $0x20] sm:$0xff]  ;;  %977 = vmatprep.mubr.msk.bf16.mxu0 %vm392_vm3, %v361_v10  ;;  %v370_v19 = vpack.c.bf16 %v348_v17, %v347_v16  ;;  %v334_v20 = vld [vmem:[%s1164_s25 + $0x28] sm:$0xff]  ;;  %993 = vmatprep.mubr.msk.bf16.mxu1 %vm392_vm3, %v369_v14 }
  0x15   : > { %279 = vst.msk [vmem:[#allocation2 + $0x70] sm:$0xff] %vm264_vm2, %v1066_v6  ;;  %280 = vst.msk [vmem:[#allocation2 + $0x78] sm:$0xff] %vm264_vm2, %v1066_v6  ;;  %v349_v21 = vld [vmem:[%s1164_s25 + $0xa0] sm:$0xff]  ;;  %v350_v22 = vld [vmem:[%s1164_s25 + $0xa8] sm:$0xff]  ;;  %v363_v23 = vpack.c.bf16 %v334_v20, %v333_v18 }
  0x16   : > { %281 = vst.msk [vmem:[#allocation2 + $0x80] sm:$0xff] %vm264_vm2, %v1066_v6  ;;  %282 = vst.msk [vmem:[#allocation2 + $0x88] sm:$0xff] %vm264_vm2, %v1066_v6  ;;  %976 = vmatpush3.bf16.msra.mxu0 %v1040_v5  ;;  %1012 = vmatpush3.bf16.msra.mxu1 %v1040_v5  ;;  %v371_v24 = vpack.c.bf16 %v350_v22, %v349_v21  ;;  %v335_v25 = vld [vmem:[%s1164_s25 + $0x30] sm:$0xff]  ;;  %v336_v26 = vld [vmem:[%s1164_s25 + $0x38] sm:$0xff] }
  0x17   : > { %283 = vst.msk [vmem:[#allocation2 + $0x90] sm:$0xff] %vm264_vm2, %v1066_v6  ;;  %284 = vst.msk [vmem:[#allocation2 + $0x98] sm:$0xff] %vm264_vm2, %v1066_v6  ;;  %v351_v27 = vld [vmem:[%s1164_s25 + $0xb0] sm:$0xff]  ;;  %v352_v28 = vld [vmem:[%s1164_s25 + $0xb8] sm:$0xff]  ;;  %v364_v33 = vpack.c.bf16 %v336_v26, %v335_v25 }
  0x18   : > { %285 = vst.msk [vmem:[#allocation2 + $0xa0] sm:$0xff] %vm264_vm2, %v1066_v6  ;;  %286 = vst.msk [vmem:[#allocation2 + $0xa8] sm:$0xff] %vm264_vm2, %v1066_v6  ;;  %v337_v29 = vld [vmem:[%s1164_s25 + $0x40] sm:$0xff]  ;;  %v338_v30 = vld [vmem:[%s1164_s25 + $0x48] sm:$0xff]  ;;  %v372_v34 = vpack.c.bf16 %v352_v28, %v351_v27 }
  0x19   : > { %287 = vst.msk [vmem:[#allocation2 + $0xb0] sm:$0xff] %vm264_vm2, %v1066_v6  ;;  %288 = vst.msk [vmem:[#allocation2 + $0xb8] sm:$0xff] %vm264_vm2, %v1066_v6  ;;  %978 = vmatmul.mubr.msk.bf16.vlgmr.msra.gmra.mxu0 %vm392_vm3, %v362_v15  ;;  %994 = vmatmul.mubr.msk.bf16.vlgmr.msra.gmra.mxu1 %vm392_vm3, %v370_v19  ;;  %v353_v31 = vld [vmem:[%s1164_s25 + $0xc0] sm:$0xff]  ;;  %v354_v32 = vld [vmem:[%s1164_s25 + $0xc8] sm:$0xff]  ;;  %v365_v35 = vpack.c.bf16 %v338_v30, %v337_v29 }
  0x1a   : > { %289 = vst.msk [vmem:[#allocation2 + $0xc0] sm:$0xff] %vm264_vm2, %v1066_v6  ;;  %290 = vst.msk [vmem:[#allocation2 + $0xc8] sm:$0xff] %vm264_vm2, %v1066_v6  ;;  %981 = vmatprep.mubr.msk.bf16.mxu0 %vm392_vm3, %v363_v23  ;;  %997 = vmatprep.mubr.msk.bf16.mxu1 %vm392_vm3, %v371_v24  ;;  %v373_v36 = vpack.c.bf16 %v354_v32, %v353_v31  ;;  %v339_v37 = vld [vmem:[%s1164_s25 + $0x50] sm:$0xff]  ;;  %v340_v38 = vld [vmem:[%s1164_s25 + $0x58] sm:$0xff] }
  0x1b   : > { %291 = vst.msk [vmem:[#allocation2 + $0xd0] sm:$0xff] %vm264_vm2, %v1066_v6  ;;  %292 = vst.msk [vmem:[#allocation2 + $0xd8] sm:$0xff] %vm264_vm2, %v1066_v6  ;;  %v355_v39 = vld [vmem:[%s1164_s25 + $0xd0] sm:$0xff]  ;;  %v356_v40 = vld [vmem:[%s1164_s25 + $0xd8] sm:$0xff]  ;;  %v366_v45 = vpack.c.bf16 %v340_v38, %v339_v37 }
  0x1c   : > { %293 = vst.msk [vmem:[#allocation2 + $0xe0] sm:$0xff] %vm264_vm2, %v1066_v6  ;;  %294 = vst.msk [vmem:[#allocation2 + $0xe8] sm:$0xff] %vm264_vm2, %v1066_v6  ;;  %v341_v41 = vld [vmem:[%s1164_s25 + $0x60] sm:$0xff]  ;;  %v342_v42 = vld [vmem:[%s1164_s25 + $0x68] sm:$0xff]  ;;  %v374_v46 = vpack.c.bf16 %v356_v40, %v355_v39 }
  0x1d   : > { %295 = vst.msk [vmem:[#allocation2 + $0xf0] sm:$0xff] %vm264_vm2, %v1066_v6  ;;  %296 = vst.msk [vmem:[#allocation2 + $0xf8] sm:$0xff] %vm264_vm2, %v1066_v6  ;;  %v357_v43 = vld [vmem:[%s1164_s25 + $0xe0] sm:$0xff]  ;;  %v358_v44 = vld [vmem:[%s1164_s25 + $0xe8] sm:$0xff]  ;;  %v367_v47 = vpack.c.bf16 %v342_v42, %v341_v41 }
  0x1e   : > { %v375_v48 = vpack.c.bf16 %v358_v44, %v357_v43  ;;  %v343_v49 = vld [vmem:[%s1164_s25 + $0x70] sm:$0xff]  ;;  %v344_v50 = vld [vmem:[%s1164_s25 + $0x78] sm:$0xff]  ;;  %v297_v59 = vld [vmem:[#allocation2] sm:$0xff] }
  0x1f   : > { %v359_v51 = vld [vmem:[%s1164_s25 + $0xf0] sm:$0xff]  ;;  %v360_v52 = vld [vmem:[%s1164_s25 + $0xf8] sm:$0xff]  ;;  %v368_v53 = vpack.c.bf16 %v344_v50, %v343_v49  ;;  %v313_v60 = vld [vmem:[#allocation2 + $0x80] sm:$0xff] }
  0x20   : > { %v376_v54 = vpack.c.bf16 %v360_v52, %v359_v51  ;;  %v299_v55 = vld [vmem:[#allocation2 + $0x10] sm:$0xff]  ;;  %v300_v1 = vld [vmem:[#allocation2 + $0x18] sm:$0xff]  ;;  %v298_v7 = vld [vmem:[#allocation2 + $0x8] sm:$0xff] }
  0x21   : > { %982 = vmatmul.mubr.msk.bf16.gmra.mxu0 %vm392_vm3, %v364_v33  ;;  %998 = vmatmul.mubr.msk.bf16.gmra.mxu1 %vm392_vm3, %v372_v34  ;;  %v315_v56 = vld [vmem:[#allocation2 + $0x90] sm:$0xff]  ;;  %v316_v2 = vld [vmem:[#allocation2 + $0x98] sm:$0xff]  ;;  %v314_v8 = vld [vmem:[#allocation2 + $0x88] sm:$0xff] }
  0x22   : > { %985 = vmatprep.mubr.msk.bf16.mxu0 %vm392_vm3, %v365_v35  ;;  %1001 = vmatprep.mubr.msk.bf16.mxu1 %vm392_vm3, %v373_v36  ;;  %v303_v13 = vld [vmem:[#allocation2 + $0x30] sm:$0xff]  ;;  %v1223_v17 = vld [vmem:[%s1365_s2] ss:$0 sm:$0xff]  ;;  %v304_v32 = vld [vmem:[#allocation2 + $0x38] sm:$0xff] }
  0x23   : > { %v319_v14 = vld [vmem:[#allocation2 + $0xb0] sm:$0xff]  ;;  %v301_v20 = vld [vmem:[#allocation2 + $0x20] sm:$0xff]  ;;  %v320_v33 = vld [vmem:[#allocation2 + $0xb8] sm:$0xff] }
  0x24   : > { %v317_v21 = vld [vmem:[#allocation2 + $0xa0] sm:$0xff]  ;;  %v302_v42 = vld [vmem:[#allocation2 + $0x28] sm:$0xff] }
  0x25   : > { %v318_v43 = vld [vmem:[#allocation2 + $0xa8] sm:$0xff] }
  0x29   : > { %986 = vmatmul.mubr.msk.bf16.gmra.mxu0 %vm392_vm3, %v366_v45  ;;  %1002 = vmatmul.mubr.msk.bf16.gmra.mxu1 %vm392_vm3, %v374_v46 }
  0x2a   : > { %989 = vmatprep.mubr.msk.bf16.mxu0 %vm392_vm3, %v367_v47  ;;  %1005 = vmatprep.mubr.msk.bf16.mxu1 %vm392_vm3, %v375_v48 }
  0x31   : > { %990 = vmatmul.mubr.msk.bf16.gmra.mxu0 %vm392_vm3, %v368_v53  ;;  %1006 = vmatmul.mubr.msk.bf16.gmra.mxu1 %vm392_vm3, %v376_v54  ;;  %v307_v54 = vld [vmem:[#allocation2 + $0x50] sm:$0xff] }
  0xd9   : > { %v979_v57 = vpop.f32.mrf.mxu0  ;;  %v995_v58 = vpop.f32.mrf.mxu1 }
  0xda   : > { %v611_v61 = vadd.f32 %v979_v57, %v299_v55  ;;  %v627_v62 = vadd.f32 %v995_v58, %v315_v56  ;;  %v323_v55 = vld [vmem:[#allocation2 + $0xd0] sm:$0xff] }
  0xdb   : > { %v482_v63 = vpop.f32.mrf.mxu0  ;;  %v546_v0 = vpop.f32.mrf.mxu1 }
  0xdc   : > { %644 = vst.msk [vmem:[#allocation2 + $0x10] sm:$0xff] %vm264_vm2, %v611_v61  ;;  %660 = vst.msk [vmem:[#allocation2 + $0x90] sm:$0xff] %vm264_vm2, %v627_v62  ;;  %v609_v3 = vadd.f32 %v482_v63, %v297_v59  ;;  %v625_v4 = vadd.f32 %v546_v0, %v313_v60 }
  0xdd   : > { %v980_v5 = vpop.f32.mrf.mxu0  ;;  %v996_v6 = vpop.f32.mrf.mxu1 }
  0xde   : > { %642 = vst.msk [vmem:[#allocation2] sm:$0xff] %vm264_vm2, %v609_v3  ;;  %658 = vst.msk [vmem:[#allocation2 + $0x80] sm:$0xff] %vm264_vm2, %v625_v4  ;;  %v612_v9 = vadd.f32 %v980_v5, %v300_v1  ;;  %v628_v10 = vadd.f32 %v996_v6, %v316_v2  ;;  %v305_v2 = vld [vmem:[#allocation2 + $0x40] sm:$0xff] }
  0xdf   : > { %v485_v11 = vpop.f32.mrf.mxu0  ;;  %v549_v12 = vpop.f32.mrf.mxu1  ;;  %v321_v3 = vld [vmem:[#allocation2 + $0xc0] sm:$0xff] }
  0xe0   : > { %645 = vst.msk [vmem:[#allocation2 + $0x18] sm:$0xff] %vm264_vm2, %v612_v9  ;;  %661 = vst.msk [vmem:[#allocation2 + $0x98] sm:$0xff] %vm264_vm2, %v628_v10  ;;  %v610_v15 = vadd.f32 %v485_v11, %v298_v7  ;;  %v626_v16 = vadd.f32 %v549_v12, %v314_v8 }
  0xe1   : > { %v983_v18 = vpop.f32.mrf.mxu0  ;;  %v999_v19 = vpop.f32.mrf.mxu1 }
  0xe2   : > { %643 = vst.msk [vmem:[#allocation2 + $0x8] sm:$0xff] %vm264_vm2, %v610_v15  ;;  %659 = vst.msk [vmem:[#allocation2 + $0x88] sm:$0xff] %vm264_vm2, %v626_v16  ;;  %v615_v22 = vadd.f32 %v983_v18, %v303_v13  ;;  %v631_v23 = vadd.f32 %v999_v19, %v319_v14  ;;  %v308_v14 = vld [vmem:[#allocation2 + $0x58] sm:$0xff]  ;;  %v306_v16 = vld [vmem:[#allocation2 + $0x48] sm:$0xff] }
  0xe3   : > { %v679_v24 = vld [vmem:[#allocation2 + $0x10] sm:$0xff]  ;;  %v498_v26 = vpop.f32.mrf.mxu0  ;;  %v562_v27 = vpop.f32.mrf.mxu1  ;;  %v324_v15 = vld [vmem:[#allocation2 + $0xd8] sm:$0xff] }
  0xe4   : > { %v695_v25 = vld [vmem:[#allocation2 + $0x90] sm:$0xff]  ;;  %v718_v28 = vadd.f32 %v1223_v17, %v679_v24  ;;  %648 = vst.msk [vmem:[#allocation2 + $0x30] sm:$0xff] %vm264_vm2, %v615_v22  ;;  %664 = vst.msk [vmem:[#allocation2 + $0xb0] sm:$0xff] %vm264_vm2, %v631_v23  ;;  %v613_v30 = vadd.f32 %v498_v26, %v301_v20  ;;  %v629_v31 = vadd.f32 %v562_v27, %v317_v21  ;;  %v322_v24 = vld [vmem:[#allocation2 + $0xc8] sm:$0xff] }
  0xe5   : > { %v734_v29 = vadd.f32 %v1223_v17, %v695_v25  ;;  %v677_v34 = vld [vmem:[#allocation2] sm:$0xff]  ;;  %v984_v36 = vpop.f32.mrf.mxu0  ;;  %v1000_v37 = vpop.f32.mrf.mxu1 }
  0xe6   : > { %v693_v35 = vld [vmem:[#allocation2 + $0x80] sm:$0xff]  ;;  %v750_v38 = vmax.f32 %v718_v28, 0.0  ;;  %v716_v40 = vadd.f32 %v1223_v17, %v677_v34  ;;  %646 = vst.msk [vmem:[#allocation2 + $0x20] sm:$0xff] %vm264_vm2, %v613_v30  ;;  %662 = vst.msk [vmem:[#allocation2 + $0xa0] sm:$0xff] %vm264_vm2, %v629_v31  ;;  %v616_v46 = vadd.f32 %v984_v36, %v304_v32  ;;  %v632_v47 = vadd.f32 %v1000_v37, %v320_v33  ;;  %v311_v33 = vld [vmem:[#allocation2 + $0x70] sm:$0xff] }
  0xe7   : > { %v766_v39 = vmax.f32 %v734_v29, 0.0  ;;  %v732_v41 = vadd.f32 %v1223_v17, %v693_v35  ;;  %v680_v44 = vld [vmem:[#allocation2 + $0x18] sm:$0xff]  ;;  %v501_v48 = vpop.f32.mrf.mxu0  ;;  %v565_v49 = vpop.f32.mrf.mxu1  ;;  %v327_v34 = vld [vmem:[#allocation2 + $0xf0] sm:$0xff] }
  0xe8   : > { %v696_v45 = vld [vmem:[#allocation2 + $0x98] sm:$0xff]  ;;  %782 = vst.msk [vmem:[%s1236_s30 + $0x10] sm:$0xff] %vm264_vm2, %v750_v38  ;;  %v748_v50 = vmax.f32 %v716_v40, 0.0  ;;  %v719_v52 = vadd.f32 %v1223_v17, %v680_v44  ;;  %649 = vst.msk [vmem:[#allocation2 + $0x38] sm:$0xff] %vm264_vm2, %v616_v46  ;;  %v614_v58 = vadd.f32 %v501_v48, %v302_v42  ;;  %v630_v59 = vadd.f32 %v565_v49, %v318_v43  ;;  %v325_v46 = vld [vmem:[#allocation2 + $0xe0] sm:$0xff] }
  0xe9   : > { %798 = vst.msk [vmem:[%s1236_s30 + $0x90] sm:$0xff] %vm264_vm2, %v766_v39  ;;  %v764_v51 = vmax.f32 %v732_v41, 0.0  ;;  %v735_v53 = vadd.f32 %v1223_v17, %v696_v45  ;;  %v678_v56 = vld [vmem:[#allocation2 + $0x8] sm:$0xff]  ;;  %665 = vst.msk [vmem:[#allocation2 + $0xb8] sm:$0xff] %vm264_vm2, %v632_v47  ;;  %v987_v60 = vpop.f32.mrf.mxu0  ;;  %v1003_v61 = vpop.f32.mrf.mxu1  ;;  %v309_v45 = vld [vmem:[#allocation2 + $0x60] sm:$0xff] }
  0xea   : > { %v694_v57 = vld [vmem:[#allocation2 + $0x88] sm:$0xff]  ;;  %780 = vst.msk [vmem:[%s1236_s30] sm:$0xff] %vm264_vm2, %v748_v50  ;;  %v751_v62 = vmax.f32 %v719_v52, 0.0  ;;  %v717_v0 = vadd.f32 %v1223_v17, %v678_v56  ;;  %647 = vst.msk [vmem:[#allocation2 + $0x28] sm:$0xff] %vm264_vm2, %v614_v58  ;;  %v619_v6 = vadd.f32 %v987_v60, %v307_v54  ;;  %v635_v7 = vadd.f32 %v1003_v61, %v323_v55  ;;  %v328_v58 = vld [vmem:[#allocation2 + $0xf8] sm:$0xff] }
  0xeb   : > { %796 = vst.msk [vmem:[%s1236_s30 + $0x80] sm:$0xff] %vm264_vm2, %v764_v51  ;;  %v767_v63 = vmax.f32 %v735_v53, 0.0  ;;  %v733_v1 = vadd.f32 %v1223_v17, %v694_v57  ;;  %v683_v4 = vld [vmem:[#allocation2 + $0x30] sm:$0xff]  ;;  %663 = vst.msk [vmem:[#allocation2 + $0xa8] sm:$0xff] %vm264_vm2, %v630_v59  ;;  %v514_v8 = vpop.f32.mrf.mxu0  ;;  %v578_v9 = vpop.f32.mrf.mxu1  ;;  %v312_v57 = vld [vmem:[#allocation2 + $0x78] sm:$0xff] }
  0xec   : > { %v699_v5 = vld [vmem:[#allocation2 + $0xb0] sm:$0xff]  ;;  %783 = vst.msk [vmem:[%s1236_s30 + $0x18] sm:$0xff] %vm264_vm2, %v751_v62  ;;  %v749_v10 = vmax.f32 %v717_v0, 0.0  ;;  %v722_v12 = vadd.f32 %v1223_v17, %v683_v4  ;;  %652 = vst.msk [vmem:[#allocation2 + $0x50] sm:$0xff] %vm264_vm2, %v619_v6  ;;  %v617_v20 = vadd.f32 %v514_v8, %v305_v2  ;;  %v633_v21 = vadd.f32 %v578_v9, %v321_v3  ;;  %v326_v6 = vld [vmem:[#allocation2 + $0xe8] sm:$0xff] }
  0xed   : > { %799 = vst.msk [vmem:[%s1236_s30 + $0x98] sm:$0xff] %vm264_vm2, %v767_v63  ;;  %v765_v11 = vmax.f32 %v733_v1, 0.0  ;;  %v738_v13 = vadd.f32 %v1223_v17, %v699_v5  ;;  %v681_v18 = vld [vmem:[#allocation2 + $0x20] sm:$0xff]  ;;  %668 = vst.msk [vmem:[#allocation2 + $0xd0] sm:$0xff] %vm264_vm2, %v635_v7  ;;  %v988_v22 = vpop.f32.mrf.mxu0  ;;  %v1004_v23 = vpop.f32.mrf.mxu1  ;;  %v310_v5 = vld [vmem:[#allocation2 + $0x68] sm:$0xff] }
  0xee   : > { %v697_v19 = vld [vmem:[#allocation2 + $0xa0] sm:$0xff]  ;;  %781 = vst.msk [vmem:[%s1236_s30 + $0x8] sm:$0xff] %vm264_vm2, %v749_v10  ;;  %v754_v25 = vmax.f32 %v722_v12, 0.0  ;;  %v720_v27 = vadd.f32 %v1223_v17, %v681_v18  ;;  %650 = vst.msk [vmem:[#allocation2 + $0x40] sm:$0xff] %vm264_vm2, %v617_v20  ;;  %v620_v29 = vadd.f32 %v988_v22, %v308_v14  ;;  %v636_v30 = vadd.f32 %v1004_v23, %v324_v15 }
  0xef   : > { %797 = vst.msk [vmem:[%s1236_s30 + $0x88] sm:$0xff] %vm264_vm2, %v765_v11  ;;  %v770_v26 = vmax.f32 %v738_v13, 0.0  ;;  %v736_v28 = vadd.f32 %v1223_v17, %v697_v19  ;;  %666 = vst.msk [vmem:[#allocation2 + $0xc0] sm:$0xff] %vm264_vm2, %v633_v21  ;;  %v517_v31 = vpop.f32.mrf.mxu0  ;;  %v581_v32 = vpop.f32.mrf.mxu1  ;;  %v684_v37 = vld [vmem:[#allocation2 + $0x38] sm:$0xff] }
  0xf0   : > { %786 = vst.msk [vmem:[%s1236_s30 + $0x30] sm:$0xff] %vm264_vm2, %v754_v25  ;;  %v752_v35 = vmax.f32 %v720_v27, 0.0  ;;  %v700_v38 = vld [vmem:[#allocation2 + $0xb8] sm:$0xff]  ;;  %v618_v39 = vadd.f32 %v517_v31, %v306_v16  ;;  %v634_v40 = vadd.f32 %v581_v32, %v322_v24  ;;  %v723_v41 = vadd.f32 %v1223_v17, %v684_v37  ;;  %653 = vst.msk [vmem:[#allocation2 + $0x58] sm:$0xff] %vm264_vm2, %v620_v29 }
  0xf1   : > { %802 = vst.msk [vmem:[%s1236_s30 + $0xb0] sm:$0xff] %vm264_vm2, %v770_v26  ;;  %v768_v36 = vmax.f32 %v736_v28, 0.0  ;;  %v739_v42 = vadd.f32 %v1223_v17, %v700_v38  ;;  %669 = vst.msk [vmem:[#allocation2 + $0xd8] sm:$0xff] %vm264_vm2, %v636_v30  ;;  %v991_v43 = vpop.f32.mrf.mxu0  ;;  %v1007_v44 = vpop.f32.mrf.mxu1  ;;  %v682_v47 = vld [vmem:[#allocation2 + $0x28] sm:$0xff] }
  0xf2   : > { %784 = vst.msk [vmem:[%s1236_s30 + $0x20] sm:$0xff] %vm264_vm2, %v752_v35  ;;  %v698_v48 = vld [vmem:[#allocation2 + $0xa8] sm:$0xff]  ;;  %651 = vst.msk [vmem:[#allocation2 + $0x48] sm:$0xff] %vm264_vm2, %v618_v39  ;;  %v623_v49 = vadd.f32 %v991_v43, %v311_v33  ;;  %v639_v50 = vadd.f32 %v1007_v44, %v327_v34  ;;  %v755_v51 = vmax.f32 %v723_v41, 0.0  ;;  %v721_v53 = vadd.f32 %v1223_v17, %v682_v47 }
  0xf3   : > { %800 = vst.msk [vmem:[%s1236_s30 + $0xa0] sm:$0xff] %vm264_vm2, %v768_v36  ;;  %667 = vst.msk [vmem:[#allocation2 + $0xc8] sm:$0xff] %vm264_vm2, %v634_v40  ;;  %v771_v52 = vmax.f32 %v739_v42, 0.0  ;;  %v737_v54 = vadd.f32 %v1223_v17, %v698_v48  ;;  %v530_v55 = vpop.f32.mrf.mxu0  ;;  %v594_v56 = vpop.f32.mrf.mxu1  ;;  %v687_v59 = vld [vmem:[#allocation2 + $0x50] sm:$0xff] }
  0xf4   : > { %v703_v60 = vld [vmem:[#allocation2 + $0xd0] sm:$0xff]  ;;  %656 = vst.msk [vmem:[#allocation2 + $0x70] sm:$0xff] %vm264_vm2, %v623_v49  ;;  %672 = vst.msk [vmem:[#allocation2 + $0xf0] sm:$0xff] %vm264_vm2, %v639_v50  ;;  %v621_v61 = vadd.f32 %v530_v55, %v309_v45  ;;  %v637_v62 = vadd.f32 %v594_v56, %v325_v46  ;;  %v753_v63 = vmax.f32 %v721_v53, 0.0  ;;  %v726_v1 = vadd.f32 %v1223_v17, %v687_v59 }
  0xf5   : > { %787 = vst.msk [vmem:[%s1236_s30 + $0x38] sm:$0xff] %vm264_vm2, %v755_v51  ;;  %803 = vst.msk [vmem:[%s1236_s30 + $0xb8] sm:$0xff] %vm264_vm2, %v771_v52  ;;  %v769_v0 = vmax.f32 %v737_v54, 0.0  ;;  %v742_v2 = vadd.f32 %v1223_v17, %v703_v60  ;;  %v992_v3 = vpop.f32.mrf.mxu0  ;;  %v1008_v4 = vpop.f32.mrf.mxu1  ;;  %v685_v7 = vld [vmem:[#allocation2 + $0x40] sm:$0xff] }
  0xf6   : > { %v701_v8 = vld [vmem:[#allocation2 + $0xc0] sm:$0xff]  ;;  %654 = vst.msk [vmem:[#allocation2 + $0x60] sm:$0xff] %vm264_vm2, %v621_v61  ;;  %670 = vst.msk [vmem:[#allocation2 + $0xe0] sm:$0xff] %vm264_vm2, %v637_v62  ;;  %v624_v9 = vadd.f32 %v992_v3, %v312_v57  ;;  %v640_v10 = vadd.f32 %v1008_v4, %v328_v58  ;;  %v758_v11 = vmax.f32 %v726_v1, 0.0  ;;  %v724_v13 = vadd.f32 %v1223_v17, %v685_v7 }
  0xf7   : > { %785 = vst.msk [vmem:[%s1236_s30 + $0x28] sm:$0xff] %vm264_vm2, %v753_v63  ;;  %801 = vst.msk [vmem:[%s1236_s30 + $0xa8] sm:$0xff] %vm264_vm2, %v769_v0  ;;  %v774_v12 = vmax.f32 %v742_v2, 0.0  ;;  %v740_v14 = vadd.f32 %v1223_v17, %v701_v8  ;;  %v533_v15 = vpop.f32.mrf.mxu0  ;;  %v597_v16 = vpop.f32.mrf.mxu1  ;;  %v688_v18 = vld [vmem:[#allocation2 + $0x58] sm:$0xff] }
  0xf8   : > { %v704_v19 = vld [vmem:[#allocation2 + $0xd8] sm:$0xff]  ;;  %657 = vst.msk [vmem:[#allocation2 + $0x78] sm:$0xff] %vm264_vm2, %v624_v9  ;;  %673 = vst.msk [vmem:[#allocation2 + $0xf8] sm:$0xff] %vm264_vm2, %v640_v10  ;;  %v622_v20 = vadd.f32 %v533_v15, %v310_v5  ;;  %v638_v21 = vadd.f32 %v597_v16, %v326_v6  ;;  %v756_v22 = vmax.f32 %v724_v13, 0.0  ;;  %v727_v24 = vadd.f32 %v1223_v17, %v688_v18 }
  0xf9   : > { %790 = vst.msk [vmem:[%s1236_s30 + $0x50] sm:$0xff] %vm264_vm2, %v758_v11  ;;  %806 = vst.msk [vmem:[%s1236_s30 + $0xd0] sm:$0xff] %vm264_vm2, %v774_v12  ;;  %v772_v23 = vmax.f32 %v740_v14, 0.0  ;;  %v743_v25 = vadd.f32 %v1223_v17, %v704_v19  ;;  %v686_v26 = vld [vmem:[#allocation2 + $0x48] sm:$0xff] }
  0xfa   : > { %v702_v27 = vld [vmem:[#allocation2 + $0xc8] sm:$0xff]  ;;  %v725_v28 = vadd.f32 %v1223_v17, %v686_v26  ;;  %655 = vst.msk [vmem:[#allocation2 + $0x68] sm:$0xff] %vm264_vm2, %v622_v20  ;;  %671 = vst.msk [vmem:[#allocation2 + $0xe8] sm:$0xff] %vm264_vm2, %v638_v21  ;;  %v759_v30 = vmax.f32 %v727_v24, 0.0 }
  0xfb   : > { %v741_v29 = vadd.f32 %v1223_v17, %v702_v27  ;;  %788 = vst.msk [vmem:[%s1236_s30 + $0x40] sm:$0xff] %vm264_vm2, %v756_v22  ;;  %804 = vst.msk [vmem:[%s1236_s30 + $0xc0] sm:$0xff] %vm264_vm2, %v772_v23  ;;  %v775_v31 = vmax.f32 %v743_v25, 0.0  ;;  %v691_v32 = vld [vmem:[#allocation2 + $0x70] sm:$0xff] }
  0xfc   : > { %v707_v33 = vld [vmem:[#allocation2 + $0xf0] sm:$0xff]  ;;  %v757_v34 = vmax.f32 %v725_v28, 0.0  ;;  %v730_v36 = vadd.f32 %v1223_v17, %v691_v32  ;;  %791 = vst.msk [vmem:[%s1236_s30 + $0x58] sm:$0xff] %vm264_vm2, %v759_v30 }
  0xfd   : > { %v773_v35 = vmax.f32 %v741_v29, 0.0  ;;  %v746_v37 = vadd.f32 %v1223_v17, %v707_v33  ;;  %807 = vst.msk [vmem:[%s1236_s30 + $0xd8] sm:$0xff] %vm264_vm2, %v775_v31  ;;  %v689_v38 = vld [vmem:[#allocation2 + $0x60] sm:$0xff] }
  0xfe   : > { %v705_v39 = vld [vmem:[#allocation2 + $0xe0] sm:$0xff]  ;;  %789 = vst.msk [vmem:[%s1236_s30 + $0x48] sm:$0xff] %vm264_vm2, %v757_v34  ;;  %v762_v40 = vmax.f32 %v730_v36, 0.0  ;;  %v728_v42 = vadd.f32 %v1223_v17, %v689_v38 }
  0xff   : > { %805 = vst.msk [vmem:[%s1236_s30 + $0xc8] sm:$0xff] %vm264_vm2, %v773_v35  ;;  %v778_v41 = vmax.f32 %v746_v37, 0.0  ;;  %v744_v43 = vadd.f32 %v1223_v17, %v705_v39  ;;  %v692_v44 = vld [vmem:[#allocation2 + $0x78] sm:$0xff] }
 0x100   : > { %v708_v45 = vld [vmem:[#allocation2 + $0xf8] sm:$0xff]  ;;  %794 = vst.msk [vmem:[%s1236_s30 + $0x70] sm:$0xff] %vm264_vm2, %v762_v40  ;;  %v760_v46 = vmax.f32 %v728_v42, 0.0  ;;  %v731_v48 = vadd.f32 %v1223_v17, %v692_v44 }
 0x101   : > { %810 = vst.msk [vmem:[%s1236_s30 + $0xf0] sm:$0xff] %vm264_vm2, %v778_v41  ;;  %v776_v47 = vmax.f32 %v744_v43, 0.0  ;;  %v747_v49 = vadd.f32 %v1223_v17, %v708_v45  ;;  %v690_v50 = vld [vmem:[#allocation2 + $0x68] sm:$0xff] }
 0x102   : > { %v706_v51 = vld [vmem:[#allocation2 + $0xe8] sm:$0xff]  ;;  %792 = vst.msk [vmem:[%s1236_s30 + $0x60] sm:$0xff] %vm264_vm2, %v760_v46  ;;  %v763_v52 = vmax.f32 %v731_v48, 0.0  ;;  %v729_v54 = vadd.f32 %v1223_v17, %v690_v50 }
 0x103   : > { %808 = vst.msk [vmem:[%s1236_s30 + $0xe0] sm:$0xff] %vm264_vm2, %v776_v47  ;;  %v779_v53 = vmax.f32 %v747_v49, 0.0  ;;  %v745_v55 = vadd.f32 %v1223_v17, %v706_v51 }
 0x104   : > { %795 = vst.msk [vmem:[%s1236_s30 + $0x78] sm:$0xff] %vm264_vm2, %v763_v52  ;;  %v761_v56 = vmax.f32 %v729_v54, 0.0 }
 0x105   : > { %811 = vst.msk [vmem:[%s1236_s30 + $0xf8] sm:$0xff] %vm264_vm2, %v779_v53  ;;  %v777_v57 = vmax.f32 %v745_v55, 0.0 }
 0x106   : > { %793 = vst.msk [vmem:[%s1236_s30 + $0x68] sm:$0xff] %vm264_vm2, %v761_v56 }
 0x107   : > { %809 = vst.msk [vmem:[%s1236_s30 + $0xe8] sm:$0xff] %vm264_vm2, %v777_v57 }
 0x108 PF: > { %s13_s14 = sadd.s32 1, %s1063_s14   ;;  %s1368_s12 = smov %s1059_s13 }
 0x109   : > { %p10_p5 = scmp.ge.s32.totalorder %s13_s14, 4   ;;  %s1369_s13 = smov %s1371_s15 }
 0x10b   :  { %12 = sbr.rel (!%p10_p5) target bundleno = 2 (0x2), region = 76 }

// kernel: stylegan_refiner_forward.17
= control target key start
LH: loop header
LB: loop body
LE: loop exit
PB: predicated region body
PF: predicated region fallthrough
CT: control target
= control target key end

     0   :  { %s158_s22 = smov 64   ;;  %vm136_vm0 = vcmask 523264   ;;  %s369_s0 = inlined_call_operand.vmem [shape: f32[16,2,8,128], index: 0, kind: input, shape index: {}]   ;;  %s370_s1 = inlined_call_operand.vmem [shape: f32[16,8,64], index: 1, kind: output, shape index: {}]  }
   0x1   :  { %v12_v0 = vld [vmem:[%s369_s0 + $0x20] sm:$0xff]  ;;  %v13_v1 = vld [vmem:[%s369_s0 + $0x28] sm:$0xff]  ;;  %v14_v5 = vld [vmem:[%s369_s0 + $0x30] sm:$0xff] }
   0x2   :  { %v8_v2 = vld [vmem:[%s369_s0] sm:$0xff]  ;;  %v178_v3 = vmax.f32 %v12_v0, %v13_v1  ;;  %v9_v4 = vld [vmem:[%s369_s0 + $0x8] sm:$0xff]  ;;  %v15_v6 = vld [vmem:[%s369_s0 + $0x38] sm:$0xff] }
   0x3   :  { %v189_v7 = vmax.f32 %v8_v2, %v9_v4  ;;  %v10_v8 = vld [vmem:[%s369_s0 + $0x10] sm:$0xff]  ;;  %v11_v9 = vld [vmem:[%s369_s0 + $0x18] sm:$0xff]  ;;  %v199_v10 = vmax.f32 %v14_v5, %v15_v6  ;;  %v16_v14 = vld [vmem:[%s369_s0 + $0x40] sm:$0xff] }
   0x4   :  { %76 = vrot.lane.b32.xlu1 %v178_v3, %s158_s22  ;;  %v203_v11 = vmax.f32 %v10_v8, %v11_v9  ;;  %v18_v12 = vld [vmem:[%s369_s0 + $0x50] sm:$0xff]  ;;  %v19_v13 = vld [vmem:[%s369_s0 + $0x58] sm:$0xff]  ;;  %v17_v15 = vld [vmem:[%s369_s0 + $0x48] sm:$0xff] }
   0x5   :  { %72 = vrot.lane.b32.xlu0 %v189_v7, %s158_s22  ;;  %v219_v16 = vmax.f32 %v18_v12, %v19_v13  ;;  %v223_v17 = vmax.f32 %v16_v14, %v17_v15  ;;  %v22_v18 = vld [vmem:[%s369_s0 + $0x70] sm:$0xff]  ;;  %v23_v19 = vld [vmem:[%s369_s0 + $0x78] sm:$0xff]  ;;  %v20_v20 = vld [vmem:[%s369_s0 + $0x60] sm:$0xff] }
   0x6   :  { %v21_v21 = vld [vmem:[%s369_s0 + $0x68] sm:$0xff]  ;;  %v47_v22 = vmax.f32 %v22_v18, %v23_v19  ;;  %v26_v24 = vld [vmem:[%s369_s0 + $0x90] sm:$0xff]  ;;  %v27_v25 = vld [vmem:[%s369_s0 + $0x98] sm:$0xff] }
   0x7   :  { %v46_v23 = vmax.f32 %v20_v20, %v21_v21  ;;  %v24_v26 = vld [vmem:[%s369_s0 + $0x80] sm:$0xff]  ;;  %v25_v27 = vld [vmem:[%s369_s0 + $0x88] sm:$0xff]  ;;  %v49_v28 = vmax.f32 %v26_v24, %v27_v25  ;;  %v30_v30 = vld [vmem:[%s369_s0 + $0xb0] sm:$0xff] }
   0x8   :  { %78 = vrot.lane.b32.xlu1 %v199_v10, %s158_s22  ;;  %v48_v29 = vmax.f32 %v24_v26, %v25_v27  ;;  %v31_v31 = vld [vmem:[%s369_s0 + $0xb8] sm:$0xff]  ;;  %v28_v32 = vld [vmem:[%s369_s0 + $0xa0] sm:$0xff]  ;;  %v29_v33 = vld [vmem:[%s369_s0 + $0xa8] sm:$0xff] }
   0x9   :  { %74 = vrot.lane.b32.xlu0 %v203_v11, %s158_s22  ;;  %v51_v34 = vmax.f32 %v30_v30, %v31_v31  ;;  %v50_v35 = vmax.f32 %v28_v32, %v29_v33  ;;  %v34_v36 = vld [vmem:[%s369_s0 + $0xd0] sm:$0xff]  ;;  %v35_v37 = vld [vmem:[%s369_s0 + $0xd8] sm:$0xff]  ;;  %v32_v38 = vld [vmem:[%s369_s0 + $0xc0] sm:$0xff] }
   0xa   :  { %v33_v39 = vld [vmem:[%s369_s0 + $0xc8] sm:$0xff]  ;;  %v53_v40 = vmax.f32 %v34_v36, %v35_v37  ;;  %v38_v42 = vld [vmem:[%s369_s0 + $0xf0] sm:$0xff]  ;;  %v39_v43 = vld [vmem:[%s369_s0 + $0xf8] sm:$0xff] }
   0xb   :  { %v52_v41 = vmax.f32 %v32_v38, %v33_v39  ;;  %v36_v44 = vld [vmem:[%s369_s0 + $0xe0] sm:$0xff]  ;;  %v37_v45 = vld [vmem:[%s369_s0 + $0xe8] sm:$0xff]  ;;  %v55_v46 = vmax.f32 %v38_v42, %v39_v43 }
   0xc   :  { %82 = vrot.lane.b32.xlu1 %v219_v16, %s158_s22  ;;  %v54_v47 = vmax.f32 %v36_v44, %v37_v45 }
   0xd   :  { %80 = vrot.lane.b32.xlu0 %v223_v17, %s158_s22 }
  0x10   :  { %86 = vrot.lane.b32.xlu1 %v47_v22, %s158_s22 }
  0x11   :  { %84 = vrot.lane.b32.xlu0 %v46_v23, %s158_s22 }
  0x14   :  { %90 = vrot.lane.b32.xlu1 %v49_v28, %s158_s22 }
  0x15   :  { %88 = vrot.lane.b32.xlu0 %v48_v29, %s158_s22 }
  0x18   :  { %94 = vrot.lane.b32.xlu1 %v51_v34, %s158_s22 }
  0x19   :  { %92 = vrot.lane.b32.xlu0 %v50_v35, %s158_s22 }
  0x1c   :  { %98 = vrot.lane.b32.xlu1 %v53_v40, %s158_s22 }
  0x1d   :  { %96 = vrot.lane.b32.xlu0 %v52_v41, %s158_s22 }
  0x20   :  { %102 = vrot.lane.b32.xlu1 %v55_v46, %s158_s22 }
  0x21   :  { %100 = vrot.lane.b32.xlu0 %v54_v47, %s158_s22 }
  0x76   :  { %v77_v48 = vpop.permute.xlu1 %76 }
  0x77   :  { %v122_v49 = vmax.f32 %v178_v3, %v77_v48  ;;  %v73_v50 = vpop.permute.xlu0 %72 }
  0x78   :  { %v120_v51 = vmax.f32 %v189_v7, %v73_v50 }
  0x79   :  { %139 = vst.msk [vmem:[%s370_s1 + $0x10] sm:$0xff] %vm136_vm0, %v122_v49 }
  0x7a   :  { %137 = vst.msk [vmem:[%s370_s1] sm:$0xff] %vm136_vm0, %v120_v51  ;;  %v79_v52 = vpop.permute.xlu1 %78 }
  0x7b   :  { %v123_v53 = vmax.f32 %v199_v10, %v79_v52  ;;  %v75_v54 = vpop.permute.xlu0 %74 }
  0x7c   :  { %v121_v55 = vmax.f32 %v203_v11, %v75_v54 }
  0x7d   :  { %140 = vst.msk [vmem:[%s370_s1 + $0x18] sm:$0xff] %vm136_vm0, %v123_v53 }
  0x7e   :  { %138 = vst.msk [vmem:[%s370_s1 + $0x8] sm:$0xff] %vm136_vm0, %v121_v55  ;;  %v83_v56 = vpop.permute.xlu1 %82 }
  0x7f   :  { %v125_v57 = vmax.f32 %v219_v16, %v83_v56  ;;  %v81_v58 = vpop.permute.xlu0 %80 }
  0x80   :  { %v124_v59 = vmax.f32 %v223_v17, %v81_v58 }
  0x81   :  { %142 = vst.msk [vmem:[%s370_s1 + $0x28] sm:$0xff] %vm136_vm0, %v125_v57 }
  0x82   :  { %141 = vst.msk [vmem:[%s370_s1 + $0x20] sm:$0xff] %vm136_vm0, %v124_v59  ;;  %v87_v60 = vpop.permute.xlu1 %86 }
  0x83   :  { %v127_v61 = vmax.f32 %v47_v22, %v87_v60  ;;  %v85_v62 = vpop.permute.xlu0 %84 }
  0x84   :  { %v126_v63 = vmax.f32 %v46_v23, %v85_v62 }
  0x85   :  { %144 = vst.msk [vmem:[%s370_s1 + $0x38] sm:$0xff] %vm136_vm0, %v127_v61 }
  0x86   :  { %143 = vst.msk [vmem:[%s370_s1 + $0x30] sm:$0xff] %vm136_vm0, %v126_v63  ;;  %v91_v0 = vpop.permute.xlu1 %90 }
  0x87   :  { %v129_v1 = vmax.f32 %v49_v28, %v91_v0  ;;  %v89_v2 = vpop.permute.xlu0 %88 }
  0x88   :  { %v128_v3 = vmax.f32 %v48_v29, %v89_v2 }
  0x89   :  { %146 = vst.msk [vmem:[%s370_s1 + $0x48] sm:$0xff] %vm136_vm0, %v129_v1 }
  0x8a   :  { %145 = vst.msk [vmem:[%s370_s1 + $0x40] sm:$0xff] %vm136_vm0, %v128_v3  ;;  %v95_v4 = vpop.permute.xlu1 %94 }
  0x8b   :  { %v131_v5 = vmax.f32 %v51_v34, %v95_v4  ;;  %v93_v6 = vpop.permute.xlu0 %92 }
  0x8c   :  { %v130_v7 = vmax.f32 %v50_v35, %v93_v6 }
  0x8d   :  { %148 = vst.msk [vmem:[%s370_s1 + $0x58] sm:$0xff] %vm136_vm0, %v131_v5 }
  0x8e   :  { %147 = vst.msk [vmem:[%s370_s1 + $0x50] sm:$0xff] %vm136_vm0, %v130_v7  ;;  %v99_v8 = vpop.permute.xlu1 %98 }
  0x8f   :  { %v133_v9 = vmax.f32 %v53_v40, %v99_v8  ;;  %v97_v10 = vpop.permute.xlu0 %96 }
  0x90   :  { %v132_v11 = vmax.f32 %v52_v41, %v97_v10 }
  0x91   :  { %150 = vst.msk [vmem:[%s370_s1 + $0x68] sm:$0xff] %vm136_vm0, %v133_v9 }
  0x92   :  { %149 = vst.msk [vmem:[%s370_s1 + $0x60] sm:$0xff] %vm136_vm0, %v132_v11  ;;  %v103_v12 = vpop.permute.xlu1 %102 }
  0x93   :  { %v135_v13 = vmax.f32 %v55_v46, %v103_v12  ;;  %v101_v14 = vpop.permute.xlu0 %100 }
  0x94   :  { %v134_v15 = vmax.f32 %v54_v47, %v101_v14 }
  0x95   :  { %152 = vst.msk [vmem:[%s370_s1 + $0x78] sm:$0xff] %vm136_vm0, %v135_v13 }
  0x96   :  { %151 = vst.msk [vmem:[%s370_s1 + $0x70] sm:$0xff] %vm136_vm0, %v134_v15 }

// kernel: stylegan_refiner_forward.16
= control target key start
LH: loop header
LB: loop body
LE: loop exit
PB: predicated region body
PF: predicated region fallthrough
CT: control target
= control target key end

     0   :  { %s2186_s12 = smov 0   ;;  %s2188_s13 = smov 0   ;;  %s2928_s0 = inlined_call_operand.vmem [shape: f32[512,576], index: 0, kind: input, shape index: {}]   ;;  %s2929_s1 = inlined_call_operand.vmem [shape: bf16[576,64], index: 1, kind: input, shape index: {}]   ;;  %s2930_s2 = inlined_call_operand.vmem [shape: f32[1,64], index: 2, kind: input, shape index: {}]   ;;  %s2931_s3 = inlined_call_operand.vmem [shape: f32[512,64], index: 3, kind: output, shape index: {}]  }
   0x1   :  { %s2190_s14 = smov 0  }
   0x2 LB: > { %s32_s15 = sadd.s32 1, %s2159_s13  ;;  %p1719_p0 = scmp.ge.s32.totalorder %s2163_s14, 1  ;;  %s2163_s14 = sphi %s2190_s14, %s13_s14   ;;  %s2159_s13 = sphi %s2188_s13, %s2979_s13   ;;  %s2155_s12 = sphi %s2186_s12, %s2978_s12  }
   0x3   : > { %p34_p1 = scmp.ge.s32.totalorder %s32_s15, 2  ;;  %p191_p2 = scmp.lt.s32.totalorder %s2163_s14, 3 }
   0x5   : > { %s2981_s15 = smov (%p34_p1, %s32_s15), 0  ;;  %p192_p3 = pnand %p1719_p0, %p191_p2 }
   0x7   : > { %195 = sbr.rel (%p192_p3) target bundleno = 417 (0x1a1), region = 32 }
   0xc   : > { %v2105_v0 = vld [vmem:[%s2929_s1 + $0x78] sm:$0xff]   ;;  %s1720_s18 = sshll.u32 %s2155_s12, 5  ;;  %v2107_v2 = vld [vmem:[%s2929_s1 + $0x70] sm:$0xff]   ;;  %v2109_v4 = vld [vmem:[%s2929_s1 + $0x68] sm:$0xff]   ;;  %vm272_vm0 = vcmask 523264  }
   0xd   : > { %v2106_v1 = vld [vmem:[%s2929_s1 + $0x38] sm:$0xff]   ;;  %p236_p4 = scmp.lt.s32.totalorder %s1720_s18, 63  ;;  %1779 = vmatprep.subr.bf16.mxu0 %v2105_v0  ;;  %2063 = vmatprep.subr.bf16.mxu1 %v2105_v0  ;;  %v2108_v3 = vld [vmem:[%s2929_s1 + $0x30] sm:$0xff]   ;;  %v2110_v5 = vld [vmem:[%s2929_s1 + $0x28] sm:$0xff]  }
   0xe   : > { %1780 = vmatpush3.bf16.msra.mxu0 %v2106_v1  ;;  %2071 = vmatpush3.bf16.msra.mxu1 %v2106_v1  ;;  %v2111_v6 = vld [vmem:[%s2929_s1 + $0x60] sm:$0xff]   ;;  %v2113_v8 = vld [vmem:[%s2929_s1 + $0x58] sm:$0xff]   ;;  %v2115_v10 = vld [vmem:[%s2929_s1 + $0x50] sm:$0xff]  }
   0xf   : > { %1781 = vmatprep.subr.bf16.mxu0 %v2107_v2  ;;  %2064 = vmatprep.subr.bf16.mxu1 %v2107_v2  ;;  %s2983_s18 = smov (!%p236_p4, %s1720_s18), 63  ;;  %v2112_v7 = vld [vmem:[%s2929_s1 + $0x20] sm:$0xff]   ;;  %v2114_v9 = vld [vmem:[%s2929_s1 + $0x18] sm:$0xff]   ;;  %v2116_v17 = vld [vmem:[%s2929_s1 + $0x10] sm:$0xff]  }
  0x10   : > { %s2079_s4 = smul.u32 40, %s2983_s18  ;;  %v2117_v18 = vld [vmem:[%s2929_s1 + $0x48] sm:$0xff]   ;;  %v2119_v20 = vld [vmem:[%s2929_s1 + $0x40] sm:$0xff]   ;;  %v2121_v26 = vld [vmem:[%s2929_s1 + $0xf8] sm:$0xff]   ;;  %s1723_s27 = sshll.u32 %s2983_s18, 3 }
  0x11   : > { %v2118_v19 = vld [vmem:[%s2929_s1 + $0x8] sm:$0xff]   ;;  %v2120_v21 = vld [vmem:[%s2929_s1] sm:$0xff]   ;;  %v2124_v27 = vld [vmem:[%s2929_s1 + $0x118] sm:$0xff]   ;;  %s2713_s29 = scalar_lea.vmem %s2931_s3, %s1723_s27 }
  0x12   : > { %1782 = vmatpush3.bf16.msra.mxu0 %v2108_v3  ;;  %2072 = vmatpush3.bf16.msra.mxu1 %v2108_v3  ;;  %s2237_s11 = scalar_lea.vmem %s2928_s0, %s2079_s4  ;;  %v2122_v34 = vld [vmem:[%s2929_s1 + $0xb8] sm:$0xff]   ;;  %v2123_v35 = vld [vmem:[%s2929_s1 + $0xf0] sm:$0xff]   ;;  %v2126_v43 = vld [vmem:[%s2929_s1 + $0xe8] sm:$0xff]  }
  0x13   : > { %1783 = vmatprep.subr.bf16.mxu0 %v2109_v4  ;;  %2065 = vmatprep.subr.bf16.mxu1 %v2109_v4  ;;  %v338_v11 = vld [vmem:[%s2237_s11 + $0x8] sm:$0xff]  ;;  %v343_v12 = vld [vmem:[%s2237_s11 + $0x30] sm:$0xff]  ;;  %v337_v22 = vld [vmem:[%s2237_s11] sm:$0xff] }
  0x14   : > { %v458_v13 = vld [vmem:[%s2237_s11 + $0x3c8] sm:$0xff]  ;;  %v498_v14 = vpack.c.bf16 %v343_v12, %v338_v11  ;;  %v463_v15 = vld [vmem:[%s2237_s11 + $0x3f0] sm:$0xff]  ;;  %v457_v24 = vld [vmem:[%s2237_s11 + $0x3c0] sm:$0xff] }
  0x15   : > { %v558_v16 = vpack.c.bf16 %v463_v15, %v458_v13  ;;  %v342_v23 = vld [vmem:[%s2237_s11 + $0x28] sm:$0xff]  ;;  %v348_v28 = vld [vmem:[%s2237_s11 + $0x58] sm:$0xff]  ;;  %v353_v29 = vld [vmem:[%s2237_s11 + $0x80] sm:$0xff] }
  0x16   : > { %1784 = vmatpush3.bf16.msra.mxu0 %v2110_v5  ;;  %2073 = vmatpush3.bf16.msra.mxu1 %v2110_v5  ;;  %v462_v25 = vld [vmem:[%s2237_s11 + $0x3e8] sm:$0xff]  ;;  %v497_v30 = vpack.c.bf16 %v342_v23, %v337_v22  ;;  %v468_v32 = vld [vmem:[%s2237_s11 + $0x418] sm:$0xff]  ;;  %v473_v33 = vld [vmem:[%s2237_s11 + $0x440] sm:$0xff]  ;;  %v503_v36 = vpack.c.bf16 %v353_v29, %v348_v28 }
  0x17   : > { %1785 = vmatprep.subr.bf16.mxu0 %v2111_v6  ;;  %2066 = vmatprep.subr.bf16.mxu1 %v2111_v6  ;;  %v557_v31 = vpack.c.bf16 %v462_v25, %v457_v24  ;;  %v2125_v37 = vld [vmem:[%s2929_s1 + $0xb0] sm:$0xff]   ;;  %v563_v38 = vpack.c.bf16 %v473_v33, %v468_v32  ;;  %v352_v40 = vld [vmem:[%s2237_s11 + $0x78] sm:$0xff]  ;;  %v358_v44 = vld [vmem:[%s2237_s11 + $0xa8] sm:$0xff] }
  0x18   : > { %946 = vmatprep.mubr.bf16.mxu0 %v498_v14  ;;  %1042 = vmatprep.mubr.bf16.mxu1 %v558_v16  ;;  %v347_v39 = vld [vmem:[%s2237_s11 + $0x50] sm:$0xff]  ;;  %v472_v42 = vld [vmem:[%s2237_s11 + $0x438] sm:$0xff]  ;;  %v478_v46 = vld [vmem:[%s2237_s11 + $0x468] sm:$0xff] }
  0x19   : > { %v467_v41 = vld [vmem:[%s2237_s11 + $0x410] sm:$0xff]  ;;  %v502_v48 = vpack.c.bf16 %v352_v40, %v347_v39  ;;  %v2127_v50 = vld [vmem:[%s2929_s1 + $0xa8] sm:$0xff]   ;;  %v2128_v52 = vld [vmem:[%s2929_s1 + $0xe0] sm:$0xff]  }
  0x1a   : > { %1786 = vmatpush3.bf16.msra.mxu0 %v2112_v7  ;;  %2074 = vmatpush3.bf16.msra.mxu1 %v2112_v7  ;;  %v363_v45 = vld [vmem:[%s2237_s11 + $0xd0] sm:$0xff]  ;;  %v562_v49 = vpack.c.bf16 %v472_v42, %v467_v41  ;;  %v2129_v54 = vld [vmem:[%s2929_s1 + $0xa0] sm:$0xff]   ;;  %v362_v56 = vld [vmem:[%s2237_s11 + $0xc8] sm:$0xff] }
  0x1b   : > { %1787 = vmatprep.subr.bf16.mxu0 %v2113_v8  ;;  %2067 = vmatprep.subr.bf16.mxu1 %v2113_v8  ;;  %v483_v47 = vld [vmem:[%s2237_s11 + $0x490] sm:$0xff]  ;;  %v508_v51 = vpack.c.bf16 %v363_v45, %v358_v44  ;;  %v357_v55 = vld [vmem:[%s2237_s11 + $0xa0] sm:$0xff]  ;;  %v482_v58 = vld [vmem:[%s2237_s11 + $0x488] sm:$0xff] }
  0x1c   : > { %v568_v53 = vpack.c.bf16 %v483_v47, %v478_v46  ;;  %v477_v57 = vld [vmem:[%s2237_s11 + $0x460] sm:$0xff]  ;;  %v2130_v59 = vld [vmem:[%s2929_s1 + $0xd8] sm:$0xff]   ;;  %v2137_v60 = vld [vmem:[%s2929_s1 + $0x110] sm:$0xff]   ;;  %v507_v1 = vpack.c.bf16 %v362_v56, %v357_v55 }
  0x1d   : > { %v368_v61 = vld [vmem:[%s2237_s11 + $0xf8] sm:$0xff]  ;;  %v373_v62 = vld [vmem:[%s2237_s11 + $0x120] sm:$0xff]  ;;  %v567_v2 = vpack.c.bf16 %v482_v58, %v477_v57  ;;  %v2132_v5 = vld [vmem:[%s2929_s1 + $0xd0] sm:$0xff]  }
  0x1e   : > { %1788 = vmatpush3.bf16.msra.mxu0 %v2114_v9  ;;  %2075 = vmatpush3.bf16.msra.mxu1 %v2114_v9  ;;  %v488_v63 = vld [vmem:[%s2237_s11 + $0x4b8] sm:$0xff]  ;;  %v493_v0 = vld [vmem:[%s2237_s11 + $0x4e0] sm:$0xff]  ;;  %v513_v4 = vpack.c.bf16 %v373_v62, %v368_v61  ;;  %v2133_v7 = vld [vmem:[%s2929_s1 + $0x90] sm:$0xff]  }
  0x1f   : > { %1789 = vmatprep.subr.bf16.mxu0 %v2115_v10  ;;  %2068 = vmatprep.subr.bf16.mxu1 %v2115_v10  ;;  %v2131_v3 = vld [vmem:[%s2929_s1 + $0x98] sm:$0xff]   ;;  %v573_v6 = vpack.c.bf16 %v493_v0, %v488_v63  ;;  %v367_v8 = vld [vmem:[%s2237_s11 + $0xf0] sm:$0xff]  ;;  %v2134_v12 = vld [vmem:[%s2929_s1 + $0xc8] sm:$0xff]  }
  0x20   : > { %v372_v9 = vld [vmem:[%s2237_s11 + $0x118] sm:$0xff]  ;;  %v487_v10 = vld [vmem:[%s2237_s11 + $0x4b0] sm:$0xff]  ;;  %v378_v13 = vld [vmem:[%s2237_s11 + $0x148] sm:$0xff] }
  0x21   : > { %v492_v11 = vld [vmem:[%s2237_s11 + $0x4d8] sm:$0xff]  ;;  %v383_v14 = vld [vmem:[%s2237_s11 + $0x170] sm:$0xff]  ;;  %v345_v16 = vld [vmem:[%s2237_s11 + $0x40] sm:$0xff] }
  0x22   : > { %1790 = vmatpush3.bf16.msra.mxu0 %v2116_v17  ;;  %2076 = vmatpush3.bf16.msra.mxu1 %v2116_v17  ;;  %v340_v15 = vld [vmem:[%s2237_s11 + $0x18] sm:$0xff]  ;;  %v2139_v17 = vld [vmem:[%s2929_s1 + $0x108] sm:$0xff]   ;;  %v2136_v22 = vld [vmem:[%s2929_s1 + $0xc0] sm:$0xff]  }
  0x23   : > { %1791 = vmatprep.subr.bf16.mxu0 %v2117_v18  ;;  %2069 = vmatprep.subr.bf16.mxu1 %v2117_v18  ;;  %v512_v18 = vpack.c.bf16 %v372_v9, %v367_v8  ;;  %v500_v23 = vpack.c.bf16 %v345_v16, %v340_v15  ;;  %v2138_v24 = vld [vmem:[%s2929_s1 + $0x80] sm:$0xff]   ;;  %v344_v28 = vld [vmem:[%s2237_s11 + $0x38] sm:$0xff]  ;;  %v355_v32 = vld [vmem:[%s2237_s11 + $0x90] sm:$0xff] }
  0x24   : > { %v377_v25 = vld [vmem:[%s2237_s11 + $0x140] sm:$0xff]  ;;  %v388_v29 = vld [vmem:[%s2237_s11 + $0x198] sm:$0xff]  ;;  %v354_v41 = vld [vmem:[%s2237_s11 + $0x88] sm:$0xff] }
  0x25   : > { %v392_v39 = vld [vmem:[%s2237_s11 + $0x1b8] sm:$0xff]  ;;  %v349_v40 = vld [vmem:[%s2237_s11 + $0x60] sm:$0xff]  ;;  %v398_v42 = vld [vmem:[%s2237_s11 + $0x1e8] sm:$0xff] }
  0x26   : > { %1792 = vmatpush3.bf16.msra.mxu0 %v2118_v19  ;;  %2077 = vmatpush3.bf16.msra.mxu1 %v2118_v19  ;;  %v572_v19 = vpack.c.bf16 %v492_v11, %v487_v10  ;;  %v360_v44 = vld [vmem:[%s2237_s11 + $0xb8] sm:$0xff]  ;;  %v365_v45 = vld [vmem:[%s2237_s11 + $0xe0] sm:$0xff]  ;;  %v504_v47 = vpack.c.bf16 %v354_v41, %v349_v40  ;;  %v370_v56 = vld [vmem:[%s2237_s11 + $0x108] sm:$0xff] }
  0x27   : > { %1793 = vmatprep.subr.bf16.mxu0 %v2119_v20  ;;  %2070 = vmatprep.subr.bf16.mxu1 %v2119_v20  ;;  %v2135_v20 = vld [vmem:[%s2929_s1 + $0x88] sm:$0xff]   ;;  %v413_v55 = vld [vmem:[%s2237_s11 + $0x260] sm:$0xff]  ;;  %v375_v57 = vld [vmem:[%s2237_s11 + $0x130] sm:$0xff] }
  0x28   : > { %v515_v61 = vpack.c.bf16 %v375_v57, %v370_v56  ;;  %v407_v62 = vld [vmem:[%s2237_s11 + $0x230] sm:$0xff]  ;;  %v412_v63 = vld [vmem:[%s2237_s11 + $0x258] sm:$0xff]  ;;  %v369_v0 = vld [vmem:[%s2237_s11 + $0x100] sm:$0xff] }
  0x29   : > { %v417_v10 = vld [vmem:[%s2237_s11 + $0x280] sm:$0xff]  ;;  %v422_v11 = vld [vmem:[%s2237_s11 + $0x2a8] sm:$0xff]  ;;  %v415_v41 = vld [vmem:[%s2237_s11 + $0x270] sm:$0xff] }
  0x2a   : > { %1794 = vmatpush3.bf16.msra.mxu0 %v2120_v21  ;;  %2078 = vmatpush3.bf16.msra.mxu1 %v2120_v21  ;;  %v518_v21 = vpack.c.bf16 %v383_v14, %v378_v13  ;;  %v384_v13 = vld [vmem:[%s2237_s11 + $0x178] sm:$0xff]  ;;  %v433_v15 = vld [vmem:[%s2237_s11 + $0x300] sm:$0xff]  ;;  %v390_v16 = vld [vmem:[%s2237_s11 + $0x1a8] sm:$0xff] }
  0x2b   : > { %1891 = vmatprep.subr.bf16.mxu1 %v2121_v26  ;;  %2023 = vmatprep.subr.bf16.mxu0 %v2124_v27  ;;  %v382_v26 = vld [vmem:[%s2237_s11 + $0x168] sm:$0xff]  ;;  %v428_v14 = vld [vmem:[%s2237_s11 + $0x2d8] sm:$0xff] }
  0x2c   : > { %v517_v33 = vpack.c.bf16 %v382_v26, %v377_v25  ;;  %v394_v25 = vld [vmem:[%s2237_s11 + $0x1c8] sm:$0xff] }
  0x2d   : > { %947 = vmatmul.mubr.bf16.vlgmr.msra.gmra.mxu0 %v497_v30  ;;  %1043 = vmatmul.mubr.bf16.vlgmr.msra.gmra.mxu1 %v557_v31  ;;  %v393_v30 = vld [vmem:[%s2237_s11 + $0x1c0] sm:$0xff]  ;;  %v350_v31 = vld [vmem:[%s2237_s11 + $0x68] sm:$0xff] }
  0x2e   : > { %1892 = vmatpush3.bf16.msra.mxu1 %v2122_v34  ;;  %2024 = vmatpush3.bf16.msra.mxu0 %v2124_v27  ;;  %v339_v27 = vld [vmem:[%s2237_s11 + $0x10] sm:$0xff]  ;;  %v438_v26 = vld [vmem:[%s2237_s11 + $0x328] sm:$0xff] }
  0x2f   : > { %1893 = vmatprep.subr.bf16.mxu1 %v2123_v35  ;;  %954 = vmatprep.mubr.bf16.mxu0 %v503_v36  ;;  %v499_v34 = vpack.c.bf16 %v344_v28, %v339_v27  ;;  %v2140_v35 = vld [vmem:[%s2929_s1 + $0x100] sm:$0xff]   ;;  %v523_v36 = vpack.c.bf16 %v393_v30, %v388_v29  ;;  %v443_v27 = vld [vmem:[%s2237_s11 + $0x350] sm:$0xff]  ;;  %v400_v28 = vld [vmem:[%s2237_s11 + $0x1f8] sm:$0xff] }
  0x30   : > { %1050 = vmatprep.mubr.bf16.mxu1 %v563_v38  ;;  %2025 = vmatprep.subr.bf16.mxu0 %v2137_v60  ;;  %v387_v38 = vld [vmem:[%s2237_s11 + $0x190] sm:$0xff]  ;;  %v405_v29 = vld [vmem:[%s2237_s11 + $0x220] sm:$0xff]  ;;  %v410_v40 = vld [vmem:[%s2237_s11 + $0x248] sm:$0xff] }
  0x31   : > { %v522_v46 = vpack.c.bf16 %v392_v39, %v387_v38  ;;  %v448_v38 = vld [vmem:[%s2237_s11 + $0x378] sm:$0xff]  ;;  %v453_v39 = vld [vmem:[%s2237_s11 + $0x3a0] sm:$0xff] }
  0x32   : > { %1894 = vmatpush3.bf16.msra.mxu1 %v2125_v37  ;;  %2026 = vmatpush3.bf16.msra.mxu0 %v2137_v60  ;;  %v505_v37 = vpack.c.bf16 %v355_v32, %v350_v31  ;;  %v548_v32 = vpack.c.bf16 %v443_v27, %v438_v26 }
  0x33   : > { %1895 = vmatprep.subr.bf16.mxu1 %v2126_v43  ;;  %2027 = vmatprep.subr.bf16.mxu0 %v2139_v17  ;;  %v403_v43 = vld [vmem:[%s2237_s11 + $0x210] sm:$0xff] }
  0x35   : > { %955 = vmatmul.mubr.bf16.gmra.mxu0 %v502_v48  ;;  %1051 = vmatmul.mubr.bf16.gmra.mxu1 %v562_v49  ;;  %v528_v48 = vpack.c.bf16 %v403_v43, %v398_v42  ;;  %v510_v49 = vpack.c.bf16 %v365_v45, %v360_v44  ;;  %v553_v44 = vpack.c.bf16 %v453_v39, %v448_v38 }
  0x36   : > { %1896 = vmatpush3.bf16.msra.mxu1 %v2127_v50  ;;  %962 = vmatprep.mubr.bf16.mxu0 %v508_v51  ;;  %v397_v50 = vld [vmem:[%s2237_s11 + $0x1e0] sm:$0xff]  ;;  %v402_v51 = vld [vmem:[%s2237_s11 + $0x208] sm:$0xff]  ;;  %v535_v45 = vpack.c.bf16 %v415_v41, %v410_v40 }
  0x37   : > { %1897 = vmatprep.subr.bf16.mxu1 %v2128_v52  ;;  %1058 = vmatprep.mubr.bf16.mxu1 %v568_v53  ;;  %v359_v52 = vld [vmem:[%s2237_s11 + $0xb0] sm:$0xff]  ;;  %v364_v53 = vld [vmem:[%s2237_s11 + $0xd8] sm:$0xff]  ;;  %v527_v58 = vpack.c.bf16 %v402_v51, %v397_v50  ;;  %v425_v51 = vld [vmem:[%s2237_s11 + $0x2c0] sm:$0xff] }
  0x38   : > { %2028 = vmatpush3.bf16.msra.mxu0 %v2139_v17  ;;  %v395_v17 = vld [vmem:[%s2237_s11 + $0x1d0] sm:$0xff]  ;;  %v420_v50 = vld [vmem:[%s2237_s11 + $0x298] sm:$0xff] }
  0x39   : > { %2029 = vmatprep.subr.bf16.mxu0 %v2140_v35  ;;  %v540_v56 = vpack.c.bf16 %v425_v51, %v420_v50 }
  0x3a   : > { %1898 = vmatpush3.bf16.msra.mxu1 %v2129_v54  ;;  %v408_v54 = vld [vmem:[%s2237_s11 + $0x238] sm:$0xff] }
  0x3b   : > { %1899 = vmatprep.subr.bf16.mxu1 %v2130_v59  ;;  %v509_v59 = vpack.c.bf16 %v364_v53, %v359_v52  ;;  %v533_v60 = vpack.c.bf16 %v413_v55, %v408_v54  ;;  %v341_v52 = vld [vmem:[%s2237_s11 + $0x20] sm:$0xff]  ;;  %v346_v53 = vld [vmem:[%s2237_s11 + $0x48] sm:$0xff] }
  0x3c   : > { %2030 = vmatpush3.bf16.msra.mxu0 %v2140_v35  ;;  %v442_v35 = vld [vmem:[%s2237_s11 + $0x348] sm:$0xff]  ;;  %v501_v57 = vpack.c.bf16 %v346_v53, %v341_v52 }
  0x3d   : > { %963 = vmatmul.mubr.bf16.gmra.mxu0 %v507_v1  ;;  %1059 = vmatmul.mubr.bf16.gmra.mxu1 %v567_v2  ;;  %v374_v1 = vld [vmem:[%s2237_s11 + $0x128] sm:$0xff] }
  0x3e   : > { %1900 = vmatpush3.bf16.msra.mxu1 %v2131_v3  ;;  %970 = vmatprep.mubr.bf16.mxu0 %v513_v4  ;;  %v418_v2 = vld [vmem:[%s2237_s11 + $0x288] sm:$0xff]  ;;  %v423_v3 = vld [vmem:[%s2237_s11 + $0x2b0] sm:$0xff]  ;;  %v380_v4 = vld [vmem:[%s2237_s11 + $0x158] sm:$0xff] }
  0x3f   : > { %1901 = vmatprep.subr.bf16.mxu1 %v2132_v5  ;;  %1066 = vmatprep.mubr.bf16.mxu1 %v573_v6  ;;  %v385_v5 = vld [vmem:[%s2237_s11 + $0x180] sm:$0xff]  ;;  %v532_v6 = vpack.c.bf16 %v412_v63, %v407_v62  ;;  %v538_v8 = vpack.c.bf16 %v423_v3, %v418_v2  ;;  %v430_v62 = vld [vmem:[%s2237_s11 + $0x2e8] sm:$0xff]  ;;  %v435_v63 = vld [vmem:[%s2237_s11 + $0x310] sm:$0xff] }
  0x40   : > { %v520_v9 = vpack.c.bf16 %v385_v5, %v380_v4  ;;  %v545_v4 = vpack.c.bf16 %v435_v63, %v430_v62 }
  0x42   : > { %1902 = vmatpush3.bf16.msra.mxu1 %v2133_v7  ;;  %v514_v7 = vpack.c.bf16 %v374_v1, %v369_v0  ;;  %v361_v0 = vld [vmem:[%s2237_s11 + $0xc0] sm:$0xff]  ;;  %v366_v1 = vld [vmem:[%s2237_s11 + $0xe8] sm:$0xff] }
  0x43   : > { %1903 = vmatprep.subr.bf16.mxu1 %v2134_v12  ;;  %v379_v12 = vld [vmem:[%s2237_s11 + $0x150] sm:$0xff]  ;;  %v511_v5 = vpack.c.bf16 %v366_v1, %v361_v0 }
  0x45   : > { %971 = vmatmul.mubr.bf16.gmra.mxu0 %v512_v18  ;;  %1067 = vmatmul.mubr.bf16.gmra.mxu1 %v572_v19  ;;  %v537_v18 = vpack.c.bf16 %v422_v11, %v417_v10  ;;  %v519_v19 = vpack.c.bf16 %v384_v13, %v379_v12  ;;  %v440_v10 = vld [vmem:[%s2237_s11 + $0x338] sm:$0xff]  ;;  %v445_v11 = vld [vmem:[%s2237_s11 + $0x360] sm:$0xff]  ;;  %v386_v13 = vld [vmem:[%s2237_s11 + $0x188] sm:$0xff] }
  0x46   : > { %1904 = vmatpush3.bf16.msra.mxu1 %v2135_v20  ;;  %978 = vmatprep.mubr.bf16.mxu0 %v518_v21  ;;  %v543_v20 = vpack.c.bf16 %v433_v15, %v428_v14  ;;  %v525_v21 = vpack.c.bf16 %v395_v17, %v390_v16  ;;  %v381_v12 = vld [vmem:[%s2237_s11 + $0x160] sm:$0xff]  ;;  %v550_v16 = vpack.c.bf16 %v445_v11, %v440_v10 }
  0x47   : > { %1905 = vmatprep.subr.bf16.mxu1 %v2136_v22  ;;  %1107 = vmatprep.mubr.bf16.mxu1 %v500_v23  ;;  %v427_v22 = vld [vmem:[%s2237_s11 + $0x2d0] sm:$0xff]  ;;  %v432_v23 = vld [vmem:[%s2237_s11 + $0x2f8] sm:$0xff]  ;;  %v521_v17 = vpack.c.bf16 %v386_v13, %v381_v12 }
  0x48   : > { %v542_v30 = vpack.c.bf16 %v432_v23, %v427_v22  ;;  %v450_v22 = vld [vmem:[%s2237_s11 + $0x388] sm:$0xff]  ;;  %v455_v23 = vld [vmem:[%s2237_s11 + $0x3b0] sm:$0xff] }
  0x4a   : > { %1906 = vmatpush3.bf16.msra.mxu1 %v2138_v24  ;;  %v389_v24 = vld [vmem:[%s2237_s11 + $0x1a0] sm:$0xff] }
  0x4b   : > { %v524_v31 = vpack.c.bf16 %v394_v25, %v389_v24  ;;  %v401_v24 = vld [vmem:[%s2237_s11 + $0x200] sm:$0xff]  ;;  %v406_v25 = vld [vmem:[%s2237_s11 + $0x228] sm:$0xff] }
  0x4d   : > { %979 = vmatmul.mubr.bf16.gmra.mxu0 %v517_v33  ;;  %1108 = vmatmul.mubr.bf16.vlgmr.msra.gmra.mxu1 %v499_v34  ;;  %v530_v33 = vpack.c.bf16 %v405_v29, %v400_v28  ;;  %v437_v34 = vld [vmem:[%s2237_s11 + $0x320] sm:$0xff]  ;;  %v555_v28 = vpack.c.bf16 %v455_v23, %v450_v22  ;;  %v531_v29 = vpack.c.bf16 %v406_v25, %v401_v24 }
  0x4e   : > { %986 = vmatprep.mubr.bf16.mxu0 %v523_v36  ;;  %1115 = vmatprep.mubr.bf16.mxu1 %v505_v37  ;;  %v399_v36 = vld [vmem:[%s2237_s11 + $0x1f0] sm:$0xff]  ;;  %v404_v37 = vld [vmem:[%s2237_s11 + $0x218] sm:$0xff]  ;;  %v547_v42 = vpack.c.bf16 %v442_v35, %v437_v34  ;;  %v465_v35 = vld [vmem:[%s2237_s11 + $0x400] sm:$0xff] }
  0x4f   : > { %v529_v43 = vpack.c.bf16 %v404_v37, %v399_v36  ;;  %v460_v34 = vld [vmem:[%s2237_s11 + $0x3d8] sm:$0xff]  ;;  %v421_v36 = vld [vmem:[%s2237_s11 + $0x2a0] sm:$0xff]  ;;  %v426_v37 = vld [vmem:[%s2237_s11 + $0x2c8] sm:$0xff] }
  0x50   : > { %v560_v40 = vpack.c.bf16 %v465_v35, %v460_v34  ;;  %v541_v41 = vpack.c.bf16 %v426_v37, %v421_v36 }
  0x55   : > { %987 = vmatmul.mubr.bf16.gmra.mxu0 %v522_v46  ;;  %1116 = vmatmul.mubr.bf16.gmra.mxu1 %v504_v47  ;;  %v447_v46 = vld [vmem:[%s2237_s11 + $0x370] sm:$0xff]  ;;  %v452_v47 = vld [vmem:[%s2237_s11 + $0x398] sm:$0xff] }
  0x56   : > { %994 = vmatprep.mubr.bf16.mxu0 %v528_v48  ;;  %1123 = vmatprep.mubr.bf16.mxu1 %v510_v49  ;;  %v409_v48 = vld [vmem:[%s2237_s11 + $0x240] sm:$0xff]  ;;  %v414_v49 = vld [vmem:[%s2237_s11 + $0x268] sm:$0xff]  ;;  %v552_v54 = vpack.c.bf16 %v452_v47, %v447_v46  ;;  %v475_v47 = vld [vmem:[%s2237_s11 + $0x450] sm:$0xff] }
  0x57   : > { %v534_v55 = vpack.c.bf16 %v414_v49, %v409_v48  ;;  %v470_v46 = vld [vmem:[%s2237_s11 + $0x428] sm:$0xff]  ;;  %v441_v48 = vld [vmem:[%s2237_s11 + $0x340] sm:$0xff] }
  0x58   : > { %v446_v49 = vld [vmem:[%s2237_s11 + $0x368] sm:$0xff]  ;;  %v565_v52 = vpack.c.bf16 %v475_v47, %v470_v46 }
  0x59   : > { %v551_v53 = vpack.c.bf16 %v446_v49, %v441_v48 }
  0x5d   : > { %995 = vmatmul.mubr.bf16.gmra.mxu0 %v527_v58  ;;  %1124 = vmatmul.mubr.bf16.gmra.mxu1 %v509_v59  ;;  %v419_v58 = vld [vmem:[%s2237_s11 + $0x290] sm:$0xff]  ;;  %v424_v59 = vld [vmem:[%s2237_s11 + $0x2b8] sm:$0xff] }
  0x5e   : > { %1002 = vmatprep.mubr.bf16.mxu0 %v533_v60  ;;  %1131 = vmatprep.mubr.bf16.mxu1 %v515_v61  ;;  %v351_v60 = vld [vmem:[%s2237_s11 + $0x70] sm:$0xff]  ;;  %v356_v61 = vld [vmem:[%s2237_s11 + $0x98] sm:$0xff]  ;;  %v539_v2 = vpack.c.bf16 %v424_v59, %v419_v58  ;;  %v485_v59 = vld [vmem:[%s2237_s11 + $0x4a0] sm:$0xff] }
  0x5f   : > { %v506_v3 = vpack.c.bf16 %v356_v61, %v351_v60  ;;  %v480_v58 = vld [vmem:[%s2237_s11 + $0x478] sm:$0xff]  ;;  %v461_v60 = vld [vmem:[%s2237_s11 + $0x3e0] sm:$0xff]  ;;  %v466_v61 = vld [vmem:[%s2237_s11 + $0x408] sm:$0xff] }
  0x60   : > { %v570_v0 = vpack.c.bf16 %v485_v59, %v480_v58  ;;  %v561_v1 = vpack.c.bf16 %v466_v61, %v461_v60 }
  0x65   : > { %1003 = vmatmul.mubr.bf16.gmra.mxu0 %v532_v6  ;;  %1132 = vmatmul.mubr.bf16.gmra.mxu1 %v514_v7  ;;  %v429_v6 = vld [vmem:[%s2237_s11 + $0x2e0] sm:$0xff]  ;;  %v434_v7 = vld [vmem:[%s2237_s11 + $0x308] sm:$0xff] }
  0x66   : > { %1010 = vmatprep.mubr.bf16.mxu0 %v538_v8  ;;  %1139 = vmatprep.mubr.bf16.mxu1 %v520_v9  ;;  %v371_v8 = vld [vmem:[%s2237_s11 + $0x110] sm:$0xff]  ;;  %v376_v9 = vld [vmem:[%s2237_s11 + $0x138] sm:$0xff]  ;;  %v544_v14 = vpack.c.bf16 %v434_v7, %v429_v6  ;;  %v490_v6 = vld [vmem:[%s2237_s11 + $0x4c8] sm:$0xff] }
  0x67   : > { %v516_v15 = vpack.c.bf16 %v376_v9, %v371_v8  ;;  %v495_v7 = vld [vmem:[%s2237_s11 + $0x4f0] sm:$0xff]  ;;  %v481_v8 = vld [vmem:[%s2237_s11 + $0x480] sm:$0xff]  ;;  %v486_v9 = vld [vmem:[%s2237_s11 + $0x4a8] sm:$0xff] }
  0x68   : > { %v575_v12 = vpack.c.bf16 %v495_v7, %v490_v6  ;;  %v571_v13 = vpack.c.bf16 %v486_v9, %v481_v8 }
  0x6d   : > { %1011 = vmatmul.mubr.bf16.gmra.mxu0 %v537_v18  ;;  %1140 = vmatmul.mubr.bf16.gmra.mxu1 %v519_v19  ;;  %v439_v18 = vld [vmem:[%s2237_s11 + $0x330] sm:$0xff]  ;;  %v444_v19 = vld [vmem:[%s2237_s11 + $0x358] sm:$0xff] }
  0x6e   : > { %1018 = vmatprep.mubr.bf16.mxu0 %v543_v20  ;;  %1147 = vmatprep.mubr.bf16.mxu1 %v525_v21  ;;  %v391_v20 = vld [vmem:[%s2237_s11 + $0x1b0] sm:$0xff]  ;;  %v396_v21 = vld [vmem:[%s2237_s11 + $0x1d8] sm:$0xff]  ;;  %v549_v26 = vpack.c.bf16 %v444_v19, %v439_v18 }
  0x6f   : > { %v526_v27 = vpack.c.bf16 %v396_v21, %v391_v20  ;;  %v2165_v20 = vmov 0.0  }
  0x70   : > { %275 = vst.msk [vmem:[#allocation2 + $0x10] sm:$0xff] %vm272_vm0, %v2165_v20  ;;  %273 = vst.msk [vmem:[#allocation2] sm:$0xff] %vm272_vm0, %v2165_v20 }
  0x71   : > { %274 = vst.msk [vmem:[#allocation2 + $0x8] sm:$0xff] %vm272_vm0, %v2165_v20  ;;  %276 = vst.msk [vmem:[#allocation2 + $0x18] sm:$0xff] %vm272_vm0, %v2165_v20 }
  0x72   : > { %277 = vst.msk [vmem:[#allocation2 + $0x20] sm:$0xff] %vm272_vm0, %v2165_v20  ;;  %278 = vst.msk [vmem:[#allocation2 + $0x28] sm:$0xff] %vm272_vm0, %v2165_v20 }
  0x73   : > { %279 = vst.msk [vmem:[#allocation2 + $0x30] sm:$0xff] %vm272_vm0, %v2165_v20  ;;  %280 = vst.msk [vmem:[#allocation2 + $0x38] sm:$0xff] %vm272_vm0, %v2165_v20 }
  0x74   : > { %281 = vst.msk [vmem:[#allocation2 + $0x40] sm:$0xff] %vm272_vm0, %v2165_v20  ;;  %282 = vst.msk [vmem:[#allocation2 + $0x48] sm:$0xff] %vm272_vm0, %v2165_v20 }
  0x75   : > { %1019 = vmatmul.mubr.bf16.gmra.mxu0 %v542_v30  ;;  %1148 = vmatmul.mubr.bf16.gmra.mxu1 %v524_v31  ;;  %v449_v30 = vld [vmem:[%s2237_s11 + $0x380] sm:$0xff]  ;;  %v454_v31 = vld [vmem:[%s2237_s11 + $0x3a8] sm:$0xff]  ;;  %283 = vst.msk [vmem:[#allocation2 + $0x50] sm:$0xff] %vm272_vm0, %v2165_v20  ;;  %284 = vst.msk [vmem:[#allocation2 + $0x58] sm:$0xff] %vm272_vm0, %v2165_v20 }
  0x76   : > { %1026 = vmatprep.mubr.bf16.mxu0 %v548_v32  ;;  %1155 = vmatprep.mubr.bf16.mxu1 %v530_v33  ;;  %v411_v32 = vld [vmem:[%s2237_s11 + $0x250] sm:$0xff]  ;;  %v416_v33 = vld [vmem:[%s2237_s11 + $0x278] sm:$0xff]  ;;  %v554_v38 = vpack.c.bf16 %v454_v31, %v449_v30  ;;  %285 = vst.msk [vmem:[#allocation2 + $0x60] sm:$0xff] %vm272_vm0, %v2165_v20  ;;  %286 = vst.msk [vmem:[#allocation2 + $0x68] sm:$0xff] %vm272_vm0, %v2165_v20 }
  0x77   : > { %v536_v39 = vpack.c.bf16 %v416_v33, %v411_v32  ;;  %287 = vst.msk [vmem:[#allocation2 + $0x70] sm:$0xff] %vm272_vm0, %v2165_v20  ;;  %288 = vst.msk [vmem:[#allocation2 + $0x78] sm:$0xff] %vm272_vm0, %v2165_v20 }
  0x78   : > { %289 = vst.msk [vmem:[#allocation2 + $0x80] sm:$0xff] %vm272_vm0, %v2165_v20  ;;  %290 = vst.msk [vmem:[#allocation2 + $0x88] sm:$0xff] %vm272_vm0, %v2165_v20 }
  0x79   : > { %291 = vst.msk [vmem:[#allocation2 + $0x90] sm:$0xff] %vm272_vm0, %v2165_v20  ;;  %292 = vst.msk [vmem:[#allocation2 + $0x98] sm:$0xff] %vm272_vm0, %v2165_v20 }
  0x7a   : > { %293 = vst.msk [vmem:[#allocation2 + $0xa0] sm:$0xff] %vm272_vm0, %v2165_v20  ;;  %294 = vst.msk [vmem:[#allocation2 + $0xa8] sm:$0xff] %vm272_vm0, %v2165_v20 }
  0x7b   : > { %295 = vst.msk [vmem:[#allocation2 + $0xb0] sm:$0xff] %vm272_vm0, %v2165_v20  ;;  %296 = vst.msk [vmem:[#allocation2 + $0xb8] sm:$0xff] %vm272_vm0, %v2165_v20 }
  0x7c   : > { %297 = vst.msk [vmem:[#allocation2 + $0xc0] sm:$0xff] %vm272_vm0, %v2165_v20  ;;  %298 = vst.msk [vmem:[#allocation2 + $0xc8] sm:$0xff] %vm272_vm0, %v2165_v20 }
  0x7d   : > { %1027 = vmatmul.mubr.bf16.gmra.mxu0 %v547_v42  ;;  %1156 = vmatmul.mubr.bf16.gmra.mxu1 %v529_v43  ;;  %v459_v42 = vld [vmem:[%s2237_s11 + $0x3d0] sm:$0xff]  ;;  %v464_v43 = vld [vmem:[%s2237_s11 + $0x3f8] sm:$0xff]  ;;  %299 = vst.msk [vmem:[#allocation2 + $0xd0] sm:$0xff] %vm272_vm0, %v2165_v20  ;;  %300 = vst.msk [vmem:[#allocation2 + $0xd8] sm:$0xff] %vm272_vm0, %v2165_v20 }
  0x7e   : > { %1034 = vmatprep.mubr.bf16.mxu0 %v553_v44  ;;  %1163 = vmatprep.mubr.bf16.mxu1 %v535_v45  ;;  %v431_v44 = vld [vmem:[%s2237_s11 + $0x2f0] sm:$0xff]  ;;  %v436_v45 = vld [vmem:[%s2237_s11 + $0x318] sm:$0xff]  ;;  %v559_v50 = vpack.c.bf16 %v464_v43, %v459_v42  ;;  %301 = vst.msk [vmem:[#allocation2 + $0xe0] sm:$0xff] %vm272_vm0, %v2165_v20  ;;  %302 = vst.msk [vmem:[#allocation2 + $0xe8] sm:$0xff] %vm272_vm0, %v2165_v20 }
  0x7f   : > { %v546_v51 = vpack.c.bf16 %v436_v45, %v431_v44  ;;  %303 = vst.msk [vmem:[#allocation2 + $0xf0] sm:$0xff] %vm272_vm0, %v2165_v20  ;;  %304 = vst.msk [vmem:[#allocation2 + $0xf8] sm:$0xff] %vm272_vm0, %v2165_v20 }
  0x85   : > { %1035 = vmatmul.mubr.bf16.gmra.mxu0 %v552_v54  ;;  %1164 = vmatmul.mubr.bf16.gmra.mxu1 %v534_v55  ;;  %v469_v54 = vld [vmem:[%s2237_s11 + $0x420] sm:$0xff]  ;;  %v474_v55 = vld [vmem:[%s2237_s11 + $0x448] sm:$0xff] }
  0x86   : > { %1171 = vmatprep.mubr.bf16.mxu1 %v540_v56  ;;  %2031 = vmatprep.mubr.msk.bf16.mxu0 %vm272_vm0, %v501_v57  ;;  %v451_v56 = vld [vmem:[%s2237_s11 + $0x390] sm:$0xff]  ;;  %v456_v57 = vld [vmem:[%s2237_s11 + $0x3b8] sm:$0xff]  ;;  %v564_v62 = vpack.c.bf16 %v474_v55, %v469_v54 }
  0x87   : > { %v556_v63 = vpack.c.bf16 %v456_v57, %v451_v56 }
  0x8d   : > { %1172 = vmatmul.mubr.bf16.gmra.mxu1 %v539_v2  ;;  %2032 = vmatmul.mubr.msk.bf16.vlgmr.msra.gmra.mxu0 %vm272_vm0, %v506_v3  ;;  %v479_v2 = vld [vmem:[%s2237_s11 + $0x470] sm:$0xff]  ;;  %v484_v3 = vld [vmem:[%s2237_s11 + $0x498] sm:$0xff] }
  0x8e   : > { %1179 = vmatprep.mubr.bf16.mxu1 %v545_v4  ;;  %2035 = vmatprep.mubr.msk.bf16.mxu0 %vm272_vm0, %v511_v5  ;;  %v471_v4 = vld [vmem:[%s2237_s11 + $0x430] sm:$0xff]  ;;  %v476_v5 = vld [vmem:[%s2237_s11 + $0x458] sm:$0xff]  ;;  %v569_v10 = vpack.c.bf16 %v484_v3, %v479_v2 }
  0x8f   : > { %v566_v11 = vpack.c.bf16 %v476_v5, %v471_v4 }
  0x95   : > { %1180 = vmatmul.mubr.bf16.gmra.mxu1 %v544_v14  ;;  %2036 = vmatmul.mubr.msk.bf16.gmra.mxu0 %vm272_vm0, %v516_v15  ;;  %v489_v14 = vld [vmem:[%s2237_s11 + $0x4c0] sm:$0xff]  ;;  %v494_v15 = vld [vmem:[%s2237_s11 + $0x4e8] sm:$0xff] }
  0x96   : > { %1187 = vmatprep.mubr.bf16.mxu1 %v550_v16  ;;  %2039 = vmatprep.mubr.msk.bf16.mxu0 %vm272_vm0, %v521_v17  ;;  %v491_v16 = vld [vmem:[%s2237_s11 + $0x4d0] sm:$0xff]  ;;  %v496_v17 = vld [vmem:[%s2237_s11 + $0x4f8] sm:$0xff]  ;;  %v574_v18 = vpack.c.bf16 %v494_v15, %v489_v14 }
  0x97   : > { %v576_v19 = vpack.c.bf16 %v496_v17, %v491_v16 }
  0x9d   : > { %1188 = vmatmul.mubr.bf16.gmra.mxu1 %v549_v26  ;;  %2040 = vmatmul.mubr.msk.bf16.gmra.mxu0 %vm272_vm0, %v526_v27 }
  0x9e   : > { %1195 = vmatprep.mubr.bf16.mxu1 %v555_v28  ;;  %2043 = vmatprep.mubr.msk.bf16.mxu0 %vm272_vm0, %v531_v29 }
  0xa5   : > { %1196 = vmatmul.mubr.bf16.gmra.mxu1 %v554_v38  ;;  %2044 = vmatmul.mubr.msk.bf16.gmra.mxu0 %vm272_vm0, %v536_v39 }
  0xa6   : > { %1203 = vmatprep.mubr.bf16.mxu1 %v560_v40  ;;  %2047 = vmatprep.mubr.msk.bf16.mxu0 %vm272_vm0, %v541_v41 }
  0xad   : > { %1204 = vmatmul.mubr.bf16.gmra.mxu1 %v559_v50  ;;  %2048 = vmatmul.mubr.msk.bf16.gmra.mxu0 %vm272_vm0, %v546_v51 }
  0xae   : > { %1211 = vmatprep.mubr.bf16.mxu1 %v565_v52  ;;  %2051 = vmatprep.mubr.msk.bf16.mxu0 %vm272_vm0, %v551_v53 }
  0xb5   : > { %1212 = vmatmul.mubr.bf16.gmra.mxu1 %v564_v62  ;;  %2052 = vmatmul.mubr.msk.bf16.gmra.mxu0 %vm272_vm0, %v556_v63 }
  0xb6   : > { %1219 = vmatprep.mubr.bf16.mxu1 %v570_v0  ;;  %2055 = vmatprep.mubr.msk.bf16.mxu0 %vm272_vm0, %v561_v1 }
  0xbd   : > { %1220 = vmatmul.mubr.bf16.gmra.mxu1 %v569_v10  ;;  %2056 = vmatmul.mubr.msk.bf16.gmra.mxu0 %vm272_vm0, %v566_v11 }
  0xbe   : > { %1227 = vmatprep.mubr.bf16.mxu1 %v575_v12  ;;  %2059 = vmatprep.mubr.msk.bf16.mxu0 %vm272_vm0, %v571_v13 }
  0xc5   : > { %1228 = vmatmul.mubr.bf16.gmra.mxu1 %v574_v18  ;;  %2060 = vmatmul.mubr.msk.bf16.gmra.mxu0 %vm272_vm0, %v576_v19 }
  0xed   : > { %v1795_v21 = vpop.f32.mrf.mxu0  ;;  %v1867_v22 = vpop.f32.mrf.mxu1 }
  0xef   : > { %v1796_v23 = vpop.f32.mrf.mxu0  ;;  %v1868_v24 = vpop.f32.mrf.mxu1 }
  0xf0   : > { %v2528_v25 = vadd.f32 %v1796_v23, %v1795_v21  ;;  %v2530_v26 = vadd.f32 %v1868_v24, %v1867_v22 }
  0xf1   : > { %v1798_v27 = vpop.f32.mrf.mxu0  ;;  %v1870_v28 = vpop.f32.mrf.mxu1 }
  0xf2   : > { %2932 = vst [vmem:[#allocation3_spill] sm:$0xff] %v2530_v26 }
  0xf3   : > { %v1799_v29 = vpop.f32.mrf.mxu0  ;;  %v1871_v30 = vpop.f32.mrf.mxu1 }
  0xf4   : > { %v2532_v31 = vadd.f32 %v1799_v29, %v1798_v27  ;;  %v2534_v32 = vadd.f32 %v1871_v30, %v1870_v28 }
  0xf5   : > { %v1801_v33 = vpop.f32.mrf.mxu0  ;;  %v1873_v34 = vpop.f32.mrf.mxu1 }
  0xf6   : > { %2933 = vst [vmem:[#allocation4_spill] sm:$0xff] %v2534_v32 }
  0xf7   : > { %v1802_v35 = vpop.f32.mrf.mxu0  ;;  %v1874_v36 = vpop.f32.mrf.mxu1 }
  0xf8   : > { %v2536_v37 = vadd.f32 %v1802_v35, %v1801_v33  ;;  %v2538_v38 = vadd.f32 %v1874_v36, %v1873_v34 }
  0xf9   : > { %v1804_v39 = vpop.f32.mrf.mxu0  ;;  %v1876_v40 = vpop.f32.mrf.mxu1 }
  0xfa   : > { %2934 = vst [vmem:[#allocation5_spill] sm:$0xff] %v2538_v38 }
  0xfb   : > { %v1805_v41 = vpop.f32.mrf.mxu0  ;;  %v1877_v42 = vpop.f32.mrf.mxu1 }
  0xfc   : > { %v2540_v43 = vadd.f32 %v1805_v41, %v1804_v39  ;;  %v2542_v44 = vadd.f32 %v1877_v42, %v1876_v40 }
  0xfd   : > { %v1807_v45 = vpop.f32.mrf.mxu0  ;;  %v1879_v46 = vpop.f32.mrf.mxu1 }
  0xfe   : > { %2935 = vst [vmem:[#allocation6_spill] sm:$0xff] %v2542_v44 }
  0xff   : > { %v1808_v47 = vpop.f32.mrf.mxu0  ;;  %v1880_v48 = vpop.f32.mrf.mxu1 }
 0x100   : > { %v2544_v49 = vadd.f32 %v1808_v47, %v1807_v45  ;;  %v2546_v50 = vadd.f32 %v1880_v48, %v1879_v46 }
 0x101   : > { %v1810_v51 = vpop.f32.mrf.mxu0  ;;  %v1882_v52 = vpop.f32.mrf.mxu1 }
 0x102   : > { %2936 = vst [vmem:[#allocation7_spill] sm:$0xff] %v2546_v50 }
 0x103   : > { %v1811_v53 = vpop.f32.mrf.mxu0  ;;  %v1883_v54 = vpop.f32.mrf.mxu1 }
 0x104   : > { %v2548_v55 = vadd.f32 %v1811_v53, %v1810_v51  ;;  %v2550_v56 = vadd.f32 %v1883_v54, %v1882_v52 }
 0x105   : > { %v1813_v57 = vpop.f32.mrf.mxu0  ;;  %v1885_v58 = vpop.f32.mrf.mxu1 }
 0x106   : > { %2937 = vst [vmem:[#allocation8_spill] sm:$0xff] %v2550_v56 }
 0x107   : > { %v1814_v59 = vpop.f32.mrf.mxu0  ;;  %v1886_v60 = vpop.f32.mrf.mxu1 }
 0x108   : > { %v2552_v61 = vadd.f32 %v1814_v59, %v1813_v57  ;;  %v2554_v62 = vadd.f32 %v1886_v60, %v1885_v58 }
 0x109   : > { %v1816_v63 = vpop.f32.mrf.mxu0  ;;  %v1888_v0 = vpop.f32.mrf.mxu1 }
 0x10a   : > { %2938 = vst [vmem:[#allocation9_spill] sm:$0xff] %v2554_v62 }
 0x10b   : > { %v1817_v1 = vpop.f32.mrf.mxu0  ;;  %v1889_v2 = vpop.f32.mrf.mxu1 }
 0x10c   : > { %v2556_v3 = vadd.f32 %v1817_v1, %v1816_v63  ;;  %v2558_v4 = vadd.f32 %v1889_v2, %v1888_v0 }
 0x10d   : > { %v1819_v5 = vpop.f32.mrf.mxu0  ;;  %v2560_v6 = vpop.f32.mrf.mxu1 }
 0x10e   : > { %2939 = vst [vmem:[#allocation10_spill] sm:$0xff] %v2558_v4 }
 0x10f   : > { %v1820_v7 = vpop.f32.mrf.mxu0  ;;  %v2562_v8 = vpop.f32.mrf.mxu1 }
 0x110   : > { %v2564_v9 = vadd.f32 %v1820_v7, %v1819_v5 }
 0x111   : > { %v1822_v10 = vpop.f32.mrf.mxu0  ;;  %v2566_v11 = vpop.f32.mrf.mxu1 }
 0x113   : > { %v1823_v12 = vpop.f32.mrf.mxu0  ;;  %v2568_v13 = vpop.f32.mrf.mxu1 }
 0x114   : > { %v2570_v14 = vadd.f32 %v1823_v12, %v1822_v10 }
 0x115   : > { %v1825_v15 = vpop.f32.mrf.mxu0  ;;  %v1913_v16 = vpop.f32.mrf.mxu1 }
 0x117   : > { %v1826_v17 = vpop.f32.mrf.mxu0  ;;  %v1914_v18 = vpop.f32.mrf.mxu1 }
 0x118   : > { %v2572_v19 = vadd.f32 %v1826_v17, %v1825_v15  ;;  %v1915_v26 = vadd.f32 %v1914_v18, %v1913_v16  ;;  %v1912_v16 = vadd.f32 %v2568_v13, %v2566_v11 }
 0x119   : > { %v1828_v20 = vpop.f32.mrf.mxu0  ;;  %v1916_v21 = vpop.f32.mrf.mxu1 }
 0x11a   : > { %v1113_v11 = vadd.f32 %v1912_v16, %v2532_v31 }
 0x11b   : > { %v1829_v22 = vpop.f32.mrf.mxu0  ;;  %v1917_v23 = vpop.f32.mrf.mxu1 }
 0x11c   : > { %v2574_v24 = vadd.f32 %v1829_v22, %v1828_v20 }
 0x11d   : > { %v1831_v27 = vpop.f32.mrf.mxu0  ;;  %v2576_v28 = vpop.f32.mrf.mxu1 }
 0x11f   : > { %v1832_v29 = vpop.f32.mrf.mxu0  ;;  %v2578_v30 = vpop.f32.mrf.mxu1 }
 0x120   : > { %v2580_v33 = vadd.f32 %v1832_v29, %v1831_v27 }
 0x121   : > { %v1834_v34 = vpop.f32.mrf.mxu0  ;;  %v2582_v35 = vpop.f32.mrf.mxu1 }
 0x123   : > { %v1835_v36 = vpop.f32.mrf.mxu0  ;;  %v2584_v39 = vpop.f32.mrf.mxu1 }
 0x124   : > { %v2586_v40 = vadd.f32 %v1835_v36, %v1834_v34 }
 0x125   : > { %v2588_v41 = vpop.f32.mrf.mxu0  ;;  %v1925_v42 = vpop.f32.mrf.mxu1 }
 0x127   : > { %v2590_v45 = vpop.f32.mrf.mxu0  ;;  %v1926_v46 = vpop.f32.mrf.mxu1 }
 0x129   : > { %v2592_v47 = vpop.f32.mrf.mxu0  ;;  %v2594_v48 = vpop.f32.mrf.mxu1 }
 0x12b   : > { %v2596_v51 = vpop.f32.mrf.mxu0  ;;  %v1929_v52 = vpop.f32.mrf.mxu1 }
 0x12d   : > { %v2598_v53 = vpop.f32.mrf.mxu0  ;;  %v2600_v54 = vpop.f32.mrf.mxu1 }
 0x12e   : > { %2940 = vst [vmem:[#allocation11_spill] sm:$0xff] %v2598_v53 }
 0x12f   : > { %v2602_v57 = vpop.f32.mrf.mxu0  ;;  %v2604_v58 = vpop.f32.mrf.mxu1 }
 0x130   : > { %2941 = vst [vmem:[#allocation12_spill] sm:$0xff] %v2602_v57 }
 0x131   : > { %v2606_v59 = vpop.f32.mrf.mxu0  ;;  %v2608_v60 = vpop.f32.mrf.mxu1 }
 0x132   : > { %2942 = vst [vmem:[#allocation13_spill] sm:$0xff] %v2606_v59 }
 0x133   : > { %v2610_v63 = vpop.f32.mrf.mxu0  ;;  %v2612_v0 = vpop.f32.mrf.mxu1 }
 0x134   : > { %2943 = vst [vmem:[#allocation14_spill] sm:$0xff] %v2610_v63  ;;  %v1918_v63 = vadd.f32 %v1917_v23, %v1916_v21 }
 0x135   : > { %v2614_v1 = vpop.f32.mrf.mxu0  ;;  %v2616_v2 = vpop.f32.mrf.mxu1 }
 0x136   : > { %v1121_v21 = vadd.f32 %v1918_v63, %v2540_v43 }
 0x137   : > { %v2618_v5 = vpop.f32.mrf.mxu0  ;;  %v2620_v7 = vpop.f32.mrf.mxu1 }
 0x138   : > { %v1939_v16 = vadd.f32 %v2620_v7, %v2616_v2  ;;  %v1933_v2 = vadd.f32 %v2604_v58, %v2600_v54  ;;  %v310_v58 = vld [vmem:[#allocation2 + $0x28] sm:$0xff] }
 0x139   : > { %v2622_v10 = vpop.f32.mrf.mxu0  ;;  %v2624_v12 = vpop.f32.mrf.mxu1 }
 0x13a   : > { %2944 = vst [vmem:[#allocation15_spill] sm:$0xff] %v2622_v10 }
 0x13b   : > { %v2626_v15 = vpop.f32.mrf.mxu0  ;;  %v2628_v17 = vpop.f32.mrf.mxu1 }
 0x13c   : > { %2945 = vst [vmem:[#allocation16_spill] sm:$0xff] %v2626_v15  ;;  %v1942_v7 = vadd.f32 %v2628_v17, %v2624_v12  ;;  %v1150_v12 = vadd.f32 %v1939_v16, %v2572_v19 }
 0x13d   : > { %v2630_v20 = vpop.f32.mrf.mxu0  ;;  %v2632_v22 = vpop.f32.mrf.mxu1 }
 0x13e   : > { %2946 = vst [vmem:[#allocation17_spill] sm:$0xff] %v2630_v20 }
 0x13f   : > { %v2634_v27 = vpop.f32.mrf.mxu0  ;;  %v2636_v29 = vpop.f32.mrf.mxu1 }
 0x140   : > { %2947 = vst [vmem:[#allocation18_spill] sm:$0xff] %v2634_v27 }
 0x141   : > { %v2638_v34 = vpop.f32.mrf.mxu0  ;;  %v2640_v36 = vpop.f32.mrf.mxu1 }
 0x142   : > { %2948 = vst [vmem:[#allocation19_spill] sm:$0xff] %v2638_v34  ;;  %v1909_v34 = vadd.f32 %v2562_v8, %v2560_v6  ;;  %v305_v6 = vld [vmem:[#allocation2] sm:$0xff] }
 0x143   : > { %v2642_v4 = vpop.f32.mrf.mxu0  ;;  %v2644_v56 = vpop.f32.mrf.mxu1 }
 0x144   : > { %2949 = vst [vmem:[#allocation20_spill] sm:$0xff] %v2642_v4 }
 0x145   : > { %v2646_v62 = vpop.f32.mrf.mxu0  ;;  %v2648_v50 = vpop.f32.mrf.mxu1 }
 0x146   : > { %2950 = vst [vmem:[#allocation21_spill] sm:$0xff] %v2646_v62  ;;  %v1118_v62 = vadd.f32 %v1915_v26, %v2536_v37  ;;  %v308_v37 = vld [vmem:[#allocation2 + $0x18] sm:$0xff] }
 0x147   : > { %v2650_v32 = vpop.f32.mrf.mxu0  ;;  %v2652_v44 = vpop.f32.mrf.mxu1 }
 0x148   : > { %2951 = vst [vmem:[#allocation22_spill] sm:$0xff] %v2650_v32  ;;  %v307_v32 = vld [vmem:[#allocation2 + $0x10] sm:$0xff]  ;;  %v1951_v16 = vadd.f32 %v2652_v44, %v2648_v50  ;;  %v1945_v44 = vadd.f32 %v2636_v29, %v2632_v22 }
 0x149   : > { %v2654_v38 = vpop.f32.mrf.mxu0  ;;  %v2656_v27 = vpop.f32.mrf.mxu1 }
 0x14a   : > { %2952 = vst [vmem:[#allocation23_spill] sm:$0xff] %v2654_v38  ;;  %v1110_v38 = vadd.f32 %v1909_v34, %v2528_v25 }
 0x14b   : > { %v2660_v20 = vpop.f32.mrf.mxu0  ;;  %v2662_v4 = vpop.f32.mrf.mxu1 }
 0x14c   : > { %2953 = vst [vmem:[#allocation24_spill] sm:$0xff] %v2660_v20  ;;  %v1927_v20 = vadd.f32 %v1926_v46, %v1925_v42  ;;  %v306_v42 = vld [vmem:[#allocation2 + $0x8] sm:$0xff] }
 0x14d   : > { %v2665_v59 = vpop.f32.mrf.mxu1  ;;  %v2033_v15 = vpop.f32.mrf.mxu0 }
 0x14e   : > { %2954 = vst [vmem:[#allocation25_spill] sm:$0xff] %v2665_v59  ;;  %v1279_v18 = vadd.f32 %v2033_v15, %v1118_v62  ;;  %v1921_v59 = vadd.f32 %v2578_v30, %v2576_v28  ;;  %v1134_v63 = vadd.f32 %v1927_v20, %v2552_v61  ;;  %v311_v30 = vld [vmem:[#allocation2 + $0x30] sm:$0xff]  ;;  %v309_v61 = vld [vmem:[#allocation2 + $0x20] sm:$0xff] }
 0x14f   : > { %v2670_v10 = vpop.f32.mrf.mxu1  ;;  %v1270_v8 = vpop.f32.mrf.mxu0 }
 0x150   : > { %v1399_v57 = vadd.f32 %v1279_v18, %v307_v32  ;;  %v1271_v53 = vadd.f32 %v1270_v8, %v1110_v38  ;;  %v1930_v38 = vadd.f32 %v1929_v52, %v2594_v48  ;;  %v1126_v15 = vadd.f32 %v1921_v59, %v2544_v49  ;;  %v2693_v52 = vld [vmem:[%s2930_s2] ss:$0 sm:$0xff] }
 0x151   : > { %v2673_v26 = vpop.f32.mrf.mxu1  ;;  %v2034_v23 = vpop.f32.mrf.mxu0  ;;  %v1924_v48 = vadd.f32 %v2584_v39, %v2582_v35 }
 0x152   : > { %1431 = vst.msk [vmem:[#allocation2 + $0x10] sm:$0xff] %vm272_vm0, %v1399_v57  ;;  %v1397_v62 = vadd.f32 %v1271_v53, %v305_v6  ;;  %v1282_v25 = vadd.f32 %v2034_v23, %v1121_v21  ;;  %v1137_v59 = vadd.f32 %v1930_v38, %v2556_v3  ;;  %v312_v6 = vld [vmem:[#allocation2 + $0x38] sm:$0xff] }
 0x153   : > { %v2679_v13 = vpop.f32.mrf.mxu1  ;;  %v1273_v32 = vpop.f32.mrf.mxu0 }
 0x154   : > { %1429 = vst.msk [vmem:[#allocation2] sm:$0xff] %vm272_vm0, %v1397_v62  ;;  %v1400_v43 = vadd.f32 %v1282_v25, %v308_v37  ;;  %v1274_v46 = vadd.f32 %v1273_v32, %v1113_v11  ;;  %v1129_v25 = vadd.f32 %v1924_v48, %v2548_v55  ;;  %v1142_v48 = vadd.f32 %v1933_v2, %v2564_v9 }
 0x155   : > { %v2684_v28 = vpop.f32.mrf.mxu1  ;;  %v2037_v53 = vpop.f32.mrf.mxu0 }
 0x156   : > { %1432 = vst.msk [vmem:[#allocation2 + $0x18] sm:$0xff] %vm272_vm0, %v1400_v43  ;;  %v1398_v31 = vadd.f32 %v1274_v46, %v306_v42  ;;  %v1295_v57 = vadd.f32 %v2037_v53, %v1134_v63  ;;  %v315_v46 = vld [vmem:[#allocation2 + $0x50] sm:$0xff] }
 0x157   : > { %v2695_v34 = vpop.f32.mrf.mxu1  ;;  %v1286_v20 = vpop.f32.mrf.mxu0 }
 0x158   : > { %1430 = vst.msk [vmem:[#allocation2 + $0x8] sm:$0xff] %vm272_vm0, %v1398_v31  ;;  %v1403_v18 = vadd.f32 %v1295_v57, %v311_v30  ;;  %v1287_v49 = vadd.f32 %v1286_v20, %v1126_v15  ;;  %v1936_v31 = vadd.f32 %v2612_v0, %v2608_v60  ;;  %v1153_v20 = vadd.f32 %v1942_v7, %v2574_v24  ;;  %v313_v60 = vld [vmem:[#allocation2 + $0x40] sm:$0xff]  ;;  %v316_v24 = vld [vmem:[#allocation2 + $0x58] sm:$0xff] }
 0x159   : > { %v1466_v35 = vld [vmem:[#allocation2 + $0x10] sm:$0xff]  ;;  %v2702_v39 = vpop.f32.mrf.mxu1  ;;  %v2038_v8 = vpop.f32.mrf.mxu0  ;;  %v1839_v0 = vadd.f32 %v2590_v45, %v2588_v41  ;;  %v1954_v45 = vadd.f32 %v2662_v4, %v2656_v27  ;;  %v1948_v4 = vadd.f32 %v2644_v56, %v2640_v36 }
 0x15a   : > { %v1505_v21 = vadd.f32 %v2693_v52, %v1466_v35  ;;  %1435 = vst.msk [vmem:[#allocation2 + $0x30] sm:$0xff] %vm272_vm0, %v1403_v18  ;;  %v1401_v37 = vadd.f32 %v1287_v49, %v309_v61  ;;  %v1298_v23 = vadd.f32 %v2038_v8, %v1137_v59  ;;  %v1145_v7 = vadd.f32 %v1936_v31, %v2570_v14 }
 0x15b   : > { %v1464_v3 = vld [vmem:[#allocation2] sm:$0xff]  ;;  %v2715_v62 = vpop.f32.mrf.mxu1  ;;  %v1289_v11 = vpop.f32.mrf.mxu0 }
 0x15c   : > { %v1537_v42 = vmax.f32 %v1505_v21, 0.0  ;;  %v1503_v32 = vadd.f32 %v2693_v52, %v1464_v3  ;;  %1433 = vst.msk [vmem:[#allocation2 + $0x20] sm:$0xff] %vm272_vm0, %v1401_v37  ;;  %v1404_v54 = vadd.f32 %v1298_v23, %v312_v6  ;;  %v1290_v38 = vadd.f32 %v1289_v11, %v1129_v25  ;;  %v314_v11 = vld [vmem:[#allocation2 + $0x48] sm:$0xff] }
 0x15d   : > { %v1467_v17 = vld [vmem:[#allocation2 + $0x18] sm:$0xff]  ;;  %v2721_v43 = vpop.f32.mrf.mxu1  ;;  %v2041_v63 = vpop.f32.mrf.mxu0 }
 0x15e   : > { %1569 = vst.msk [vmem:[%s2713_s29 + $0x10] sm:$0xff] %vm272_vm0, %v1537_v42  ;;  %v1535_v55 = vmax.f32 %v1503_v32, 0.0  ;;  %v1506_v30 = vadd.f32 %v2693_v52, %v1467_v17  ;;  %1436 = vst.msk [vmem:[#allocation2 + $0x38] sm:$0xff] %vm272_vm0, %v1404_v54  ;;  %v1311_v53 = vadd.f32 %v2041_v63, %v1150_v12  ;;  %v1402_v19 = vadd.f32 %v1290_v38, %v310_v58  ;;  %v319_v58 = vld [vmem:[#allocation2 + $0x70] sm:$0xff] }
 0x15f   : > { %v1465_v57 = vld [vmem:[#allocation2 + $0x8] sm:$0xff]  ;;  %v2729_v15 = vpop.f32.mrf.mxu1  ;;  %v1302_v61 = vpop.f32.mrf.mxu0  ;;  %v1166_v42 = vadd.f32 %v1951_v16, %v1839_v0  ;;  %v1842_v32 = vadd.f32 %v2596_v51, %v2592_v47  ;;  %v1158_v51 = vadd.f32 %v1945_v44, %v2580_v33  ;;  %v320_v16 = vld [vmem:[#allocation2 + $0x78] sm:$0xff] }
 0x160   : > { %1567 = vst.msk [vmem:[%s2713_s29] sm:$0xff] %vm272_vm0, %v1535_v55  ;;  %v1538_v18 = vmax.f32 %v1506_v30, 0.0  ;;  %v1504_v49 = vadd.f32 %v2693_v52, %v1465_v57  ;;  %v1407_v59 = vadd.f32 %v1311_v53, %v315_v46  ;;  %1434 = vst.msk [vmem:[#allocation2 + $0x28] sm:$0xff] %vm272_vm0, %v1402_v19  ;;  %v1303_v9 = vadd.f32 %v1302_v61, %v1142_v48  ;;  %v317_v46 = vld [vmem:[#allocation2 + $0x60] sm:$0xff]  ;;  %v2957_v0 = vld [vmem:[#allocation12_spill] sm:$0xff] }
 0x161   : > { %v1470_v35 = vld [vmem:[#allocation2 + $0x30] sm:$0xff]  ;;  %v2741_v6 = vpop.f32.mrf.mxu1  ;;  %v2042_v8 = vpop.f32.mrf.mxu0  ;;  %v1169_v55 = vadd.f32 %v1954_v45, %v1842_v32  ;;  %v1963_v30 = vadd.f32 %v2695_v34, %v2684_v28  ;;  %v1851_v48 = vadd.f32 %v2618_v5, %v2614_v1  ;;  %v1161_v28 = vadd.f32 %v1948_v4, %v2586_v40 }
 0x162   : > { %1570 = vst.msk [vmem:[%s2713_s29 + $0x18] sm:$0xff] %vm272_vm0, %v1538_v18  ;;  %v1536_v50 = vmax.f32 %v1504_v49, 0.0  ;;  %v1509_v21 = vadd.f32 %v2693_v52, %v1470_v35  ;;  %1439 = vst.msk [vmem:[#allocation2 + $0x50] sm:$0xff] %vm272_vm0, %v1407_v59  ;;  %v1314_v41 = vadd.f32 %v2042_v8, %v1153_v20  ;;  %v1405_v23 = vadd.f32 %v1303_v9, %v313_v60  ;;  %v2955_v34 = vld [vmem:[#allocation25_spill] sm:$0xff]  ;;  %v2956_v60 = vld [vmem:[#allocation11_spill] sm:$0xff] }
 0x163   : > { %v1468_v37 = vld [vmem:[#allocation2 + $0x20] sm:$0xff]  ;;  %v2751_v2 = vpop.f32.mrf.mxu1  ;;  %v1305_v3 = vpop.f32.mrf.mxu0  ;;  %v1957_v49 = vadd.f32 %v2670_v10, %v2955_v34  ;;  %v1845_v35 = vadd.f32 %v2957_v0, %v2956_v60  ;;  %v1966_v9 = vadd.f32 %v2715_v62, %v2702_v39  ;;  %v318_v8 = vld [vmem:[#allocation2 + $0x68] sm:$0xff]  ;;  %v1182_v45 = vadd.f32 %v1963_v30, %v1851_v48  ;;  %v2963_v48 = vld [vmem:[#allocation22_spill] sm:$0xff] }
 0x164   : > { %1568 = vst.msk [vmem:[%s2713_s29 + $0x8] sm:$0xff] %vm272_vm0, %v1536_v50  ;;  %v1541_v22 = vmax.f32 %v1509_v21, 0.0  ;;  %v1507_v29 = vadd.f32 %v2693_v52, %v1468_v37  ;;  %v1408_v25 = vadd.f32 %v1314_v41, %v316_v24  ;;  %1437 = vst.msk [vmem:[#allocation2 + $0x40] sm:$0xff] %vm272_vm0, %v1405_v23  ;;  %v1306_v14 = vadd.f32 %v1305_v3, %v1145_v7  ;;  %v2958_v37 = vld [vmem:[#allocation15_spill] sm:$0xff]  ;;  %v2959_v23 = vld [vmem:[#allocation16_spill] sm:$0xff] }
 0x165   : > { %v1471_v27 = vld [vmem:[#allocation2 + $0x38] sm:$0xff]  ;;  %v2762_v54 = vpop.f32.mrf.mxu1  ;;  %v2045_v12 = vpop.f32.mrf.mxu0  ;;  %v1854_v7 = vadd.f32 %v2959_v23, %v2958_v37  ;;  %v1174_v32 = vadd.f32 %v1957_v49, %v1845_v35  ;;  %v1960_v4 = vadd.f32 %v2679_v13, %v2673_v26  ;;  %v322_v35 = vld [vmem:[#allocation2 + $0x88] sm:$0xff] }
 0x166   : > { %1573 = vst.msk [vmem:[%s2713_s29 + $0x30] sm:$0xff] %vm272_vm0, %v1541_v22  ;;  %v1539_v17 = vmax.f32 %v1507_v29, 0.0  ;;  %v1510_v38 = vadd.f32 %v2693_v52, %v1471_v27  ;;  %1440 = vst.msk [vmem:[#allocation2 + $0x58] sm:$0xff] %vm272_vm0, %v1408_v25  ;;  %v1327_v47 = vadd.f32 %v2045_v12, %v1166_v42  ;;  %v1406_v56 = vadd.f32 %v1306_v14, %v314_v11  ;;  %v323_v22 = vld [vmem:[#allocation2 + $0x90] sm:$0xff] }
 0x167   : > { %v1974_v36 = vpop.f32.mrf.mxu1  ;;  %v1318_v63 = vpop.f32.mrf.mxu0  ;;  %v1469_v31 = vld [vmem:[#allocation2 + $0x28] sm:$0xff] }
 0x168   : > { %1571 = vst.msk [vmem:[%s2713_s29 + $0x20] sm:$0xff] %vm272_vm0, %v1539_v17  ;;  %v1542_v53 = vmax.f32 %v1510_v38, 0.0  ;;  %v1411_v57 = vadd.f32 %v1327_v47, %v319_v58  ;;  %v1319_v19 = vadd.f32 %v1318_v63, %v1158_v51  ;;  %v1508_v33 = vadd.f32 %v2693_v52, %v1469_v31  ;;  %1438 = vst.msk [vmem:[#allocation2 + $0x48] sm:$0xff] %vm272_vm0, %v1406_v56  ;;  %v321_v58 = vld [vmem:[#allocation2 + $0x80] sm:$0xff]  ;;  %v2960_v63 = vld [vmem:[#allocation13_spill] sm:$0xff] }
 0x169   : > { %v1474_v61 = vld [vmem:[#allocation2 + $0x50] sm:$0xff]  ;;  %v2777_v20 = vpop.f32.mrf.mxu1  ;;  %v2046_v18 = vpop.f32.mrf.mxu0  ;;  %v1185_v17 = vadd.f32 %v1966_v9, %v1854_v7  ;;  %v1975_v51 = vadd.f32 %v1974_v36, %v2762_v54  ;;  %v324_v31 = vld [vmem:[#allocation2 + $0x98] sm:$0xff]  ;;  %v1972_v7 = vadd.f32 %v2751_v2, %v2741_v6 }
 0x16a   : > { %1574 = vst.msk [vmem:[%s2713_s29 + $0x38] sm:$0xff] %vm272_vm0, %v1542_v53  ;;  %v1513_v59 = vadd.f32 %v2693_v52, %v1474_v61  ;;  %1443 = vst.msk [vmem:[#allocation2 + $0x70] sm:$0xff] %vm272_vm0, %v1411_v57  ;;  %v1409_v1 = vadd.f32 %v1319_v19, %v317_v46  ;;  %v1330_v5 = vadd.f32 %v2046_v18, %v1169_v55  ;;  %v1540_v24 = vmax.f32 %v1508_v33, 0.0  ;;  %v2961_v55 = vld [vmem:[#allocation14_spill] sm:$0xff]  ;;  %v2962_v19 = vld [vmem:[#allocation21_spill] sm:$0xff] }
 0x16b   : > { %v1977_v40 = vpop.f32.mrf.mxu1  ;;  %v1321_v10 = vpop.f32.mrf.mxu0  ;;  %v1472_v50 = vld [vmem:[#allocation2 + $0x40] sm:$0xff]  ;;  %v1848_v30 = vadd.f32 %v2961_v55, %v2960_v63  ;;  %v1863_v33 = vadd.f32 %v2963_v48, %v2962_v19  ;;  %v2970_v48 = vld [vmem:[#allocation5_spill] sm:$0xff] }
 0x16c   : > { %v1545_v44 = vmax.f32 %v1513_v59, 0.0  ;;  %1441 = vst.msk [vmem:[#allocation2 + $0x60] sm:$0xff] %vm272_vm0, %v1409_v1  ;;  %v1412_v21 = vadd.f32 %v1330_v5, %v320_v16  ;;  %v1322_v41 = vadd.f32 %v1321_v10, %v1161_v28  ;;  %1572 = vst.msk [vmem:[%s2713_s29 + $0x28] sm:$0xff] %vm272_vm0, %v1540_v24  ;;  %v1511_v3 = vadd.f32 %v2693_v52, %v1472_v50  ;;  %v2964_v24 = vld [vmem:[#allocation17_spill] sm:$0xff] }
 0x16d   : > { %v1475_v39 = vld [vmem:[#allocation2 + $0x58] sm:$0xff]  ;;  %v2796_v62 = vpop.f32.mrf.mxu1  ;;  %v2049_v29 = vpop.f32.mrf.mxu0  ;;  %v1969_v16 = vadd.f32 %v2729_v15, %v2721_v43  ;;  %v1978_v34 = vadd.f32 %v1977_v40, %v2777_v20  ;;  %v1177_v59 = vadd.f32 %v1960_v4, %v1848_v30  ;;  %v1198_v9 = vadd.f32 %v1975_v51, %v1863_v33  ;;  %v2966_v43 = vld [vmem:[#allocation23_spill] sm:$0xff]  ;;  %v2967_v15 = vld [vmem:[#allocation24_spill] sm:$0xff] }
 0x16e   : > { %1577 = vst.msk [vmem:[%s2713_s29 + $0x50] sm:$0xff] %vm272_vm0, %v1545_v44  ;;  %v1514_v25 = vadd.f32 %v2693_v52, %v1475_v39  ;;  %1444 = vst.msk [vmem:[#allocation2 + $0x78] sm:$0xff] %vm272_vm0, %v1412_v21  ;;  %v1410_v11 = vadd.f32 %v1322_v41, %v318_v8  ;;  %v1343_v42 = vadd.f32 %v2049_v29, %v1182_v45  ;;  %v1543_v27 = vmax.f32 %v1511_v3, 0.0  ;;  %v2965_v8 = vld [vmem:[#allocation18_spill] sm:$0xff]  ;;  %v327_v21 = vld [vmem:[#allocation2 + $0xb0] sm:$0xff] }
 0x16f   : > { %v2804_v14 = vpop.f32.mrf.mxu1  ;;  %v1334_v12 = vpop.f32.mrf.mxu0  ;;  %v1473_v47 = vld [vmem:[#allocation2 + $0x48] sm:$0xff]  ;;  %v1857_v10 = vadd.f32 %v2965_v8, %v2964_v24  ;;  %v1866_v44 = vadd.f32 %v2967_v15, %v2966_v43  ;;  %v328_v51 = vld [vmem:[#allocation2 + $0xb8] sm:$0xff] }
 0x170   : > { %v1546_v38 = vmax.f32 %v1514_v25, 0.0  ;;  %1442 = vst.msk [vmem:[#allocation2 + $0x68] sm:$0xff] %vm272_vm0, %v1410_v11  ;;  %v1415_v56 = vadd.f32 %v1343_v42, %v323_v22  ;;  %v1335_v46 = vadd.f32 %v1334_v12, %v1174_v32  ;;  %1575 = vst.msk [vmem:[%s2713_s29 + $0x40] sm:$0xff] %vm272_vm0, %v1543_v27  ;;  %v1512_v26 = vadd.f32 %v2693_v52, %v1473_v47  ;;  %v2968_v12 = vld [vmem:[#allocation19_spill] sm:$0xff] }
 0x171   : > { %v1478_v13 = vld [vmem:[#allocation2 + $0x70] sm:$0xff]  ;;  %v2813_v53 = vpop.f32.mrf.mxu1  ;;  %v2050_v57 = vpop.f32.mrf.mxu0  ;;  %v1190_v29 = vadd.f32 %v1969_v16, %v1857_v10  ;;  %v1201_v11 = vadd.f32 %v1978_v34, %v1866_v44  ;;  %v1981_v55 = vadd.f32 %v2804_v14, %v2796_v62 }
 0x172   : > { %1578 = vst.msk [vmem:[%s2713_s29 + $0x58] sm:$0xff] %vm272_vm0, %v1546_v38  ;;  %v1517_v54 = vadd.f32 %v2693_v52, %v1478_v13  ;;  %1447 = vst.msk [vmem:[#allocation2 + $0x90] sm:$0xff] %vm272_vm0, %v1415_v56  ;;  %v1413_v36 = vadd.f32 %v1335_v46, %v321_v58  ;;  %v1346_v61 = vadd.f32 %v2050_v57, %v1185_v17  ;;  %v1544_v18 = vmax.f32 %v1512_v26, 0.0  ;;  %v325_v58 = vld [vmem:[#allocation2 + $0xa0] sm:$0xff]  ;;  %v2969_v17 = vld [vmem:[#allocation20_spill] sm:$0xff] }
 0x173   : > { %v1476_v28 = vld [vmem:[#allocation2 + $0x60] sm:$0xff]  ;;  %v1983_v49 = vpop.f32.mrf.mxu1  ;;  %v1337_v1 = vpop.f32.mrf.mxu0  ;;  %v1860_v38 = vadd.f32 %v2969_v17, %v2968_v12 }
 0x174   : > { %v1549_v5 = vmax.f32 %v1517_v54, 0.0  ;;  %v1515_v60 = vadd.f32 %v2693_v52, %v1476_v28  ;;  %1445 = vst.msk [vmem:[#allocation2 + $0x80] sm:$0xff] %vm272_vm0, %v1413_v36  ;;  %v1416_v0 = vadd.f32 %v1346_v61, %v324_v31  ;;  %1576 = vst.msk [vmem:[%s2713_s29 + $0x48] sm:$0xff] %vm272_vm0, %v1544_v18  ;;  %v1338_v40 = vadd.f32 %v1337_v1, %v1177_v59  ;;  %v326_v18 = vld [vmem:[#allocation2 + $0xa8] sm:$0xff]  ;;  %v331_v59 = vld [vmem:[#allocation2 + $0xd0] sm:$0xff] }
 0x175   : > { %v1479_v20 = vld [vmem:[#allocation2 + $0x78] sm:$0xff]  ;;  %v1985_v50 = vpop.f32.mrf.mxu1  ;;  %v2053_v41 = vpop.f32.mrf.mxu0  ;;  %v1193_v57 = vadd.f32 %v1972_v7, %v1860_v38  ;;  %v1984_v14 = vadd.f32 %v1983_v49, %v2813_v53  ;;  %v329_v53 = vld [vmem:[#allocation2 + $0xc0] sm:$0xff] }
 0x176   : > { %1581 = vst.msk [vmem:[%s2713_s29 + $0x70] sm:$0xff] %vm272_vm0, %v1549_v5  ;;  %v1547_v45 = vmax.f32 %v1515_v60, 0.0  ;;  %v1518_v37 = vadd.f32 %v2693_v52, %v1479_v20  ;;  %1448 = vst.msk [vmem:[#allocation2 + $0x98] sm:$0xff] %vm272_vm0, %v1416_v0  ;;  %v1359_v23 = vadd.f32 %v2053_v41, %v1198_v9  ;;  %v1414_v39 = vadd.f32 %v1338_v40, %v322_v35  ;;  %v2971_v35 = vld [vmem:[#allocation3_spill] sm:$0xff]  ;;  %v2972_v20 = vld [vmem:[#allocation6_spill] sm:$0xff] }
 0x177   : > { %v1477_v3 = vld [vmem:[#allocation2 + $0x68] sm:$0xff]  ;;  %v1986_v22 = vpop.f32.mrf.mxu1  ;;  %v1350_v25 = vpop.f32.mrf.mxu0  ;;  %v1206_v9 = vadd.f32 %v1981_v55, %v2971_v35 }
 0x178   : > { %1579 = vst.msk [vmem:[%s2713_s29 + $0x60] sm:$0xff] %vm272_vm0, %v1547_v45  ;;  %v1550_v42 = vmax.f32 %v1518_v37, 0.0  ;;  %v1516_v32 = vadd.f32 %v2693_v52, %v1477_v3  ;;  %v1419_v4 = vadd.f32 %v1359_v23, %v327_v21  ;;  %v1987_v27 = vadd.f32 %v1986_v22, %v1985_v50  ;;  %1446 = vst.msk [vmem:[#allocation2 + $0x88] sm:$0xff] %vm272_vm0, %v1414_v39  ;;  %v332_v45 = vld [vmem:[#allocation2 + $0xd8] sm:$0xff]  ;;  %v2973_v23 = vld [vmem:[#allocation4_spill] sm:$0xff] }
 0x179   : > { %v1482_v47 = vld [vmem:[#allocation2 + $0x90] sm:$0xff]  ;;  %v1351_v6 = vadd.f32 %v1350_v25, %v1190_v29  ;;  %v1988_v2 = vpop.f32.mrf.mxu1  ;;  %v2054_v56 = vpop.f32.mrf.mxu0  ;;  %v1209_v7 = vadd.f32 %v1984_v14, %v2973_v23 }
 0x17a   : > { %1582 = vst.msk [vmem:[%s2713_s29 + $0x78] sm:$0xff] %vm272_vm0, %v1550_v42  ;;  %v1548_v46 = vmax.f32 %v1516_v32, 0.0  ;;  %v1521_v63 = vadd.f32 %v2693_v52, %v1482_v47  ;;  %1451 = vst.msk [vmem:[#allocation2 + $0xb0] sm:$0xff] %vm272_vm0, %v1419_v4  ;;  %v1362_v30 = vadd.f32 %v2054_v56, %v1201_v11  ;;  %v1214_v33 = vadd.f32 %v1987_v27, %v2970_v48  ;;  %v330_v42 = vld [vmem:[#allocation2 + $0xc8] sm:$0xff]  ;;  %v2974_v56 = vld [vmem:[#allocation7_spill] sm:$0xff] }
 0x17b   : > { %v1480_v26 = vld [vmem:[#allocation2 + $0x80] sm:$0xff]  ;;  %v1417_v13 = vadd.f32 %v1351_v6, %v325_v58  ;;  %v1989_v31 = vpop.f32.mrf.mxu1  ;;  %v1353_v19 = vpop.f32.mrf.mxu0 }
 0x17c   : > { %1580 = vst.msk [vmem:[%s2713_s29 + $0x68] sm:$0xff] %vm272_vm0, %v1548_v46  ;;  %v1553_v54 = vmax.f32 %v1521_v63, 0.0  ;;  %v1519_v36 = vadd.f32 %v2693_v52, %v1480_v26  ;;  %v1420_v61 = vadd.f32 %v1362_v30, %v328_v51  ;;  %v1990_v16 = vadd.f32 %v1989_v31, %v1988_v2  ;;  %v333_v26 = vld [vmem:[#allocation2 + $0xe0] sm:$0xff] }
 0x17d   : > { %v1483_v62 = vld [vmem:[#allocation2 + $0x98] sm:$0xff]  ;;  %1449 = vst.msk [vmem:[#allocation2 + $0xa0] sm:$0xff] %vm272_vm0, %v1417_v13  ;;  %v1354_v28 = vadd.f32 %v1353_v19, %v1193_v57  ;;  %v1991_v34 = vpop.f32.mrf.mxu1  ;;  %v2057_v1 = vpop.f32.mrf.mxu0 }
 0x17e   : > { %1585 = vst.msk [vmem:[%s2713_s29 + $0x90] sm:$0xff] %vm272_vm0, %v1553_v54  ;;  %v1551_v5 = vmax.f32 %v1519_v36, 0.0  ;;  %v1522_v60 = vadd.f32 %v2693_v52, %v1483_v62  ;;  %1452 = vst.msk [vmem:[#allocation2 + $0xb8] sm:$0xff] %vm272_vm0, %v1420_v61  ;;  %v1375_v0 = vadd.f32 %v2057_v1, %v1214_v33  ;;  %v1217_v40 = vadd.f32 %v1990_v16, %v2972_v20  ;;  %v2977_v20 = vld [vmem:[#allocation10_spill] sm:$0xff] }
 0x17f   : > { %v1418_v24 = vadd.f32 %v1354_v28, %v326_v18  ;;  %v1992_v8 = vpop.f32.mrf.mxu1  ;;  %v1366_v49 = vpop.f32.mrf.mxu0  ;;  %v1481_v43 = vld [vmem:[#allocation2 + $0x88] sm:$0xff]  ;;  %v2975_v18 = vld [vmem:[#allocation9_spill] sm:$0xff] }
 0x180   : > { %1583 = vst.msk [vmem:[%s2713_s29 + $0x80] sm:$0xff] %vm272_vm0, %v1551_v5  ;;  %v1554_v10 = vmax.f32 %v1522_v60, 0.0  ;;  %v1423_v15 = vadd.f32 %v1375_v0, %v331_v59  ;;  %v1367_v44 = vadd.f32 %v1366_v49, %v1206_v9  ;;  %v1520_v50 = vadd.f32 %v2693_v52, %v1481_v43  ;;  %v335_v59 = vld [vmem:[#allocation2 + $0xf0] sm:$0xff]  ;;  %v2976_v5 = vld [vmem:[#allocation8_spill] sm:$0xff] }
 0x181   : > { %v1486_v21 = vld [vmem:[#allocation2 + $0xb0] sm:$0xff]  ;;  %1450 = vst.msk [vmem:[#allocation2 + $0xa8] sm:$0xff] %vm272_vm0, %v1418_v24  ;;  %v1994_v41 = vpop.f32.mrf.mxu1  ;;  %v2058_v37 = vpop.f32.mrf.mxu0  ;;  %v1993_v39 = vadd.f32 %v1992_v8, %v1991_v34 }
 0x182   : > { %1586 = vst.msk [vmem:[%s2713_s29 + $0x98] sm:$0xff] %vm272_vm0, %v1554_v10  ;;  %v1525_v3 = vadd.f32 %v2693_v52, %v1486_v21  ;;  %1455 = vst.msk [vmem:[#allocation2 + $0xd0] sm:$0xff] %vm272_vm0, %v1423_v15  ;;  %v1421_v22 = vadd.f32 %v1367_v44, %v329_v53  ;;  %v1378_v29 = vadd.f32 %v2058_v37, %v1217_v40  ;;  %v1552_v25 = vmax.f32 %v1520_v50, 0.0  ;;  %v334_v53 = vld [vmem:[#allocation2 + $0xe8] sm:$0xff]  ;;  %v336_v21 = vld [vmem:[#allocation2 + $0xf8] sm:$0xff] }
 0x183   : > { %v1995_v11 = vpop.f32.mrf.mxu1  ;;  %v1369_v32 = vpop.f32.mrf.mxu0  ;;  %v1222_v46 = vadd.f32 %v1993_v39, %v2974_v56 }
 0x184   : > { %v1557_v4 = vmax.f32 %v1525_v3, 0.0  ;;  %v1484_v27 = vld [vmem:[#allocation2 + $0xa0] sm:$0xff]  ;;  %1453 = vst.msk [vmem:[#allocation2 + $0xc0] sm:$0xff] %vm272_vm0, %v1421_v22  ;;  %v1424_v58 = vadd.f32 %v1378_v29, %v332_v45  ;;  %v1370_v12 = vadd.f32 %v1369_v32, %v1209_v7  ;;  %1584 = vst.msk [vmem:[%s2713_s29 + $0x88] sm:$0xff] %vm272_vm0, %v1552_v25  ;;  %v1996_v55 = vadd.f32 %v1995_v11, %v1994_v41 }
 0x185   : > { %v1523_v17 = vadd.f32 %v2693_v52, %v1484_v27  ;;  %v1487_v38 = vld [vmem:[#allocation2 + $0xb8] sm:$0xff]  ;;  %v1997_v47 = vpop.f32.mrf.mxu1  ;;  %v2061_v6 = vpop.f32.mrf.mxu0 }
 0x186   : > { %1589 = vst.msk [vmem:[%s2713_s29 + $0xb0] sm:$0xff] %vm272_vm0, %v1557_v4  ;;  %v1526_v2 = vadd.f32 %v2693_v52, %v1487_v38  ;;  %1456 = vst.msk [vmem:[#allocation2 + $0xd8] sm:$0xff] %vm272_vm0, %v1424_v58  ;;  %v1422_v51 = vadd.f32 %v1370_v12, %v330_v42  ;;  %v1225_v60 = vadd.f32 %v1996_v55, %v2976_v5 }
 0x187   : > { %v1555_v63 = vmax.f32 %v1523_v17, 0.0  ;;  %v1998_v30 = vpop.f32.mrf.mxu1  ;;  %v1382_v13 = vpop.f32.mrf.mxu0 }
 0x188   : > { %v1558_v31 = vmax.f32 %v1526_v2, 0.0  ;;  %v1485_v57 = vld [vmem:[#allocation2 + $0xa8] sm:$0xff]  ;;  %1454 = vst.msk [vmem:[#allocation2 + $0xc8] sm:$0xff] %vm272_vm0, %v1422_v51  ;;  %v1999_v19 = vadd.f32 %v1998_v30, %v1997_v47  ;;  %v1383_v48 = vadd.f32 %v1382_v13, %v1222_v46 }
 0x189   : > { %1587 = vst.msk [vmem:[%s2713_s29 + $0xa0] sm:$0xff] %vm272_vm0, %v1555_v63  ;;  %v1524_v33 = vadd.f32 %v2693_v52, %v1485_v57  ;;  %v1490_v54 = vld [vmem:[#allocation2 + $0xd0] sm:$0xff]  ;;  %v2000_v36 = vpop.f32.mrf.mxu1  ;;  %v2062_v61 = vpop.f32.mrf.mxu0 }
 0x18a   : > { %1590 = vst.msk [vmem:[%s2713_s29 + $0xb8] sm:$0xff] %vm272_vm0, %v1558_v31  ;;  %v1529_v16 = vadd.f32 %v2693_v52, %v1490_v54  ;;  %v1230_v62 = vadd.f32 %v1999_v19, %v2975_v18  ;;  %v1425_v14 = vadd.f32 %v1383_v48, %v333_v26 }
 0x18b   : > { %v1556_v28 = vmax.f32 %v1524_v33, 0.0  ;;  %v1488_v34 = vld [vmem:[#allocation2 + $0xc0] sm:$0xff]  ;;  %v2001_v1 = vpop.f32.mrf.mxu1  ;;  %v1385_v0 = vpop.f32.mrf.mxu0 }
 0x18c   : > { %v1561_v35 = vmax.f32 %v1529_v16, 0.0  ;;  %v1527_v9 = vadd.f32 %v2693_v52, %v1488_v34  ;;  %v1391_v24 = vadd.f32 %v2061_v6, %v1230_v62  ;;  %1457 = vst.msk [vmem:[#allocation2 + $0xe0] sm:$0xff] %vm272_vm0, %v1425_v14  ;;  %v2002_v8 = vadd.f32 %v2001_v1, %v2000_v36 }
 0x18d   : > { %1588 = vst.msk [vmem:[%s2713_s29 + $0xa8] sm:$0xff] %vm272_vm0, %v1556_v28  ;;  %v1491_v49 = vld [vmem:[#allocation2 + $0xd8] sm:$0xff]  ;;  %v1386_v10 = vadd.f32 %v1385_v0, %v1225_v60 }
 0x18e   : > { %1593 = vst.msk [vmem:[%s2713_s29 + $0xd0] sm:$0xff] %vm272_vm0, %v1561_v35  ;;  %v1559_v43 = vmax.f32 %v1527_v9, 0.0  ;;  %v1530_v15 = vadd.f32 %v2693_v52, %v1491_v49  ;;  %v1427_v44 = vadd.f32 %v1391_v24, %v335_v59  ;;  %v1233_v40 = vadd.f32 %v2002_v8, %v2977_v20 }
 0x18f   : > { %v1489_v50 = vld [vmem:[#allocation2 + $0xc8] sm:$0xff]  ;;  %v1426_v41 = vadd.f32 %v1386_v10, %v334_v53 }
 0x190   : > { %1591 = vst.msk [vmem:[%s2713_s29 + $0xc0] sm:$0xff] %vm272_vm0, %v1559_v43  ;;  %v1562_v45 = vmax.f32 %v1530_v15, 0.0  ;;  %v1528_v37 = vadd.f32 %v2693_v52, %v1489_v50  ;;  %1459 = vst.msk [vmem:[#allocation2 + $0xf0] sm:$0xff] %vm272_vm0, %v1427_v44  ;;  %v1394_v23 = vadd.f32 %v2062_v61, %v1233_v40 }
 0x191   : > { %1458 = vst.msk [vmem:[#allocation2 + $0xe8] sm:$0xff] %vm272_vm0, %v1426_v41 }
 0x192   : > { %1594 = vst.msk [vmem:[%s2713_s29 + $0xd8] sm:$0xff] %vm272_vm0, %v1562_v45  ;;  %v1560_v7 = vmax.f32 %v1528_v37, 0.0  ;;  %v1428_v3 = vadd.f32 %v1394_v23, %v336_v21 }
 0x193   : > { %v1492_v39 = vld [vmem:[#allocation2 + $0xe0] sm:$0xff] }
 0x194   : > { %1592 = vst.msk [vmem:[%s2713_s29 + $0xc8] sm:$0xff] %vm272_vm0, %v1560_v7  ;;  %v1531_v22 = vadd.f32 %v2693_v52, %v1492_v39  ;;  %1460 = vst.msk [vmem:[#allocation2 + $0xf8] sm:$0xff] %vm272_vm0, %v1428_v3 }
 0x196   : > { %v1563_v29 = vmax.f32 %v1531_v22, 0.0 }
 0x197   : > { %v1494_v25 = vld [vmem:[#allocation2 + $0xf0] sm:$0xff] }
 0x198   : > { %v1533_v11 = vadd.f32 %v2693_v52, %v1494_v25  ;;  %1595 = vst.msk [vmem:[%s2713_s29 + $0xe0] sm:$0xff] %vm272_vm0, %v1563_v29  ;;  %v1493_v42 = vld [vmem:[#allocation2 + $0xe8] sm:$0xff] }
 0x199   : > { %v1532_v32 = vadd.f32 %v2693_v52, %v1493_v42 }
 0x19a   : > { %v1565_v4 = vmax.f32 %v1533_v11, 0.0 }
 0x19b   : > { %v1495_v27 = vld [vmem:[#allocation2 + $0xf8] sm:$0xff]  ;;  %v1564_v58 = vmax.f32 %v1532_v32, 0.0 }
 0x19c   : > { %1597 = vst.msk [vmem:[%s2713_s29 + $0xf0] sm:$0xff] %vm272_vm0, %v1565_v4  ;;  %v1534_v12 = vadd.f32 %v2693_v52, %v1495_v27 }
 0x19d   : > { %1596 = vst.msk [vmem:[%s2713_s29 + $0xe8] sm:$0xff] %vm272_vm0, %v1564_v58 }
 0x19e   : > { %v1566_v17 = vmax.f32 %v1534_v12, 0.0 }
 0x1a0   : > { %1598 = vst.msk [vmem:[%s2713_s29 + $0xf8] sm:$0xff] %vm272_vm0, %v1566_v17 }
 0x1a1 PF: > { %s13_s14 = sadd.s32 1, %s2163_s14   ;;  %s2978_s12 = smov %s2159_s13 }
 0x1a2   : > { %p10_p5 = scmp.ge.s32.totalorder %s13_s14, 4   ;;  %s2979_s13 = smov %s2981_s15 }
 0x1a4   :  { %12 = sbr.rel (!%p10_p5) target bundleno = 2 (0x2), region = 76 }

// kernel: stylegan_refiner_forward.18
= control target key start
LH: loop header
LB: loop body
LE: loop exit
PB: predicated region body
PF: predicated region fallthrough
CT: control target
= control target key end

     0   :  { %vm459_vm0 = vcmask 523264   ;;  %s1622_s1 = inlined_call_operand.vmem [shape: bf16[576,128], index: 1, kind: input, shape index: {}]   ;;  %s1623_s0 = inlined_call_operand.vmem [shape: f32[128,576], index: 0, kind: input, shape index: {}]   ;;  %s1624_s2 = inlined_call_operand.vmem [shape: f32[1,128], index: 2, kind: input, shape index: {}]   ;;  %s1625_s3 = inlined_call_operand.vmem [shape: f32[128,128], index: 3, kind: output, shape index: {}]  }
   0x1   :  { %v1102_v0 = vld [vmem:[%s1622_s1 + $0x78] sm:$0xff]   ;;  %v1106_v4 = vld [vmem:[%s1622_s1 + $0x70] sm:$0xff]   ;;  %v1110_v8 = vld [vmem:[%s1622_s1 + $0x68] sm:$0xff]  }
   0x2   :  { %v1103_v1 = vld [vmem:[%s1622_s1 + $0xf8] sm:$0xff]   ;;  %930 = vmatprep.subr.bf16.mxu0 %v1102_v0  ;;  %v1107_v5 = vld [vmem:[%s1622_s1 + $0xf0] sm:$0xff]   ;;  %v1111_v9 = vld [vmem:[%s1622_s1 + $0xe8] sm:$0xff]  }
   0x3   :  { %v1104_v2 = vld [vmem:[%s1622_s1 + $0x38] sm:$0xff]   ;;  %994 = vmatprep.subr.bf16.mxu1 %v1103_v1  ;;  %v1108_v6 = vld [vmem:[%s1622_s1 + $0x30] sm:$0xff]   ;;  %v1112_v10 = vld [vmem:[%s1622_s1 + $0x28] sm:$0xff]  }
   0x4   :  { %v1105_v3 = vld [vmem:[%s1622_s1 + $0xb8] sm:$0xff]   ;;  %931 = vmatpush3.bf16.msra.mxu0 %v1104_v2  ;;  %v1109_v7 = vld [vmem:[%s1622_s1 + $0xb0] sm:$0xff]   ;;  %v1113_v11 = vld [vmem:[%s1622_s1 + $0xa8] sm:$0xff]  }
   0x5   :  { %995 = vmatpush3.bf16.msra.mxu1 %v1105_v3  ;;  %932 = vmatprep.subr.bf16.mxu0 %v1106_v4  ;;  %v1114_v12 = vld [vmem:[%s1622_s1 + $0x60] sm:$0xff]   ;;  %v1118_v16 = vld [vmem:[%s1622_s1 + $0x58] sm:$0xff]   ;;  %v1122_v20 = vld [vmem:[%s1622_s1 + $0x50] sm:$0xff]  }
   0x6   :  { %996 = vmatprep.subr.bf16.mxu1 %v1107_v5  ;;  %v1115_v13 = vld [vmem:[%s1622_s1 + $0xe0] sm:$0xff]   ;;  %v1119_v17 = vld [vmem:[%s1622_s1 + $0xd8] sm:$0xff]   ;;  %v1123_v21 = vld [vmem:[%s1622_s1 + $0xd0] sm:$0xff]  }
   0x7   :  { %v1116_v14 = vld [vmem:[%s1622_s1 + $0x20] sm:$0xff]   ;;  %v1120_v18 = vld [vmem:[%s1622_s1 + $0x18] sm:$0xff]   ;;  %v1124_v22 = vld [vmem:[%s1622_s1 + $0x10] sm:$0xff]  }
   0x8   :  { %933 = vmatpush3.bf16.msra.mxu0 %v1108_v6  ;;  %v1117_v15 = vld [vmem:[%s1622_s1 + $0xa0] sm:$0xff]   ;;  %v1121_v19 = vld [vmem:[%s1622_s1 + $0x98] sm:$0xff]   ;;  %v1125_v23 = vld [vmem:[%s1622_s1 + $0x90] sm:$0xff]  }
   0x9   :  { %997 = vmatpush3.bf16.msra.mxu1 %v1109_v7  ;;  %934 = vmatprep.subr.bf16.mxu0 %v1110_v8  ;;  %v1126_v24 = vld [vmem:[%s1622_s1 + $0x48] sm:$0xff]   ;;  %v1130_v28 = vld [vmem:[%s1622_s1 + $0x40] sm:$0xff]   ;;  %v57_v33 = vld [vmem:[%s1623_s0 + $0x30] sm:$0xff] }
   0xa   :  { %998 = vmatprep.subr.bf16.mxu1 %v1111_v9  ;;  %v1127_v25 = vld [vmem:[%s1622_s1 + $0xc8] sm:$0xff]   ;;  %v1131_v29 = vld [vmem:[%s1622_s1 + $0xc0] sm:$0xff]   ;;  %v54_v34 = vld [vmem:[%s1623_s0 + $0x18] sm:$0xff] }
   0xb   :  { %v1128_v26 = vld [vmem:[%s1622_s1 + $0x8] sm:$0xff]   ;;  %v1132_v30 = vld [vmem:[%s1622_s1] sm:$0xff]   ;;  %v53_v41 = vld [vmem:[%s1623_s0 + $0x10] sm:$0xff] }
   0xc   :  { %935 = vmatpush3.bf16.msra.mxu0 %v1112_v10  ;;  %v1129_v27 = vld [vmem:[%s1622_s1 + $0x88] sm:$0xff]   ;;  %v1133_v31 = vld [vmem:[%s1622_s1 + $0x80] sm:$0xff]   ;;  %v58_v42 = vld [vmem:[%s1623_s0 + $0x38] sm:$0xff] }
   0xd   :  { %999 = vmatpush3.bf16.msra.mxu1 %v1113_v11  ;;  %936 = vmatprep.subr.bf16.mxu0 %v1114_v12  ;;  %v52_v32 = vld [vmem:[%s1623_s0 + $0x8] sm:$0xff]  ;;  %v59_v36 = vld [vmem:[%s1623_s0 + $0x40] sm:$0xff]  ;;  %v133_v43 = vpack.c.bf16 %v58_v42, %v53_v41  ;;  %v1134_v44 = vld [vmem:[%s1622_s1 + $0x118] sm:$0xff]  }
   0xe   :  { %1000 = vmatprep.subr.bf16.mxu1 %v1115_v13  ;;  %v132_v35 = vpack.c.bf16 %v57_v33, %v52_v32  ;;  %v51_v37 = vld [vmem:[%s1623_s0] sm:$0xff]  ;;  %v56_v38 = vld [vmem:[%s1623_s0 + $0x28] sm:$0xff]  ;;  %v134_v39 = vpack.c.bf16 %v59_v36, %v54_v34  ;;  %v62_v45 = vld [vmem:[%s1623_s0 + $0x58] sm:$0xff] }
   0xf   :  { %v131_v40 = vpack.c.bf16 %v56_v38, %v51_v37  ;;  %v67_v46 = vld [vmem:[%s1623_s0 + $0x80] sm:$0xff]  ;;  %v64_v47 = vld [vmem:[%s1623_s0 + $0x68] sm:$0xff]  ;;  %v69_v48 = vld [vmem:[%s1623_s0 + $0x90] sm:$0xff] }
  0x10   :  { %937 = vmatpush3.bf16.msra.mxu0 %v1116_v14  ;;  %516 = vmatprep.mubr.bf16.mxu0 %v132_v35  ;;  %v137_v49 = vpack.c.bf16 %v67_v46, %v62_v45  ;;  %v139_v50 = vpack.c.bf16 %v69_v48, %v64_v47  ;;  %v61_v51 = vld [vmem:[%s1623_s0 + $0x50] sm:$0xff]  ;;  %v66_v52 = vld [vmem:[%s1623_s0 + $0x78] sm:$0xff]  ;;  %v63_v53 = vld [vmem:[%s1623_s0 + $0x60] sm:$0xff] }
  0x11   :  { %1001 = vmatpush3.bf16.msra.mxu1 %v1117_v15  ;;  %938 = vmatprep.subr.bf16.mxu0 %v1118_v16  ;;  %v68_v54 = vld [vmem:[%s1623_s0 + $0x88] sm:$0xff]  ;;  %v77_v56 = vld [vmem:[%s1623_s0 + $0xd0] sm:$0xff]  ;;  %v74_v57 = vld [vmem:[%s1623_s0 + $0xb8] sm:$0xff]  ;;  %v136_v59 = vpack.c.bf16 %v66_v52, %v61_v51 }
  0x12   :  { %1002 = vmatprep.subr.bf16.mxu1 %v1119_v17  ;;  %613 = vmatprep.mubr.bf16.mxu1 %v134_v39  ;;  %v72_v55 = vld [vmem:[%s1623_s0 + $0xa8] sm:$0xff]  ;;  %v79_v58 = vld [vmem:[%s1623_s0 + $0xe0] sm:$0xff]  ;;  %v138_v60 = vpack.c.bf16 %v68_v54, %v63_v53  ;;  %v1135_v62 = vld [vmem:[%s1622_s1 + $0x110] sm:$0xff]  }
  0x13   :  { %v142_v61 = vpack.c.bf16 %v77_v56, %v72_v55  ;;  %v144_v63 = vpack.c.bf16 %v79_v58, %v74_v57  ;;  %v71_v0 = vld [vmem:[%s1623_s0 + $0xa0] sm:$0xff]  ;;  %v76_v1 = vld [vmem:[%s1623_s0 + $0xc8] sm:$0xff]  ;;  %v73_v2 = vld [vmem:[%s1623_s0 + $0xb0] sm:$0xff] }
  0x14   :  { %939 = vmatpush3.bf16.msra.mxu0 %v1120_v18  ;;  %v78_v3 = vld [vmem:[%s1623_s0 + $0xd8] sm:$0xff]  ;;  %v87_v5 = vld [vmem:[%s1623_s0 + $0x120] sm:$0xff]  ;;  %v84_v6 = vld [vmem:[%s1623_s0 + $0x108] sm:$0xff]  ;;  %v141_v8 = vpack.c.bf16 %v76_v1, %v71_v0 }
  0x15   :  { %1003 = vmatpush3.bf16.msra.mxu1 %v1121_v19  ;;  %940 = vmatprep.subr.bf16.mxu0 %v1122_v20  ;;  %v82_v4 = vld [vmem:[%s1623_s0 + $0xf8] sm:$0xff]  ;;  %v89_v7 = vld [vmem:[%s1623_s0 + $0x130] sm:$0xff]  ;;  %v1136_v9 = vld [vmem:[%s1622_s1 + $0x108] sm:$0xff]   ;;  %v143_v10 = vpack.c.bf16 %v78_v3, %v73_v2 }
  0x16   :  { %1004 = vmatprep.subr.bf16.mxu1 %v1123_v21  ;;  %v147_v11 = vpack.c.bf16 %v87_v5, %v82_v4  ;;  %v149_v12 = vpack.c.bf16 %v89_v7, %v84_v6  ;;  %v81_v13 = vld [vmem:[%s1623_s0 + $0xf0] sm:$0xff]  ;;  %v86_v14 = vld [vmem:[%s1623_s0 + $0x118] sm:$0xff]  ;;  %v83_v15 = vld [vmem:[%s1623_s0 + $0x100] sm:$0xff] }
  0x17   :  { %v88_v16 = vld [vmem:[%s1623_s0 + $0x128] sm:$0xff]  ;;  %v97_v18 = vld [vmem:[%s1623_s0 + $0x170] sm:$0xff]  ;;  %v1137_v19 = vld [vmem:[%s1622_s1 + $0x100] sm:$0xff]  }
  0x18   :  { %941 = vmatpush3.bf16.msra.mxu0 %v1124_v22  ;;  %v92_v17 = vld [vmem:[%s1623_s0 + $0x148] sm:$0xff]  ;;  %v94_v20 = vld [vmem:[%s1623_s0 + $0x158] sm:$0xff]  ;;  %v99_v21 = vld [vmem:[%s1623_s0 + $0x180] sm:$0xff]  ;;  %v146_v22 = vpack.c.bf16 %v86_v14, %v81_v13 }
  0x19   :  { %1005 = vmatpush3.bf16.msra.mxu1 %v1125_v23  ;;  %942 = vmatprep.subr.bf16.mxu0 %v1126_v24  ;;  %v148_v23 = vpack.c.bf16 %v88_v16, %v83_v15  ;;  %v152_v24 = vpack.c.bf16 %v97_v18, %v92_v17  ;;  %v104_v32 = vld [vmem:[%s1623_s0 + $0x1a8] sm:$0xff]  ;;  %v109_v33 = vld [vmem:[%s1623_s0 + $0x1d0] sm:$0xff]  ;;  %v106_v39 = vld [vmem:[%s1623_s0 + $0x1b8] sm:$0xff] }
  0x1a   :  { %1006 = vmatprep.subr.bf16.mxu1 %v1127_v25  ;;  %v154_v25 = vpack.c.bf16 %v99_v21, %v94_v20  ;;  %v159_v37 = vpack.c.bf16 %v109_v33, %v104_v32  ;;  %v101_v38 = vld [vmem:[%s1623_s0 + $0x190] sm:$0xff]  ;;  %v108_v41 = vld [vmem:[%s1623_s0 + $0x1c8] sm:$0xff]  ;;  %v119_v45 = vld [vmem:[%s1623_s0 + $0x220] sm:$0xff] }
  0x1b   :  { %v112_v42 = vld [vmem:[%s1623_s0 + $0x1e8] sm:$0xff]  ;;  %v156_v46 = vpack.c.bf16 %v106_v39, %v101_v38  ;;  %v113_v52 = vld [vmem:[%s1623_s0 + $0x1f0] sm:$0xff]  ;;  %v118_v53 = vld [vmem:[%s1623_s0 + $0x218] sm:$0xff] }
  0x1c   :  { %943 = vmatpush3.bf16.msra.mxu0 %v1128_v26  ;;  %v91_v26 = vld [vmem:[%s1623_s0 + $0x140] sm:$0xff]  ;;  %v116_v51 = vld [vmem:[%s1623_s0 + $0x208] sm:$0xff]  ;;  %v122_v54 = vld [vmem:[%s1623_s0 + $0x238] sm:$0xff] }
  0x1d   :  { %1007 = vmatpush3.bf16.msra.mxu1 %v1129_v27  ;;  %944 = vmatprep.subr.bf16.mxu0 %v1130_v28  ;;  %v96_v27 = vld [vmem:[%s1623_s0 + $0x168] sm:$0xff]  ;;  %v93_v28 = vld [vmem:[%s1623_s0 + $0x150] sm:$0xff]  ;;  %v127_v55 = vld [vmem:[%s1623_s0 + $0x260] sm:$0xff] }
  0x1e   :  { %1008 = vmatprep.subr.bf16.mxu1 %v1131_v29  ;;  %v98_v29 = vld [vmem:[%s1623_s0 + $0x178] sm:$0xff]  ;;  %v151_v34 = vpack.c.bf16 %v96_v27, %v91_v26  ;;  %v124_v56 = vld [vmem:[%s1623_s0 + $0x248] sm:$0xff]  ;;  %v129_v57 = vld [vmem:[%s1623_s0 + $0x270] sm:$0xff] }
  0x1f   :  { %v153_v35 = vpack.c.bf16 %v98_v29, %v93_v28  ;;  %v123_v0 = vld [vmem:[%s1623_s0 + $0x240] sm:$0xff]  ;;  %v128_v1 = vld [vmem:[%s1623_s0 + $0x268] sm:$0xff]  ;;  %v110_v13 = vld [vmem:[%s1623_s0 + $0x1d8] sm:$0xff] }
  0x20   :  { %945 = vmatpush3.bf16.msra.mxu0 %v1132_v30  ;;  %v102_v30 = vld [vmem:[%s1623_s0 + $0x198] sm:$0xff]  ;;  %v55_v2 = vld [vmem:[%s1623_s0 + $0x20] sm:$0xff]  ;;  %v60_v3 = vld [vmem:[%s1623_s0 + $0x48] sm:$0xff]  ;;  %v168_v7 = vpack.c.bf16 %v128_v1, %v123_v0 }
  0x21   :  { %1009 = vmatpush3.bf16.msra.mxu1 %v1133_v31  ;;  %1070 = vmatprep.subr.bf16.mxu0 %v1134_v44  ;;  %v107_v31 = vld [vmem:[%s1623_s0 + $0x1c0] sm:$0xff]  ;;  %v100_v5 = vld [vmem:[%s1623_s0 + $0x188] sm:$0xff] }
  0x22   :  { %1094 = vmatprep.subr.bf16.mxu1 %v1134_v44  ;;  %v157_v36 = vpack.c.bf16 %v107_v31, %v102_v30  ;;  %v95_v4 = vld [vmem:[%s1623_s0 + $0x160] sm:$0xff]  ;;  %v80_v15 = vld [vmem:[%s1623_s0 + $0xe8] sm:$0xff] }
  0x23   :  { %517 = vmatmul.mubr.bf16.vlgmr.msra.gmra.mxu0 %v131_v40  ;;  %v103_v40 = vld [vmem:[%s1623_s0 + $0x1a0] sm:$0xff]  ;;  %v120_v17 = vld [vmem:[%s1623_s0 + $0x228] sm:$0xff] }
  0x24   :  { %614 = vmatmul.mubr.bf16.vlgmr.msra.gmra.mxu1 %v133_v43  ;;  %1071 = vmatpush3.bf16.msra.mxu0 %v1134_v44  ;;  %v117_v43 = vld [vmem:[%s1623_s0 + $0x210] sm:$0xff]  ;;  %v158_v47 = vpack.c.bf16 %v108_v41, %v103_v40  ;;  %v75_v14 = vld [vmem:[%s1623_s0 + $0xc0] sm:$0xff] }
  0x25   :  { %1098 = vmatpush3.bf16.msra.mxu1 %v1134_v44  ;;  %524 = vmatprep.mubr.bf16.mxu0 %v137_v49  ;;  %v114_v44 = vld [vmem:[%s1623_s0 + $0x1f8] sm:$0xff]  ;;  %v162_v48 = vpack.c.bf16 %v117_v43, %v112_v42  ;;  %v115_v16 = vld [vmem:[%s1623_s0 + $0x200] sm:$0xff]  ;;  %v145_v20 = vpack.c.bf16 %v80_v15, %v75_v14 }
  0x26   :  { %621 = vmatprep.mubr.bf16.mxu1 %v139_v50  ;;  %1072 = vmatprep.subr.bf16.mxu0 %v1135_v62  ;;  %v164_v49 = vpack.c.bf16 %v119_v45, %v114_v44  ;;  %v111_v50 = vld [vmem:[%s1623_s0 + $0x1e0] sm:$0xff]  ;;  %v165_v21 = vpack.c.bf16 %v120_v17, %v115_v16 }
  0x27   :  { %1095 = vmatprep.subr.bf16.mxu1 %v1135_v62  ;;  %v161_v58 = vpack.c.bf16 %v116_v51, %v111_v50 }
  0x28   :  { %1073 = vmatpush3.bf16.msra.mxu0 %v1135_v62 }
  0x29   :  { %1099 = vmatpush3.bf16.msra.mxu1 %v1135_v62  ;;  %1074 = vmatprep.subr.bf16.mxu0 %v1136_v9  ;;  %v121_v62 = vld [vmem:[%s1623_s0 + $0x230] sm:$0xff] }
  0x2a   :  { %1096 = vmatprep.subr.bf16.mxu1 %v1136_v9 }
  0x2b   :  { %525 = vmatmul.mubr.bf16.gmra.mxu0 %v136_v59  ;;  %v163_v59 = vpack.c.bf16 %v118_v53, %v113_v52 }
  0x2c   :  { %622 = vmatmul.mubr.bf16.gmra.mxu1 %v138_v60  ;;  %532 = vmatprep.mubr.bf16.mxu0 %v142_v61  ;;  %v167_v60 = vpack.c.bf16 %v127_v55, %v122_v54  ;;  %v169_v61 = vpack.c.bf16 %v129_v57, %v124_v56 }
  0x2d   :  { %629 = vmatprep.mubr.bf16.mxu1 %v144_v63  ;;  %1075 = vmatpush3.bf16.msra.mxu0 %v1136_v9  ;;  %v126_v63 = vld [vmem:[%s1623_s0 + $0x258] sm:$0xff] }
  0x2e   :  { %1100 = vmatpush3.bf16.msra.mxu1 %v1136_v9  ;;  %1076 = vmatprep.subr.bf16.mxu0 %v1137_v19  ;;  %v166_v6 = vpack.c.bf16 %v126_v63, %v121_v62  ;;  %v155_v9 = vpack.c.bf16 %v100_v5, %v95_v4 }
  0x2f   :  { %1097 = vmatprep.subr.bf16.mxu1 %v1137_v19 }
  0x31   :  { %1077 = vmatpush3.bf16.msra.mxu0 %v1137_v19 }
  0x32   :  { %1101 = vmatpush3.bf16.msra.mxu1 %v1137_v19 }
  0x33   :  { %533 = vmatmul.mubr.bf16.gmra.mxu0 %v141_v8  ;;  %v135_v8 = vpack.c.bf16 %v60_v3, %v55_v2 }
  0x34   :  { %630 = vmatmul.mubr.bf16.gmra.mxu1 %v143_v10  ;;  %540 = vmatprep.mubr.bf16.mxu0 %v147_v11  ;;  %v65_v10 = vld [vmem:[%s1623_s0 + $0x70] sm:$0xff]  ;;  %v70_v11 = vld [vmem:[%s1623_s0 + $0x98] sm:$0xff] }
  0x35   :  { %637 = vmatprep.mubr.bf16.mxu1 %v149_v12  ;;  %v105_v12 = vld [vmem:[%s1623_s0 + $0x1b0] sm:$0xff]  ;;  %v140_v18 = vpack.c.bf16 %v70_v11, %v65_v10 }
  0x36   :  { %v160_v19 = vpack.c.bf16 %v110_v13, %v105_v12 }
  0x3b   :  { %541 = vmatmul.mubr.bf16.gmra.mxu0 %v146_v22  ;;  %v85_v22 = vld [vmem:[%s1623_s0 + $0x110] sm:$0xff] }
  0x3c   :  { %638 = vmatmul.mubr.bf16.gmra.mxu1 %v148_v23  ;;  %548 = vmatprep.mubr.bf16.mxu0 %v152_v24  ;;  %v90_v23 = vld [vmem:[%s1623_s0 + $0x138] sm:$0xff]  ;;  %v125_v24 = vld [vmem:[%s1623_s0 + $0x250] sm:$0xff] }
  0x3d   :  { %645 = vmatprep.mubr.bf16.mxu1 %v154_v25  ;;  %v130_v25 = vld [vmem:[%s1623_s0 + $0x278] sm:$0xff]  ;;  %v150_v26 = vpack.c.bf16 %v90_v23, %v85_v22 }
  0x3e   :  { %v170_v27 = vpack.c.bf16 %v130_v25, %v125_v24 }
  0x43   :  { %549 = vmatmul.mubr.bf16.gmra.mxu0 %v151_v34 }
  0x44   :  { %646 = vmatmul.mubr.bf16.gmra.mxu1 %v153_v35  ;;  %556 = vmatprep.mubr.bf16.mxu0 %v157_v36 }
  0x45   :  { %653 = vmatprep.mubr.bf16.mxu1 %v159_v37 }
  0x4b   :  { %557 = vmatmul.mubr.bf16.gmra.mxu0 %v156_v46 }
  0x4c   :  { %654 = vmatmul.mubr.bf16.gmra.mxu1 %v158_v47  ;;  %564 = vmatprep.mubr.bf16.mxu0 %v162_v48 }
  0x4d   :  { %661 = vmatprep.mubr.bf16.mxu1 %v164_v49 }
  0x53   :  { %565 = vmatmul.mubr.bf16.gmra.mxu0 %v161_v58 }
  0x54   :  { %662 = vmatmul.mubr.bf16.gmra.mxu1 %v163_v59  ;;  %572 = vmatprep.mubr.bf16.mxu0 %v167_v60 }
  0x55   :  { %669 = vmatprep.mubr.bf16.mxu1 %v169_v61 }
  0x5b   :  { %573 = vmatmul.mubr.bf16.gmra.mxu0 %v166_v6 }
  0x5c   :  { %670 = vmatmul.mubr.bf16.gmra.mxu1 %v168_v7  ;;  %1078 = vmatprep.mubr.msk.bf16.mxu0 %vm459_vm0, %v135_v8 }
  0x5d   :  { %1086 = vmatprep.mubr.msk.bf16.mxu1 %vm459_vm0, %v155_v9 }
  0x63   :  { %1079 = vmatmul.mubr.msk.bf16.vlgmr.msra.gmra.mxu0 %vm459_vm0, %v140_v18 }
  0x64   :  { %1087 = vmatmul.mubr.msk.bf16.vlgmr.msra.gmra.mxu1 %vm459_vm0, %v160_v19  ;;  %1082 = vmatprep.mubr.msk.bf16.mxu0 %vm459_vm0, %v145_v20 }
  0x65   :  { %1090 = vmatprep.mubr.msk.bf16.mxu1 %vm459_vm0, %v165_v21 }
  0x6b   :  { %1083 = vmatmul.mubr.msk.bf16.gmra.mxu0 %vm459_vm0, %v150_v26 }
  0x6c   :  { %1091 = vmatmul.mubr.msk.bf16.gmra.mxu1 %vm459_vm0, %v170_v27 }
  0xe3   :  { %v946_v28 = vpop.f32.mrf.mxu0 }
  0xe4   :  { %v1010_v29 = vpop.f32.mrf.mxu1 }
  0xe5   :  { %v947_v30 = vpop.f32.mrf.mxu0 }
  0xe6   :  { %v1011_v31 = vpop.f32.mrf.mxu1  ;;  %v948_v21 = vadd.f32 %v947_v30, %v946_v28 }
  0xe7   :  { %v949_v32 = vpop.f32.mrf.mxu0  ;;  %v1012_v22 = vadd.f32 %v1011_v31, %v1010_v29 }
  0xe8   :  { %v1013_v33 = vpop.f32.mrf.mxu1 }
  0xe9   :  { %v950_v34 = vpop.f32.mrf.mxu0  ;;  %v616_v29 = vadd.f32 %v1012_v22, %v948_v21 }
  0xea   :  { %v1014_v35 = vpop.f32.mrf.mxu1  ;;  %v951_v23 = vadd.f32 %v950_v34, %v949_v32 }
  0xeb   :  { %v952_v36 = vpop.f32.mrf.mxu0  ;;  %v1015_v24 = vadd.f32 %v1014_v35, %v1013_v33 }
  0xec   :  { %v1016_v37 = vpop.f32.mrf.mxu1 }
  0xed   :  { %v953_v38 = vpop.f32.mrf.mxu0  ;;  %v619_v31 = vadd.f32 %v1015_v24, %v951_v23 }
  0xee   :  { %v1017_v39 = vpop.f32.mrf.mxu1  ;;  %v954_v26 = vadd.f32 %v953_v38, %v952_v36 }
  0xef   :  { %v955_v40 = vpop.f32.mrf.mxu0  ;;  %v1018_v27 = vadd.f32 %v1017_v39, %v1016_v37 }
  0xf0   :  { %v1019_v41 = vpop.f32.mrf.mxu1 }
  0xf1   :  { %v956_v42 = vpop.f32.mrf.mxu0  ;;  %v624_v35 = vadd.f32 %v1018_v27, %v954_v26 }
  0xf2   :  { %v1020_v43 = vpop.f32.mrf.mxu1 }
  0xf3   :  { %v958_v44 = vpop.f32.mrf.mxu0 }
  0xf4   :  { %v1022_v45 = vpop.f32.mrf.mxu1 }
  0xf5   :  { %v959_v46 = vpop.f32.mrf.mxu0 }
  0xf6   :  { %v1023_v47 = vpop.f32.mrf.mxu1 }
  0xf7   :  { %v1514_v48 = vpop.f32.mrf.mxu0 }
  0xf8   :  { %1626 = vst [vmem:[#allocation3_spill] sm:$0xff] %v1514_v48  ;;  %v1516_v49 = vpop.f32.mrf.mxu1 }
  0xf9   :  { %1627 = vst [vmem:[#allocation4_spill] sm:$0xff] %v1516_v49  ;;  %v962_v50 = vpop.f32.mrf.mxu0  ;;  %v1024_v49 = vadd.f32 %v1023_v47, %v1022_v45 }
  0xfa   :  { %v1026_v51 = vpop.f32.mrf.mxu1 }
  0xfb   :  { %v964_v52 = vpop.f32.mrf.mxu0 }
  0xfc   :  { %v1028_v53 = vpop.f32.mrf.mxu1 }
  0xfd   :  { %v965_v54 = vpop.f32.mrf.mxu0 }
  0xfe   :  { %v1029_v55 = vpop.f32.mrf.mxu1 }
  0xff   :  { %v1518_v56 = vpop.f32.mrf.mxu0  ;;  %v1030_v28 = vadd.f32 %v1029_v55, %v1028_v53  ;;  %v1636_v37 = vld [vmem:[#allocation3_spill] sm:$0xff] }
 0x100   :  { %1628 = vst [vmem:[#allocation5_spill] sm:$0xff] %v1518_v56  ;;  %v1520_v57 = vpop.f32.mrf.mxu1  ;;  %v960_v56 = vadd.f32 %v959_v46, %v958_v44  ;;  %v1535_v38 = vadd.f32 %v962_v50, %v1636_v37  ;;  %v1637_v39 = vld [vmem:[#allocation4_spill] sm:$0xff] }
 0x101   :  { %1629 = vst [vmem:[#allocation6_spill] sm:$0xff] %v1520_v57  ;;  %v1522_v58 = vpop.f32.mrf.mxu0  ;;  %v1021_v57 = vadd.f32 %v1020_v43, %v1019_v41 }
 0x102   :  { %1630 = vst [vmem:[#allocation7_spill] sm:$0xff] %v1522_v58  ;;  %v1524_v59 = vpop.f32.mrf.mxu1  ;;  %v1540_v43 = vadd.f32 %v1024_v49, %v960_v56 }
 0x103   :  { %1631 = vst [vmem:[#allocation8_spill] sm:$0xff] %v1524_v59  ;;  %v970_v60 = vpop.f32.mrf.mxu0  ;;  %v957_v59 = vadd.f32 %v956_v42, %v955_v40  ;;  %v1538_v40 = vadd.f32 %v1026_v51, %v1637_v39 }
 0x104   :  { %v1034_v61 = vpop.f32.mrf.mxu1 }
 0x105   :  { %v971_v62 = vpop.f32.mrf.mxu0  ;;  %v627_v36 = vadd.f32 %v1021_v57, %v957_v59 }
 0x106   :  { %v1035_v63 = vpop.f32.mrf.mxu1  ;;  %v972_v32 = vadd.f32 %v971_v62, %v970_v60 }
 0x107   :  { %v973_v0 = vpop.f32.mrf.mxu0  ;;  %v1036_v34 = vadd.f32 %v1035_v63, %v1034_v61  ;;  %v1638_v62 = vld [vmem:[#allocation5_spill] sm:$0xff] }
 0x108   :  { %v1037_v1 = vpop.f32.mrf.mxu1 }
 0x109   :  { %v974_v2 = vpop.f32.mrf.mxu0  ;;  %v648_v56 = vadd.f32 %v1036_v34, %v972_v32  ;;  %v1639_v63 = vld [vmem:[#allocation7_spill] sm:$0xff] }
 0x10a   :  { %v1038_v3 = vpop.f32.mrf.mxu1  ;;  %v975_v41 = vadd.f32 %v974_v2, %v973_v0  ;;  %v969_v0 = vadd.f32 %v1639_v63, %v1638_v62  ;;  %v1641_v2 = vld [vmem:[#allocation8_spill] sm:$0xff]  ;;  %v635_v63 = vadd.f32 %v1538_v40, %v1535_v38 }
 0x10b   :  { %v976_v4 = vpop.f32.mrf.mxu0  ;;  %v1039_v44 = vadd.f32 %v1038_v3, %v1037_v1  ;;  %v1640_v1 = vld [vmem:[#allocation6_spill] sm:$0xff] }
 0x10c   :  { %v1040_v5 = vpop.f32.mrf.mxu1  ;;  %v1033_v3 = vadd.f32 %v1641_v2, %v1640_v1 }
 0x10d   :  { %v977_v6 = vpop.f32.mrf.mxu0 }
 0x10e   :  { %v1041_v7 = vpop.f32.mrf.mxu1  ;;  %v978_v48 = vadd.f32 %v977_v6, %v976_v4 }
 0x10f   :  { %v979_v8 = vpop.f32.mrf.mxu0 }
 0x110   :  { %v1043_v9 = vpop.f32.mrf.mxu1 }
 0x111   :  { %v980_v10 = vpop.f32.mrf.mxu0 }
 0x112   :  { %v1044_v11 = vpop.f32.mrf.mxu1  ;;  %v981_v45 = vadd.f32 %v980_v10, %v979_v8 }
 0x113   :  { %v982_v12 = vpop.f32.mrf.mxu0  ;;  %v1045_v46 = vadd.f32 %v1044_v11, %v1043_v9 }
 0x114   :  { %v1046_v13 = vpop.f32.mrf.mxu1 }
 0x115   :  { %v983_v14 = vpop.f32.mrf.mxu0  ;;  %v659_v9 = vadd.f32 %v1045_v46, %v981_v45 }
 0x116   :  { %v1047_v15 = vpop.f32.mrf.mxu1 }
 0x117   :  { %v1526_v16 = vpop.f32.mrf.mxu0  ;;  %v1048_v50 = vadd.f32 %v1047_v15, %v1046_v13 }
 0x118   :  { %1632 = vst [vmem:[#allocation9_spill] sm:$0xff] %v1526_v16  ;;  %v1528_v17 = vpop.f32.mrf.mxu1 }
 0x119   :  { %1633 = vst [vmem:[#allocation10_spill] sm:$0xff] %v1528_v17  ;;  %v1530_v18 = vpop.f32.mrf.mxu0  ;;  %v1042_v17 = vadd.f32 %v1041_v7, %v1040_v5 }
 0x11a   :  { %1634 = vst [vmem:[#allocation11_spill] sm:$0xff] %v1530_v18  ;;  %v1532_v19 = vpop.f32.mrf.mxu1 }
 0x11b   :  { %1635 = vst [vmem:[#allocation12_spill] sm:$0xff] %v1532_v19  ;;  %v988_v20 = vpop.f32.mrf.mxu0  ;;  %v966_v19 = vadd.f32 %v965_v54, %v964_v52  ;;  %v1545_v52 = vld [vmem:[%s1624_s2] ss:$0 sm:$0xff]  ;;  %v656_v53 = vadd.f32 %v1042_v17, %v978_v48  ;;  %v984_v54 = vadd.f32 %v983_v14, %v982_v12 }
 0x11c   :  { %v1052_v25 = vpop.f32.mrf.mxu1 }
 0x11d   :  { %v989_v58 = vpop.f32.mrf.mxu0  ;;  %v640_v51 = vadd.f32 %v1030_v28, %v966_v19  ;;  %v664_v14 = vadd.f32 %v1048_v50, %v984_v54 }
 0x11e   :  { %v1053_v16 = vpop.f32.mrf.mxu1  ;;  %v990_v59 = vadd.f32 %v989_v58, %v988_v20  ;;  %v651_v58 = vadd.f32 %v1039_v44, %v975_v41 }
 0x11f   :  { %v991_v18 = vpop.f32.mrf.mxu0  ;;  %v1054_v60 = vadd.f32 %v1053_v16, %v1052_v25 }
 0x120   :  { %v1055_v30 = vpop.f32.mrf.mxu1  ;;  %v1644_v37 = vld [vmem:[#allocation10_spill] sm:$0xff] }
 0x121   :  { %v992_v33 = vpop.f32.mrf.mxu0  ;;  %v672_v20 = vadd.f32 %v1054_v60, %v990_v59  ;;  %v1643_v34 = vld [vmem:[#allocation11_spill] sm:$0xff] }
 0x122   :  { %v1056_v42 = vpop.f32.mrf.mxu1  ;;  %v993_v21 = vadd.f32 %v992_v33, %v991_v18  ;;  %v1642_v18 = vld [vmem:[#allocation9_spill] sm:$0xff]  ;;  %v1645_v39 = vld [vmem:[#allocation12_spill] sm:$0xff] }
 0x123   :  { %v1080_v47 = vpop.f32.mrf.mxu0  ;;  %v1057_v26 = vadd.f32 %v1056_v42, %v1055_v30  ;;  %v987_v33 = vadd.f32 %v1643_v34, %v1642_v18  ;;  %v1051_v41 = vadd.f32 %v1645_v39, %v1644_v37 }
 0x124   :  { %v721_v55 = vadd.f32 %v1080_v47, %v624_v35  ;;  %v1088_v57 = vpop.f32.mrf.mxu1 }
 0x125   :  { %v753_v61 = vadd.f32 %v1088_v57, %v656_v53  ;;  %v712_v49 = vpop.f32.mrf.mxu0 }
 0x126   :  { %v835_v4 = vadd.f32 %v1545_v52, %v721_v55  ;;  %v713_v5 = vadd.f32 %v712_v49, %v616_v29  ;;  %v744_v48 = vpop.f32.mrf.mxu1  ;;  %v643_v55 = vadd.f32 %v1033_v3, %v969_v0 }
 0x127   :  { %v843_v6 = vadd.f32 %v1545_v52, %v753_v61  ;;  %v745_v7 = vadd.f32 %v744_v48, %v648_v56  ;;  %v1081_v8 = vpop.f32.mrf.mxu0  ;;  %v675_v61 = vadd.f32 %v1057_v26, %v993_v21 }
 0x128   :  { %v851_v10 = vmax.f32 %v835_v4, 0.0  ;;  %v833_v11 = vadd.f32 %v1545_v52, %v713_v5  ;;  %v724_v12 = vadd.f32 %v1081_v8, %v627_v36  ;;  %v1089_v13 = vpop.f32.mrf.mxu1  ;;  %v667_v4 = vadd.f32 %v1051_v41, %v987_v33 }
 0x129   :  { %v859_v15 = vmax.f32 %v843_v6, 0.0  ;;  %v841_v16 = vadd.f32 %v1545_v52, %v745_v7  ;;  %v756_v17 = vadd.f32 %v1089_v13, %v659_v9  ;;  %v715_v19 = vpop.f32.mrf.mxu0 }
 0x12a   :  { %867 = vst [vmem:[%s1625_s3 + $0x10] sm:$0xff] %v851_v10  ;;  %v849_v22 = vmax.f32 %v833_v11, 0.0  ;;  %v836_v23 = vadd.f32 %v1545_v52, %v724_v12  ;;  %v716_v24 = vadd.f32 %v715_v19, %v619_v31  ;;  %v747_v25 = vpop.f32.mrf.mxu1 }
 0x12b   :  { %875 = vst [vmem:[%s1625_s3 + $0x50] sm:$0xff] %v859_v15  ;;  %v857_v27 = vmax.f32 %v841_v16, 0.0  ;;  %v844_v28 = vadd.f32 %v1545_v52, %v756_v17  ;;  %v748_v29 = vadd.f32 %v747_v25, %v651_v58  ;;  %v1084_v32 = vpop.f32.mrf.mxu0 }
 0x12c   :  { %865 = vst [vmem:[%s1625_s3] sm:$0xff] %v849_v22  ;;  %v852_v35 = vmax.f32 %v836_v23, 0.0  ;;  %v834_v31 = vadd.f32 %v1545_v52, %v716_v24  ;;  %v737_v30 = vadd.f32 %v1084_v32, %v640_v51  ;;  %v1092_v36 = vpop.f32.mrf.mxu1 }
 0x12d   :  { %873 = vst [vmem:[%s1625_s3 + $0x40] sm:$0xff] %v857_v27  ;;  %v860_v42 = vmax.f32 %v844_v28, 0.0  ;;  %v842_v44 = vadd.f32 %v1545_v52, %v748_v29  ;;  %v769_v45 = vadd.f32 %v1092_v36, %v672_v20  ;;  %v728_v46 = vpop.f32.mrf.mxu0 }
 0x12e   :  { %868 = vst [vmem:[%s1625_s3 + $0x18] sm:$0xff] %v852_v35  ;;  %v850_v47 = vmax.f32 %v834_v31, 0.0  ;;  %v839_v53 = vadd.f32 %v1545_v52, %v737_v30  ;;  %v729_v54 = vadd.f32 %v728_v46, %v1540_v43  ;;  %v760_v50 = vpop.f32.mrf.mxu1 }
 0x12f   :  { %876 = vst [vmem:[%s1625_s3 + $0x58] sm:$0xff] %v860_v42  ;;  %v858_v57 = vmax.f32 %v842_v44, 0.0  ;;  %v847_v51 = vadd.f32 %v1545_v52, %v769_v45  ;;  %v761_v59 = vadd.f32 %v760_v50, %v664_v14  ;;  %v1085_v60 = vpop.f32.mrf.mxu0 }
 0x130   :  { %866 = vst [vmem:[%s1625_s3 + $0x8] sm:$0xff] %v850_v47  ;;  %v855_v49 = vmax.f32 %v839_v53, 0.0  ;;  %v837_v56 = vadd.f32 %v1545_v52, %v729_v54  ;;  %v740_v43 = vadd.f32 %v1085_v60, %v643_v55  ;;  %v1093_v62 = vpop.f32.mrf.mxu1 }
 0x131   :  { %874 = vst [vmem:[%s1625_s3 + $0x48] sm:$0xff] %v858_v57  ;;  %v863_v0 = vmax.f32 %v847_v51, 0.0  ;;  %v845_v1 = vadd.f32 %v1545_v52, %v761_v59  ;;  %v772_v2 = vadd.f32 %v1093_v62, %v675_v61  ;;  %v731_v3 = vpop.f32.mrf.mxu0 }
 0x132   :  { %871 = vst [vmem:[%s1625_s3 + $0x30] sm:$0xff] %v855_v49  ;;  %v853_v5 = vmax.f32 %v837_v56, 0.0  ;;  %v840_v48 = vadd.f32 %v1545_v52, %v740_v43  ;;  %v732_v6 = vadd.f32 %v731_v3, %v635_v63  ;;  %v763_v7 = vpop.f32.mrf.mxu1 }
 0x133   :  { %879 = vst [vmem:[%s1625_s3 + $0x70] sm:$0xff] %v863_v0  ;;  %v861_v38 = vmax.f32 %v845_v1, 0.0  ;;  %v848_v40 = vadd.f32 %v1545_v52, %v772_v2  ;;  %v764_v8 = vadd.f32 %v763_v7, %v667_v4 }
 0x134   :  { %869 = vst [vmem:[%s1625_s3 + $0x20] sm:$0xff] %v853_v5  ;;  %v856_v9 = vmax.f32 %v840_v48, 0.0  ;;  %v838_v58 = vadd.f32 %v1545_v52, %v732_v6 }
 0x135   :  { %877 = vst [vmem:[%s1625_s3 + $0x60] sm:$0xff] %v861_v38  ;;  %v864_v10 = vmax.f32 %v848_v40, 0.0  ;;  %v846_v11 = vadd.f32 %v1545_v52, %v764_v8 }
 0x136   :  { %872 = vst [vmem:[%s1625_s3 + $0x38] sm:$0xff] %v856_v9  ;;  %v854_v12 = vmax.f32 %v838_v58, 0.0 }
 0x137   :  { %880 = vst [vmem:[%s1625_s3 + $0x78] sm:$0xff] %v864_v10  ;;  %v862_v13 = vmax.f32 %v846_v11, 0.0 }
 0x138   :  { %870 = vst [vmem:[%s1625_s3 + $0x28] sm:$0xff] %v854_v12 }
 0x139   :  { %878 = vst [vmem:[%s1625_s3 + $0x68] sm:$0xff] %v862_v13 }

// kernel: stylegan_refiner_forward.20
= control target key start
LH: loop header
LB: loop body
LE: loop exit
PB: predicated region body
PF: predicated region fallthrough
CT: control target
= control target key end

     0   :  { %s158_s0 = inlined_call_operand.vmem [shape: f32[8,2,4,256], index: 0, kind: input, shape index: {}]   ;;  %s159_s1 = inlined_call_operand.vmem [shape: f32[8,4,128], index: 1, kind: output, shape index: {}]  }
   0x1   :  { %v8_v0 = vld [vmem:[%s158_s0] sm:$0xff]  ;;  %v9_v1 = vld [vmem:[%s158_s0 + $0x8] sm:$0xff]  ;;  %v10_v2 = vld [vmem:[%s158_s0 + $0x10] sm:$0xff] }
   0x2   :  { %v24_v3 = vmax.f32 %v8_v0, %v9_v1  ;;  %v11_v4 = vld [vmem:[%s158_s0 + $0x18] sm:$0xff]  ;;  %v12_v5 = vld [vmem:[%s158_s0 + $0x20] sm:$0xff]  ;;  %v13_v6 = vld [vmem:[%s158_s0 + $0x28] sm:$0xff] }
   0x3   :  { %v25_v7 = vmax.f32 %v10_v2, %v11_v4  ;;  %v26_v8 = vmax.f32 %v12_v5, %v13_v6  ;;  %v14_v9 = vld [vmem:[%s158_s0 + $0x30] sm:$0xff]  ;;  %v15_v10 = vld [vmem:[%s158_s0 + $0x38] sm:$0xff]  ;;  %v16_v11 = vld [vmem:[%s158_s0 + $0x40] sm:$0xff] }
   0x4   :  { %v40_v12 = vrot.slane %v24_v3, 4  ;;  %v27_v13 = vmax.f32 %v14_v9, %v15_v10  ;;  %v17_v14 = vld [vmem:[%s158_s0 + $0x48] sm:$0xff]  ;;  %v18_v15 = vld [vmem:[%s158_s0 + $0x50] sm:$0xff]  ;;  %v19_v16 = vld [vmem:[%s158_s0 + $0x58] sm:$0xff] }
   0x5   :  { %v41_v17 = vrot.slane %v25_v7, 4  ;;  %v42_v18 = vrot.slane %v26_v8, 4  ;;  %v28_v19 = vmax.f32 %v16_v11, %v17_v14  ;;  %v29_v20 = vmax.f32 %v18_v15, %v19_v16  ;;  %v20_v21 = vld [vmem:[%s158_s0 + $0x60] sm:$0xff]  ;;  %v21_v22 = vld [vmem:[%s158_s0 + $0x68] sm:$0xff]  ;;  %v22_v23 = vld [vmem:[%s158_s0 + $0x70] sm:$0xff] }
   0x6   :  { %v56_v24 = vmax.f32 %v24_v3, %v40_v12  ;;  %v43_v25 = vrot.slane %v27_v13, 4  ;;  %v30_v26 = vmax.f32 %v20_v21, %v21_v22  ;;  %v23_v27 = vld [vmem:[%s158_s0 + $0x78] sm:$0xff] }
   0x7   :  { %v57_v28 = vmax.f32 %v25_v7, %v41_v17  ;;  %v58_v29 = vmax.f32 %v26_v8, %v42_v18  ;;  %v44_v30 = vrot.slane %v28_v19, 4  ;;  %v45_v31 = vrot.slane %v29_v20, 4 }
   0x8   :  { %64 = vst [vmem:[%s159_s1] sm:$0xf] %v56_v24  ;;  %v59_v32 = vmax.f32 %v27_v13, %v43_v25  ;;  %v46_v33 = vrot.slane %v30_v26, 4  ;;  %v31_v34 = vmax.f32 %v22_v23, %v23_v27 }
   0x9   :  { %65 = vst [vmem:[%s159_s1 + $0x4] sm:$0xf] %v57_v28  ;;  %66 = vst [vmem:[%s159_s1 + $0x8] sm:$0xf] %v58_v29  ;;  %v60_v35 = vmax.f32 %v28_v19, %v44_v30  ;;  %v61_v36 = vmax.f32 %v29_v20, %v45_v31 }
   0xa   :  { %67 = vst [vmem:[%s159_s1 + $0xc] sm:$0xf] %v59_v32  ;;  %v62_v37 = vmax.f32 %v30_v26, %v46_v33  ;;  %v47_v38 = vrot.slane %v31_v34, 4 }
   0xb   :  { %68 = vst [vmem:[%s159_s1 + $0x10] sm:$0xf] %v60_v35  ;;  %69 = vst [vmem:[%s159_s1 + $0x14] sm:$0xf] %v61_v36 }
   0xc   :  { %70 = vst [vmem:[%s159_s1 + $0x18] sm:$0xf] %v62_v37  ;;  %v63_v39 = vmax.f32 %v31_v34, %v47_v38 }
   0xe   :  { %71 = vst [vmem:[%s159_s1 + $0x1c] sm:$0xf] %v63_v39 }

// kernel: stylegan_refiner_forward.19
= control target key start
LH: loop header
LB: loop body
LE: loop exit
PB: predicated region body
PF: predicated region fallthrough
CT: control target
= control target key end

     0   :  { %s1359_s12 = smov 0   ;;  %s1361_s13 = smov 0   ;;  %s1653_s0 = inlined_call_operand.vmem [shape: f32[128,1152], index: 0, kind: input, shape index: {}]   ;;  %s1654_s1 = inlined_call_operand.vmem [shape: bf16[1152,128], index: 1, kind: input, shape index: {}]   ;;  %s1655_s2 = inlined_call_operand.vmem [shape: f32[1,128], index: 2, kind: input, shape index: {}]   ;;  %s1656_s3 = inlined_call_operand.vmem [shape: f32[128,128], index: 3, kind: output, shape index: {}]  }
   0x1   :  { %s1363_s14 = smov 0   ;;  %s1365_s15 = smov 0  }
   0x2   :  { %s1367_s16 = smov 0  }
   0x3 LB: > { %s25_s17 = sadd.s32 1, %s1332_s15  ;;  %p48_p1 = scmp.ne.s32.totalorder %s1324_s13, %s1320_s12  ;;  %s1336_s16 = sphi %s1367_s16, %s13_s16   ;;  %s1332_s15 = sphi %s1365_s15, %s1660_s15   ;;  %s1328_s14 = sphi %s1363_s14, %s1659_s14   ;;  %s1324_s13 = sphi %s1361_s13, %s1658_s13   ;;  %s1320_s12 = sphi %s1359_s12, %s1657_s12  }
   0x4   : > { %p26_p0 = scmp.ge.s32.totalorder %s25_s17, 3  ;;  %p49_p2 = scmp.eq.s32.totalorder %s1336_s16, 0 }
   0x5   : > { %s41_s19 = sadd.s32 1, %s1324_s13  ;;  %p1083_p5 = scmp.ge.s32.totalorder %s1336_s16, 3 }
   0x6   : > { %s1662_s17 = smov (%p26_p0, %s25_s17), 0  ;;  %p50_p3 = por %p49_p2, %p48_p1 }
   0x7   : > { %s37_s18 = ssub.s32 %s1332_s15, %s1662_s17  ;;  %162 = sbr.rel (%p1083_p5) target bundleno = 41 (0x29), region = 20 }
   0x8   : > { %p39_p4 = scmp.eq.s32.totalorder %s37_s18, 0 }
   0xa   : > { %s1394_s20 = scalar_select %p39_p4, %s1324_s13, %s41_s19  }
   0xc   : > { %165 = sbr.rel (!%p50_p3) target bundleno = 41 (0x29), region = 24  ;;  %s167_s21 = sand.u32 (%p50_p3), 1, %s1324_s13  }
   0xd   : > { %s1118_s22 = smul.u32 (%p50_p3), 24, %s1332_s15 }
   0xe   : > { %s1231_s23 = smul.u32 (%p50_p3), 384, %s167_s21 }
   0xf   : > { %s1402_s26 = scalar_lea.vmem (%p50_p3), %s1653_s0, %s1118_s22 }
  0x10   : > { %v188_v0 = vld [vmem:[%s1402_s26] sm:$0xff] (%p50_p3)  ;;  %v190_v1 = vld [vmem:[%s1402_s26 + $0x8] sm:$0xff] (%p50_p3)  ;;  %v192_v2 = vld [vmem:[%s1402_s26 + $0x10] sm:$0xff] (%p50_p3)  ;;  %s1407_s27 = scalar_lea.vmem (%p50_p3), [#allocation3], %s1231_s23 }
  0x11   : > { %189 = vst [vmem:[%s1407_s27] sm:$0xff] %v188_v0  ;;  %191 = vst [vmem:[%s1407_s27 + $0x8] sm:$0xff] %v190_v1  ;;  %v194_v3 = vld [vmem:[%s1402_s26 + $0x48] sm:$0xff]  ;;  %v196_v4 = vld [vmem:[%s1402_s26 + $0x50] sm:$0xff] }
  0x12   : > { %193 = vst [vmem:[%s1407_s27 + $0x10] sm:$0xff] %v192_v2  ;;  %v198_v5 = vld [vmem:[%s1402_s26 + $0x58] sm:$0xff]  ;;  %195 = vst [vmem:[%s1407_s27 + $0x18] sm:$0xff] %v194_v3  ;;  %v200_v6 = vld [vmem:[%s1402_s26 + $0x90] sm:$0xff] }
  0x13   : > { %197 = vst [vmem:[%s1407_s27 + $0x20] sm:$0xff] %v196_v4  ;;  %199 = vst [vmem:[%s1407_s27 + $0x28] sm:$0xff] %v198_v5  ;;  %v202_v7 = vld [vmem:[%s1402_s26 + $0x98] sm:$0xff]  ;;  %v204_v8 = vld [vmem:[%s1402_s26 + $0xa0] sm:$0xff] }
  0x14   : > { %201 = vst [vmem:[%s1407_s27 + $0x30] sm:$0xff] %v200_v6  ;;  %203 = vst [vmem:[%s1407_s27 + $0x38] sm:$0xff] %v202_v7  ;;  %v206_v9 = vld [vmem:[%s1402_s26 + $0xd8] sm:$0xff]  ;;  %v208_v10 = vld [vmem:[%s1402_s26 + $0xe0] sm:$0xff] }
  0x15   : > { %205 = vst [vmem:[%s1407_s27 + $0x40] sm:$0xff] %v204_v8  ;;  %v210_v11 = vld [vmem:[%s1402_s26 + $0xe8] sm:$0xff]  ;;  %207 = vst [vmem:[%s1407_s27 + $0x48] sm:$0xff] %v206_v9  ;;  %v212_v12 = vld [vmem:[%s1402_s26 + $0x120] sm:$0xff] }
  0x16   : > { %209 = vst [vmem:[%s1407_s27 + $0x50] sm:$0xff] %v208_v10  ;;  %211 = vst [vmem:[%s1407_s27 + $0x58] sm:$0xff] %v210_v11  ;;  %v214_v13 = vld [vmem:[%s1402_s26 + $0x128] sm:$0xff]  ;;  %v216_v14 = vld [vmem:[%s1402_s26 + $0x130] sm:$0xff] }
  0x17   : > { %213 = vst [vmem:[%s1407_s27 + $0x60] sm:$0xff] %v212_v12  ;;  %215 = vst [vmem:[%s1407_s27 + $0x68] sm:$0xff] %v214_v13  ;;  %v218_v15 = vld [vmem:[%s1402_s26 + $0x168] sm:$0xff]  ;;  %v220_v16 = vld [vmem:[%s1402_s26 + $0x170] sm:$0xff] }
  0x18   : > { %217 = vst [vmem:[%s1407_s27 + $0x70] sm:$0xff] %v216_v14  ;;  %v222_v17 = vld [vmem:[%s1402_s26 + $0x178] sm:$0xff]  ;;  %219 = vst [vmem:[%s1407_s27 + $0x78] sm:$0xff] %v218_v15  ;;  %v224_v18 = vld [vmem:[%s1402_s26 + $0x1b0] sm:$0xff] }
  0x19   : > { %221 = vst [vmem:[%s1407_s27 + $0x80] sm:$0xff] %v220_v16  ;;  %223 = vst [vmem:[%s1407_s27 + $0x88] sm:$0xff] %v222_v17  ;;  %v226_v19 = vld [vmem:[%s1402_s26 + $0x1b8] sm:$0xff]  ;;  %v228_v20 = vld [vmem:[%s1402_s26 + $0x1c0] sm:$0xff] }
  0x1a   : > { %225 = vst [vmem:[%s1407_s27 + $0x90] sm:$0xff] %v224_v18  ;;  %227 = vst [vmem:[%s1407_s27 + $0x98] sm:$0xff] %v226_v19  ;;  %v230_v21 = vld [vmem:[%s1402_s26 + $0x1f8] sm:$0xff]  ;;  %v232_v22 = vld [vmem:[%s1402_s26 + $0x200] sm:$0xff] }
  0x1b   : > { %229 = vst [vmem:[%s1407_s27 + $0xa0] sm:$0xff] %v228_v20  ;;  %v234_v23 = vld [vmem:[%s1402_s26 + $0x208] sm:$0xff]  ;;  %231 = vst [vmem:[%s1407_s27 + $0xa8] sm:$0xff] %v230_v21  ;;  %v236_v24 = vld [vmem:[%s1402_s26 + $0x240] sm:$0xff] }
  0x1c   : > { %233 = vst [vmem:[%s1407_s27 + $0xb0] sm:$0xff] %v232_v22  ;;  %235 = vst [vmem:[%s1407_s27 + $0xb8] sm:$0xff] %v234_v23  ;;  %v238_v25 = vld [vmem:[%s1402_s26 + $0x248] sm:$0xff]  ;;  %v240_v26 = vld [vmem:[%s1402_s26 + $0x250] sm:$0xff] }
  0x1d   : > { %237 = vst [vmem:[%s1407_s27 + $0xc0] sm:$0xff] %v236_v24  ;;  %239 = vst [vmem:[%s1407_s27 + $0xc8] sm:$0xff] %v238_v25  ;;  %v242_v27 = vld [vmem:[%s1402_s26 + $0x288] sm:$0xff]  ;;  %v244_v28 = vld [vmem:[%s1402_s26 + $0x290] sm:$0xff] }
  0x1e   : > { %241 = vst [vmem:[%s1407_s27 + $0xd0] sm:$0xff] %v240_v26  ;;  %v246_v29 = vld [vmem:[%s1402_s26 + $0x298] sm:$0xff]  ;;  %243 = vst [vmem:[%s1407_s27 + $0xd8] sm:$0xff] %v242_v27  ;;  %v248_v30 = vld [vmem:[%s1402_s26 + $0x2d0] sm:$0xff] }
  0x1f   : > { %245 = vst [vmem:[%s1407_s27 + $0xe0] sm:$0xff] %v244_v28  ;;  %247 = vst [vmem:[%s1407_s27 + $0xe8] sm:$0xff] %v246_v29  ;;  %v250_v31 = vld [vmem:[%s1402_s26 + $0x2d8] sm:$0xff]  ;;  %v252_v32 = vld [vmem:[%s1402_s26 + $0x2e0] sm:$0xff] }
  0x20   : > { %249 = vst [vmem:[%s1407_s27 + $0xf0] sm:$0xff] %v248_v30  ;;  %251 = vst [vmem:[%s1407_s27 + $0xf8] sm:$0xff] %v250_v31  ;;  %v254_v33 = vld [vmem:[%s1402_s26 + $0x318] sm:$0xff]  ;;  %v256_v34 = vld [vmem:[%s1402_s26 + $0x320] sm:$0xff] }
  0x21   : > { %253 = vst [vmem:[%s1407_s27 + $0x100] sm:$0xff] %v252_v32  ;;  %v258_v35 = vld [vmem:[%s1402_s26 + $0x328] sm:$0xff]  ;;  %255 = vst [vmem:[%s1407_s27 + $0x108] sm:$0xff] %v254_v33  ;;  %v260_v36 = vld [vmem:[%s1402_s26 + $0x360] sm:$0xff] }
  0x22   : > { %257 = vst [vmem:[%s1407_s27 + $0x110] sm:$0xff] %v256_v34  ;;  %259 = vst [vmem:[%s1407_s27 + $0x118] sm:$0xff] %v258_v35  ;;  %v262_v37 = vld [vmem:[%s1402_s26 + $0x368] sm:$0xff]  ;;  %v264_v38 = vld [vmem:[%s1402_s26 + $0x370] sm:$0xff] }
  0x23   : > { %261 = vst [vmem:[%s1407_s27 + $0x120] sm:$0xff] %v260_v36  ;;  %263 = vst [vmem:[%s1407_s27 + $0x128] sm:$0xff] %v262_v37  ;;  %v266_v39 = vld [vmem:[%s1402_s26 + $0x3a8] sm:$0xff]  ;;  %v268_v40 = vld [vmem:[%s1402_s26 + $0x3b0] sm:$0xff] }
  0x24   : > { %265 = vst [vmem:[%s1407_s27 + $0x130] sm:$0xff] %v264_v38  ;;  %v270_v41 = vld [vmem:[%s1402_s26 + $0x3b8] sm:$0xff]  ;;  %267 = vst [vmem:[%s1407_s27 + $0x138] sm:$0xff] %v266_v39  ;;  %v272_v42 = vld [vmem:[%s1402_s26 + $0x3f0] sm:$0xff] }
  0x25   : > { %269 = vst [vmem:[%s1407_s27 + $0x140] sm:$0xff] %v268_v40  ;;  %271 = vst [vmem:[%s1407_s27 + $0x148] sm:$0xff] %v270_v41  ;;  %v274_v43 = vld [vmem:[%s1402_s26 + $0x3f8] sm:$0xff]  ;;  %v276_v44 = vld [vmem:[%s1402_s26 + $0x400] sm:$0xff] }
  0x26   : > { %273 = vst [vmem:[%s1407_s27 + $0x150] sm:$0xff] %v272_v42  ;;  %275 = vst [vmem:[%s1407_s27 + $0x158] sm:$0xff] %v274_v43  ;;  %v278_v45 = vld [vmem:[%s1402_s26 + $0x438] sm:$0xff]  ;;  %v280_v46 = vld [vmem:[%s1402_s26 + $0x440] sm:$0xff] }
  0x27   : > { %277 = vst [vmem:[%s1407_s27 + $0x160] sm:$0xff] %v276_v44  ;;  %v282_v47 = vld [vmem:[%s1402_s26 + $0x448] sm:$0xff]  ;;  %279 = vst [vmem:[%s1407_s27 + $0x168] sm:$0xff] %v278_v45 }
  0x28   : > { %281 = vst [vmem:[%s1407_s27 + $0x170] sm:$0xff] %v280_v46  ;;  %283 = vst [vmem:[%s1407_s27 + $0x178] sm:$0xff] %v282_v47 }
  0x29 PF: > { %p1085_p6 = scmp.ge.s32.totalorder %s1336_s16, 1  ;;  %p300_p7 = scmp.lt.s32.totalorder %s1336_s16, 4 }
  0x2b   : > { %p301_p8 = pnand %p1085_p6, %p300_p7 }
  0x2c   : > { %s307_s28 = sand.u32 (!%p301_p8), 1, %s1320_s12   ;;  %s346_s29 = smul.u32 (!%p301_p8), 48, %s1328_s14 }
  0x2d   : > { %304 = sbr.rel (%p301_p8) target bundleno = 372 (0x174), region = 51  ;;  %p1087_p10 = scmp.ne.s32.totalorder (!%p301_p8), %s1328_s14, 0 }
  0x2e   : > { %s1232_s30 = smul.u32 (!%p301_p8), 384, %s307_s28  ;;  %p347_p9 = scmp.lt.s32.totalorder (!%p301_p8), %s346_s29, 143 }
  0x30   : > { %s1511_s8 = scalar_lea.vmem (!%p301_p8), [#allocation3], %s1232_s30 }
  0x32   : > { %s1664_s29 = smov (!%p347_p9, %s346_s29), 143  ;;  %371 = sbr.rel (%p1087_p10) target bundleno = 64 (0x40), region = 59 }
  0x33   : > { %s1086_s4 = sshll.u32 %s1664_s29, 2 }
  0x34   : > { %s1509_s7 = scalar_lea.vmem %s1654_s1, %s1086_s4 }
  0x37   : > { %v1338_v48 = vmov 0.0  }
  0x38   : > { %372 = vst [vmem:[#allocation2 + $0x30] sm:$0xff] %v1338_v48  ;;  %373 = vst [vmem:[#allocation2] sm:$0xff] %v1338_v48 }
  0x39   : > { %374 = vst [vmem:[#allocation2 + $0x58] sm:$0xff] %v1338_v48  ;;  %375 = vst [vmem:[#allocation2 + $0x18] sm:$0xff] %v1338_v48 }
  0x3a   : > { %376 = vst [vmem:[#allocation2 + $0x50] sm:$0xff] %v1338_v48  ;;  %377 = vst [vmem:[#allocation2 + $0x68] sm:$0xff] %v1338_v48 }
  0x3b   : > { %378 = vst [vmem:[#allocation2 + $0x8] sm:$0xff] %v1338_v48  ;;  %379 = vst [vmem:[#allocation2 + $0x48] sm:$0xff] %v1338_v48 }
  0x3c   : > { %380 = vst [vmem:[#allocation2 + $0x40] sm:$0xff] %v1338_v48  ;;  %381 = vst [vmem:[#allocation2 + $0x20] sm:$0xff] %v1338_v48 }
  0x3d   : > { %382 = vst [vmem:[#allocation2 + $0x10] sm:$0xff] %v1338_v48  ;;  %383 = vst [vmem:[#allocation2 + $0x38] sm:$0xff] %v1338_v48 }
  0x3e   : > { %384 = vst [vmem:[#allocation2 + $0x60] sm:$0xff] %v1338_v48  ;;  %385 = vst [vmem:[#allocation2 + $0x70] sm:$0xff] %v1338_v48 }
  0x3f   : > { %386 = vst [vmem:[#allocation2 + $0x78] sm:$0xff] %v1338_v48  ;;  %387 = vst [vmem:[#allocation2 + $0x28] sm:$0xff] %v1338_v48 }
  0x40 PF: > { %v1274_v49 = vld [vmem:[%s1509_s7 + $0x78] sm:$0xff]   ;;  %v1277_v52 = vld [vmem:[%s1509_s7 + $0x70] sm:$0xff]   ;;  %v1280_v55 = vld [vmem:[%s1509_s7 + $0x68] sm:$0xff]   ;;  %p1112_p11 = scmp.ne.s32.totalorder %s1328_s14, 2 }
  0x41   : > { %v1275_v50 = vld [vmem:[%s1509_s7 + $0x38] sm:$0xff]   ;;  %1119 = vmatprep.subr.bf16.mxu0 %v1274_v49  ;;  %v1278_v53 = vld [vmem:[%s1509_s7 + $0x30] sm:$0xff]   ;;  %v1281_v56 = vld [vmem:[%s1509_s7 + $0x28] sm:$0xff]  }
  0x42   : > { %v1276_v51 = vld [vmem:[%s1509_s7 + $0xb8] sm:$0xff]   ;;  %1120 = vmatpush3.bf16.msra.mxu0 %v1275_v50  ;;  %v1279_v54 = vld [vmem:[%s1509_s7 + $0xb0] sm:$0xff]   ;;  %v1282_v57 = vld [vmem:[%s1509_s7 + $0xa8] sm:$0xff]  }
  0x43   : > { %1199 = vmatprep.subr.bf16.mxu1 %v1276_v51  ;;  %1121 = vmatprep.subr.bf16.mxu0 %v1277_v52  ;;  %v1283_v58 = vld [vmem:[%s1509_s7 + $0x60] sm:$0xff]   ;;  %v1286_v61 = vld [vmem:[%s1509_s7 + $0x58] sm:$0xff]   ;;  %v1289_v0 = vld [vmem:[%s1509_s7 + $0x50] sm:$0xff]  }
  0x44   : > { %1200 = vmatpush3.bf16.msra.mxu1 %v1276_v51  ;;  %v1284_v59 = vld [vmem:[%s1509_s7 + $0x20] sm:$0xff]   ;;  %v1288_v62 = vld [vmem:[%s1509_s7 + $0x98] sm:$0xff]   ;;  %v1291_v1 = vld [vmem:[%s1509_s7 + $0x90] sm:$0xff]  }
  0x45   : > { %1201 = vmatprep.subr.bf16.mxu1 %v1279_v54  ;;  %v1285_v60 = vld [vmem:[%s1509_s7 + $0xa0] sm:$0xff]   ;;  %v1287_v63 = vld [vmem:[%s1509_s7 + $0x18] sm:$0xff]   ;;  %v1290_v2 = vld [vmem:[%s1509_s7 + $0x10] sm:$0xff]  }
  0x46   : > { %1122 = vmatpush3.bf16.msra.mxu0 %v1278_v53  ;;  %v1292_v3 = vld [vmem:[%s1509_s7 + $0x48] sm:$0xff]   ;;  %v1295_v6 = vld [vmem:[%s1509_s7 + $0x40] sm:$0xff]   ;;  %v406_v10 = vld [vmem:[%s1511_s8 + $0x10] sm:$0xff] }
  0x47   : > { %1123 = vmatprep.subr.bf16.mxu0 %v1280_v55  ;;  %v1294_v4 = vld [vmem:[%s1509_s7 + $0x88] sm:$0xff]   ;;  %v408_v8 = vld [vmem:[%s1511_s8 + $0x20] sm:$0xff]  ;;  %v407_v16 = vld [vmem:[%s1511_s8 + $0x18] sm:$0xff] }
  0x48   : > { %1202 = vmatpush3.bf16.msra.mxu1 %v1279_v54  ;;  %v1293_v5 = vld [vmem:[%s1509_s7 + $0x8] sm:$0xff]   ;;  %v1297_v12 = vld [vmem:[%s1509_s7 + $0x80] sm:$0xff]   ;;  %v411_v17 = vld [vmem:[%s1511_s8 + $0x38] sm:$0xff] }
  0x49   : > { %1203 = vmatprep.subr.bf16.mxu1 %v1282_v57  ;;  %v405_v7 = vld [vmem:[%s1511_s8 + $0x8] sm:$0xff]  ;;  %v1296_v14 = vld [vmem:[%s1509_s7] sm:$0xff]   ;;  %v414_v18 = vld [vmem:[%s1511_s8 + $0x50] sm:$0xff] }
  0x4a   : > { %1124 = vmatpush3.bf16.msra.mxu0 %v1281_v56  ;;  %v453_v9 = vpack.c.bf16 %v408_v8, %v405_v7  ;;  %v409_v11 = vld [vmem:[%s1511_s8 + $0x28] sm:$0xff]  ;;  %v404_v15 = vld [vmem:[%s1511_s8] sm:$0xff]  ;;  %v415_v20 = vld [vmem:[%s1511_s8 + $0x58] sm:$0xff]  ;;  %v456_v24 = vpack.c.bf16 %v414_v18, %v411_v17 }
  0x4b   : > { %1125 = vmatprep.subr.bf16.mxu0 %v1283_v58  ;;  %v454_v13 = vpack.c.bf16 %v409_v11, %v406_v10  ;;  %v412_v19 = vld [vmem:[%s1511_s8 + $0x40] sm:$0xff]  ;;  %v452_v21 = vpack.c.bf16 %v407_v16, %v404_v15  ;;  %v418_v22 = vld [vmem:[%s1511_s8 + $0x70] sm:$0xff]  ;;  %v421_v23 = vld [vmem:[%s1511_s8 + $0x88] sm:$0xff] }
  0x4c   : > { %1204 = vmatpush3.bf16.msra.mxu1 %v1282_v57  ;;  %700 = vmatprep.mubr.bf16.mxu0 %v453_v9  ;;  %v457_v25 = vpack.c.bf16 %v415_v20, %v412_v19  ;;  %v460_v26 = vpack.c.bf16 %v421_v23, %v418_v22  ;;  %v410_v27 = vld [vmem:[%s1511_s8 + $0x30] sm:$0xff]  ;;  %v413_v28 = vld [vmem:[%s1511_s8 + $0x48] sm:$0xff]  ;;  %v420_v30 = vld [vmem:[%s1511_s8 + $0x80] sm:$0xff] }
  0x4d   : > { %1205 = vmatprep.subr.bf16.mxu1 %v1285_v60  ;;  %1215 = vmatprep.mubr.bf16.mxu1 %v454_v13  ;;  %v417_v29 = vld [vmem:[%s1511_s8 + $0x68] sm:$0xff]  ;;  %v424_v31 = vld [vmem:[%s1511_s8 + $0xa0] sm:$0xff]  ;;  %v427_v32 = vld [vmem:[%s1511_s8 + $0xb8] sm:$0xff]  ;;  %v455_v33 = vpack.c.bf16 %v413_v28, %v410_v27 }
  0x4e   : > { %1126 = vmatpush3.bf16.msra.mxu0 %v1284_v59  ;;  %v430_v34 = vld [vmem:[%s1511_s8 + $0xd0] sm:$0xff]  ;;  %v433_v35 = vld [vmem:[%s1511_s8 + $0xe8] sm:$0xff]  ;;  %v459_v36 = vpack.c.bf16 %v420_v30, %v417_v29  ;;  %v463_v37 = vpack.c.bf16 %v427_v32, %v424_v31  ;;  %v416_v39 = vld [vmem:[%s1511_s8 + $0x60] sm:$0xff] }
  0x4f   : > { %1127 = vmatprep.subr.bf16.mxu0 %v1286_v61  ;;  %v466_v38 = vpack.c.bf16 %v433_v35, %v430_v34  ;;  %v419_v40 = vld [vmem:[%s1511_s8 + $0x78] sm:$0xff]  ;;  %v426_v42 = vld [vmem:[%s1511_s8 + $0xb0] sm:$0xff]  ;;  %v436_v43 = vld [vmem:[%s1511_s8 + $0x100] sm:$0xff] }
  0x50   : > { %1206 = vmatpush3.bf16.msra.mxu1 %v1285_v60  ;;  %v423_v41 = vld [vmem:[%s1511_s8 + $0x98] sm:$0xff]  ;;  %v458_v45 = vpack.c.bf16 %v419_v40, %v416_v39  ;;  %v442_v46 = vld [vmem:[%s1511_s8 + $0x130] sm:$0xff]  ;;  %v445_v47 = vld [vmem:[%s1511_s8 + $0x148] sm:$0xff] }
  0x51   : > { %1207 = vmatprep.subr.bf16.mxu1 %v1288_v62  ;;  %v439_v44 = vld [vmem:[%s1511_s8 + $0x118] sm:$0xff]  ;;  %v462_v48 = vpack.c.bf16 %v426_v42, %v423_v41  ;;  %v472_v50 = vpack.c.bf16 %v445_v47, %v442_v46  ;;  %v422_v51 = vld [vmem:[%s1511_s8 + $0x90] sm:$0xff]  ;;  %v425_v52 = vld [vmem:[%s1511_s8 + $0xa8] sm:$0xff] }
  0x52   : > { %1128 = vmatpush3.bf16.msra.mxu0 %v1287_v63  ;;  %v469_v49 = vpack.c.bf16 %v439_v44, %v436_v43  ;;  %v429_v53 = vld [vmem:[%s1511_s8 + $0xc8] sm:$0xff]  ;;  %v432_v54 = vld [vmem:[%s1511_s8 + $0xe0] sm:$0xff]  ;;  %v451_v56 = vld [vmem:[%s1511_s8 + $0x178] sm:$0xff]  ;;  %v461_v57 = vpack.c.bf16 %v425_v52, %v422_v51 }
  0x53   : > { %1129 = vmatprep.subr.bf16.mxu0 %v1289_v0  ;;  %v448_v55 = vld [vmem:[%s1511_s8 + $0x160] sm:$0xff]  ;;  %v465_v58 = vpack.c.bf16 %v432_v54, %v429_v53  ;;  %v431_v61 = vld [vmem:[%s1511_s8 + $0xd8] sm:$0xff]  ;;  %v438_v63 = vld [vmem:[%s1511_s8 + $0x110] sm:$0xff] }
  0x54   : > { %1208 = vmatpush3.bf16.msra.mxu1 %v1288_v62  ;;  %v475_v59 = vpack.c.bf16 %v451_v56, %v448_v55  ;;  %v428_v60 = vld [vmem:[%s1511_s8 + $0xc0] sm:$0xff]  ;;  %v435_v62 = vld [vmem:[%s1511_s8 + $0xf8] sm:$0xff]  ;;  %v450_v11 = vld [vmem:[%s1511_s8 + $0x170] sm:$0xff] }
  0x55   : > { %1209 = vmatprep.subr.bf16.mxu1 %v1291_v1  ;;  %v464_v0 = vpack.c.bf16 %v431_v61, %v428_v60  ;;  %v440_v8 = vld [vmem:[%s1511_s8 + $0x120] sm:$0xff]  ;;  %v443_v9 = vld [vmem:[%s1511_s8 + $0x138] sm:$0xff]  ;;  %v449_v15 = vld [vmem:[%s1511_s8 + $0x168] sm:$0xff] }
  0x56   : > { %1130 = vmatpush3.bf16.msra.mxu0 %v1290_v2  ;;  %v434_v2 = vld [vmem:[%s1511_s8 + $0xf0] sm:$0xff]  ;;  %v447_v10 = vld [vmem:[%s1511_s8 + $0x158] sm:$0xff]  ;;  %v389_v30 = vld [vmem:[#allocation2] sm:$0xff] }
  0x57   : > { %1131 = vmatprep.subr.bf16.mxu0 %v1292_v3  ;;  %v437_v3 = vld [vmem:[%s1511_s8 + $0x108] sm:$0xff]  ;;  %v474_v13 = vpack.c.bf16 %v450_v11, %v447_v10  ;;  %v388_v22 = vld [vmem:[#allocation2 + $0x30] sm:$0xff]  ;;  %v391_v44 = vld [vmem:[#allocation2 + $0x18] sm:$0xff] }
  0x58   : > { %1210 = vmatpush3.bf16.msra.mxu1 %v1291_v1  ;;  %v468_v1 = vpack.c.bf16 %v438_v63, %v435_v62  ;;  %v392_v52 = vld [vmem:[#allocation2 + $0x50] sm:$0xff] }
  0x59   : > { %1211 = vmatprep.subr.bf16.mxu1 %v1294_v4 }
  0x5a   : > { %1132 = vmatpush3.bf16.msra.mxu0 %v1293_v5  ;;  %v444_v5 = vld [vmem:[%s1511_s8 + $0x140] sm:$0xff] }
  0x5b   : > { %1133 = vmatprep.subr.bf16.mxu0 %v1295_v6  ;;  %v467_v6 = vpack.c.bf16 %v437_v3, %v434_v2 }
  0x5c   : > { %1212 = vmatpush3.bf16.msra.mxu1 %v1294_v4  ;;  %v441_v4 = vld [vmem:[%s1511_s8 + $0x128] sm:$0xff] }
  0x5d   : > { %1213 = vmatprep.subr.bf16.mxu1 %v1297_v12  ;;  %v471_v7 = vpack.c.bf16 %v444_v5, %v441_v4 }
  0x5e   : > { %1134 = vmatpush3.bf16.msra.mxu0 %v1296_v14  ;;  %v446_v14 = vld [vmem:[%s1511_s8 + $0x150] sm:$0xff] }
  0x5f   : > { %v473_v16 = vpack.c.bf16 %v449_v15, %v446_v14 }
  0x60   : > { %1214 = vmatpush3.bf16.msra.mxu1 %v1297_v12  ;;  %v470_v12 = vpack.c.bf16 %v443_v9, %v440_v8  ;;  %v395_v8 = vld [vmem:[#allocation2 + $0x48] sm:$0xff] }
  0x61   : > { %701 = vmatmul.mubr.bf16.vlgmr.msra.gmra.mxu0 %v452_v21 }
  0x62   : > { %708 = vmatprep.mubr.bf16.mxu0 %v456_v24 }
  0x63   : > { %1216 = vmatmul.mubr.bf16.vlgmr.msra.gmra.mxu1 %v457_v25 }
  0x64   : > { %1219 = vmatprep.mubr.bf16.mxu1 %v460_v26 }
  0x69   : > { %709 = vmatmul.mubr.bf16.gmra.mxu0 %v455_v33 }
  0x6a   : > { %716 = vmatprep.mubr.bf16.mxu0 %v459_v36 }
  0x6b   : > { %1220 = vmatmul.mubr.bf16.gmra.mxu1 %v463_v37  ;;  %v390_v37 = vld [vmem:[#allocation2 + $0x58] sm:$0xff] }
  0x6c   : > { %1223 = vmatprep.mubr.bf16.mxu1 %v466_v38 }
  0x71   : > { %717 = vmatmul.mubr.bf16.gmra.mxu0 %v458_v45 }
  0x72   : > { %724 = vmatprep.mubr.bf16.mxu0 %v462_v48 }
  0x73   : > { %1224 = vmatmul.mubr.bf16.gmra.mxu1 %v469_v49 }
  0x74   : > { %1227 = vmatprep.mubr.bf16.mxu1 %v472_v50 }
  0x79   : > { %725 = vmatmul.mubr.bf16.gmra.mxu0 %v461_v57 }
  0x7a   : > { %732 = vmatprep.mubr.bf16.mxu0 %v465_v58 }
  0x7b   : > { %1228 = vmatmul.mubr.bf16.gmra.mxu1 %v475_v59  ;;  %v393_v59 = vld [vmem:[#allocation2 + $0x68] sm:$0xff] }
  0x81   : > { %733 = vmatmul.mubr.bf16.gmra.mxu0 %v464_v0 }
  0x82   : > { %740 = vmatprep.mubr.bf16.mxu0 %v468_v1  ;;  %v394_v1 = vld [vmem:[#allocation2 + $0x8] sm:$0xff] }
  0x89   : > { %741 = vmatmul.mubr.bf16.gmra.mxu0 %v467_v6 }
  0x8a   : > { %748 = vmatprep.mubr.bf16.mxu0 %v471_v7 }
  0x91   : > { %749 = vmatmul.mubr.bf16.gmra.mxu0 %v470_v12 }
  0x92   : > { %756 = vmatprep.mubr.bf16.mxu0 %v474_v13 }
  0x99   : > { %757 = vmatmul.mubr.bf16.gmra.mxu0 %v473_v16  ;;  %v396_v16 = vld [vmem:[#allocation2 + $0x40] sm:$0xff] }
 0x121   : > { %v1135_v17 = vpop.f32.mrf.mxu0 }
 0x123   : > { %v1136_v18 = vpop.f32.mrf.mxu0  ;;  %v1217_v19 = vpop.f32.mrf.mxu1 }
 0x124   : > { %v1137_v20 = vadd.f32 %v1136_v18, %v1135_v17 }
 0x125   : > { %v1138_v21 = vpop.f32.mrf.mxu0  ;;  %v799_v23 = vpop.f32.mrf.mxu1 }
 0x126   : > { %v800_v24 = vadd.f32 %v1137_v20, %v799_v23  ;;  %v397_v23 = vld [vmem:[#allocation2 + $0x20] sm:$0xff] }
 0x127   : > { %v1139_v25 = vpop.f32.mrf.mxu0  ;;  %v1218_v26 = vpop.f32.mrf.mxu1 }
 0x128   : > { %v862_v27 = vadd.f32 %v800_v24, %v388_v22  ;;  %v1140_v28 = vadd.f32 %v1139_v25, %v1138_v21 }
 0x129   : > { %v1141_v29 = vpop.f32.mrf.mxu0  ;;  %v802_v31 = vpop.f32.mrf.mxu1 }
 0x12a   : > { %878 = vst [vmem:[#allocation2 + $0x30] sm:$0xff] %v862_v27  ;;  %v803_v32 = vadd.f32 %v1140_v28, %v802_v31 }
 0x12b   : > { %v1142_v33 = vpop.f32.mrf.mxu0  ;;  %v1221_v34 = vpop.f32.mrf.mxu1 }
 0x12c   : > { %v863_v35 = vadd.f32 %v803_v32, %v389_v30  ;;  %v1143_v36 = vadd.f32 %v1142_v33, %v1141_v29  ;;  %v398_v29 = vld [vmem:[#allocation2 + $0x10] sm:$0xff] }
 0x12d   : > { %v1144_v38 = vpop.f32.mrf.mxu0  ;;  %v815_v41 = vpop.f32.mrf.mxu1 }
 0x12e   : > { %879 = vst [vmem:[#allocation2] sm:$0xff] %v863_v35  ;;  %v808_v39 = vadd.f32 %v1217_v19, %v1143_v36  ;;  %v399_v36 = vld [vmem:[#allocation2 + $0x38] sm:$0xff] }
 0x12f   : > { %v1145_v40 = vpop.f32.mrf.mxu0  ;;  %v1222_v48 = vpop.f32.mrf.mxu1 }
 0x130   : > { %v864_v42 = vadd.f32 %v808_v39, %v390_v37  ;;  %v1146_v43 = vadd.f32 %v1145_v40, %v1144_v38 }
 0x131   : > { %v1147_v45 = vpop.f32.mrf.mxu0  ;;  %v818_v55 = vpop.f32.mrf.mxu1 }
 0x132   : > { %880 = vst [vmem:[#allocation2 + $0x58] sm:$0xff] %v864_v42  ;;  %v811_v46 = vadd.f32 %v1218_v26, %v1146_v43 }
 0x133   : > { %v1148_v47 = vpop.f32.mrf.mxu0  ;;  %v1225_v62 = vpop.f32.mrf.mxu1 }
 0x134   : > { %v865_v49 = vadd.f32 %v811_v46, %v391_v44  ;;  %v1149_v50 = vadd.f32 %v1148_v47, %v1147_v45  ;;  %v400_v44 = vld [vmem:[#allocation2 + $0x60] sm:$0xff] }
 0x135   : > { %v1150_v51 = vpop.f32.mrf.mxu0  ;;  %v831_v5 = vpop.f32.mrf.mxu1 }
 0x136   : > { %881 = vst [vmem:[#allocation2 + $0x18] sm:$0xff] %v865_v49  ;;  %v816_v53 = vadd.f32 %v1149_v50, %v815_v41 }
 0x137   : > { %v1151_v54 = vpop.f32.mrf.mxu0  ;;  %v1226_v12 = vpop.f32.mrf.mxu1 }
 0x138   : > { %v866_v56 = vadd.f32 %v816_v53, %v392_v52  ;;  %v1152_v57 = vadd.f32 %v1151_v54, %v1150_v51  ;;  %v401_v51 = vld [vmem:[#allocation2 + $0x70] sm:$0xff] }
 0x139   : > { %v1153_v58 = vpop.f32.mrf.mxu0  ;;  %v834_v19 = vpop.f32.mrf.mxu1 }
 0x13a   : > { %882 = vst [vmem:[#allocation2 + $0x50] sm:$0xff] %v866_v56  ;;  %v819_v60 = vadd.f32 %v1152_v57, %v818_v55  ;;  %v402_v56 = vld [vmem:[#allocation2 + $0x78] sm:$0xff] }
 0x13b   : > { %v1154_v61 = vpop.f32.mrf.mxu0  ;;  %v1229_v26 = vpop.f32.mrf.mxu1 }
 0x13c   : > { %v867_v63 = vadd.f32 %v819_v60, %v393_v59  ;;  %v1155_v0 = vadd.f32 %v1154_v61, %v1153_v58 }
 0x13d   : > { %v1156_v2 = vpop.f32.mrf.mxu0  ;;  %v847_v33 = vpop.f32.mrf.mxu1 }
 0x13e   : > { %883 = vst [vmem:[#allocation2 + $0x68] sm:$0xff] %v867_v63  ;;  %v824_v3 = vadd.f32 %v1221_v34, %v1155_v0 }
 0x13f   : > { %v1157_v4 = vpop.f32.mrf.mxu0  ;;  %v1230_v40 = vpop.f32.mrf.mxu1 }
 0x140   : > { %v868_v6 = vadd.f32 %v824_v3, %v394_v1  ;;  %v1158_v7 = vadd.f32 %v1157_v4, %v1156_v2 }
 0x141   : > { %v1159_v9 = vpop.f32.mrf.mxu0  ;;  %v850_v47 = vpop.f32.mrf.mxu1 }
 0x142   : > { %884 = vst [vmem:[#allocation2 + $0x8] sm:$0xff] %v868_v6  ;;  %v827_v10 = vadd.f32 %v1222_v48, %v1158_v7 }
 0x143   : > { %v1160_v11 = vpop.f32.mrf.mxu0 }
 0x144   : > { %v869_v13 = vadd.f32 %v827_v10, %v395_v8  ;;  %v1161_v14 = vadd.f32 %v1160_v11, %v1159_v9 }
 0x145   : > { %v1162_v15 = vpop.f32.mrf.mxu0 }
 0x146   : > { %885 = vst [vmem:[#allocation2 + $0x48] sm:$0xff] %v869_v13  ;;  %v832_v17 = vadd.f32 %v1161_v14, %v831_v5 }
 0x147   : > { %v1163_v18 = vpop.f32.mrf.mxu0 }
 0x148   : > { %v870_v20 = vadd.f32 %v832_v17, %v396_v16  ;;  %v1164_v21 = vadd.f32 %v1163_v18, %v1162_v15 }
 0x149   : > { %v1165_v22 = vpop.f32.mrf.mxu0 }
 0x14a   : > { %886 = vst [vmem:[#allocation2 + $0x40] sm:$0xff] %v870_v20  ;;  %v835_v24 = vadd.f32 %v1164_v21, %v834_v19 }
 0x14b   : > { %v1166_v25 = vpop.f32.mrf.mxu0 }
 0x14c   : > { %v871_v27 = vadd.f32 %v835_v24, %v397_v23  ;;  %v1167_v28 = vadd.f32 %v1166_v25, %v1165_v22 }
 0x14d   : > { %v1168_v30 = vpop.f32.mrf.mxu0 }
 0x14e   : > { %887 = vst [vmem:[#allocation2 + $0x20] sm:$0xff] %v871_v27  ;;  %v840_v31 = vadd.f32 %v1225_v62, %v1167_v28  ;;  %v403_v62 = vld [vmem:[#allocation2 + $0x28] sm:$0xff] }
 0x14f   : > { %v1169_v32 = vpop.f32.mrf.mxu0 }
 0x150   : > { %v872_v34 = vadd.f32 %v840_v31, %v398_v29  ;;  %v1170_v35 = vadd.f32 %v1169_v32, %v1168_v30 }
 0x151   : > { %v1171_v37 = vpop.f32.mrf.mxu0 }
 0x152   : > { %888 = vst [vmem:[#allocation2 + $0x10] sm:$0xff] %v872_v34  ;;  %v843_v38 = vadd.f32 %v1226_v12, %v1170_v35 }
 0x153   : > { %v1172_v39 = vpop.f32.mrf.mxu0 }
 0x154   : > { %v873_v41 = vadd.f32 %v843_v38, %v399_v36  ;;  %v1173_v42 = vadd.f32 %v1172_v39, %v1171_v37 }
 0x155   : > { %v1174_v43 = vpop.f32.mrf.mxu0 }
 0x156   : > { %889 = vst [vmem:[#allocation2 + $0x38] sm:$0xff] %v873_v41  ;;  %v848_v45 = vadd.f32 %v1173_v42, %v847_v33 }
 0x157   : > { %v1175_v46 = vpop.f32.mrf.mxu0 }
 0x158   : > { %v874_v48 = vadd.f32 %v848_v45, %v400_v44  ;;  %v1176_v49 = vadd.f32 %v1175_v46, %v1174_v43 }
 0x159   : > { %v1177_v50 = vpop.f32.mrf.mxu0 }
 0x15a   : > { %890 = vst [vmem:[#allocation2 + $0x60] sm:$0xff] %v874_v48  ;;  %v851_v52 = vadd.f32 %v1176_v49, %v850_v47 }
 0x15b   : > { %v1178_v53 = vpop.f32.mrf.mxu0 }
 0x15c   : > { %v875_v54 = vadd.f32 %v851_v52, %v401_v51  ;;  %v1179_v55 = vadd.f32 %v1178_v53, %v1177_v50 }
 0x15d   : > { %v1180_v57 = vpop.f32.mrf.mxu0 }
 0x15e   : > { %891 = vst [vmem:[#allocation2 + $0x70] sm:$0xff] %v875_v54  ;;  %v856_v58 = vadd.f32 %v1229_v26, %v1179_v55 }
 0x15f   : > { %v1181_v59 = vpop.f32.mrf.mxu0 }
 0x160   : > { %v876_v60 = vadd.f32 %v856_v58, %v402_v56  ;;  %v1182_v61 = vadd.f32 %v1181_v59, %v1180_v57 }
 0x162   : > { %892 = vst [vmem:[#allocation2 + $0x78] sm:$0xff] %v876_v60  ;;  %v859_v63 = vadd.f32 %v1230_v40, %v1182_v61  ;;  %897 = sbr.rel (%p1112_p11) target bundleno = 372 (0x174), region = 63 }
 0x164   : > { %v877_v0 = vadd.f32 %v859_v63, %v403_v62 }
 0x166   : > { %893 = vst [vmem:[#allocation2 + $0x28] sm:$0xff] %v877_v0 }
 0x167   : > { %v898_v1 = vld [vmem:[#allocation2 + $0x30] sm:$0xff]  ;;  %v1113_v2 = vld [vmem:[%s1655_s2] ss:$0 sm:$0xff]  ;;  %v900_v6 = vld [vmem:[#allocation2 + $0x58] sm:$0xff] }
 0x168   : > { %v899_v3 = vld [vmem:[#allocation2] sm:$0xff]  ;;  %v921_v4 = vadd.f32 %v1113_v2, %v898_v1  ;;  %v901_v7 = vld [vmem:[#allocation2 + $0x18] sm:$0xff]  ;;  %v902_v8 = vld [vmem:[#allocation2 + $0x50] sm:$0xff]  ;;  %v923_v9 = vadd.f32 %v1113_v2, %v900_v6 }
 0x169   : > { %v922_v5 = vadd.f32 %v1113_v2, %v899_v3  ;;  %v924_v10 = vadd.f32 %v1113_v2, %v901_v7  ;;  %v925_v11 = vadd.f32 %v1113_v2, %v902_v8  ;;  %v903_v12 = vld [vmem:[#allocation2 + $0x68] sm:$0xff]  ;;  %v906_v19 = vld [vmem:[#allocation2 + $0x40] sm:$0xff]  ;;  %v908_v21 = vld [vmem:[#allocation2 + $0x10] sm:$0xff] }
 0x16a   : > { %v904_v13 = vld [vmem:[#allocation2 + $0x8] sm:$0xff]  ;;  %v937_v15 = vmax.f32 %v921_v4, 0.0  ;;  %v926_v17 = vadd.f32 %v1113_v2, %v903_v12  ;;  %v907_v20 = vld [vmem:[#allocation2 + $0x20] sm:$0xff]  ;;  %v939_v22 = vmax.f32 %v923_v9, 0.0  ;;  %v909_v26 = vld [vmem:[#allocation2 + $0x38] sm:$0xff]  ;;  %v929_v31 = vadd.f32 %v1113_v2, %v906_v19 }
 0x16b   : > { %v905_v14 = vld [vmem:[#allocation2 + $0x48] sm:$0xff]  ;;  %v938_v16 = vmax.f32 %v922_v5, 0.0  ;;  %v927_v18 = vadd.f32 %v1113_v2, %v904_v13  ;;  %v940_v23 = vmax.f32 %v924_v10, 0.0  ;;  %v941_v24 = vmax.f32 %v925_v11, 0.0  ;;  %v910_v27 = vld [vmem:[#allocation2 + $0x60] sm:$0xff]  ;;  %v911_v28 = vld [vmem:[#allocation2 + $0x70] sm:$0xff] }
 0x16c   : > { %v928_v25 = vadd.f32 %v1113_v2, %v905_v14  ;;  %953 = vst [vmem:[%s1656_s3] sm:$0xff] %v937_v15  ;;  %v942_v29 = vmax.f32 %v926_v17, 0.0  ;;  %v930_v32 = vadd.f32 %v1113_v2, %v907_v20  ;;  %v912_v33 = vld [vmem:[#allocation2 + $0x78] sm:$0xff]  ;;  %955 = vst [vmem:[%s1656_s3 + $0x10] sm:$0xff] %v939_v22  ;;  %v931_v36 = vadd.f32 %v1113_v2, %v908_v21 }
 0x16d   : > { %954 = vst [vmem:[%s1656_s3 + $0x8] sm:$0xff] %v938_v16  ;;  %v943_v30 = vmax.f32 %v927_v18, 0.0  ;;  %v913_v34 = vld [vmem:[#allocation2 + $0x28] sm:$0xff]  ;;  %956 = vst [vmem:[%s1656_s3 + $0x18] sm:$0xff] %v940_v23  ;;  %v932_v37 = vadd.f32 %v1113_v2, %v909_v26  ;;  %v933_v38 = vadd.f32 %v1113_v2, %v910_v27  ;;  %v945_v39 = vmax.f32 %v929_v31, 0.0 }
 0x16e   : > { %957 = vst [vmem:[%s1656_s3 + $0x20] sm:$0xff] %v941_v24  ;;  %v944_v35 = vmax.f32 %v928_v25, 0.0  ;;  %958 = vst [vmem:[%s1656_s3 + $0x28] sm:$0xff] %v942_v29  ;;  %v946_v40 = vmax.f32 %v930_v32, 0.0  ;;  %v934_v41 = vadd.f32 %v1113_v2, %v911_v28  ;;  %v935_v42 = vadd.f32 %v1113_v2, %v912_v33 }
 0x16f   : > { %959 = vst [vmem:[%s1656_s3 + $0x30] sm:$0xff] %v943_v30  ;;  %v947_v43 = vmax.f32 %v931_v36, 0.0  ;;  %v948_v44 = vmax.f32 %v932_v37, 0.0  ;;  %v949_v45 = vmax.f32 %v933_v38, 0.0  ;;  %v936_v46 = vadd.f32 %v1113_v2, %v913_v34  ;;  %961 = vst [vmem:[%s1656_s3 + $0x40] sm:$0xff] %v945_v39 }
 0x170   : > { %960 = vst [vmem:[%s1656_s3 + $0x38] sm:$0xff] %v944_v35  ;;  %962 = vst [vmem:[%s1656_s3 + $0x48] sm:$0xff] %v946_v40  ;;  %v950_v47 = vmax.f32 %v934_v41, 0.0  ;;  %v951_v48 = vmax.f32 %v935_v42, 0.0 }
 0x171   : > { %963 = vst [vmem:[%s1656_s3 + $0x50] sm:$0xff] %v947_v43  ;;  %964 = vst [vmem:[%s1656_s3 + $0x58] sm:$0xff] %v948_v44  ;;  %v952_v49 = vmax.f32 %v936_v46, 0.0 }
 0x172   : > { %965 = vst [vmem:[%s1656_s3 + $0x60] sm:$0xff] %v949_v45  ;;  %966 = vst [vmem:[%s1656_s3 + $0x68] sm:$0xff] %v950_v47 }
 0x173   : > { %967 = vst [vmem:[%s1656_s3 + $0x70] sm:$0xff] %v951_v48  ;;  %968 = vst [vmem:[%s1656_s3 + $0x78] sm:$0xff] %v952_v49 }
 0x174 PF: > { %s13_s16 = sadd.s32 1, %s1336_s16   ;;  %s1657_s12 = smov %s1324_s13 }
 0x175   : > { %p10_p12 = scmp.ge.s32.totalorder %s13_s16, 5   ;;  %s1658_s13 = smov %s1394_s20 }
 0x176   : > { %s1659_s14 = smov %s1332_s15  ;;  %s1660_s15 = smov %s1662_s17 }
 0x177   :  { %12 = sbr.rel (!%p10_p12) target bundleno = 3 (0x3), region = 104 }

// kernel: stylegan_refiner_forward.21
= control target key start
LH: loop header
LB: loop body
LE: loop exit
PB: predicated region body
PF: predicated region fallthrough
CT: control target
= control target key end

     0   :  { %s1175_s12 = smov 0   ;;  %s1177_s13 = smov 0   ;;  %s1335_s0 = inlined_call_operand.vmem [shape: f32[32,1152], index: 0, kind: input, shape index: {}]   ;;  %s1336_s1 = inlined_call_operand.vmem [shape: bf16[1152,256], index: 1, kind: input, shape index: {}]   ;;  %s1337_s2 = inlined_call_operand.vmem [shape: f32[1,256], index: 2, kind: input, shape index: {}]   ;;  %s1338_s3 = inlined_call_operand.vmem [shape: f32[32,256], index: 3, kind: output, shape index: {}]  }
   0x1   :  { %s1179_s14 = smov 0   ;;  %s1181_s15 = smov 0  }
   0x2   :  { %s1183_s16 = smov 0  }
   0x3 LB: > { %s25_s17 = sadd.s32 1, %s1147_s15  ;;  %p48_p1 = scmp.ne.s32.totalorder %s1139_s13, %s1135_s12  ;;  %s1151_s16 = sphi %s1183_s16, %s13_s16   ;;  %s1147_s15 = sphi %s1181_s15, %s1342_s15   ;;  %s1143_s14 = sphi %s1179_s14, %s1341_s14   ;;  %s1139_s13 = sphi %s1177_s13, %s1340_s13   ;;  %s1135_s12 = sphi %s1175_s12, %s1339_s12  }
   0x4   : > { %p26_p0 = scmp.ge.s32.totalorder %s25_s17, 3  ;;  %p49_p2 = scmp.eq.s32.totalorder %s1151_s16, 0 }
   0x5   : > { %s41_s19 = sadd.s32 1, %s1139_s13  ;;  %p936_p5 = scmp.ge.s32.totalorder %s1151_s16, 3 }
   0x6   : > { %s1344_s17 = smov (%p26_p0, %s25_s17), 0  ;;  %p50_p3 = por %p49_p2, %p48_p1 }
   0x7   : > { %s37_s18 = ssub.s32 %s1147_s15, %s1344_s17  ;;  %164 = sbr.rel (%p936_p5) target bundleno = 23 (0x17), region = 20 }
   0x8   : > { %p39_p4 = scmp.eq.s32.totalorder %s37_s18, 0 }
   0xa   : > { %s1210_s20 = scalar_select %p39_p4, %s1139_s13, %s41_s19  }
   0xc   : > { %167 = sbr.rel (!%p50_p3) target bundleno = 23 (0x17), region = 24  ;;  %s169_s21 = sand.u32 (%p50_p3), 1, %s1139_s13  }
   0xd   : > { %s995_s22 = smul.u32 (%p50_p3), 24, %s1147_s15 }
   0xe   : > { %s997_s23 = smul.u32 (%p50_p3), 96, %s169_s21 }
   0xf   : > { %s177_s26 = scalar_lea.vmem (%p50_p3), %s1335_s0, %s995_s22 }
  0x10   : > { %v190_v0 = vld [vmem:[%s177_s26] sm:$0xff] (%p50_p3)  ;;  %v192_v1 = vld [vmem:[%s177_s26 + $0x8] sm:$0xff] (%p50_p3)  ;;  %v194_v2 = vld [vmem:[%s177_s26 + $0x10] sm:$0xff] (%p50_p3)  ;;  %s171_s27 = scalar_lea.vmem (%p50_p3), [#allocation3], %s997_s23 }
  0x11   : > { %191 = vst [vmem:[%s171_s27] sm:$0xff] %v190_v0  ;;  %193 = vst [vmem:[%s171_s27 + $0x8] sm:$0xff] %v192_v1  ;;  %v196_v3 = vld [vmem:[%s177_s26 + $0x48] sm:$0xff]  ;;  %v198_v4 = vld [vmem:[%s177_s26 + $0x50] sm:$0xff] }
  0x12   : > { %195 = vst [vmem:[%s171_s27 + $0x10] sm:$0xff] %v194_v2  ;;  %v200_v5 = vld [vmem:[%s177_s26 + $0x58] sm:$0xff]  ;;  %197 = vst [vmem:[%s171_s27 + $0x18] sm:$0xff] %v196_v3  ;;  %v202_v6 = vld [vmem:[%s177_s26 + $0x90] sm:$0xff] }
  0x13   : > { %199 = vst [vmem:[%s171_s27 + $0x20] sm:$0xff] %v198_v4  ;;  %201 = vst [vmem:[%s171_s27 + $0x28] sm:$0xff] %v200_v5  ;;  %v204_v7 = vld [vmem:[%s177_s26 + $0x98] sm:$0xff]  ;;  %v206_v8 = vld [vmem:[%s177_s26 + $0xa0] sm:$0xff] }
  0x14   : > { %203 = vst [vmem:[%s171_s27 + $0x30] sm:$0xff] %v202_v6  ;;  %205 = vst [vmem:[%s171_s27 + $0x38] sm:$0xff] %v204_v7  ;;  %v208_v9 = vld [vmem:[%s177_s26 + $0xd8] sm:$0xff]  ;;  %v210_v10 = vld [vmem:[%s177_s26 + $0xe0] sm:$0xff] }
  0x15   : > { %207 = vst [vmem:[%s171_s27 + $0x40] sm:$0xff] %v206_v8  ;;  %v212_v11 = vld [vmem:[%s177_s26 + $0xe8] sm:$0xff]  ;;  %209 = vst [vmem:[%s171_s27 + $0x48] sm:$0xff] %v208_v9 }
  0x16   : > { %211 = vst [vmem:[%s171_s27 + $0x50] sm:$0xff] %v210_v10  ;;  %213 = vst [vmem:[%s171_s27 + $0x58] sm:$0xff] %v212_v11 }
  0x17 PF: > { %p938_p6 = scmp.ge.s32.totalorder %s1151_s16, 1  ;;  %p233_p7 = scmp.lt.s32.totalorder %s1151_s16, 4 }
  0x19   : > { %p234_p8 = pnand %p938_p6, %p233_p7 }
  0x1a   : > { %s240_s28 = sand.u32 (!%p234_p8), 1, %s1135_s12   ;;  %s284_s29 = smul.u32 (!%p234_p8), 48, %s1143_s14 }
  0x1b   : > { %237 = sbr.rel (%p234_p8) target bundleno = 335 (0x14f), region = 51  ;;  %p941_p10 = scmp.ne.s32.totalorder (!%p234_p8), %s1143_s14, 0 }
  0x1c   : > { %s998_s30 = smul.u32 (!%p234_p8), 96, %s240_s28  ;;  %p286_p9 = scmp.lt.s32.totalorder (!%p234_p8), %s284_s29, 143 }
  0x1e   : > { %s1227_s8 = scalar_lea.vmem (!%p234_p8), [#allocation3], %s998_s30 }
  0x20   : > { %s1346_s29 = smov (!%p286_p9, %s284_s29), 143  ;;  %317 = sbr.rel (%p941_p10) target bundleno = 42 (0x2a), region = 59 }
  0x21   : > { %s996_s4 = sshll.u32 %s1346_s29, 3 }
  0x22   : > { %s1225_s7 = scalar_lea.vmem %s1336_s1, %s996_s4 }
  0x25   : > { %v1153_v12 = vmov 0.0  }
  0x26   : > { %318 = vst [vmem:[#allocation2 + $0x30] sm:$0xff] %v1153_v12  ;;  %319 = vst [vmem:[#allocation2] sm:$0xff] %v1153_v12 }
  0x27   : > { %320 = vst [vmem:[#allocation2 + $0x18] sm:$0xff] %v1153_v12  ;;  %321 = vst [vmem:[#allocation2 + $0x10] sm:$0xff] %v1153_v12 }
  0x28   : > { %322 = vst [vmem:[#allocation2 + $0x8] sm:$0xff] %v1153_v12  ;;  %323 = vst [vmem:[#allocation2 + $0x20] sm:$0xff] %v1153_v12 }
  0x29   : > { %324 = vst [vmem:[#allocation2 + $0x28] sm:$0xff] %v1153_v12  ;;  %325 = vst [vmem:[#allocation2 + $0x38] sm:$0xff] %v1153_v12 }
  0x2a PF: > { %v1041_v13 = vld [vmem:[%s1225_s7 + $0x74] ss:$8 sps:$4 sm:$0xff]   ;;  %v1043_v14 = vld [vmem:[%s1225_s7 + $0x70] ss:$8 sps:$4 sm:$0xff]   ;;  %v1154_v15 = vmov 0   ;;  %v335_v46 = vld [vmem:[%s1227_s8 + $0x8] sm:$0xff] }
  0x2b   : > { %725 = vmatprep.mubr.bf16.mxu1 %v1154_v15  ;;  %640 = vmatprep.subr.bf16.mxu0 %v1041_v13  ;;  %v1044_v16 = vld [vmem:[%s1225_s7 + $0x64] ss:$8 sps:$4 sm:$0xff]   ;;  %v1046_v17 = vld [vmem:[%s1225_s7 + $0x60] ss:$8 sps:$4 sm:$0xff]   ;;  %v1047_v18 = vld [vmem:[%s1225_s7 + $0x54] ss:$8 sps:$4 sm:$0xff]  }
  0x2c   : > { %641 = vmatpush1.bf16.msra.mxu0 %v1043_v14  ;;  %v1049_v19 = vld [vmem:[%s1225_s7 + $0x50] ss:$8 sps:$4 sm:$0xff]   ;;  %v1050_v20 = vld [vmem:[%s1225_s7 + $0x44] ss:$8 sps:$4 sm:$0xff]   ;;  %v1062_v21 = vld [vmem:[%s1225_s7 + $0x174] ss:$8 sps:$4 sm:$0xff]  }
  0x2d   : > { %642 = vmatprep.subr.bf16.mxu0 %v1044_v16  ;;  %v1064_v22 = vld [vmem:[%s1225_s7 + $0x170] ss:$8 sps:$4 sm:$0xff]   ;;  %v1052_v23 = vld [vmem:[%s1225_s7 + $0x40] ss:$8 sps:$4 sm:$0xff]   ;;  %v1053_v24 = vld [vmem:[%s1225_s7 + $0x34] ss:$8 sps:$4 sm:$0xff]   ;;  %693 = vmatprep.subr.bf16.mxu1 %v1062_v21 }
  0x2e   : > { %v1068_v25 = vld [vmem:[%s1225_s7 + $0x164] ss:$8 sps:$4 sm:$0xff]   ;;  %694 = vmatpush1.bf16.msra.mxu1 %v1064_v22  ;;  %v1070_v26 = vld [vmem:[%s1225_s7 + $0x160] ss:$8 sps:$4 sm:$0xff]   ;;  %v1055_v27 = vld [vmem:[%s1225_s7 + $0x30] ss:$8 sps:$4 sm:$0xff]  }
  0x2f   : > { %695 = vmatprep.subr.bf16.mxu1 %v1068_v25  ;;  %v1074_v28 = vld [vmem:[%s1225_s7 + $0x154] ss:$8 sps:$4 sm:$0xff]   ;;  %v1056_v29 = vld [vmem:[%s1225_s7 + $0x24] ss:$8 sps:$4 sm:$0xff]   ;;  %v1076_v30 = vld [vmem:[%s1225_s7 + $0x150] ss:$8 sps:$4 sm:$0xff]  }
  0x30   : > { %643 = vmatpush1.bf16.msra.mxu0 %v1046_v17  ;;  %v1080_v31 = vld [vmem:[%s1225_s7 + $0x144] ss:$8 sps:$4 sm:$0xff]   ;;  %v1058_v32 = vld [vmem:[%s1225_s7 + $0x20] ss:$8 sps:$4 sm:$0xff]   ;;  %v1059_v33 = vld [vmem:[%s1225_s7 + $0x14] ss:$8 sps:$4 sm:$0xff]  }
  0x31   : > { %644 = vmatprep.subr.bf16.mxu0 %v1047_v18  ;;  %v1082_v34 = vld [vmem:[%s1225_s7 + $0x140] ss:$8 sps:$4 sm:$0xff]   ;;  %v1086_v35 = vld [vmem:[%s1225_s7 + $0x134] ss:$8 sps:$4 sm:$0xff]   ;;  %v1061_v36 = vld [vmem:[%s1225_s7 + $0x10] ss:$8 sps:$4 sm:$0xff]  }
  0x32   : > { %696 = vmatpush1.bf16.msra.mxu1 %v1070_v26  ;;  %v1065_v37 = vld [vmem:[%s1225_s7 + $0x4] ss:$8 sps:$4 sm:$0xff]   ;;  %v1088_v38 = vld [vmem:[%s1225_s7 + $0x130] ss:$8 sps:$4 sm:$0xff]   ;;  %v1067_v40 = vld [vmem:[%s1225_s7] ss:$8 sps:$4 sm:$0xff]  }
  0x33   : > { %697 = vmatprep.subr.bf16.mxu1 %v1074_v28  ;;  %v1092_v39 = vld [vmem:[%s1225_s7 + $0x124] ss:$8 sps:$4 sm:$0xff]   ;;  %v1071_v41 = vld [vmem:[%s1225_s7 + $0xf4] ss:$8 sps:$4 sm:$0xff]   ;;  %v1094_v42 = vld [vmem:[%s1225_s7 + $0x120] ss:$8 sps:$4 sm:$0xff]  }
  0x34   : > { %645 = vmatpush1.bf16.msra.mxu0 %v1049_v19  ;;  %v1098_v43 = vld [vmem:[%s1225_s7 + $0x114] ss:$8 sps:$4 sm:$0xff]   ;;  %v1073_v44 = vld [vmem:[%s1225_s7 + $0xf0] ss:$8 sps:$4 sm:$0xff]   ;;  %v1077_v45 = vld [vmem:[%s1225_s7 + $0xe4] ss:$8 sps:$4 sm:$0xff]  }
  0x35   : > { %646 = vmatprep.subr.bf16.mxu0 %v1050_v20  ;;  %v1100_v47 = vld [vmem:[%s1225_s7 + $0x110] ss:$8 sps:$4 sm:$0xff]   ;;  %v338_v48 = vld [vmem:[%s1227_s8 + $0x20] sm:$0xff]  ;;  %v1083_v52 = vld [vmem:[%s1225_s7 + $0xd4] ss:$8 sps:$4 sm:$0xff]   ;;  %p990_p11 = scmp.ne.s32.totalorder %s1143_s14, 2 }
  0x36   : > { %698 = vmatpush1.bf16.msra.mxu1 %v1076_v30  ;;  %v1104_v49 = vld [vmem:[%s1225_s7 + $0x104] ss:$8 sps:$4 sm:$0xff]   ;;  %v347_v50 = vpack.c.bf16 %v338_v48, %v335_v46  ;;  %v1079_v51 = vld [vmem:[%s1225_s7 + $0xe0] ss:$8 sps:$4 sm:$0xff]   ;;  %v336_v54 = vld [vmem:[%s1227_s8 + $0x10] sm:$0xff] }
  0x37   : > { %699 = vmatprep.subr.bf16.mxu1 %v1080_v31  ;;  %v1106_v53 = vld [vmem:[%s1225_s7 + $0x100] ss:$8 sps:$4 sm:$0xff]   ;;  %v1085_v56 = vld [vmem:[%s1225_s7 + $0xd0] ss:$8 sps:$4 sm:$0xff]   ;;  %v1089_v57 = vld [vmem:[%s1225_s7 + $0xc4] ss:$8 sps:$4 sm:$0xff]  }
  0x38   : > { %647 = vmatpush1.bf16.msra.mxu0 %v1052_v23  ;;  %672 = vmatprep.mubr.bf16.mxu0 %v347_v50  ;;  %v339_v55 = vld [vmem:[%s1227_s8 + $0x28] sm:$0xff]  ;;  %v1095_v60 = vld [vmem:[%s1225_s7 + $0xb4] ss:$8 sps:$4 sm:$0xff]   ;;  %v342_v61 = vld [vmem:[%s1227_s8 + $0x40] sm:$0xff] }
  0x39   : > { %648 = vmatprep.subr.bf16.mxu0 %v1053_v24  ;;  %v348_v58 = vpack.c.bf16 %v339_v55, %v336_v54  ;;  %v1091_v59 = vld [vmem:[%s1225_s7 + $0xc0] ss:$8 sps:$4 sm:$0xff]   ;;  %v345_v62 = vld [vmem:[%s1227_s8 + $0x58] sm:$0xff]  ;;  %v1101_v0 = vld [vmem:[%s1225_s7 + $0xa4] ss:$8 sps:$4 sm:$0xff]  }
  0x3a   : > { %700 = vmatpush1.bf16.msra.mxu1 %v1082_v34  ;;  %v1097_v63 = vld [vmem:[%s1225_s7 + $0xb0] ss:$8 sps:$4 sm:$0xff]   ;;  %v351_v1 = vpack.c.bf16 %v345_v62, %v342_v61  ;;  %v1103_v2 = vld [vmem:[%s1225_s7 + $0xa0] ss:$8 sps:$4 sm:$0xff]   ;;  %v1107_v3 = vld [vmem:[%s1225_s7 + $0x94] ss:$8 sps:$4 sm:$0xff]  }
  0x3b   : > { %701 = vmatprep.subr.bf16.mxu1 %v1086_v35  ;;  %v1109_v4 = vld [vmem:[%s1225_s7 + $0x90] ss:$8 sps:$4 sm:$0xff]   ;;  %v1110_v5 = vld [vmem:[%s1225_s7 + $0x84] ss:$8 sps:$4 sm:$0xff]   ;;  %v1112_v6 = vld [vmem:[%s1225_s7 + $0x80] ss:$8 sps:$4 sm:$0xff]  }
  0x3c   : > { %649 = vmatpush1.bf16.msra.mxu0 %v1055_v27  ;;  %v334_v7 = vld [vmem:[%s1227_s8] sm:$0xff]  ;;  %v337_v8 = vld [vmem:[%s1227_s8 + $0x18] sm:$0xff]  ;;  %v344_v10 = vld [vmem:[%s1227_s8 + $0x50] sm:$0xff] }
  0x3d   : > { %650 = vmatprep.subr.bf16.mxu0 %v1056_v29  ;;  %v341_v9 = vld [vmem:[%s1227_s8 + $0x38] sm:$0xff]  ;;  %v346_v11 = vpack.c.bf16 %v337_v8, %v334_v7  ;;  %v340_v13 = vld [vmem:[%s1227_s8 + $0x30] sm:$0xff]  ;;  %v343_v14 = vld [vmem:[%s1227_s8 + $0x48] sm:$0xff] }
  0x3e   : > { %702 = vmatpush1.bf16.msra.mxu1 %v1088_v38  ;;  %v350_v12 = vpack.c.bf16 %v344_v10, %v341_v9  ;;  %v326_v20 = vld [vmem:[#allocation2 + $0x30] sm:$0xff]  ;;  %v327_v23 = vld [vmem:[#allocation2] sm:$0xff]  ;;  %v328_v28 = vld [vmem:[#allocation2 + $0x18] sm:$0xff] }
  0x3f   : > { %703 = vmatprep.subr.bf16.mxu1 %v1092_v39  ;;  %v332_v46 = vld [vmem:[#allocation2 + $0x28] sm:$0xff] }
  0x40   : > { %651 = vmatpush1.bf16.msra.mxu0 %v1058_v32 }
  0x41   : > { %652 = vmatprep.subr.bf16.mxu0 %v1059_v33  ;;  %v329_v33 = vld [vmem:[#allocation2 + $0x10] sm:$0xff] }
  0x42   : > { %704 = vmatpush1.bf16.msra.mxu1 %v1094_v42  ;;  %v331_v42 = vld [vmem:[#allocation2 + $0x20] sm:$0xff] }
  0x43   : > { %705 = vmatprep.subr.bf16.mxu1 %v1098_v43 }
  0x44   : > { %653 = vmatpush1.bf16.msra.mxu0 %v1061_v36 }
  0x45   : > { %654 = vmatprep.subr.bf16.mxu0 %v1065_v37  ;;  %v330_v37 = vld [vmem:[#allocation2 + $0x8] sm:$0xff] }
  0x46   : > { %706 = vmatpush1.bf16.msra.mxu1 %v1100_v47 }
  0x47   : > { %707 = vmatprep.subr.bf16.mxu1 %v1104_v49 }
  0x48   : > { %655 = vmatpush1.bf16.msra.mxu0 %v1067_v40 }
  0x49   : > { %656 = vmatprep.subr.bf16.mxu0 %v1071_v41 }
  0x4a   : > { %708 = vmatpush1.bf16.msra.mxu1 %v1106_v53 }
  0x4c   : > { %657 = vmatpush2.bf16.msra.mxu0 %v1073_v44 }
  0x4d   : > { %658 = vmatprep.subr.bf16.mxu0 %v1077_v45  ;;  %726 = vmatmul.mubr.bf16.vlgmr.msra.gmra.mxu1 %v348_v58 }
  0x4e   : > { %735 = vmatprep.mubr.bf16.mxu1 %v1154_v15  ;;  %v349_v15 = vpack.c.bf16 %v343_v14, %v340_v13 }
  0x50   : > { %659 = vmatpush2.bf16.msra.mxu0 %v1079_v51  ;;  %v333_v51 = vld [vmem:[#allocation2 + $0x38] sm:$0xff] }
  0x51   : > { %660 = vmatprep.subr.bf16.mxu0 %v1083_v52 }
  0x54   : > { %661 = vmatpush2.bf16.msra.mxu0 %v1085_v56 }
  0x55   : > { %662 = vmatprep.subr.bf16.mxu0 %v1089_v57  ;;  %736 = vmatmul.mubr.bf16.gmra.mxu1 %v351_v1 }
  0x58   : > { %663 = vmatpush2.bf16.msra.mxu0 %v1091_v59 }
  0x59   : > { %664 = vmatprep.subr.bf16.mxu0 %v1095_v60 }
  0x5c   : > { %665 = vmatpush2.bf16.msra.mxu0 %v1097_v63 }
  0x5d   : > { %666 = vmatprep.subr.bf16.mxu0 %v1101_v0 }
  0x60   : > { %667 = vmatpush2.bf16.msra.mxu0 %v1103_v2 }
  0x61   : > { %668 = vmatprep.subr.bf16.mxu0 %v1107_v3 }
  0x64   : > { %669 = vmatpush2.bf16.msra.mxu0 %v1109_v4 }
  0x65   : > { %670 = vmatprep.subr.bf16.mxu0 %v1110_v5 }
  0x68   : > { %671 = vmatpush2.bf16.msra.mxu0 %v1112_v6 }
  0x6b   : > { %673 = vmatmul.mubr.bf16.vlgmr.msra.gmra.mxu0 %v346_v11 }
  0x6c   : > { %682 = vmatprep.mubr.bf16.mxu0 %v350_v12 }
  0x73   : > { %683 = vmatmul.mubr.bf16.gmra.mxu0 %v349_v15 }
 0x10d   : > { %v727_v16 = vpop.f32.mrf.mxu1 }
 0x10f   : > { %v729_v17 = vpop.f32.mrf.mxu1 }
 0x111   : > { %v731_v18 = vpop.f32.mrf.mxu1 }
 0x113   : > { %v733_v19 = vpop.f32.mrf.mxu1 }
 0x115   : > { %v737_v25 = vpop.f32.mrf.mxu1 }
 0x117   : > { %v739_v32 = vpop.f32.mrf.mxu1 }
 0x119   : > { %v741_v41 = vpop.f32.mrf.mxu1 }
 0x11b   : > { %v743_v50 = vpop.f32.mrf.mxu1 }
 0x12b   : > { %v674_v21 = vpop.f32.mrf.mxu0 }
 0x12c   : > { %v728_v22 = vadd.f32 %v727_v16, %v674_v21 }
 0x12d   : > { %v676_v24 = vpop.f32.mrf.mxu0 }
 0x12e   : > { %v746_v26 = vadd.f32 %v728_v22, %v326_v20  ;;  %v730_v27 = vadd.f32 %v729_v17, %v676_v24 }
 0x12f   : > { %v678_v29 = vpop.f32.mrf.mxu0 }
 0x130   : > { %754 = vst [vmem:[#allocation2 + $0x30] sm:$0xff] %v746_v26  ;;  %v747_v30 = vadd.f32 %v730_v27, %v327_v23  ;;  %v732_v31 = vadd.f32 %v731_v18, %v678_v29 }
 0x131   : > { %v680_v34 = vpop.f32.mrf.mxu0 }
 0x132   : > { %755 = vst [vmem:[#allocation2] sm:$0xff] %v747_v30  ;;  %v748_v35 = vadd.f32 %v732_v31, %v328_v28  ;;  %v734_v36 = vadd.f32 %v733_v19, %v680_v34 }
 0x133   : > { %v684_v38 = vpop.f32.mrf.mxu0 }
 0x134   : > { %756 = vst [vmem:[#allocation2 + $0x18] sm:$0xff] %v748_v35  ;;  %v749_v39 = vadd.f32 %v734_v36, %v329_v33  ;;  %v738_v40 = vadd.f32 %v737_v25, %v684_v38 }
 0x135   : > { %v686_v43 = vpop.f32.mrf.mxu0 }
 0x136   : > { %757 = vst [vmem:[#allocation2 + $0x10] sm:$0xff] %v749_v39  ;;  %v750_v44 = vadd.f32 %v738_v40, %v330_v37  ;;  %v740_v45 = vadd.f32 %v739_v32, %v686_v43 }
 0x137   : > { %v688_v47 = vpop.f32.mrf.mxu0 }
 0x138   : > { %758 = vst [vmem:[#allocation2 + $0x8] sm:$0xff] %v750_v44  ;;  %v751_v48 = vadd.f32 %v740_v45, %v331_v42  ;;  %v742_v49 = vadd.f32 %v741_v41, %v688_v47 }
 0x139   : > { %v690_v52 = vpop.f32.mrf.mxu0 }
 0x13a   : > { %759 = vst [vmem:[#allocation2 + $0x20] sm:$0xff] %v751_v48  ;;  %v752_v53 = vadd.f32 %v742_v49, %v332_v46  ;;  %v744_v54 = vadd.f32 %v743_v50, %v690_v52  ;;  %765 = sbr.rel (%p990_p11) target bundleno = 335 (0x14f), region = 63 }
 0x13c   : > { %760 = vst [vmem:[#allocation2 + $0x28] sm:$0xff] %v752_v53  ;;  %v753_v55 = vadd.f32 %v744_v54, %v333_v51 }
 0x13e   : > { %761 = vst [vmem:[#allocation2 + $0x38] sm:$0xff] %v753_v55 }
 0x13f   : > { %v776_v56 = vlaneseq  ;;  %v774_v58 = vld [vmem:[%s1337_s2] sm:$0x3]  ;;  %v766_v59 = vld [vmem:[#allocation2 + $0x30] sm:$0xff]  ;;  %v768_v63 = vld [vmem:[#allocation2 + $0x18] sm:$0xff] }
 0x140   : > { %v767_v61 = vld [vmem:[#allocation2] sm:$0xff]  ;;  %v769_v0 = vld [vmem:[#allocation2 + $0x10] sm:$0xff]  ;;  %v770_v1 = vld [vmem:[#allocation2 + $0x8] sm:$0xff] }
 0x141   : > { %v777_v57 = vshrl.u32 %v776_v56, 7  ;;  %v771_v4 = vld [vmem:[#allocation2 + $0x20] sm:$0xff] }
 0x143   : > { %v778_v60 = vsub.s32 0, %v777_v57  ;;  %v782_v62 = vsub.s32 1, %v777_v57  ;;  %v772_v5 = vld [vmem:[#allocation2 + $0x28] sm:$0xff] }
 0x145   : > { %v779_v2 = vrot.slane %v774_v58, %v778_v60  ;;  %v783_v3 = vrot.slane %v774_v58, %v782_v62  ;;  %v773_v6 = vld [vmem:[#allocation2 + $0x38] sm:$0xff] }
 0x147   : > { %v786_v7 = vadd.f32 %v779_v2, %v766_v59  ;;  %v787_v8 = vadd.f32 %v783_v3, %v767_v61  ;;  %v788_v9 = vadd.f32 %v779_v2, %v768_v63  ;;  %v789_v10 = vadd.f32 %v783_v3, %v769_v0 }
 0x148   : > { %v790_v11 = vadd.f32 %v779_v2, %v770_v1  ;;  %v791_v12 = vadd.f32 %v783_v3, %v771_v4  ;;  %v792_v13 = vadd.f32 %v779_v2, %v772_v5  ;;  %v793_v14 = vadd.f32 %v783_v3, %v773_v6 }
 0x149   : > { %v794_v15 = vmax.f32 %v786_v7, 0.0  ;;  %v795_v16 = vmax.f32 %v787_v8, 0.0  ;;  %v796_v17 = vmax.f32 %v788_v9, 0.0  ;;  %v797_v18 = vmax.f32 %v789_v10, 0.0 }
 0x14a   : > { %v798_v19 = vmax.f32 %v790_v11, 0.0  ;;  %v799_v20 = vmax.f32 %v791_v12, 0.0  ;;  %v800_v21 = vmax.f32 %v792_v13, 0.0  ;;  %v801_v22 = vmax.f32 %v793_v14, 0.0 }
 0x14b   : > { %802 = vst [vmem:[%s1338_s3] sm:$0xff] %v794_v15  ;;  %803 = vst [vmem:[%s1338_s3 + $0x8] sm:$0xff] %v795_v16 }
 0x14c   : > { %804 = vst [vmem:[%s1338_s3 + $0x10] sm:$0xff] %v796_v17  ;;  %805 = vst [vmem:[%s1338_s3 + $0x18] sm:$0xff] %v797_v18 }
 0x14d   : > { %806 = vst [vmem:[%s1338_s3 + $0x20] sm:$0xff] %v798_v19  ;;  %807 = vst [vmem:[%s1338_s3 + $0x28] sm:$0xff] %v799_v20 }
 0x14e   : > { %808 = vst [vmem:[%s1338_s3 + $0x30] sm:$0xff] %v800_v21  ;;  %809 = vst [vmem:[%s1338_s3 + $0x38] sm:$0xff] %v801_v22 }
 0x14f PF: > { %s13_s16 = sadd.s32 1, %s1151_s16   ;;  %s1339_s12 = smov %s1139_s13 }
 0x150   : > { %p10_p12 = scmp.ge.s32.totalorder %s13_s16, 5   ;;  %s1340_s13 = smov %s1210_s20 }
 0x151   : > { %s1341_s14 = smov %s1147_s15  ;;  %s1342_s15 = smov %s1344_s17 }
 0x152   :  { %12 = sbr.rel (!%p10_p12) target bundleno = 3 (0x3), region = 104 }

// kernel: stylegan_refiner_forward.24
= control target key start
LH: loop header
LB: loop body
LE: loop exit
PB: predicated region body
PF: predicated region fallthrough
CT: control target
= control target key end

     0   :  { %s90_s0 = inlined_call_operand.vmem [shape: f32[4,2,2,512], index: 0, kind: input, shape index: {}]   ;;  %s91_s1 = inlined_call_operand.vmem [shape: f32[4,2,256], index: 1, kind: output, shape index: {}]  }
   0x1   :  { %v8_v0 = vld [vmem:[%s90_s0] sm:$0xff]  ;;  %v9_v1 = vld [vmem:[%s90_s0 + $0x8] sm:$0xff]  ;;  %v10_v2 = vld [vmem:[%s90_s0 + $0x10] sm:$0xff] }
   0x2   :  { %v16_v3 = vmax.f32 %v8_v0, %v9_v1  ;;  %v11_v4 = vld [vmem:[%s90_s0 + $0x18] sm:$0xff]  ;;  %v12_v5 = vld [vmem:[%s90_s0 + $0x20] sm:$0xff]  ;;  %v13_v6 = vld [vmem:[%s90_s0 + $0x28] sm:$0xff] }
   0x3   :  { %v17_v7 = vmax.f32 %v10_v2, %v11_v4  ;;  %v18_v8 = vmax.f32 %v12_v5, %v13_v6  ;;  %v14_v9 = vld [vmem:[%s90_s0 + $0x30] sm:$0xff]  ;;  %v15_v10 = vld [vmem:[%s90_s0 + $0x38] sm:$0xff] }
   0x4   :  { %v24_v11 = vrot.slane %v16_v3, 4  ;;  %v19_v12 = vmax.f32 %v14_v9, %v15_v10 }
   0x5   :  { %v25_v13 = vrot.slane %v17_v7, 4  ;;  %v26_v14 = vrot.slane %v18_v8, 4 }
   0x6   :  { %v32_v15 = vmax.f32 %v16_v3, %v24_v11  ;;  %v27_v16 = vrot.slane %v19_v12, 4 }
   0x7   :  { %v33_v17 = vmax.f32 %v17_v7, %v25_v13  ;;  %v34_v18 = vmax.f32 %v18_v8, %v26_v14 }
   0x8   :  { %36 = vst [vmem:[%s91_s1] sm:$0xf] %v32_v15  ;;  %v35_v19 = vmax.f32 %v19_v12, %v27_v16 }
   0x9   :  { %37 = vst [vmem:[%s91_s1 + $0x4] sm:$0xf] %v33_v17  ;;  %38 = vst [vmem:[%s91_s1 + $0x8] sm:$0xf] %v34_v18 }
   0xa   :  { %39 = vst [vmem:[%s91_s1 + $0xc] sm:$0xf] %v35_v19 }

// kernel: stylegan_refiner_forward.22
= control target key start
LH: loop header
LB: loop body
LE: loop exit
PB: predicated region body
PF: predicated region fallthrough
CT: control target
= control target key end

     0   :  { %s1175_s12 = smov 0   ;;  %s1177_s13 = smov 0   ;;  %s1335_s0 = inlined_call_operand.vmem [shape: f32[32,2304], index: 0, kind: input, shape index: {}]   ;;  %s1336_s1 = inlined_call_operand.vmem [shape: bf16[2304,256], index: 1, kind: input, shape index: {}]   ;;  %s1337_s2 = inlined_call_operand.vmem [shape: f32[1,256], index: 2, kind: input, shape index: {}]   ;;  %s1338_s3 = inlined_call_operand.vmem [shape: f32[32,256], index: 3, kind: output, shape index: {}]  }
   0x1   :  { %s1179_s14 = smov 0   ;;  %s1181_s15 = smov 0  }
   0x2   :  { %s1183_s16 = smov 0  }
   0x3 LB: > { %s25_s17 = sadd.s32 1, %s1147_s15  ;;  %p48_p1 = scmp.ne.s32.totalorder %s1139_s13, %s1135_s12  ;;  %s1151_s16 = sphi %s1183_s16, %s13_s16   ;;  %s1147_s15 = sphi %s1181_s15, %s1342_s15   ;;  %s1143_s14 = sphi %s1179_s14, %s1341_s14   ;;  %s1139_s13 = sphi %s1177_s13, %s1340_s13   ;;  %s1135_s12 = sphi %s1175_s12, %s1339_s12  }
   0x4   : > { %p26_p0 = scmp.ge.s32.totalorder %s25_s17, 6  ;;  %p49_p2 = scmp.eq.s32.totalorder %s1151_s16, 0 }
   0x5   : > { %s41_s19 = sadd.s32 1, %s1139_s13  ;;  %p936_p5 = scmp.ge.s32.totalorder %s1151_s16, 6 }
   0x6   : > { %s1344_s17 = smov (%p26_p0, %s25_s17), 0  ;;  %p50_p3 = por %p49_p2, %p48_p1 }
   0x7   : > { %s37_s18 = ssub.s32 %s1147_s15, %s1344_s17  ;;  %164 = sbr.rel (%p936_p5) target bundleno = 23 (0x17), region = 20 }
   0x8   : > { %p39_p4 = scmp.eq.s32.totalorder %s37_s18, 0 }
   0xa   : > { %s1210_s20 = scalar_select %p39_p4, %s1139_s13, %s41_s19  }
   0xc   : > { %167 = sbr.rel (!%p50_p3) target bundleno = 23 (0x17), region = 24  ;;  %s169_s21 = sand.u32 (%p50_p3), 1, %s1139_s13  }
   0xd   : > { %s995_s22 = smul.u32 (%p50_p3), 24, %s1147_s15 }
   0xe   : > { %s997_s23 = smul.u32 (%p50_p3), 96, %s169_s21 }
   0xf   : > { %s177_s26 = scalar_lea.vmem (%p50_p3), %s1335_s0, %s995_s22 }
  0x10   : > { %v190_v0 = vld [vmem:[%s177_s26] sm:$0xff] (%p50_p3)  ;;  %v192_v1 = vld [vmem:[%s177_s26 + $0x8] sm:$0xff] (%p50_p3)  ;;  %v194_v2 = vld [vmem:[%s177_s26 + $0x10] sm:$0xff] (%p50_p3)  ;;  %s171_s27 = scalar_lea.vmem (%p50_p3), [#allocation3], %s997_s23 }
  0x11   : > { %191 = vst [vmem:[%s171_s27] sm:$0xff] %v190_v0  ;;  %193 = vst [vmem:[%s171_s27 + $0x8] sm:$0xff] %v192_v1  ;;  %v196_v3 = vld [vmem:[%s177_s26 + $0x90] sm:$0xff]  ;;  %v198_v4 = vld [vmem:[%s177_s26 + $0x98] sm:$0xff] }
  0x12   : > { %195 = vst [vmem:[%s171_s27 + $0x10] sm:$0xff] %v194_v2  ;;  %v200_v5 = vld [vmem:[%s177_s26 + $0xa0] sm:$0xff]  ;;  %197 = vst [vmem:[%s171_s27 + $0x18] sm:$0xff] %v196_v3  ;;  %v204_v7 = vld [vmem:[%s177_s26 + $0x128] sm:$0xff] }
  0x13   : > { %199 = vst [vmem:[%s171_s27 + $0x20] sm:$0xff] %v198_v4  ;;  %201 = vst [vmem:[%s171_s27 + $0x28] sm:$0xff] %v200_v5  ;;  %v202_v6 = vld [vmem:[%s177_s26 + $0x120] sm:$0xff]  ;;  %v206_v8 = vld [vmem:[%s177_s26 + $0x130] sm:$0xff] }
  0x14   : > { %203 = vst [vmem:[%s171_s27 + $0x30] sm:$0xff] %v202_v6  ;;  %205 = vst [vmem:[%s171_s27 + $0x38] sm:$0xff] %v204_v7  ;;  %v208_v9 = vld [vmem:[%s177_s26 + $0x1b0] sm:$0xff]  ;;  %v210_v10 = vld [vmem:[%s177_s26 + $0x1b8] sm:$0xff] }
  0x15   : > { %207 = vst [vmem:[%s171_s27 + $0x40] sm:$0xff] %v206_v8  ;;  %v212_v11 = vld [vmem:[%s177_s26 + $0x1c0] sm:$0xff]  ;;  %209 = vst [vmem:[%s171_s27 + $0x48] sm:$0xff] %v208_v9 }
  0x16   : > { %211 = vst [vmem:[%s171_s27 + $0x50] sm:$0xff] %v210_v10  ;;  %213 = vst [vmem:[%s171_s27 + $0x58] sm:$0xff] %v212_v11 }
  0x17 PF: > { %p938_p6 = scmp.ge.s32.totalorder %s1151_s16, 1  ;;  %p233_p7 = scmp.lt.s32.totalorder %s1151_s16, 7 }
  0x19   : > { %p234_p8 = pnand %p938_p6, %p233_p7 }
  0x1a   : > { %s240_s28 = sand.u32 (!%p234_p8), 1, %s1135_s12   ;;  %s284_s29 = smul.u32 (!%p234_p8), 48, %s1143_s14 }
  0x1b   : > { %237 = sbr.rel (%p234_p8) target bundleno = 335 (0x14f), region = 51  ;;  %p941_p10 = scmp.ne.s32.totalorder (!%p234_p8), %s1143_s14, 0 }
  0x1c   : > { %s998_s30 = smul.u32 (!%p234_p8), 96, %s240_s28  ;;  %p286_p9 = scmp.lt.s32.totalorder (!%p234_p8), %s284_s29, 287 }
  0x1e   : > { %s1227_s8 = scalar_lea.vmem (!%p234_p8), [#allocation3], %s998_s30 }
  0x20   : > { %s1346_s29 = smov (!%p286_p9, %s284_s29), 287  ;;  %317 = sbr.rel (%p941_p10) target bundleno = 42 (0x2a), region = 59 }
  0x21   : > { %s996_s4 = sshll.u32 %s1346_s29, 3 }
  0x22   : > { %s1225_s7 = scalar_lea.vmem %s1336_s1, %s996_s4 }
  0x25   : > { %v1153_v12 = vmov 0.0  }
  0x26   : > { %318 = vst [vmem:[#allocation2 + $0x30] sm:$0xff] %v1153_v12  ;;  %319 = vst [vmem:[#allocation2] sm:$0xff] %v1153_v12 }
  0x27   : > { %320 = vst [vmem:[#allocation2 + $0x18] sm:$0xff] %v1153_v12  ;;  %321 = vst [vmem:[#allocation2 + $0x10] sm:$0xff] %v1153_v12 }
  0x28   : > { %322 = vst [vmem:[#allocation2 + $0x8] sm:$0xff] %v1153_v12  ;;  %323 = vst [vmem:[#allocation2 + $0x20] sm:$0xff] %v1153_v12 }
  0x29   : > { %324 = vst [vmem:[#allocation2 + $0x28] sm:$0xff] %v1153_v12  ;;  %325 = vst [vmem:[#allocation2 + $0x38] sm:$0xff] %v1153_v12 }
  0x2a PF: > { %v1041_v13 = vld [vmem:[%s1225_s7 + $0x74] ss:$8 sps:$4 sm:$0xff]   ;;  %v1043_v14 = vld [vmem:[%s1225_s7 + $0x70] ss:$8 sps:$4 sm:$0xff]   ;;  %v1154_v15 = vmov 0   ;;  %v335_v46 = vld [vmem:[%s1227_s8 + $0x8] sm:$0xff] }
  0x2b   : > { %725 = vmatprep.mubr.bf16.mxu1 %v1154_v15  ;;  %640 = vmatprep.subr.bf16.mxu0 %v1041_v13  ;;  %v1044_v16 = vld [vmem:[%s1225_s7 + $0x64] ss:$8 sps:$4 sm:$0xff]   ;;  %v1046_v17 = vld [vmem:[%s1225_s7 + $0x60] ss:$8 sps:$4 sm:$0xff]   ;;  %v1047_v18 = vld [vmem:[%s1225_s7 + $0x54] ss:$8 sps:$4 sm:$0xff]  }
  0x2c   : > { %641 = vmatpush1.bf16.msra.mxu0 %v1043_v14  ;;  %v1049_v19 = vld [vmem:[%s1225_s7 + $0x50] ss:$8 sps:$4 sm:$0xff]   ;;  %v1050_v20 = vld [vmem:[%s1225_s7 + $0x44] ss:$8 sps:$4 sm:$0xff]   ;;  %v1062_v21 = vld [vmem:[%s1225_s7 + $0x174] ss:$8 sps:$4 sm:$0xff]  }
  0x2d   : > { %642 = vmatprep.subr.bf16.mxu0 %v1044_v16  ;;  %v1064_v22 = vld [vmem:[%s1225_s7 + $0x170] ss:$8 sps:$4 sm:$0xff]   ;;  %v1052_v23 = vld [vmem:[%s1225_s7 + $0x40] ss:$8 sps:$4 sm:$0xff]   ;;  %v1053_v24 = vld [vmem:[%s1225_s7 + $0x34] ss:$8 sps:$4 sm:$0xff]   ;;  %693 = vmatprep.subr.bf16.mxu1 %v1062_v21 }
  0x2e   : > { %v1068_v25 = vld [vmem:[%s1225_s7 + $0x164] ss:$8 sps:$4 sm:$0xff]   ;;  %694 = vmatpush1.bf16.msra.mxu1 %v1064_v22  ;;  %v1070_v26 = vld [vmem:[%s1225_s7 + $0x160] ss:$8 sps:$4 sm:$0xff]   ;;  %v1055_v27 = vld [vmem:[%s1225_s7 + $0x30] ss:$8 sps:$4 sm:$0xff]  }
  0x2f   : > { %695 = vmatprep.subr.bf16.mxu1 %v1068_v25  ;;  %v1074_v28 = vld [vmem:[%s1225_s7 + $0x154] ss:$8 sps:$4 sm:$0xff]   ;;  %v1056_v29 = vld [vmem:[%s1225_s7 + $0x24] ss:$8 sps:$4 sm:$0xff]   ;;  %v1076_v30 = vld [vmem:[%s1225_s7 + $0x150] ss:$8 sps:$4 sm:$0xff]  }
  0x30   : > { %643 = vmatpush1.bf16.msra.mxu0 %v1046_v17  ;;  %v1080_v31 = vld [vmem:[%s1225_s7 + $0x144] ss:$8 sps:$4 sm:$0xff]   ;;  %v1058_v32 = vld [vmem:[%s1225_s7 + $0x20] ss:$8 sps:$4 sm:$0xff]   ;;  %v1059_v33 = vld [vmem:[%s1225_s7 + $0x14] ss:$8 sps:$4 sm:$0xff]  }
  0x31   : > { %644 = vmatprep.subr.bf16.mxu0 %v1047_v18  ;;  %v1082_v34 = vld [vmem:[%s1225_s7 + $0x140] ss:$8 sps:$4 sm:$0xff]   ;;  %v1086_v35 = vld [vmem:[%s1225_s7 + $0x134] ss:$8 sps:$4 sm:$0xff]   ;;  %v1061_v36 = vld [vmem:[%s1225_s7 + $0x10] ss:$8 sps:$4 sm:$0xff]  }
  0x32   : > { %696 = vmatpush1.bf16.msra.mxu1 %v1070_v26  ;;  %v1065_v37 = vld [vmem:[%s1225_s7 + $0x4] ss:$8 sps:$4 sm:$0xff]   ;;  %v1088_v38 = vld [vmem:[%s1225_s7 + $0x130] ss:$8 sps:$4 sm:$0xff]   ;;  %v1067_v40 = vld [vmem:[%s1225_s7] ss:$8 sps:$4 sm:$0xff]  }
  0x33   : > { %697 = vmatprep.subr.bf16.mxu1 %v1074_v28  ;;  %v1092_v39 = vld [vmem:[%s1225_s7 + $0x124] ss:$8 sps:$4 sm:$0xff]   ;;  %v1071_v41 = vld [vmem:[%s1225_s7 + $0xf4] ss:$8 sps:$4 sm:$0xff]   ;;  %v1094_v42 = vld [vmem:[%s1225_s7 + $0x120] ss:$8 sps:$4 sm:$0xff]  }
  0x34   : > { %645 = vmatpush1.bf16.msra.mxu0 %v1049_v19  ;;  %v1098_v43 = vld [vmem:[%s1225_s7 + $0x114] ss:$8 sps:$4 sm:$0xff]   ;;  %v1073_v44 = vld [vmem:[%s1225_s7 + $0xf0] ss:$8 sps:$4 sm:$0xff]   ;;  %v1077_v45 = vld [vmem:[%s1225_s7 + $0xe4] ss:$8 sps:$4 sm:$0xff]  }
  0x35   : > { %646 = vmatprep.subr.bf16.mxu0 %v1050_v20  ;;  %v1100_v47 = vld [vmem:[%s1225_s7 + $0x110] ss:$8 sps:$4 sm:$0xff]   ;;  %v338_v48 = vld [vmem:[%s1227_s8 + $0x20] sm:$0xff]  ;;  %v1083_v52 = vld [vmem:[%s1225_s7 + $0xd4] ss:$8 sps:$4 sm:$0xff]   ;;  %p990_p11 = scmp.ne.s32.totalorder %s1143_s14, 5 }
  0x36   : > { %698 = vmatpush1.bf16.msra.mxu1 %v1076_v30  ;;  %v1104_v49 = vld [vmem:[%s1225_s7 + $0x104] ss:$8 sps:$4 sm:$0xff]   ;;  %v347_v50 = vpack.c.bf16 %v338_v48, %v335_v46  ;;  %v1079_v51 = vld [vmem:[%s1225_s7 + $0xe0] ss:$8 sps:$4 sm:$0xff]   ;;  %v336_v54 = vld [vmem:[%s1227_s8 + $0x10] sm:$0xff] }
  0x37   : > { %699 = vmatprep.subr.bf16.mxu1 %v1080_v31  ;;  %v1106_v53 = vld [vmem:[%s1225_s7 + $0x100] ss:$8 sps:$4 sm:$0xff]   ;;  %v1085_v56 = vld [vmem:[%s1225_s7 + $0xd0] ss:$8 sps:$4 sm:$0xff]   ;;  %v1089_v57 = vld [vmem:[%s1225_s7 + $0xc4] ss:$8 sps:$4 sm:$0xff]  }
  0x38   : > { %647 = vmatpush1.bf16.msra.mxu0 %v1052_v23  ;;  %672 = vmatprep.mubr.bf16.mxu0 %v347_v50  ;;  %v339_v55 = vld [vmem:[%s1227_s8 + $0x28] sm:$0xff]  ;;  %v1095_v60 = vld [vmem:[%s1225_s7 + $0xb4] ss:$8 sps:$4 sm:$0xff]   ;;  %v342_v61 = vld [vmem:[%s1227_s8 + $0x40] sm:$0xff] }
  0x39   : > { %648 = vmatprep.subr.bf16.mxu0 %v1053_v24  ;;  %v348_v58 = vpack.c.bf16 %v339_v55, %v336_v54  ;;  %v1091_v59 = vld [vmem:[%s1225_s7 + $0xc0] ss:$8 sps:$4 sm:$0xff]   ;;  %v345_v62 = vld [vmem:[%s1227_s8 + $0x58] sm:$0xff]  ;;  %v1101_v0 = vld [vmem:[%s1225_s7 + $0xa4] ss:$8 sps:$4 sm:$0xff]  }
  0x3a   : > { %700 = vmatpush1.bf16.msra.mxu1 %v1082_v34  ;;  %v1097_v63 = vld [vmem:[%s1225_s7 + $0xb0] ss:$8 sps:$4 sm:$0xff]   ;;  %v351_v1 = vpack.c.bf16 %v345_v62, %v342_v61  ;;  %v1103_v2 = vld [vmem:[%s1225_s7 + $0xa0] ss:$8 sps:$4 sm:$0xff]   ;;  %v1107_v3 = vld [vmem:[%s1225_s7 + $0x94] ss:$8 sps:$4 sm:$0xff]  }
  0x3b   : > { %701 = vmatprep.subr.bf16.mxu1 %v1086_v35  ;;  %v1109_v4 = vld [vmem:[%s1225_s7 + $0x90] ss:$8 sps:$4 sm:$0xff]   ;;  %v1110_v5 = vld [vmem:[%s1225_s7 + $0x84] ss:$8 sps:$4 sm:$0xff]   ;;  %v1112_v6 = vld [vmem:[%s1225_s7 + $0x80] ss:$8 sps:$4 sm:$0xff]  }
  0x3c   : > { %649 = vmatpush1.bf16.msra.mxu0 %v1055_v27  ;;  %v334_v7 = vld [vmem:[%s1227_s8] sm:$0xff]  ;;  %v337_v8 = vld [vmem:[%s1227_s8 + $0x18] sm:$0xff]  ;;  %v344_v10 = vld [vmem:[%s1227_s8 + $0x50] sm:$0xff] }
  0x3d   : > { %650 = vmatprep.subr.bf16.mxu0 %v1056_v29  ;;  %v341_v9 = vld [vmem:[%s1227_s8 + $0x38] sm:$0xff]  ;;  %v346_v11 = vpack.c.bf16 %v337_v8, %v334_v7  ;;  %v340_v13 = vld [vmem:[%s1227_s8 + $0x30] sm:$0xff]  ;;  %v343_v14 = vld [vmem:[%s1227_s8 + $0x48] sm:$0xff] }
  0x3e   : > { %702 = vmatpush1.bf16.msra.mxu1 %v1088_v38  ;;  %v350_v12 = vpack.c.bf16 %v344_v10, %v341_v9  ;;  %v326_v20 = vld [vmem:[#allocation2 + $0x30] sm:$0xff]  ;;  %v327_v23 = vld [vmem:[#allocation2] sm:$0xff]  ;;  %v328_v28 = vld [vmem:[#allocation2 + $0x18] sm:$0xff] }
  0x3f   : > { %703 = vmatprep.subr.bf16.mxu1 %v1092_v39  ;;  %v332_v46 = vld [vmem:[#allocation2 + $0x28] sm:$0xff] }
  0x40   : > { %651 = vmatpush1.bf16.msra.mxu0 %v1058_v32 }
  0x41   : > { %652 = vmatprep.subr.bf16.mxu0 %v1059_v33  ;;  %v329_v33 = vld [vmem:[#allocation2 + $0x10] sm:$0xff] }
  0x42   : > { %704 = vmatpush1.bf16.msra.mxu1 %v1094_v42  ;;  %v331_v42 = vld [vmem:[#allocation2 + $0x20] sm:$0xff] }
  0x43   : > { %705 = vmatprep.subr.bf16.mxu1 %v1098_v43 }
  0x44   : > { %653 = vmatpush1.bf16.msra.mxu0 %v1061_v36 }
  0x45   : > { %654 = vmatprep.subr.bf16.mxu0 %v1065_v37  ;;  %v330_v37 = vld [vmem:[#allocation2 + $0x8] sm:$0xff] }
  0x46   : > { %706 = vmatpush1.bf16.msra.mxu1 %v1100_v47 }
  0x47   : > { %707 = vmatprep.subr.bf16.mxu1 %v1104_v49 }
  0x48   : > { %655 = vmatpush1.bf16.msra.mxu0 %v1067_v40 }
  0x49   : > { %656 = vmatprep.subr.bf16.mxu0 %v1071_v41 }
  0x4a   : > { %708 = vmatpush1.bf16.msra.mxu1 %v1106_v53 }
  0x4c   : > { %657 = vmatpush2.bf16.msra.mxu0 %v1073_v44 }
  0x4d   : > { %658 = vmatprep.subr.bf16.mxu0 %v1077_v45  ;;  %726 = vmatmul.mubr.bf16.vlgmr.msra.gmra.mxu1 %v348_v58 }
  0x4e   : > { %735 = vmatprep.mubr.bf16.mxu1 %v1154_v15  ;;  %v349_v15 = vpack.c.bf16 %v343_v14, %v340_v13 }
  0x50   : > { %659 = vmatpush2.bf16.msra.mxu0 %v1079_v51  ;;  %v333_v51 = vld [vmem:[#allocation2 + $0x38] sm:$0xff] }
  0x51   : > { %660 = vmatprep.subr.bf16.mxu0 %v1083_v52 }
  0x54   : > { %661 = vmatpush2.bf16.msra.mxu0 %v1085_v56 }
  0x55   : > { %662 = vmatprep.subr.bf16.mxu0 %v1089_v57  ;;  %736 = vmatmul.mubr.bf16.gmra.mxu1 %v351_v1 }
  0x58   : > { %663 = vmatpush2.bf16.msra.mxu0 %v1091_v59 }
  0x59   : > { %664 = vmatprep.subr.bf16.mxu0 %v1095_v60 }
  0x5c   : > { %665 = vmatpush2.bf16.msra.mxu0 %v1097_v63 }
  0x5d   : > { %666 = vmatprep.subr.bf16.mxu0 %v1101_v0 }
  0x60   : > { %667 = vmatpush2.bf16.msra.mxu0 %v1103_v2 }
  0x61   : > { %668 = vmatprep.subr.bf16.mxu0 %v1107_v3 }
  0x64   : > { %669 = vmatpush2.bf16.msra.mxu0 %v1109_v4 }
  0x65   : > { %670 = vmatprep.subr.bf16.mxu0 %v1110_v5 }
  0x68   : > { %671 = vmatpush2.bf16.msra.mxu0 %v1112_v6 }
  0x6b   : > { %673 = vmatmul.mubr.bf16.vlgmr.msra.gmra.mxu0 %v346_v11 }
  0x6c   : > { %682 = vmatprep.mubr.bf16.mxu0 %v350_v12 }
  0x73   : > { %683 = vmatmul.mubr.bf16.gmra.mxu0 %v349_v15 }
 0x10d   : > { %v727_v16 = vpop.f32.mrf.mxu1 }
 0x10f   : > { %v729_v17 = vpop.f32.mrf.mxu1 }
 0x111   : > { %v731_v18 = vpop.f32.mrf.mxu1 }
 0x113   : > { %v733_v19 = vpop.f32.mrf.mxu1 }
 0x115   : > { %v737_v25 = vpop.f32.mrf.mxu1 }
 0x117   : > { %v739_v32 = vpop.f32.mrf.mxu1 }
 0x119   : > { %v741_v41 = vpop.f32.mrf.mxu1 }
 0x11b   : > { %v743_v50 = vpop.f32.mrf.mxu1 }
 0x12b   : > { %v674_v21 = vpop.f32.mrf.mxu0 }
 0x12c   : > { %v728_v22 = vadd.f32 %v727_v16, %v674_v21 }
 0x12d   : > { %v676_v24 = vpop.f32.mrf.mxu0 }
 0x12e   : > { %v746_v26 = vadd.f32 %v728_v22, %v326_v20  ;;  %v730_v27 = vadd.f32 %v729_v17, %v676_v24 }
 0x12f   : > { %v678_v29 = vpop.f32.mrf.mxu0 }
 0x130   : > { %754 = vst [vmem:[#allocation2 + $0x30] sm:$0xff] %v746_v26  ;;  %v747_v30 = vadd.f32 %v730_v27, %v327_v23  ;;  %v732_v31 = vadd.f32 %v731_v18, %v678_v29 }
 0x131   : > { %v680_v34 = vpop.f32.mrf.mxu0 }
 0x132   : > { %755 = vst [vmem:[#allocation2] sm:$0xff] %v747_v30  ;;  %v748_v35 = vadd.f32 %v732_v31, %v328_v28  ;;  %v734_v36 = vadd.f32 %v733_v19, %v680_v34 }
 0x133   : > { %v684_v38 = vpop.f32.mrf.mxu0 }
 0x134   : > { %756 = vst [vmem:[#allocation2 + $0x18] sm:$0xff] %v748_v35  ;;  %v749_v39 = vadd.f32 %v734_v36, %v329_v33  ;;  %v738_v40 = vadd.f32 %v737_v25, %v684_v38 }
 0x135   : > { %v686_v43 = vpop.f32.mrf.mxu0 }
 0x136   : > { %757 = vst [vmem:[#allocation2 + $0x10] sm:$0xff] %v749_v39  ;;  %v750_v44 = vadd.f32 %v738_v40, %v330_v37  ;;  %v740_v45 = vadd.f32 %v739_v32, %v686_v43 }
 0x137   : > { %v688_v47 = vpop.f32.mrf.mxu0 }
 0x138   : > { %758 = vst [vmem:[#allocation2 + $0x8] sm:$0xff] %v750_v44  ;;  %v751_v48 = vadd.f32 %v740_v45, %v331_v42  ;;  %v742_v49 = vadd.f32 %v741_v41, %v688_v47 }
 0x139   : > { %v690_v52 = vpop.f32.mrf.mxu0 }
 0x13a   : > { %759 = vst [vmem:[#allocation2 + $0x20] sm:$0xff] %v751_v48  ;;  %v752_v53 = vadd.f32 %v742_v49, %v332_v46  ;;  %v744_v54 = vadd.f32 %v743_v50, %v690_v52  ;;  %765 = sbr.rel (%p990_p11) target bundleno = 335 (0x14f), region = 63 }
 0x13c   : > { %760 = vst [vmem:[#allocation2 + $0x28] sm:$0xff] %v752_v53  ;;  %v753_v55 = vadd.f32 %v744_v54, %v333_v51 }
 0x13e   : > { %761 = vst [vmem:[#allocation2 + $0x38] sm:$0xff] %v753_v55 }
 0x13f   : > { %v776_v56 = vlaneseq  ;;  %v774_v58 = vld [vmem:[%s1337_s2] sm:$0x3]  ;;  %v766_v59 = vld [vmem:[#allocation2 + $0x30] sm:$0xff]  ;;  %v768_v63 = vld [vmem:[#allocation2 + $0x18] sm:$0xff] }
 0x140   : > { %v767_v61 = vld [vmem:[#allocation2] sm:$0xff]  ;;  %v769_v0 = vld [vmem:[#allocation2 + $0x10] sm:$0xff]  ;;  %v770_v1 = vld [vmem:[#allocation2 + $0x8] sm:$0xff] }
 0x141   : > { %v777_v57 = vshrl.u32 %v776_v56, 7  ;;  %v771_v4 = vld [vmem:[#allocation2 + $0x20] sm:$0xff] }
 0x143   : > { %v778_v60 = vsub.s32 0, %v777_v57  ;;  %v782_v62 = vsub.s32 1, %v777_v57  ;;  %v772_v5 = vld [vmem:[#allocation2 + $0x28] sm:$0xff] }
 0x145   : > { %v779_v2 = vrot.slane %v774_v58, %v778_v60  ;;  %v783_v3 = vrot.slane %v774_v58, %v782_v62  ;;  %v773_v6 = vld [vmem:[#allocation2 + $0x38] sm:$0xff] }
 0x147   : > { %v786_v7 = vadd.f32 %v779_v2, %v766_v59  ;;  %v787_v8 = vadd.f32 %v783_v3, %v767_v61  ;;  %v788_v9 = vadd.f32 %v779_v2, %v768_v63  ;;  %v789_v10 = vadd.f32 %v783_v3, %v769_v0 }
 0x148   : > { %v790_v11 = vadd.f32 %v779_v2, %v770_v1  ;;  %v791_v12 = vadd.f32 %v783_v3, %v771_v4  ;;  %v792_v13 = vadd.f32 %v779_v2, %v772_v5  ;;  %v793_v14 = vadd.f32 %v783_v3, %v773_v6 }
 0x149   : > { %v794_v15 = vmax.f32 %v786_v7, 0.0  ;;  %v795_v16 = vmax.f32 %v787_v8, 0.0  ;;  %v796_v17 = vmax.f32 %v788_v9, 0.0  ;;  %v797_v18 = vmax.f32 %v789_v10, 0.0 }
 0x14a   : > { %v798_v19 = vmax.f32 %v790_v11, 0.0  ;;  %v799_v20 = vmax.f32 %v791_v12, 0.0  ;;  %v800_v21 = vmax.f32 %v792_v13, 0.0  ;;  %v801_v22 = vmax.f32 %v793_v14, 0.0 }
 0x14b   : > { %802 = vst [vmem:[%s1338_s3] sm:$0xff] %v794_v15  ;;  %803 = vst [vmem:[%s1338_s3 + $0x8] sm:$0xff] %v795_v16 }
 0x14c   : > { %804 = vst [vmem:[%s1338_s3 + $0x10] sm:$0xff] %v796_v17  ;;  %805 = vst [vmem:[%s1338_s3 + $0x18] sm:$0xff] %v797_v18 }
 0x14d   : > { %806 = vst [vmem:[%s1338_s3 + $0x20] sm:$0xff] %v798_v19  ;;  %807 = vst [vmem:[%s1338_s3 + $0x28] sm:$0xff] %v799_v20 }
 0x14e   : > { %808 = vst [vmem:[%s1338_s3 + $0x30] sm:$0xff] %v800_v21  ;;  %809 = vst [vmem:[%s1338_s3 + $0x38] sm:$0xff] %v801_v22 }
 0x14f PF: > { %s13_s16 = sadd.s32 1, %s1151_s16   ;;  %s1339_s12 = smov %s1139_s13 }
 0x150   : > { %p10_p12 = scmp.ge.s32.totalorder %s13_s16, 8   ;;  %s1340_s13 = smov %s1210_s20 }
 0x151   : > { %s1341_s14 = smov %s1147_s15  ;;  %s1342_s15 = smov %s1344_s17 }
 0x152   :  { %12 = sbr.rel (!%p10_p12) target bundleno = 3 (0x3), region = 104 }

// kernel: stylegan_refiner_forward.25
= control target key start
LH: loop header
LB: loop body
LE: loop exit
PB: predicated region body
PF: predicated region fallthrough
CT: control target
= control target key end

     0   :  { %s1298_s12 = smov 0   ;;  %s1300_s13 = smov 0   ;;  %s1563_s0 = inlined_call_operand.vmem [shape: f32[8,2304], index: 0, kind: input, shape index: {}]   ;;  %s1564_s1 = inlined_call_operand.vmem [shape: bf16[2304,512], index: 1, kind: input, shape index: {}]   ;;  %s1565_s2 = inlined_call_operand.vmem [shape: f32[1,512], index: 2, kind: input, shape index: {}]   ;;  %s1566_s3 = inlined_call_operand.vmem [shape: f32[8,512], index: 3, kind: output, shape index: {}]  }
   0x1   :  { %s1302_s14 = smov 0   ;;  %s1304_s15 = smov 0  }
   0x2   :  { %s1306_s16 = smov 0   ;;  %s1308_s17 = smov 0  }
   0x3   :  { %s1310_s18 = smov 0  }
   0x4 LB: > { %s25_s19 = sadd.s32 1, %s1266_s16  ;;  %s28_s20 = sadd.s32 1, %s1270_s17  ;;  %s1274_s18 = sphi %s1310_s18, %s13_s18   ;;  %s1270_s17 = sphi %s1308_s17, %s1572_s17   ;;  %s1266_s16 = sphi %s1306_s16, %s1571_s16   ;;  %s1262_s15 = sphi %s1304_s15, %s1570_s15   ;;  %s1258_s14 = sphi %s1302_s14, %s1569_s14   ;;  %s1254_s13 = sphi %s1300_s13, %s1568_s13   ;;  %s1250_s12 = sphi %s1298_s12, %s1567_s12  }
   0x5   : > { %p26_p0 = scmp.ge.s32.totalorder %s25_s19, 6  ;;  %p76_p1 = scmp.ne.s32.totalorder %s1254_s13, %s1250_s12 }
   0x6   : > { %p77_p2 = scmp.eq.s32.totalorder %s1274_s18, 0  ;;  %s69_s24 = sadd.s32 1, %s1254_s13 }
   0x7   : > { %s1574_s19 = smov (%p26_p0, %s25_s19), 0  ;;  %s1576_s20 = smov (!%p26_p0, %s28_s20), %s1270_s17 }
   0x8   : > { %p78_p3 = por %p77_p2, %p76_p1  ;;  %p30_p4 = scmp.ge.s32.totalorder %s1576_s20, 2 }
   0x9   : > { %s64_s21 = ssub.s32 %s1266_s16, %s1574_s19  ;;  %p1026_p6 = scmp.ge.s32.totalorder %s1274_s18, 12 }
   0xa   : > { %s1578_s20 = smov (%p30_p4, %s1576_s20), 0 }
   0xb   : > { %s65_s22 = ssub.s32 %s1270_s17, %s1578_s20  ;;  %156 = sbr.rel (%p1026_p6) target bundleno = 48 (0x30), region = 16 }
   0xc   : > { %s66_s23 = sor.u32 %s65_s22, %s64_s21 }
   0xd   : > { %p67_p5 = scmp.eq.s32.totalorder %s66_s23, 0 }
   0xf   : > { %s1349_s25 = scalar_select %p67_p5, %s1254_s13, %s69_s24  }
  0x10   : > { %172 = sbr.rel (!%p78_p3) target bundleno = 48 (0x30), region = 24  ;;  %s174_s26 = sand.u32 (%p78_p3), 1, %s1254_s13  }
  0x11   : > { %s1088_s27 = smul.u32 (%p78_p3), 384, %s174_s26  ;;  %s1027_s28 = sshll.u32 (%p78_p3), %s1270_s17, 1 }
  0x12   : > { %s1087_s29 = smul.u32 (%p78_p3), 192, %s1266_s16 }
  0x13   : > { %s1363_s8 = scalar_lea.vmem (%p78_p3), [#allocation3], %s1088_s27 }
  0x14   : > { %s180_s30 = sadd.s32 (%p78_p3), %s1087_s29, %s1027_s28 }
  0x15   : > { %s1029_s4 = sshll.u32 %s180_s30, 2 }
  0x16   : > { %s1358_s7 = scalar_lea.vmem %s1564_s1, %s1029_s4 }
  0x17   : > { %v305_v0 = vld [vmem:[%s1358_s7] sm:$0xff]  ;;  %v307_v1 = vld [vmem:[%s1358_s7 + $0x10] sm:$0xff] }
  0x18   : > { %v309_v2 = vld [vmem:[%s1358_s7 + $0x20] sm:$0xff]  ;;  %306 = vst [vmem:[%s1363_s8] sm:$0xff] %v305_v0  ;;  %308 = vst [vmem:[%s1363_s8 + $0x8] sm:$0xff] %v307_v1  ;;  %v311_v3 = vld [vmem:[%s1358_s7 + $0x30] sm:$0xff] }
  0x19   : > { %310 = vst [vmem:[%s1363_s8 + $0x10] sm:$0xff] %v309_v2  ;;  %v313_v4 = vld [vmem:[%s1358_s7 + $0x40] sm:$0xff]  ;;  %v315_v5 = vld [vmem:[%s1358_s7 + $0x50] sm:$0xff]  ;;  %312 = vst [vmem:[%s1363_s8 + $0x18] sm:$0xff] %v311_v3 }
  0x1a   : > { %314 = vst [vmem:[%s1363_s8 + $0x20] sm:$0xff] %v313_v4  ;;  %316 = vst [vmem:[%s1363_s8 + $0x28] sm:$0xff] %v315_v5  ;;  %v317_v6 = vld [vmem:[%s1358_s7 + $0x60] sm:$0xff]  ;;  %v319_v7 = vld [vmem:[%s1358_s7 + $0x70] sm:$0xff] }
  0x1b   : > { %v321_v8 = vld [vmem:[%s1358_s7 + $0x80] sm:$0xff]  ;;  %318 = vst [vmem:[%s1363_s8 + $0x30] sm:$0xff] %v317_v6  ;;  %320 = vst [vmem:[%s1363_s8 + $0x38] sm:$0xff] %v319_v7  ;;  %v323_v9 = vld [vmem:[%s1358_s7 + $0x90] sm:$0xff] }
  0x1c   : > { %322 = vst [vmem:[%s1363_s8 + $0x40] sm:$0xff] %v321_v8  ;;  %v325_v10 = vld [vmem:[%s1358_s7 + $0xa0] sm:$0xff]  ;;  %v327_v11 = vld [vmem:[%s1358_s7 + $0xb0] sm:$0xff]  ;;  %324 = vst [vmem:[%s1363_s8 + $0x48] sm:$0xff] %v323_v9 }
  0x1d   : > { %326 = vst [vmem:[%s1363_s8 + $0x50] sm:$0xff] %v325_v10  ;;  %328 = vst [vmem:[%s1363_s8 + $0x58] sm:$0xff] %v327_v11  ;;  %v329_v12 = vld [vmem:[%s1358_s7 + $0xc0] sm:$0xff]  ;;  %v331_v13 = vld [vmem:[%s1358_s7 + $0xd0] sm:$0xff] }
  0x1e   : > { %v333_v14 = vld [vmem:[%s1358_s7 + $0xe0] sm:$0xff]  ;;  %330 = vst [vmem:[%s1363_s8 + $0x60] sm:$0xff] %v329_v12  ;;  %332 = vst [vmem:[%s1363_s8 + $0x68] sm:$0xff] %v331_v13  ;;  %v335_v15 = vld [vmem:[%s1358_s7 + $0xf0] sm:$0xff] }
  0x1f   : > { %334 = vst [vmem:[%s1363_s8 + $0x70] sm:$0xff] %v333_v14  ;;  %v337_v16 = vld [vmem:[%s1358_s7 + $0x100] sm:$0xff]  ;;  %v339_v17 = vld [vmem:[%s1358_s7 + $0x110] sm:$0xff]  ;;  %336 = vst [vmem:[%s1363_s8 + $0x78] sm:$0xff] %v335_v15 }
  0x20   : > { %338 = vst [vmem:[%s1363_s8 + $0x80] sm:$0xff] %v337_v16  ;;  %340 = vst [vmem:[%s1363_s8 + $0x88] sm:$0xff] %v339_v17  ;;  %v341_v18 = vld [vmem:[%s1358_s7 + $0x120] sm:$0xff]  ;;  %v343_v19 = vld [vmem:[%s1358_s7 + $0x130] sm:$0xff] }
  0x21   : > { %v345_v20 = vld [vmem:[%s1358_s7 + $0x140] sm:$0xff]  ;;  %342 = vst [vmem:[%s1363_s8 + $0x90] sm:$0xff] %v341_v18  ;;  %344 = vst [vmem:[%s1363_s8 + $0x98] sm:$0xff] %v343_v19  ;;  %v347_v21 = vld [vmem:[%s1358_s7 + $0x150] sm:$0xff] }
  0x22   : > { %346 = vst [vmem:[%s1363_s8 + $0xa0] sm:$0xff] %v345_v20  ;;  %v349_v22 = vld [vmem:[%s1358_s7 + $0x160] sm:$0xff]  ;;  %v351_v23 = vld [vmem:[%s1358_s7 + $0x170] sm:$0xff]  ;;  %348 = vst [vmem:[%s1363_s8 + $0xa8] sm:$0xff] %v347_v21 }
  0x23   : > { %350 = vst [vmem:[%s1363_s8 + $0xb0] sm:$0xff] %v349_v22  ;;  %352 = vst [vmem:[%s1363_s8 + $0xb8] sm:$0xff] %v351_v23  ;;  %v353_v24 = vld [vmem:[%s1358_s7 + $0x180] sm:$0xff]  ;;  %v355_v25 = vld [vmem:[%s1358_s7 + $0x190] sm:$0xff] }
  0x24   : > { %v357_v26 = vld [vmem:[%s1358_s7 + $0x1a0] sm:$0xff]  ;;  %354 = vst [vmem:[%s1363_s8 + $0xc0] sm:$0xff] %v353_v24  ;;  %356 = vst [vmem:[%s1363_s8 + $0xc8] sm:$0xff] %v355_v25  ;;  %v359_v27 = vld [vmem:[%s1358_s7 + $0x1b0] sm:$0xff] }
  0x25   : > { %358 = vst [vmem:[%s1363_s8 + $0xd0] sm:$0xff] %v357_v26  ;;  %v361_v28 = vld [vmem:[%s1358_s7 + $0x1c0] sm:$0xff]  ;;  %v363_v29 = vld [vmem:[%s1358_s7 + $0x1d0] sm:$0xff]  ;;  %360 = vst [vmem:[%s1363_s8 + $0xd8] sm:$0xff] %v359_v27 }
  0x26   : > { %362 = vst [vmem:[%s1363_s8 + $0xe0] sm:$0xff] %v361_v28  ;;  %364 = vst [vmem:[%s1363_s8 + $0xe8] sm:$0xff] %v363_v29  ;;  %v365_v30 = vld [vmem:[%s1358_s7 + $0x1e0] sm:$0xff]  ;;  %v367_v31 = vld [vmem:[%s1358_s7 + $0x1f0] sm:$0xff] }
  0x27   : > { %v369_v32 = vld [vmem:[%s1358_s7 + $0x200] sm:$0xff]  ;;  %366 = vst [vmem:[%s1363_s8 + $0xf0] sm:$0xff] %v365_v30  ;;  %368 = vst [vmem:[%s1363_s8 + $0xf8] sm:$0xff] %v367_v31  ;;  %v371_v33 = vld [vmem:[%s1358_s7 + $0x210] sm:$0xff] }
  0x28   : > { %370 = vst [vmem:[%s1363_s8 + $0x100] sm:$0xff] %v369_v32  ;;  %v373_v34 = vld [vmem:[%s1358_s7 + $0x220] sm:$0xff]  ;;  %v375_v35 = vld [vmem:[%s1358_s7 + $0x230] sm:$0xff]  ;;  %372 = vst [vmem:[%s1363_s8 + $0x108] sm:$0xff] %v371_v33 }
  0x29   : > { %374 = vst [vmem:[%s1363_s8 + $0x110] sm:$0xff] %v373_v34  ;;  %376 = vst [vmem:[%s1363_s8 + $0x118] sm:$0xff] %v375_v35  ;;  %v377_v36 = vld [vmem:[%s1358_s7 + $0x240] sm:$0xff]  ;;  %v379_v37 = vld [vmem:[%s1358_s7 + $0x250] sm:$0xff] }
  0x2a   : > { %v381_v38 = vld [vmem:[%s1358_s7 + $0x260] sm:$0xff]  ;;  %378 = vst [vmem:[%s1363_s8 + $0x120] sm:$0xff] %v377_v36  ;;  %380 = vst [vmem:[%s1363_s8 + $0x128] sm:$0xff] %v379_v37  ;;  %v383_v39 = vld [vmem:[%s1358_s7 + $0x270] sm:$0xff] }
  0x2b   : > { %382 = vst [vmem:[%s1363_s8 + $0x130] sm:$0xff] %v381_v38  ;;  %v385_v40 = vld [vmem:[%s1358_s7 + $0x280] sm:$0xff]  ;;  %v387_v41 = vld [vmem:[%s1358_s7 + $0x290] sm:$0xff]  ;;  %384 = vst [vmem:[%s1363_s8 + $0x138] sm:$0xff] %v383_v39 }
  0x2c   : > { %386 = vst [vmem:[%s1363_s8 + $0x140] sm:$0xff] %v385_v40  ;;  %388 = vst [vmem:[%s1363_s8 + $0x148] sm:$0xff] %v387_v41  ;;  %v389_v42 = vld [vmem:[%s1358_s7 + $0x2a0] sm:$0xff]  ;;  %v391_v43 = vld [vmem:[%s1358_s7 + $0x2b0] sm:$0xff] }
  0x2d   : > { %v393_v44 = vld [vmem:[%s1358_s7 + $0x2c0] sm:$0xff]  ;;  %390 = vst [vmem:[%s1363_s8 + $0x150] sm:$0xff] %v389_v42  ;;  %392 = vst [vmem:[%s1363_s8 + $0x158] sm:$0xff] %v391_v43  ;;  %v395_v45 = vld [vmem:[%s1358_s7 + $0x2d0] sm:$0xff] }
  0x2e   : > { %394 = vst [vmem:[%s1363_s8 + $0x160] sm:$0xff] %v393_v44  ;;  %v397_v46 = vld [vmem:[%s1358_s7 + $0x2e0] sm:$0xff]  ;;  %v399_v47 = vld [vmem:[%s1358_s7 + $0x2f0] sm:$0xff]  ;;  %396 = vst [vmem:[%s1363_s8 + $0x168] sm:$0xff] %v395_v45 }
  0x2f   : > { %398 = vst [vmem:[%s1363_s8 + $0x170] sm:$0xff] %v397_v46  ;;  %400 = vst [vmem:[%s1363_s8 + $0x178] sm:$0xff] %v399_v47 }
  0x30 PF: > { %p1030_p7 = scmp.ge.s32.totalorder %s1274_s18, 1  ;;  %p413_p8 = scmp.lt.s32.totalorder %s1274_s18, 13 }
  0x32   : > { %p414_p9 = pnand %p1030_p7, %p413_p8 }
  0x33   : > { %s420_s9 = sand.u32 (!%p414_p9), 1, %s1250_s12   ;;  %s460_s10 = smul.u32 (!%p414_p9), 3, %s1258_s14 }
  0x34   : > { %417 = sbr.rel (%p414_p9) target bundleno = 345 (0x159), region = 66  ;;  %s1032_s21 = sshll.u32 (!%p414_p9), %s1262_s15, 1 }
  0x35   : > { %s1089_s11 = smul.u32 (!%p414_p9), 384, %s420_s9  ;;  %p463_p10 = scmp.lt.s32.totalorder (!%p414_p9), %s460_s10, 17 }
  0x36   : > { %p473_p11 = scmp.lt.s32.totalorder (!%p414_p9), %s1032_s21, 3  ;;  %p1035_p12 = scmp.ne.s32.totalorder (!%p414_p9), %s1258_s14, 0 }
  0x37   : > { %s1480_s5 = scalar_lea.vmem (!%p414_p9), [#allocation3], %s1089_s11 }
  0x39   : > { %s1580_s10 = smov (!%p463_p10, %s460_s10), 17  ;;  %s1582_s21 = smov (!%p473_p11, %s1032_s21), 3 }
  0x3a   : > { %s1031_s22 = sshll.u32 %s1580_s10, 3  ;;  %s475_s12 = scalar_lea.vmem %s1565_s2, %s1582_s21 }
  0x3b   : > { %s1468_s26 = scalar_lea.vmem %s1563_s0, %s1031_s22  ;;  %s1034_s29 = sshll.u32 %s1582_s21, 3 }
  0x3c   : > { %s1478_s4 = scalar_lea.vmem %s1566_s3, %s1034_s29  ;;  %491 = sbr.rel (%p1035_p12) target bundleno = 67 (0x43), region = 74 }
  0x41   : > { %v1276_v48 = vmov 0.0  }
  0x42   : > { %492 = vst [vmem:[#allocation2] sm:$0xff] %v1276_v48  ;;  %493 = vst [vmem:[#allocation2 + $0x8] sm:$0xff] %v1276_v48 }
  0x43 PF: > { %v1148_v49 = vld [vmem:[%s1480_s5 + $0x74] ss:$8 sps:$4 sm:$0xff]   ;;  %v1150_v50 = vld [vmem:[%s1480_s5 + $0x70] ss:$8 sps:$4 sm:$0xff]   ;;  %v1277_v51 = vmov 0   ;;  %v498_v25 = vld [vmem:[%s1468_s26 + $0x10] sm:$0xff] }
  0x44   : > { %863 = vmatprep.mubr.bf16.mxu1 %v1277_v51  ;;  %790 = vmatprep.subr.bf16.mxu0 %v1148_v49  ;;  %v1151_v52 = vld [vmem:[%s1480_s5 + $0x64] ss:$8 sps:$4 sm:$0xff]   ;;  %v1153_v53 = vld [vmem:[%s1480_s5 + $0x60] ss:$8 sps:$4 sm:$0xff]   ;;  %v1154_v54 = vld [vmem:[%s1480_s5 + $0x54] ss:$8 sps:$4 sm:$0xff]   ;;  %v501_v28 = vpack.c.bf16 %v498_v25, %v498_v25 }
  0x45   : > { %791 = vmatpush1.bf16.msra.mxu0 %v1150_v50  ;;  %v1156_v55 = vld [vmem:[%s1480_s5 + $0x50] ss:$8 sps:$4 sm:$0xff]   ;;  %v1157_v56 = vld [vmem:[%s1480_s5 + $0x44] ss:$8 sps:$4 sm:$0xff]   ;;  %v1169_v57 = vld [vmem:[%s1480_s5 + $0x174] ss:$8 sps:$4 sm:$0xff]  }
  0x46   : > { %792 = vmatprep.subr.bf16.mxu0 %v1151_v52  ;;  %v1171_v58 = vld [vmem:[%s1480_s5 + $0x170] ss:$8 sps:$4 sm:$0xff]   ;;  %v1159_v59 = vld [vmem:[%s1480_s5 + $0x40] ss:$8 sps:$4 sm:$0xff]   ;;  %v1160_v60 = vld [vmem:[%s1480_s5 + $0x34] ss:$8 sps:$4 sm:$0xff]   ;;  %831 = vmatprep.subr.bf16.mxu1 %v1169_v57 }
  0x47   : > { %v1175_v61 = vld [vmem:[%s1480_s5 + $0x164] ss:$8 sps:$4 sm:$0xff]   ;;  %832 = vmatpush1.bf16.msra.mxu1 %v1171_v58  ;;  %v1177_v62 = vld [vmem:[%s1480_s5 + $0x160] ss:$8 sps:$4 sm:$0xff]   ;;  %v1162_v63 = vld [vmem:[%s1480_s5 + $0x30] ss:$8 sps:$4 sm:$0xff]  }
  0x48   : > { %833 = vmatprep.subr.bf16.mxu1 %v1175_v61  ;;  %v1181_v0 = vld [vmem:[%s1480_s5 + $0x154] ss:$8 sps:$4 sm:$0xff]   ;;  %v1163_v1 = vld [vmem:[%s1480_s5 + $0x24] ss:$8 sps:$4 sm:$0xff]   ;;  %v1183_v2 = vld [vmem:[%s1480_s5 + $0x150] ss:$8 sps:$4 sm:$0xff]  }
  0x49   : > { %793 = vmatpush1.bf16.msra.mxu0 %v1153_v53  ;;  %v1187_v3 = vld [vmem:[%s1480_s5 + $0x144] ss:$8 sps:$4 sm:$0xff]   ;;  %v1165_v4 = vld [vmem:[%s1480_s5 + $0x20] ss:$8 sps:$4 sm:$0xff]   ;;  %v1166_v5 = vld [vmem:[%s1480_s5 + $0x14] ss:$8 sps:$4 sm:$0xff]  }
  0x4a   : > { %794 = vmatprep.subr.bf16.mxu0 %v1154_v54  ;;  %v1189_v6 = vld [vmem:[%s1480_s5 + $0x140] ss:$8 sps:$4 sm:$0xff]   ;;  %v1193_v7 = vld [vmem:[%s1480_s5 + $0x134] ss:$8 sps:$4 sm:$0xff]   ;;  %v1168_v8 = vld [vmem:[%s1480_s5 + $0x10] ss:$8 sps:$4 sm:$0xff]  }
  0x4b   : > { %834 = vmatpush1.bf16.msra.mxu1 %v1177_v62  ;;  %v1172_v9 = vld [vmem:[%s1480_s5 + $0x4] ss:$8 sps:$4 sm:$0xff]   ;;  %v1195_v10 = vld [vmem:[%s1480_s5 + $0x130] ss:$8 sps:$4 sm:$0xff]   ;;  %v1174_v12 = vld [vmem:[%s1480_s5] ss:$8 sps:$4 sm:$0xff]  }
  0x4c   : > { %835 = vmatprep.subr.bf16.mxu1 %v1181_v0  ;;  %v1199_v11 = vld [vmem:[%s1480_s5 + $0x124] ss:$8 sps:$4 sm:$0xff]   ;;  %v1178_v13 = vld [vmem:[%s1480_s5 + $0xf4] ss:$8 sps:$4 sm:$0xff]   ;;  %v1201_v14 = vld [vmem:[%s1480_s5 + $0x120] ss:$8 sps:$4 sm:$0xff]  }
  0x4d   : > { %795 = vmatpush1.bf16.msra.mxu0 %v1156_v55  ;;  %v1205_v15 = vld [vmem:[%s1480_s5 + $0x114] ss:$8 sps:$4 sm:$0xff]   ;;  %v1180_v16 = vld [vmem:[%s1480_s5 + $0xf0] ss:$8 sps:$4 sm:$0xff]   ;;  %v1184_v17 = vld [vmem:[%s1480_s5 + $0xe4] ss:$8 sps:$4 sm:$0xff]  }
  0x4e   : > { %796 = vmatprep.subr.bf16.mxu0 %v1157_v56  ;;  %v497_v18 = vld [vmem:[%s1468_s26 + $0x8] sm:$0xff]  ;;  %v1211_v21 = vld [vmem:[%s1480_s5 + $0x104] ss:$8 sps:$4 sm:$0xff]   ;;  %v1186_v22 = vld [vmem:[%s1480_s5 + $0xe0] ss:$8 sps:$4 sm:$0xff]   ;;  %p1084_p13 = scmp.ne.s32.totalorder %s1258_s14, 5 }
  0x4f   : > { %836 = vmatpush1.bf16.msra.mxu1 %v1183_v2  ;;  %v1207_v19 = vld [vmem:[%s1480_s5 + $0x110] ss:$8 sps:$4 sm:$0xff]   ;;  %v500_v20 = vpack.c.bf16 %v497_v18, %v497_v18  ;;  %v1190_v23 = vld [vmem:[%s1480_s5 + $0xd4] ss:$8 sps:$4 sm:$0xff]   ;;  %v1213_v24 = vld [vmem:[%s1480_s5 + $0x100] ss:$8 sps:$4 sm:$0xff]  }
  0x50   : > { %837 = vmatprep.subr.bf16.mxu1 %v1187_v3  ;;  %v1192_v26 = vld [vmem:[%s1480_s5 + $0xd0] ss:$8 sps:$4 sm:$0xff]   ;;  %v1196_v27 = vld [vmem:[%s1480_s5 + $0xc4] ss:$8 sps:$4 sm:$0xff]   ;;  %v1198_v29 = vld [vmem:[%s1480_s5 + $0xc0] ss:$8 sps:$4 sm:$0xff]  }
  0x51   : > { %797 = vmatpush1.bf16.msra.mxu0 %v1159_v59  ;;  %822 = vmatprep.mubr.bf16.mxu0 %v500_v20  ;;  %v1202_v30 = vld [vmem:[%s1480_s5 + $0xb4] ss:$8 sps:$4 sm:$0xff]   ;;  %v1204_v31 = vld [vmem:[%s1480_s5 + $0xb0] ss:$8 sps:$4 sm:$0xff]   ;;  %v1208_v32 = vld [vmem:[%s1480_s5 + $0xa4] ss:$8 sps:$4 sm:$0xff]  }
  0x52   : > { %798 = vmatprep.subr.bf16.mxu0 %v1160_v60  ;;  %v1210_v33 = vld [vmem:[%s1480_s5 + $0xa0] ss:$8 sps:$4 sm:$0xff]   ;;  %v1214_v34 = vld [vmem:[%s1480_s5 + $0x94] ss:$8 sps:$4 sm:$0xff]   ;;  %v1216_v35 = vld [vmem:[%s1480_s5 + $0x90] ss:$8 sps:$4 sm:$0xff]  }
  0x53   : > { %838 = vmatpush1.bf16.msra.mxu1 %v1189_v6  ;;  %v1217_v36 = vld [vmem:[%s1480_s5 + $0x84] ss:$8 sps:$4 sm:$0xff]   ;;  %v1219_v37 = vld [vmem:[%s1480_s5 + $0x80] ss:$8 sps:$4 sm:$0xff]   ;;  %v496_v38 = vld [vmem:[%s1468_s26] sm:$0xff] }
  0x54   : > { %839 = vmatprep.subr.bf16.mxu1 %v1193_v7  ;;  %v499_v39 = vpack.c.bf16 %v496_v38, %v496_v38  ;;  %v494_v44 = vld [vmem:[#allocation2] sm:$0xff]  ;;  %v495_v47 = vld [vmem:[#allocation2 + $0x8] sm:$0xff] }
  0x55   : > { %799 = vmatpush1.bf16.msra.mxu0 %v1162_v63 }
  0x56   : > { %800 = vmatprep.subr.bf16.mxu0 %v1163_v1 }
  0x57   : > { %840 = vmatpush1.bf16.msra.mxu1 %v1195_v10 }
  0x58   : > { %841 = vmatprep.subr.bf16.mxu1 %v1199_v11 }
  0x59   : > { %801 = vmatpush1.bf16.msra.mxu0 %v1165_v4 }
  0x5a   : > { %802 = vmatprep.subr.bf16.mxu0 %v1166_v5 }
  0x5b   : > { %842 = vmatpush1.bf16.msra.mxu1 %v1201_v14 }
  0x5c   : > { %843 = vmatprep.subr.bf16.mxu1 %v1205_v15 }
  0x5d   : > { %803 = vmatpush1.bf16.msra.mxu0 %v1168_v8 }
  0x5e   : > { %804 = vmatprep.subr.bf16.mxu0 %v1172_v9 }
  0x5f   : > { %844 = vmatpush1.bf16.msra.mxu1 %v1207_v19 }
  0x60   : > { %845 = vmatprep.subr.bf16.mxu1 %v1211_v21 }
  0x61   : > { %805 = vmatpush1.bf16.msra.mxu0 %v1174_v12 }
  0x62   : > { %806 = vmatprep.subr.bf16.mxu0 %v1178_v13 }
  0x63   : > { %846 = vmatpush1.bf16.msra.mxu1 %v1213_v24 }
  0x65   : > { %807 = vmatpush2.bf16.msra.mxu0 %v1180_v16 }
  0x66   : > { %808 = vmatprep.subr.bf16.mxu0 %v1184_v17  ;;  %864 = vmatmul.mubr.bf16.vlgmr.msra.gmra.mxu1 %v501_v28 }
  0x69   : > { %809 = vmatpush2.bf16.msra.mxu0 %v1186_v22 }
  0x6a   : > { %810 = vmatprep.subr.bf16.mxu0 %v1190_v23 }
  0x6d   : > { %811 = vmatpush2.bf16.msra.mxu0 %v1192_v26 }
  0x6e   : > { %812 = vmatprep.subr.bf16.mxu0 %v1196_v27 }
  0x71   : > { %813 = vmatpush2.bf16.msra.mxu0 %v1198_v29 }
  0x72   : > { %814 = vmatprep.subr.bf16.mxu0 %v1202_v30 }
  0x75   : > { %815 = vmatpush2.bf16.msra.mxu0 %v1204_v31 }
  0x76   : > { %816 = vmatprep.subr.bf16.mxu0 %v1208_v32 }
  0x79   : > { %817 = vmatpush2.bf16.msra.mxu0 %v1210_v33 }
  0x7a   : > { %818 = vmatprep.subr.bf16.mxu0 %v1214_v34 }
  0x7d   : > { %819 = vmatpush2.bf16.msra.mxu0 %v1216_v35 }
  0x7e   : > { %820 = vmatprep.subr.bf16.mxu0 %v1217_v36 }
  0x81   : > { %821 = vmatpush2.bf16.msra.mxu0 %v1219_v37 }
  0x84   : > { %823 = vmatmul.mubr.bf16.vlgmr.msra.gmra.mxu0 %v499_v39 }
 0x126   : > { %v865_v40 = vpop.f32.mrf.mxu1 }
 0x128   : > { %v867_v41 = vpop.f32.mrf.mxu1 }
 0x12a   : > { %v869_v42 = vpop.f32.mrf.mxu1 }
 0x12c   : > { %v870_v43 = vpop.f32.mrf.mxu1 }
 0x144   : > { %v824_v45 = vpop.f32.mrf.mxu0 }
 0x145   : > { %v866_v46 = vadd.f32 %v865_v40, %v824_v45 }
 0x146   : > { %v826_v48 = vpop.f32.mrf.mxu0 }
 0x147   : > { %v872_v49 = vadd.f32 %v866_v46, %v494_v44  ;;  %v868_v50 = vadd.f32 %v867_v41, %v826_v48  ;;  %879 = sbr.rel (%p1084_p13) target bundleno = 345 (0x159), region = 78 }
 0x148   : > { %v828_v51 = vpop.f32.mrf.mxu0 }
 0x149   : > { %874 = vst [vmem:[#allocation2] sm:$0xff] %v872_v49  ;;  %v873_v52 = vadd.f32 %v868_v50, %v495_v47 }
 0x14a   : > { %v829_v53 = vpop.f32.mrf.mxu0 }
 0x14b   : > { %875 = vst [vmem:[#allocation2 + $0x8] sm:$0xff] %v873_v52 }
 0x14c   : > { %v884_v54 = vlaneseq  ;;  %v882_v56 = vld [vmem:[%s475_s12] sm:$0x3] }
 0x14e   : > { %v885_v55 = vshrl.u32 %v884_v54, 7 }
 0x150   : > { %v886_v57 = vsub.s32 0, %v885_v55  ;;  %v890_v58 = vsub.s32 1, %v885_v55  ;;  %v880_v59 = vld [vmem:[#allocation2] sm:$0xff] }
 0x152   : > { %v881_v60 = vld [vmem:[#allocation2 + $0x8] sm:$0xff]  ;;  %v887_v61 = vrot.slane %v882_v56, %v886_v57  ;;  %v891_v62 = vrot.slane %v882_v56, %v890_v58 }
 0x154   : > { %v894_v63 = vadd.f32 %v887_v61, %v880_v59  ;;  %v895_v0 = vadd.f32 %v891_v62, %v881_v60 }
 0x156   : > { %v896_v1 = vmax.f32 %v894_v63, 0.0  ;;  %v897_v2 = vmax.f32 %v895_v0, 0.0 }
 0x158   : > { %898 = vst [vmem:[%s1478_s4] sm:$0xff] %v896_v1  ;;  %899 = vst [vmem:[%s1478_s4 + $0x8] sm:$0xff] %v897_v2 }
 0x159 PF: > { %s13_s18 = sadd.s32 1, %s1274_s18   ;;  %s1567_s12 = smov %s1254_s13 }
 0x15a   : > { %p10_p0 = scmp.ge.s32.totalorder %s13_s18, 14   ;;  %s1568_s13 = smov %s1349_s25 }
 0x15b   : > { %s1569_s14 = smov %s1266_s16  ;;  %s1570_s15 = smov %s1270_s17 }
 0x15c   : > { %s1571_s16 = smov %s1574_s19  ;;  %s1572_s17 = smov %s1578_s20 }
 0x15d   :  { %12 = sbr.rel (!%p10_p0) target bundleno = 4 (0x4), region = 119 }

// kernel: stylegan_refiner_forward.14
= control target key start
LH: loop header
LB: loop body
LE: loop exit
PB: predicated region body
PF: predicated region fallthrough
CT: control target
= control target key end

     0   :  { %s1328_s12 = smov 0   ;;  %s1330_s13 = smov 0   ;;  %s1601_s0 = inlined_call_operand.vmem [shape: f32[2,768], index: 0, kind: input, shape index: {}]   ;;  %s1602_s1 = inlined_call_operand.vmem [shape: bf16[768,512], index: 1, kind: input, shape index: {}]   ;;  %s1603_s2 = inlined_call_operand.vmem [shape: f32[1,512], index: 2, kind: input, shape index: {}]   ;;  %s1604_s3 = inlined_call_operand.vmem [shape: f32[2,512], index: 3, kind: output, shape index: {}]  }
   0x1   :  { %s1332_s14 = smov 0   ;;  %s1334_s15 = smov 0  }
   0x2   :  { %s1336_s16 = smov 0   ;;  %s1338_s17 = smov 0  }
   0x3   :  { %s1340_s18 = smov 0  }
   0x4 LB: > { %s25_s19 = sadd.s32 1, %s1295_s16  ;;  %s28_s20 = sadd.s32 1, %s1299_s17  ;;  %s1303_s18 = sphi %s1340_s18, %s13_s18   ;;  %s1299_s17 = sphi %s1338_s17, %s1610_s17   ;;  %s1295_s16 = sphi %s1336_s16, %s1609_s16   ;;  %s1291_s15 = sphi %s1334_s15, %s1608_s15   ;;  %s1287_s14 = sphi %s1332_s14, %s1607_s14   ;;  %s1283_s13 = sphi %s1330_s13, %s1606_s13   ;;  %s1279_s12 = sphi %s1328_s12, %s1605_s12  }
   0x5   : > { %p26_p0 = scmp.ge.s32.totalorder %s25_s19, 2  ;;  %p76_p1 = scmp.ne.s32.totalorder %s1283_s13, %s1279_s12 }
   0x6   : > { %p77_p2 = scmp.eq.s32.totalorder %s1303_s18, 0  ;;  %s69_s24 = sadd.s32 1, %s1283_s13 }
   0x7   : > { %s1612_s19 = smov (%p26_p0, %s25_s19), 0  ;;  %s1614_s20 = smov (!%p26_p0, %s28_s20), %s1299_s17 }
   0x8   : > { %p78_p3 = por %p77_p2, %p76_p1  ;;  %p30_p4 = scmp.ge.s32.totalorder %s1614_s20, 2 }
   0x9   : > { %s64_s21 = ssub.s32 %s1295_s16, %s1612_s19  ;;  %p1053_p6 = scmp.ge.s32.totalorder %s1303_s18, 4 }
   0xa   : > { %s1616_s20 = smov (%p30_p4, %s1614_s20), 0 }
   0xb   : > { %s65_s22 = ssub.s32 %s1299_s17, %s1616_s20  ;;  %156 = sbr.rel (%p1053_p6) target bundleno = 48 (0x30), region = 16 }
   0xc   : > { %s66_s23 = sor.u32 %s65_s22, %s64_s21 }
   0xd   : > { %p67_p5 = scmp.eq.s32.totalorder %s66_s23, 0 }
   0xf   : > { %s1379_s25 = scalar_select %p67_p5, %s1283_s13, %s69_s24  }
  0x10   : > { %172 = sbr.rel (!%p78_p3) target bundleno = 48 (0x30), region = 24  ;;  %s174_s26 = sand.u32 (%p78_p3), 1, %s1283_s13  }
  0x11   : > { %s1115_s27 = smul.u32 (%p78_p3), 384, %s174_s26  ;;  %s1054_s28 = sshll.u32 (%p78_p3), %s1299_s17, 1 }
  0x12   : > { %s1114_s29 = smul.u32 (%p78_p3), 192, %s1295_s16 }
  0x13   : > { %s1393_s8 = scalar_lea.vmem (%p78_p3), [#allocation3], %s1115_s27 }
  0x14   : > { %s180_s30 = sadd.s32 (%p78_p3), %s1114_s29, %s1054_s28 }
  0x15   : > { %s1056_s4 = sshll.u32 %s180_s30, 2 }
  0x16   : > { %s1388_s7 = scalar_lea.vmem %s1602_s1, %s1056_s4 }
  0x17   : > { %v305_v0 = vld [vmem:[%s1388_s7] sm:$0xff]  ;;  %v307_v1 = vld [vmem:[%s1388_s7 + $0x10] sm:$0xff] }
  0x18   : > { %v309_v2 = vld [vmem:[%s1388_s7 + $0x20] sm:$0xff]  ;;  %306 = vst [vmem:[%s1393_s8] sm:$0xff] %v305_v0  ;;  %308 = vst [vmem:[%s1393_s8 + $0x8] sm:$0xff] %v307_v1  ;;  %v311_v3 = vld [vmem:[%s1388_s7 + $0x30] sm:$0xff] }
  0x19   : > { %310 = vst [vmem:[%s1393_s8 + $0x10] sm:$0xff] %v309_v2  ;;  %v313_v4 = vld [vmem:[%s1388_s7 + $0x40] sm:$0xff]  ;;  %v315_v5 = vld [vmem:[%s1388_s7 + $0x50] sm:$0xff]  ;;  %312 = vst [vmem:[%s1393_s8 + $0x18] sm:$0xff] %v311_v3 }
  0x1a   : > { %314 = vst [vmem:[%s1393_s8 + $0x20] sm:$0xff] %v313_v4  ;;  %316 = vst [vmem:[%s1393_s8 + $0x28] sm:$0xff] %v315_v5  ;;  %v317_v6 = vld [vmem:[%s1388_s7 + $0x60] sm:$0xff]  ;;  %v319_v7 = vld [vmem:[%s1388_s7 + $0x70] sm:$0xff] }
  0x1b   : > { %v321_v8 = vld [vmem:[%s1388_s7 + $0x80] sm:$0xff]  ;;  %318 = vst [vmem:[%s1393_s8 + $0x30] sm:$0xff] %v317_v6  ;;  %320 = vst [vmem:[%s1393_s8 + $0x38] sm:$0xff] %v319_v7  ;;  %v323_v9 = vld [vmem:[%s1388_s7 + $0x90] sm:$0xff] }
  0x1c   : > { %322 = vst [vmem:[%s1393_s8 + $0x40] sm:$0xff] %v321_v8  ;;  %v325_v10 = vld [vmem:[%s1388_s7 + $0xa0] sm:$0xff]  ;;  %v327_v11 = vld [vmem:[%s1388_s7 + $0xb0] sm:$0xff]  ;;  %324 = vst [vmem:[%s1393_s8 + $0x48] sm:$0xff] %v323_v9 }
  0x1d   : > { %326 = vst [vmem:[%s1393_s8 + $0x50] sm:$0xff] %v325_v10  ;;  %328 = vst [vmem:[%s1393_s8 + $0x58] sm:$0xff] %v327_v11  ;;  %v329_v12 = vld [vmem:[%s1388_s7 + $0xc0] sm:$0xff]  ;;  %v331_v13 = vld [vmem:[%s1388_s7 + $0xd0] sm:$0xff] }
  0x1e   : > { %v333_v14 = vld [vmem:[%s1388_s7 + $0xe0] sm:$0xff]  ;;  %330 = vst [vmem:[%s1393_s8 + $0x60] sm:$0xff] %v329_v12  ;;  %332 = vst [vmem:[%s1393_s8 + $0x68] sm:$0xff] %v331_v13  ;;  %v335_v15 = vld [vmem:[%s1388_s7 + $0xf0] sm:$0xff] }
  0x1f   : > { %334 = vst [vmem:[%s1393_s8 + $0x70] sm:$0xff] %v333_v14  ;;  %v337_v16 = vld [vmem:[%s1388_s7 + $0x100] sm:$0xff]  ;;  %v339_v17 = vld [vmem:[%s1388_s7 + $0x110] sm:$0xff]  ;;  %336 = vst [vmem:[%s1393_s8 + $0x78] sm:$0xff] %v335_v15 }
  0x20   : > { %338 = vst [vmem:[%s1393_s8 + $0x80] sm:$0xff] %v337_v16  ;;  %340 = vst [vmem:[%s1393_s8 + $0x88] sm:$0xff] %v339_v17  ;;  %v341_v18 = vld [vmem:[%s1388_s7 + $0x120] sm:$0xff]  ;;  %v343_v19 = vld [vmem:[%s1388_s7 + $0x130] sm:$0xff] }
  0x21   : > { %v345_v20 = vld [vmem:[%s1388_s7 + $0x140] sm:$0xff]  ;;  %342 = vst [vmem:[%s1393_s8 + $0x90] sm:$0xff] %v341_v18  ;;  %344 = vst [vmem:[%s1393_s8 + $0x98] sm:$0xff] %v343_v19  ;;  %v347_v21 = vld [vmem:[%s1388_s7 + $0x150] sm:$0xff] }
  0x22   : > { %346 = vst [vmem:[%s1393_s8 + $0xa0] sm:$0xff] %v345_v20  ;;  %v349_v22 = vld [vmem:[%s1388_s7 + $0x160] sm:$0xff]  ;;  %v351_v23 = vld [vmem:[%s1388_s7 + $0x170] sm:$0xff]  ;;  %348 = vst [vmem:[%s1393_s8 + $0xa8] sm:$0xff] %v347_v21 }
  0x23   : > { %350 = vst [vmem:[%s1393_s8 + $0xb0] sm:$0xff] %v349_v22  ;;  %352 = vst [vmem:[%s1393_s8 + $0xb8] sm:$0xff] %v351_v23  ;;  %v353_v24 = vld [vmem:[%s1388_s7 + $0x180] sm:$0xff]  ;;  %v355_v25 = vld [vmem:[%s1388_s7 + $0x190] sm:$0xff] }
  0x24   : > { %v357_v26 = vld [vmem:[%s1388_s7 + $0x1a0] sm:$0xff]  ;;  %354 = vst [vmem:[%s1393_s8 + $0xc0] sm:$0xff] %v353_v24  ;;  %356 = vst [vmem:[%s1393_s8 + $0xc8] sm:$0xff] %v355_v25  ;;  %v359_v27 = vld [vmem:[%s1388_s7 + $0x1b0] sm:$0xff] }
  0x25   : > { %358 = vst [vmem:[%s1393_s8 + $0xd0] sm:$0xff] %v357_v26  ;;  %v361_v28 = vld [vmem:[%s1388_s7 + $0x1c0] sm:$0xff]  ;;  %v363_v29 = vld [vmem:[%s1388_s7 + $0x1d0] sm:$0xff]  ;;  %360 = vst [vmem:[%s1393_s8 + $0xd8] sm:$0xff] %v359_v27 }
  0x26   : > { %362 = vst [vmem:[%s1393_s8 + $0xe0] sm:$0xff] %v361_v28  ;;  %364 = vst [vmem:[%s1393_s8 + $0xe8] sm:$0xff] %v363_v29  ;;  %v365_v30 = vld [vmem:[%s1388_s7 + $0x1e0] sm:$0xff]  ;;  %v367_v31 = vld [vmem:[%s1388_s7 + $0x1f0] sm:$0xff] }
  0x27   : > { %v369_v32 = vld [vmem:[%s1388_s7 + $0x200] sm:$0xff]  ;;  %366 = vst [vmem:[%s1393_s8 + $0xf0] sm:$0xff] %v365_v30  ;;  %368 = vst [vmem:[%s1393_s8 + $0xf8] sm:$0xff] %v367_v31  ;;  %v371_v33 = vld [vmem:[%s1388_s7 + $0x210] sm:$0xff] }
  0x28   : > { %370 = vst [vmem:[%s1393_s8 + $0x100] sm:$0xff] %v369_v32  ;;  %v373_v34 = vld [vmem:[%s1388_s7 + $0x220] sm:$0xff]  ;;  %v375_v35 = vld [vmem:[%s1388_s7 + $0x230] sm:$0xff]  ;;  %372 = vst [vmem:[%s1393_s8 + $0x108] sm:$0xff] %v371_v33 }
  0x29   : > { %374 = vst [vmem:[%s1393_s8 + $0x110] sm:$0xff] %v373_v34  ;;  %376 = vst [vmem:[%s1393_s8 + $0x118] sm:$0xff] %v375_v35  ;;  %v377_v36 = vld [vmem:[%s1388_s7 + $0x240] sm:$0xff]  ;;  %v379_v37 = vld [vmem:[%s1388_s7 + $0x250] sm:$0xff] }
  0x2a   : > { %v381_v38 = vld [vmem:[%s1388_s7 + $0x260] sm:$0xff]  ;;  %378 = vst [vmem:[%s1393_s8 + $0x120] sm:$0xff] %v377_v36  ;;  %380 = vst [vmem:[%s1393_s8 + $0x128] sm:$0xff] %v379_v37  ;;  %v383_v39 = vld [vmem:[%s1388_s7 + $0x270] sm:$0xff] }
  0x2b   : > { %382 = vst [vmem:[%s1393_s8 + $0x130] sm:$0xff] %v381_v38  ;;  %v385_v40 = vld [vmem:[%s1388_s7 + $0x280] sm:$0xff]  ;;  %v387_v41 = vld [vmem:[%s1388_s7 + $0x290] sm:$0xff]  ;;  %384 = vst [vmem:[%s1393_s8 + $0x138] sm:$0xff] %v383_v39 }
  0x2c   : > { %386 = vst [vmem:[%s1393_s8 + $0x140] sm:$0xff] %v385_v40  ;;  %388 = vst [vmem:[%s1393_s8 + $0x148] sm:$0xff] %v387_v41  ;;  %v389_v42 = vld [vmem:[%s1388_s7 + $0x2a0] sm:$0xff]  ;;  %v391_v43 = vld [vmem:[%s1388_s7 + $0x2b0] sm:$0xff] }
  0x2d   : > { %v393_v44 = vld [vmem:[%s1388_s7 + $0x2c0] sm:$0xff]  ;;  %390 = vst [vmem:[%s1393_s8 + $0x150] sm:$0xff] %v389_v42  ;;  %392 = vst [vmem:[%s1393_s8 + $0x158] sm:$0xff] %v391_v43  ;;  %v395_v45 = vld [vmem:[%s1388_s7 + $0x2d0] sm:$0xff] }
  0x2e   : > { %394 = vst [vmem:[%s1393_s8 + $0x160] sm:$0xff] %v393_v44  ;;  %v397_v46 = vld [vmem:[%s1388_s7 + $0x2e0] sm:$0xff]  ;;  %v399_v47 = vld [vmem:[%s1388_s7 + $0x2f0] sm:$0xff]  ;;  %396 = vst [vmem:[%s1393_s8 + $0x168] sm:$0xff] %v395_v45 }
  0x2f   : > { %398 = vst [vmem:[%s1393_s8 + $0x170] sm:$0xff] %v397_v46  ;;  %400 = vst [vmem:[%s1393_s8 + $0x178] sm:$0xff] %v399_v47 }
  0x30 PF: > { %p1057_p7 = scmp.ge.s32.totalorder %s1303_s18, 1  ;;  %p413_p8 = scmp.lt.s32.totalorder %s1303_s18, 5 }
  0x32   : > { %p414_p9 = pnand %p1057_p7, %p413_p8 }
  0x33   : > { %s420_s9 = sand.u32 (!%p414_p9), 1, %s1279_s12   ;;  %s460_s10 = smul.u32 (!%p414_p9), 3, %s1287_s14 }
  0x34   : > { %417 = sbr.rel (%p414_p9) target bundleno = 347 (0x15b), region = 66  ;;  %s1059_s21 = sshll.u32 (!%p414_p9), %s1291_s15, 1 }
  0x35   : > { %s1116_s11 = smul.u32 (!%p414_p9), 384, %s420_s9  ;;  %p463_p10 = scmp.lt.s32.totalorder (!%p414_p9), %s460_s10, 5 }
  0x36   : > { %p473_p11 = scmp.lt.s32.totalorder (!%p414_p9), %s1059_s21, 3  ;;  %p1062_p12 = scmp.ne.s32.totalorder (!%p414_p9), %s1287_s14, 0 }
  0x37   : > { %s1510_s5 = scalar_lea.vmem (!%p414_p9), [#allocation3], %s1116_s11 }
  0x39   : > { %s1618_s10 = smov (!%p463_p10, %s460_s10), 5  ;;  %s1620_s21 = smov (!%p473_p11, %s1059_s21), 3 }
  0x3a   : > { %s1058_s22 = sshll.u32 %s1618_s10, 1  ;;  %s475_s12 = scalar_lea.vmem %s1603_s2, %s1620_s21 }
  0x3b   : > { %s1498_s26 = scalar_lea.vmem %s1601_s0, %s1058_s22  ;;  %s1061_s29 = sshll.u32 %s1620_s21, 1 }
  0x3c   : > { %s1508_s4 = scalar_lea.vmem %s1604_s3, %s1061_s29  ;;  %491 = sbr.rel (%p1062_p12) target bundleno = 67 (0x43), region = 74 }
  0x41   : > { %v1305_v48 = vmov 0.0  }
  0x42   : > { %492 = vst [vmem:[#allocation2] sm:$0xf] %v1305_v48 }
  0x43 PF: > { %v1176_v49 = vld [vmem:[%s1510_s5 + $0x74] ss:$8 sps:$4 sm:$0xff]   ;;  %v1178_v50 = vld [vmem:[%s1510_s5 + $0x70] ss:$8 sps:$4 sm:$0xff]   ;;  %v1306_v51 = vmov 0   ;;  %v500_v9 = vlaneseq  ;;  %p1111_p13 = scmp.ne.s32.totalorder %s1287_s14, 1 }
  0x44   : > { %879 = vmatprep.mubr.bf16.mxu1 %v1306_v51  ;;  %806 = vmatprep.subr.bf16.mxu0 %v1176_v49  ;;  %v1179_v52 = vld [vmem:[%s1510_s5 + $0x64] ss:$8 sps:$4 sm:$0xff]   ;;  %v1181_v53 = vld [vmem:[%s1510_s5 + $0x60] ss:$8 sps:$4 sm:$0xff]   ;;  %v1182_v54 = vld [vmem:[%s1510_s5 + $0x54] ss:$8 sps:$4 sm:$0xff]  }
  0x45   : > { %807 = vmatpush1.bf16.msra.mxu0 %v1178_v50  ;;  %v1184_v55 = vld [vmem:[%s1510_s5 + $0x50] ss:$8 sps:$4 sm:$0xff]   ;;  %v1185_v56 = vld [vmem:[%s1510_s5 + $0x44] ss:$8 sps:$4 sm:$0xff]   ;;  %v1197_v57 = vld [vmem:[%s1510_s5 + $0x174] ss:$8 sps:$4 sm:$0xff]  }
  0x46   : > { %808 = vmatprep.subr.bf16.mxu0 %v1179_v52  ;;  %v1199_v58 = vld [vmem:[%s1510_s5 + $0x170] ss:$8 sps:$4 sm:$0xff]   ;;  %v1187_v59 = vld [vmem:[%s1510_s5 + $0x40] ss:$8 sps:$4 sm:$0xff]   ;;  %v1188_v60 = vld [vmem:[%s1510_s5 + $0x34] ss:$8 sps:$4 sm:$0xff]   ;;  %847 = vmatprep.subr.bf16.mxu1 %v1197_v57 }
  0x47   : > { %v1203_v61 = vld [vmem:[%s1510_s5 + $0x164] ss:$8 sps:$4 sm:$0xff]   ;;  %848 = vmatpush1.bf16.msra.mxu1 %v1199_v58  ;;  %v1205_v62 = vld [vmem:[%s1510_s5 + $0x160] ss:$8 sps:$4 sm:$0xff]   ;;  %v1190_v63 = vld [vmem:[%s1510_s5 + $0x30] ss:$8 sps:$4 sm:$0xff]  }
  0x48   : > { %849 = vmatprep.subr.bf16.mxu1 %v1203_v61  ;;  %v1209_v0 = vld [vmem:[%s1510_s5 + $0x154] ss:$8 sps:$4 sm:$0xff]   ;;  %v1191_v1 = vld [vmem:[%s1510_s5 + $0x24] ss:$8 sps:$4 sm:$0xff]   ;;  %v1211_v2 = vld [vmem:[%s1510_s5 + $0x150] ss:$8 sps:$4 sm:$0xff]  }
  0x49   : > { %809 = vmatpush1.bf16.msra.mxu0 %v1181_v53  ;;  %v1215_v3 = vld [vmem:[%s1510_s5 + $0x144] ss:$8 sps:$4 sm:$0xff]   ;;  %v1193_v4 = vld [vmem:[%s1510_s5 + $0x20] ss:$8 sps:$4 sm:$0xff]   ;;  %v1194_v5 = vld [vmem:[%s1510_s5 + $0x14] ss:$8 sps:$4 sm:$0xff]  }
  0x4a   : > { %810 = vmatprep.subr.bf16.mxu0 %v1182_v54  ;;  %v1217_v6 = vld [vmem:[%s1510_s5 + $0x140] ss:$8 sps:$4 sm:$0xff]   ;;  %v1307_v7 = vmov 1983009808   ;;  %v1221_v10 = vld [vmem:[%s1510_s5 + $0x134] ss:$8 sps:$4 sm:$0xff]  }
  0x4b   : > { %850 = vmatpush1.bf16.msra.mxu1 %v1205_v62  ;;  %v498_v8 = vunpack.c.l.s4 %v1307_v7  ;;  %v1196_v11 = vld [vmem:[%s1510_s5 + $0x10] ss:$8 sps:$4 sm:$0xff]   ;;  %v1200_v12 = vld [vmem:[%s1510_s5 + $0x4] ss:$8 sps:$4 sm:$0xff]   ;;  %v1538_v15 = vshrl.u32 %v500_v9, 7 }
  0x4c   : > { %851 = vmatprep.subr.bf16.mxu1 %v1209_v0  ;;  %v1223_v13 = vld [vmem:[%s1510_s5 + $0x130] ss:$8 sps:$4 sm:$0xff]   ;;  %v1227_v16 = vld [vmem:[%s1510_s5 + $0x124] ss:$8 sps:$4 sm:$0xff]   ;;  %v1202_v17 = vld [vmem:[%s1510_s5] ss:$8 sps:$4 sm:$0xff]  }
  0x4d   : > { %811 = vmatpush1.bf16.msra.mxu0 %v1184_v55  ;;  %v499_v14 = vunpack.c.0.s8 %v498_v8  ;;  %v1206_v18 = vld [vmem:[%s1510_s5 + $0xf4] ss:$8 sps:$4 sm:$0xff]   ;;  %v1229_v19 = vld [vmem:[%s1510_s5 + $0x120] ss:$8 sps:$4 sm:$0xff]   ;;  %v1208_v23 = vld [vmem:[%s1510_s5 + $0xf0] ss:$8 sps:$4 sm:$0xff]  }
  0x4e   : > { %812 = vmatprep.subr.bf16.mxu0 %v1185_v56  ;;  %v1233_v21 = vld [vmem:[%s1510_s5 + $0x114] ss:$8 sps:$4 sm:$0xff]   ;;  %v1212_v25 = vld [vmem:[%s1510_s5 + $0xe4] ss:$8 sps:$4 sm:$0xff]   ;;  %v1235_v27 = vld [vmem:[%s1510_s5 + $0x110] ss:$8 sps:$4 sm:$0xff]  }
  0x4f   : > { %852 = vmatpush1.bf16.msra.mxu1 %v1211_v2  ;;  %v1545_v20 = vsub.s32 %v499_v14, %v1538_v15  ;;  %v494_v22 = vld [vmem:[%s1498_s26] sm:$0x3f]  ;;  %v1239_v29 = vld [vmem:[%s1510_s5 + $0x104] ss:$8 sps:$4 sm:$0xff]   ;;  %v1220_v35 = vld [vmem:[%s1510_s5 + $0xd0] ss:$8 sps:$4 sm:$0xff]  }
  0x50   : > { %853 = vmatprep.subr.bf16.mxu1 %v1215_v3  ;;  %v496_v26 = vcombine.high %v494_v22, %v494_v22  ;;  %v1214_v30 = vld [vmem:[%s1510_s5 + $0xe0] ss:$8 sps:$4 sm:$0xff]   ;;  %v1218_v32 = vld [vmem:[%s1510_s5 + $0xd4] ss:$8 sps:$4 sm:$0xff]   ;;  %v1224_v36 = vld [vmem:[%s1510_s5 + $0xc4] ss:$8 sps:$4 sm:$0xff]  }
  0x51   : > { %813 = vmatpush1.bf16.msra.mxu0 %v1187_v59  ;;  %v503_v24 = vrot.slane %v494_v22, %v1545_v20  ;;  %v1241_v34 = vld [vmem:[%s1510_s5 + $0x100] ss:$8 sps:$4 sm:$0xff]   ;;  %v1230_v39 = vld [vmem:[%s1510_s5 + $0xb4] ss:$8 sps:$4 sm:$0xff]   ;;  %v1232_v40 = vld [vmem:[%s1510_s5 + $0xb0] ss:$8 sps:$4 sm:$0xff]  }
  0x52   : > { %814 = vmatprep.subr.bf16.mxu0 %v1188_v60  ;;  %v510_v33 = vrot.slane %v496_v26, %v1545_v20  ;;  %v1226_v38 = vld [vmem:[%s1510_s5 + $0xc0] ss:$8 sps:$4 sm:$0xff]   ;;  %v1236_v41 = vld [vmem:[%s1510_s5 + $0xa4] ss:$8 sps:$4 sm:$0xff]   ;;  %v1242_v43 = vld [vmem:[%s1510_s5 + $0x94] ss:$8 sps:$4 sm:$0xff]  }
  0x53   : > { %854 = vmatpush1.bf16.msra.mxu1 %v1217_v6  ;;  %v511_v28 = vcombine.high %v503_v24, %v503_v24  ;;  %v1238_v42 = vld [vmem:[%s1510_s5 + $0xa0] ss:$8 sps:$4 sm:$0xff]   ;;  %v1244_v44 = vld [vmem:[%s1510_s5 + $0x90] ss:$8 sps:$4 sm:$0xff]   ;;  %v1246_v45 = vld [vmem:[%s1510_s5 + $0x84] ss:$8 sps:$4 sm:$0xff]   ;;  %v515_v47 = vpack.c.bf16 %v503_v24, %v503_v24 }
  0x54   : > { %855 = vmatprep.subr.bf16.mxu1 %v1221_v10  ;;  %v517_v37 = vpack.c.bf16 %v510_v33, %v510_v33  ;;  %v1248_v46 = vld [vmem:[%s1510_s5 + $0x80] ss:$8 sps:$4 sm:$0xff]   ;;  %v493_v58 = vld [vmem:[#allocation2] sm:$0xf] }
  0x55   : > { %815 = vmatpush1.bf16.msra.mxu0 %v1190_v63  ;;  %v516_v31 = vpack.c.bf16 %v511_v28, %v511_v28 }
  0x56   : > { %816 = vmatprep.subr.bf16.mxu0 %v1191_v1 }
  0x57   : > { %856 = vmatpush1.bf16.msra.mxu1 %v1223_v13  ;;  %838 = vmatprep.mubr.bf16.mxu0 %v516_v31 }
  0x58   : > { %857 = vmatprep.subr.bf16.mxu1 %v1227_v16 }
  0x59   : > { %817 = vmatpush1.bf16.msra.mxu0 %v1193_v4 }
  0x5a   : > { %818 = vmatprep.subr.bf16.mxu0 %v1194_v5 }
  0x5b   : > { %858 = vmatpush1.bf16.msra.mxu1 %v1229_v19 }
  0x5c   : > { %859 = vmatprep.subr.bf16.mxu1 %v1233_v21 }
  0x5d   : > { %819 = vmatpush1.bf16.msra.mxu0 %v1196_v11 }
  0x5e   : > { %820 = vmatprep.subr.bf16.mxu0 %v1200_v12 }
  0x5f   : > { %860 = vmatpush1.bf16.msra.mxu1 %v1235_v27 }
  0x60   : > { %861 = vmatprep.subr.bf16.mxu1 %v1239_v29 }
  0x61   : > { %821 = vmatpush1.bf16.msra.mxu0 %v1202_v17 }
  0x62   : > { %822 = vmatprep.subr.bf16.mxu0 %v1206_v18 }
  0x63   : > { %862 = vmatpush1.bf16.msra.mxu1 %v1241_v34 }
  0x65   : > { %823 = vmatpush2.bf16.msra.mxu0 %v1208_v23 }
  0x66   : > { %824 = vmatprep.subr.bf16.mxu0 %v1212_v25  ;;  %880 = vmatmul.mubr.bf16.vlgmr.msra.gmra.mxu1 %v517_v37 }
  0x69   : > { %825 = vmatpush2.bf16.msra.mxu0 %v1214_v30 }
  0x6a   : > { %826 = vmatprep.subr.bf16.mxu0 %v1218_v32 }
  0x6d   : > { %827 = vmatpush2.bf16.msra.mxu0 %v1220_v35 }
  0x6e   : > { %828 = vmatprep.subr.bf16.mxu0 %v1224_v36 }
  0x71   : > { %829 = vmatpush2.bf16.msra.mxu0 %v1226_v38 }
  0x72   : > { %830 = vmatprep.subr.bf16.mxu0 %v1230_v39 }
  0x75   : > { %831 = vmatpush2.bf16.msra.mxu0 %v1232_v40 }
  0x76   : > { %832 = vmatprep.subr.bf16.mxu0 %v1236_v41 }
  0x79   : > { %833 = vmatpush2.bf16.msra.mxu0 %v1238_v42 }
  0x7a   : > { %834 = vmatprep.subr.bf16.mxu0 %v1242_v43 }
  0x7d   : > { %835 = vmatpush2.bf16.msra.mxu0 %v1244_v44 }
  0x7e   : > { %836 = vmatprep.subr.bf16.mxu0 %v1246_v45 }
  0x81   : > { %837 = vmatpush2.bf16.msra.mxu0 %v1248_v46 }
  0x84   : > { %839 = vmatmul.mubr.bf16.vlgmr.msra.gmra.mxu0 %v515_v47 }
 0x126   : > { %v881_v48 = vpop.f32.mrf.mxu1 }
 0x128   : > { %v883_v49 = vpop.f32.mrf.mxu1 }
 0x12a   : > { %v885_v50 = vpop.f32.mrf.mxu1 }
 0x12c   : > { %v886_v51 = vpop.f32.mrf.mxu1 }
 0x144   : > { %v840_v52 = vpop.f32.mrf.mxu0 }
 0x145   : > { %v882_v54 = vadd.f32 %v881_v48, %v840_v52 }
 0x146   : > { %v842_v53 = vpop.f32.mrf.mxu0 }
 0x147   : > { %v884_v55 = vadd.f32 %v883_v49, %v842_v53 }
 0x148   : > { %v844_v56 = vpop.f32.mrf.mxu0 }
 0x149   : > { %v890_v57 = vcombine.low %v882_v54, %v884_v55 }
 0x14a   : > { %v845_v59 = vpop.f32.mrf.mxu0 }
 0x14b   : > { %v897_v60 = vrot.slane %v890_v57, %v1545_v20  ;;  %904 = sbr.rel (%p1111_p13) target bundleno = 347 (0x15b), region = 78 }
 0x14d   : > { %v899_v61 = vadd.f32 %v897_v60, %v493_v58 }
 0x14f   : > { %900 = vst [vmem:[#allocation2] sm:$0xf] %v899_v61 }
 0x150   : > { %v906_v62 = vld [vmem:[%s475_s12] sm:$0x3]  ;;  %v910_v63 = vsub.s32 0, %v1538_v15  ;;  %v914_v0 = vsub.s32 1, %v1538_v15 }
 0x152   : > { %v911_v1 = vrot.slane %v906_v62, %v910_v63  ;;  %v915_v2 = vrot.slane %v906_v62, %v914_v0 }
 0x154   : > { %v916_v3 = vcombine.low %v911_v1, %v915_v2 }
 0x156   : > { %v905_v4 = vld [vmem:[#allocation2] sm:$0xf]  ;;  %v923_v5 = vrot.slane %v916_v3, %v1545_v20 }
 0x158   : > { %v925_v6 = vadd.f32 %v923_v5, %v905_v4 }
 0x15a   : > { %926 = vst [vmem:[%s1508_s4] sm:$0xf] %v925_v6 }
 0x15b PF: > { %s13_s18 = sadd.s32 1, %s1303_s18   ;;  %s1605_s12 = smov %s1283_s13 }
 0x15c   : > { %p10_p0 = scmp.ge.s32.totalorder %s13_s18, 6   ;;  %s1606_s13 = smov %s1379_s25 }
 0x15d   : > { %s1607_s14 = smov %s1295_s16  ;;  %s1608_s15 = smov %s1299_s17 }
 0x15e   : > { %s1609_s16 = smov %s1612_s19  ;;  %s1610_s17 = smov %s1616_s20 }
 0x15f   :  { %12 = sbr.rel (!%p10_p0) target bundleno = 4 (0x4), region = 119 }

// kernel: stylegan_refiner_forward.26
= control target key start
LH: loop header
LB: loop body
LE: loop exit
PB: predicated region body
PF: predicated region fallthrough
CT: control target
= control target key end

     0   :  { %s1499_s12 = smov 0   ;;  %s1501_s13 = smov 0   ;;  %s1813_s0 = inlined_call_operand.vmem [shape: f32[8,4608], index: 0, kind: input, shape index: {}]   ;;  %s1814_s1 = inlined_call_operand.vmem [shape: bf16[4608,512], index: 1, kind: input, shape index: {}]   ;;  %s1815_s2 = inlined_call_operand.vmem [shape: f32[1,512], index: 2, kind: input, shape index: {}]   ;;  %s1816_s3 = inlined_call_operand.vmem [shape: f32[8,512], index: 3, kind: output, shape index: {}]  }
   0x1   :  { %s1503_s14 = smov 0   ;;  %s1505_s15 = smov 0  }
   0x2   :  { %s1507_s16 = smov 0   ;;  %s1509_s17 = smov 0  }
   0x3   :  { %s1511_s18 = smov 0  }
   0x4 LB: > { %s25_s19 = sadd.s32 1, %s1468_s16  ;;  %s28_s20 = sadd.s32 1, %s1472_s17  ;;  %s1476_s18 = sphi %s1511_s18, %s13_s18   ;;  %s1472_s17 = sphi %s1509_s17, %s1822_s17   ;;  %s1468_s16 = sphi %s1507_s16, %s1821_s16   ;;  %s1464_s15 = sphi %s1505_s15, %s1820_s15   ;;  %s1460_s14 = sphi %s1503_s14, %s1819_s14   ;;  %s1456_s13 = sphi %s1501_s13, %s1818_s13   ;;  %s1452_s12 = sphi %s1499_s12, %s1817_s12  }
   0x5   : > { %p26_p0 = scmp.ge.s32.totalorder %s25_s19, 9  ;;  %p76_p1 = scmp.ne.s32.totalorder %s1456_s13, %s1452_s12 }
   0x6   : > { %p77_p2 = scmp.eq.s32.totalorder %s1476_s18, 0  ;;  %s69_s24 = sadd.s32 1, %s1456_s13 }
   0x7   : > { %s1824_s19 = smov (%p26_p0, %s25_s19), 0  ;;  %s1826_s20 = smov (!%p26_p0, %s28_s20), %s1472_s17 }
   0x8   : > { %p78_p3 = por %p77_p2, %p76_p1  ;;  %p30_p4 = scmp.ge.s32.totalorder %s1826_s20, 2 }
   0x9   : > { %s64_s21 = ssub.s32 %s1468_s16, %s1824_s19  ;;  %p1187_p6 = scmp.ge.s32.totalorder %s1476_s18, 18 }
   0xa   : > { %s1828_s20 = smov (%p30_p4, %s1826_s20), 0 }
   0xb   : > { %s65_s22 = ssub.s32 %s1472_s17, %s1828_s20  ;;  %156 = sbr.rel (%p1187_p6) target bundleno = 55 (0x37), region = 16 }
   0xc   : > { %s66_s23 = sor.u32 %s65_s22, %s64_s21 }
   0xd   : > { %p67_p5 = scmp.eq.s32.totalorder %s66_s23, 0 }
   0xf   : > { %s1550_s25 = scalar_select %p67_p5, %s1456_s13, %s69_s24  }
  0x10   : > { %172 = sbr.rel (!%p78_p3) target bundleno = 55 (0x37), region = 24  ;;  %s174_s26 = sand.u32 (%p78_p3), 1, %s1456_s13  }
  0x11   : > { %s1190_s27 = sshll.u32 (%p78_p3), %s1472_s17, 1  ;;  %s1188_s28 = sshll.u32 (%p78_p3), %s174_s26, 9 }
  0x12   : > { %s1268_s29 = sshll.u32 (%p78_p3), %s1468_s16, 8  ;;  %s1564_s8 = scalar_lea.vmem (%p78_p3), [#allocation3], %s1188_s28 }
  0x13   : > { %s180_s30 = sadd.s32 (%p78_p3), %s1268_s29, %s1190_s27 }
  0x14   : > { %s1192_s4 = sshll.u32 (%p78_p3), %s180_s30, 2 }
  0x15   : > { %s1559_s7 = scalar_lea.vmem %s1814_s1, %s1192_s4 }
  0x16   : > { %v337_v0 = vld [vmem:[%s1559_s7] sm:$0xff]  ;;  %v339_v1 = vld [vmem:[%s1559_s7 + $0x10] sm:$0xff] }
  0x17   : > { %v341_v2 = vld [vmem:[%s1559_s7 + $0x20] sm:$0xff]  ;;  %338 = vst [vmem:[%s1564_s8] sm:$0xff] %v337_v0  ;;  %340 = vst [vmem:[%s1564_s8 + $0x8] sm:$0xff] %v339_v1  ;;  %v343_v3 = vld [vmem:[%s1559_s7 + $0x30] sm:$0xff] }
  0x18   : > { %342 = vst [vmem:[%s1564_s8 + $0x10] sm:$0xff] %v341_v2  ;;  %v345_v4 = vld [vmem:[%s1559_s7 + $0x40] sm:$0xff]  ;;  %v347_v5 = vld [vmem:[%s1559_s7 + $0x50] sm:$0xff]  ;;  %344 = vst [vmem:[%s1564_s8 + $0x18] sm:$0xff] %v343_v3 }
  0x19   : > { %346 = vst [vmem:[%s1564_s8 + $0x20] sm:$0xff] %v345_v4  ;;  %348 = vst [vmem:[%s1564_s8 + $0x28] sm:$0xff] %v347_v5  ;;  %v349_v6 = vld [vmem:[%s1559_s7 + $0x60] sm:$0xff]  ;;  %v351_v7 = vld [vmem:[%s1559_s7 + $0x70] sm:$0xff] }
  0x1a   : > { %v353_v8 = vld [vmem:[%s1559_s7 + $0x80] sm:$0xff]  ;;  %350 = vst [vmem:[%s1564_s8 + $0x30] sm:$0xff] %v349_v6  ;;  %352 = vst [vmem:[%s1564_s8 + $0x38] sm:$0xff] %v351_v7  ;;  %v355_v9 = vld [vmem:[%s1559_s7 + $0x90] sm:$0xff] }
  0x1b   : > { %354 = vst [vmem:[%s1564_s8 + $0x40] sm:$0xff] %v353_v8  ;;  %v357_v10 = vld [vmem:[%s1559_s7 + $0xa0] sm:$0xff]  ;;  %v359_v11 = vld [vmem:[%s1559_s7 + $0xb0] sm:$0xff]  ;;  %356 = vst [vmem:[%s1564_s8 + $0x48] sm:$0xff] %v355_v9 }
  0x1c   : > { %358 = vst [vmem:[%s1564_s8 + $0x50] sm:$0xff] %v357_v10  ;;  %360 = vst [vmem:[%s1564_s8 + $0x58] sm:$0xff] %v359_v11  ;;  %v361_v12 = vld [vmem:[%s1559_s7 + $0xc0] sm:$0xff]  ;;  %v363_v13 = vld [vmem:[%s1559_s7 + $0xd0] sm:$0xff] }
  0x1d   : > { %v365_v14 = vld [vmem:[%s1559_s7 + $0xe0] sm:$0xff]  ;;  %362 = vst [vmem:[%s1564_s8 + $0x60] sm:$0xff] %v361_v12  ;;  %364 = vst [vmem:[%s1564_s8 + $0x68] sm:$0xff] %v363_v13  ;;  %v367_v15 = vld [vmem:[%s1559_s7 + $0xf0] sm:$0xff] }
  0x1e   : > { %366 = vst [vmem:[%s1564_s8 + $0x70] sm:$0xff] %v365_v14  ;;  %v369_v16 = vld [vmem:[%s1559_s7 + $0x100] sm:$0xff]  ;;  %v371_v17 = vld [vmem:[%s1559_s7 + $0x110] sm:$0xff]  ;;  %368 = vst [vmem:[%s1564_s8 + $0x78] sm:$0xff] %v367_v15 }
  0x1f   : > { %370 = vst [vmem:[%s1564_s8 + $0x80] sm:$0xff] %v369_v16  ;;  %372 = vst [vmem:[%s1564_s8 + $0x88] sm:$0xff] %v371_v17  ;;  %v373_v18 = vld [vmem:[%s1559_s7 + $0x120] sm:$0xff]  ;;  %v375_v19 = vld [vmem:[%s1559_s7 + $0x130] sm:$0xff] }
  0x20   : > { %v377_v20 = vld [vmem:[%s1559_s7 + $0x140] sm:$0xff]  ;;  %374 = vst [vmem:[%s1564_s8 + $0x90] sm:$0xff] %v373_v18  ;;  %376 = vst [vmem:[%s1564_s8 + $0x98] sm:$0xff] %v375_v19  ;;  %v379_v21 = vld [vmem:[%s1559_s7 + $0x150] sm:$0xff] }
  0x21   : > { %378 = vst [vmem:[%s1564_s8 + $0xa0] sm:$0xff] %v377_v20  ;;  %v381_v22 = vld [vmem:[%s1559_s7 + $0x160] sm:$0xff]  ;;  %v383_v23 = vld [vmem:[%s1559_s7 + $0x170] sm:$0xff]  ;;  %380 = vst [vmem:[%s1564_s8 + $0xa8] sm:$0xff] %v379_v21 }
  0x22   : > { %382 = vst [vmem:[%s1564_s8 + $0xb0] sm:$0xff] %v381_v22  ;;  %384 = vst [vmem:[%s1564_s8 + $0xb8] sm:$0xff] %v383_v23  ;;  %v385_v24 = vld [vmem:[%s1559_s7 + $0x180] sm:$0xff]  ;;  %v387_v25 = vld [vmem:[%s1559_s7 + $0x190] sm:$0xff] }
  0x23   : > { %v389_v26 = vld [vmem:[%s1559_s7 + $0x1a0] sm:$0xff]  ;;  %386 = vst [vmem:[%s1564_s8 + $0xc0] sm:$0xff] %v385_v24  ;;  %388 = vst [vmem:[%s1564_s8 + $0xc8] sm:$0xff] %v387_v25  ;;  %v391_v27 = vld [vmem:[%s1559_s7 + $0x1b0] sm:$0xff] }
  0x24   : > { %390 = vst [vmem:[%s1564_s8 + $0xd0] sm:$0xff] %v389_v26  ;;  %v393_v28 = vld [vmem:[%s1559_s7 + $0x1c0] sm:$0xff]  ;;  %v395_v29 = vld [vmem:[%s1559_s7 + $0x1d0] sm:$0xff]  ;;  %392 = vst [vmem:[%s1564_s8 + $0xd8] sm:$0xff] %v391_v27 }
  0x25   : > { %394 = vst [vmem:[%s1564_s8 + $0xe0] sm:$0xff] %v393_v28  ;;  %396 = vst [vmem:[%s1564_s8 + $0xe8] sm:$0xff] %v395_v29  ;;  %v397_v30 = vld [vmem:[%s1559_s7 + $0x1e0] sm:$0xff]  ;;  %v399_v31 = vld [vmem:[%s1559_s7 + $0x1f0] sm:$0xff] }
  0x26   : > { %v401_v32 = vld [vmem:[%s1559_s7 + $0x200] sm:$0xff]  ;;  %398 = vst [vmem:[%s1564_s8 + $0xf0] sm:$0xff] %v397_v30  ;;  %400 = vst [vmem:[%s1564_s8 + $0xf8] sm:$0xff] %v399_v31  ;;  %v403_v33 = vld [vmem:[%s1559_s7 + $0x210] sm:$0xff] }
  0x27   : > { %402 = vst [vmem:[%s1564_s8 + $0x100] sm:$0xff] %v401_v32  ;;  %v405_v34 = vld [vmem:[%s1559_s7 + $0x220] sm:$0xff]  ;;  %v407_v35 = vld [vmem:[%s1559_s7 + $0x230] sm:$0xff]  ;;  %404 = vst [vmem:[%s1564_s8 + $0x108] sm:$0xff] %v403_v33 }
  0x28   : > { %406 = vst [vmem:[%s1564_s8 + $0x110] sm:$0xff] %v405_v34  ;;  %408 = vst [vmem:[%s1564_s8 + $0x118] sm:$0xff] %v407_v35  ;;  %v409_v36 = vld [vmem:[%s1559_s7 + $0x240] sm:$0xff]  ;;  %v411_v37 = vld [vmem:[%s1559_s7 + $0x250] sm:$0xff] }
  0x29   : > { %v413_v38 = vld [vmem:[%s1559_s7 + $0x260] sm:$0xff]  ;;  %410 = vst [vmem:[%s1564_s8 + $0x120] sm:$0xff] %v409_v36  ;;  %412 = vst [vmem:[%s1564_s8 + $0x128] sm:$0xff] %v411_v37  ;;  %v415_v39 = vld [vmem:[%s1559_s7 + $0x270] sm:$0xff] }
  0x2a   : > { %414 = vst [vmem:[%s1564_s8 + $0x130] sm:$0xff] %v413_v38  ;;  %v417_v40 = vld [vmem:[%s1559_s7 + $0x280] sm:$0xff]  ;;  %v419_v41 = vld [vmem:[%s1559_s7 + $0x290] sm:$0xff]  ;;  %416 = vst [vmem:[%s1564_s8 + $0x138] sm:$0xff] %v415_v39 }
  0x2b   : > { %418 = vst [vmem:[%s1564_s8 + $0x140] sm:$0xff] %v417_v40  ;;  %420 = vst [vmem:[%s1564_s8 + $0x148] sm:$0xff] %v419_v41  ;;  %v421_v42 = vld [vmem:[%s1559_s7 + $0x2a0] sm:$0xff]  ;;  %v423_v43 = vld [vmem:[%s1559_s7 + $0x2b0] sm:$0xff] }
  0x2c   : > { %v425_v44 = vld [vmem:[%s1559_s7 + $0x2c0] sm:$0xff]  ;;  %422 = vst [vmem:[%s1564_s8 + $0x150] sm:$0xff] %v421_v42  ;;  %424 = vst [vmem:[%s1564_s8 + $0x158] sm:$0xff] %v423_v43  ;;  %v427_v45 = vld [vmem:[%s1559_s7 + $0x2d0] sm:$0xff] }
  0x2d   : > { %426 = vst [vmem:[%s1564_s8 + $0x160] sm:$0xff] %v425_v44  ;;  %v429_v46 = vld [vmem:[%s1559_s7 + $0x2e0] sm:$0xff]  ;;  %v431_v47 = vld [vmem:[%s1559_s7 + $0x2f0] sm:$0xff]  ;;  %428 = vst [vmem:[%s1564_s8 + $0x168] sm:$0xff] %v427_v45 }
  0x2e   : > { %430 = vst [vmem:[%s1564_s8 + $0x170] sm:$0xff] %v429_v46  ;;  %432 = vst [vmem:[%s1564_s8 + $0x178] sm:$0xff] %v431_v47  ;;  %v433_v48 = vld [vmem:[%s1559_s7 + $0x300] sm:$0xff]  ;;  %v435_v49 = vld [vmem:[%s1559_s7 + $0x310] sm:$0xff] }
  0x2f   : > { %v437_v50 = vld [vmem:[%s1559_s7 + $0x320] sm:$0xff]  ;;  %434 = vst [vmem:[%s1564_s8 + $0x180] sm:$0xff] %v433_v48  ;;  %436 = vst [vmem:[%s1564_s8 + $0x188] sm:$0xff] %v435_v49  ;;  %v439_v51 = vld [vmem:[%s1559_s7 + $0x330] sm:$0xff] }
  0x30   : > { %438 = vst [vmem:[%s1564_s8 + $0x190] sm:$0xff] %v437_v50  ;;  %v441_v52 = vld [vmem:[%s1559_s7 + $0x340] sm:$0xff]  ;;  %v443_v53 = vld [vmem:[%s1559_s7 + $0x350] sm:$0xff]  ;;  %440 = vst [vmem:[%s1564_s8 + $0x198] sm:$0xff] %v439_v51 }
  0x31   : > { %442 = vst [vmem:[%s1564_s8 + $0x1a0] sm:$0xff] %v441_v52  ;;  %444 = vst [vmem:[%s1564_s8 + $0x1a8] sm:$0xff] %v443_v53  ;;  %v445_v54 = vld [vmem:[%s1559_s7 + $0x360] sm:$0xff]  ;;  %v447_v55 = vld [vmem:[%s1559_s7 + $0x370] sm:$0xff] }
  0x32   : > { %v449_v56 = vld [vmem:[%s1559_s7 + $0x380] sm:$0xff]  ;;  %446 = vst [vmem:[%s1564_s8 + $0x1b0] sm:$0xff] %v445_v54  ;;  %448 = vst [vmem:[%s1564_s8 + $0x1b8] sm:$0xff] %v447_v55  ;;  %v451_v57 = vld [vmem:[%s1559_s7 + $0x390] sm:$0xff] }
  0x33   : > { %450 = vst [vmem:[%s1564_s8 + $0x1c0] sm:$0xff] %v449_v56  ;;  %v453_v58 = vld [vmem:[%s1559_s7 + $0x3a0] sm:$0xff]  ;;  %v455_v59 = vld [vmem:[%s1559_s7 + $0x3b0] sm:$0xff]  ;;  %452 = vst [vmem:[%s1564_s8 + $0x1c8] sm:$0xff] %v451_v57 }
  0x34   : > { %454 = vst [vmem:[%s1564_s8 + $0x1d0] sm:$0xff] %v453_v58  ;;  %456 = vst [vmem:[%s1564_s8 + $0x1d8] sm:$0xff] %v455_v59  ;;  %v457_v60 = vld [vmem:[%s1559_s7 + $0x3c0] sm:$0xff]  ;;  %v459_v61 = vld [vmem:[%s1559_s7 + $0x3d0] sm:$0xff] }
  0x35   : > { %v461_v62 = vld [vmem:[%s1559_s7 + $0x3e0] sm:$0xff]  ;;  %458 = vst [vmem:[%s1564_s8 + $0x1e0] sm:$0xff] %v457_v60  ;;  %460 = vst [vmem:[%s1564_s8 + $0x1e8] sm:$0xff] %v459_v61  ;;  %v463_v63 = vld [vmem:[%s1559_s7 + $0x3f0] sm:$0xff] }
  0x36   : > { %462 = vst [vmem:[%s1564_s8 + $0x1f0] sm:$0xff] %v461_v62  ;;  %464 = vst [vmem:[%s1564_s8 + $0x1f8] sm:$0xff] %v463_v63 }
  0x37 PF: > { %p1193_p7 = scmp.ge.s32.totalorder %s1476_s18, 1  ;;  %p477_p8 = scmp.lt.s32.totalorder %s1476_s18, 19 }
  0x39   : > { %p478_p9 = pnand %p1193_p7, %p477_p8 }
  0x3a   : > { %s484_s9 = sand.u32 (!%p478_p9), 1, %s1452_s12   ;;  %s1195_s10 = sshll.u32 (!%p478_p9), %s1460_s14, 2 }
  0x3b   : > { %481 = sbr.rel (%p478_p9) target bundleno = 353 (0x161), region = 66  ;;  %s1194_s11 = sshll.u32 (!%p478_p9), %s484_s9, 9 }
  0x3c   : > { %p527_p10 = scmp.lt.s32.totalorder (!%p478_p9), %s1195_s10, 35  ;;  %s1197_s21 = sshll.u32 (!%p478_p9), %s1464_s15, 1 }
  0x3d   : > { %p537_p11 = scmp.lt.s32.totalorder (!%p478_p9), %s1197_s21, 3  ;;  %s1713_s5 = scalar_lea.vmem (!%p478_p9), [#allocation3], %s1194_s11 }
  0x3e   : > { %p1200_p12 = scmp.ne.s32.totalorder (!%p478_p9), %s1460_s14, 0 }
  0x40   : > { %s1830_s10 = smov (!%p527_p10, %s1195_s10), 35  ;;  %s1832_s21 = smov (!%p537_p11, %s1197_s21), 3 }
  0x41   : > { %s1196_s22 = sshll.u32 %s1830_s10, 3  ;;  %s539_s12 = scalar_lea.vmem %s1815_s2, %s1832_s21 }
  0x42   : > { %s1699_s26 = scalar_lea.vmem %s1813_s0, %s1196_s22  ;;  %s1199_s29 = sshll.u32 %s1832_s21, 3 }
  0x43   : > { %s1711_s15 = scalar_lea.vmem %s1816_s3, %s1199_s29  ;;  %554 = sbr.rel (%p1200_p12) target bundleno = 74 (0x4a), region = 74 }
  0x48   : > { %v1478_v0 = vmov 0.0  }
  0x49   : > { %555 = vst [vmem:[#allocation2] sm:$0xff] %v1478_v0  ;;  %556 = vst [vmem:[#allocation2 + $0x8] sm:$0xff] %v1478_v0 }
  0x4a PF: > { %v1326_v1 = vld [vmem:[%s1713_s5 + $0x74] ss:$8 sps:$4 sm:$0xff]   ;;  %v1330_v3 = vld [vmem:[%s1713_s5 + $0x70] ss:$8 sps:$4 sm:$0xff]   ;;  %v1332_v5 = vld [vmem:[%s1713_s5 + $0x64] ss:$8 sps:$4 sm:$0xff]  }
  0x4b   : > { %v1328_v2 = vld [vmem:[%s1713_s5 + $0x174] ss:$8 sps:$4 sm:$0xff]   ;;  %951 = vmatprep.subr.bf16.mxu0 %v1326_v1  ;;  %v1331_v4 = vld [vmem:[%s1713_s5 + $0x170] ss:$8 sps:$4 sm:$0xff]   ;;  %v1334_v6 = vld [vmem:[%s1713_s5 + $0x164] ss:$8 sps:$4 sm:$0xff]  }
  0x4c   : > { %992 = vmatprep.subr.bf16.mxu1 %v1328_v2  ;;  %952 = vmatpush1.bf16.msra.mxu0 %v1330_v3  ;;  %v1336_v7 = vld [vmem:[%s1713_s5 + $0x60] ss:$8 sps:$4 sm:$0xff]   ;;  %v1338_v9 = vld [vmem:[%s1713_s5 + $0x54] ss:$8 sps:$4 sm:$0xff]   ;;  %v1342_v11 = vld [vmem:[%s1713_s5 + $0x50] ss:$8 sps:$4 sm:$0xff]  }
  0x4d   : > { %993 = vmatpush1.bf16.msra.mxu1 %v1331_v4  ;;  %953 = vmatprep.subr.bf16.mxu0 %v1332_v5  ;;  %v1337_v8 = vld [vmem:[%s1713_s5 + $0x160] ss:$8 sps:$4 sm:$0xff]   ;;  %v1340_v10 = vld [vmem:[%s1713_s5 + $0x154] ss:$8 sps:$4 sm:$0xff]   ;;  %v1343_v12 = vld [vmem:[%s1713_s5 + $0x150] ss:$8 sps:$4 sm:$0xff]  }
  0x4e   : > { %994 = vmatprep.subr.bf16.mxu1 %v1334_v6  ;;  %v1344_v13 = vld [vmem:[%s1713_s5 + $0x44] ss:$8 sps:$4 sm:$0xff]   ;;  %v1348_v15 = vld [vmem:[%s1713_s5 + $0x40] ss:$8 sps:$4 sm:$0xff]   ;;  %v1350_v17 = vld [vmem:[%s1713_s5 + $0x34] ss:$8 sps:$4 sm:$0xff]  }
  0x4f   : > { %v1346_v14 = vld [vmem:[%s1713_s5 + $0x144] ss:$8 sps:$4 sm:$0xff]   ;;  %v1349_v16 = vld [vmem:[%s1713_s5 + $0x140] ss:$8 sps:$4 sm:$0xff]   ;;  %v1352_v18 = vld [vmem:[%s1713_s5 + $0x134] ss:$8 sps:$4 sm:$0xff]  }
  0x50   : > { %954 = vmatpush1.bf16.msra.mxu0 %v1336_v7  ;;  %v1354_v19 = vld [vmem:[%s1713_s5 + $0x30] ss:$8 sps:$4 sm:$0xff]   ;;  %v1356_v21 = vld [vmem:[%s1713_s5 + $0x24] ss:$8 sps:$4 sm:$0xff]   ;;  %v1360_v23 = vld [vmem:[%s1713_s5 + $0x20] ss:$8 sps:$4 sm:$0xff]  }
  0x51   : > { %995 = vmatpush1.bf16.msra.mxu1 %v1337_v8  ;;  %955 = vmatprep.subr.bf16.mxu0 %v1338_v9  ;;  %v1355_v20 = vld [vmem:[%s1713_s5 + $0x130] ss:$8 sps:$4 sm:$0xff]   ;;  %v1358_v22 = vld [vmem:[%s1713_s5 + $0x124] ss:$8 sps:$4 sm:$0xff]   ;;  %v1361_v24 = vld [vmem:[%s1713_s5 + $0x120] ss:$8 sps:$4 sm:$0xff]  }
  0x52   : > { %996 = vmatprep.subr.bf16.mxu1 %v1340_v10  ;;  %v1362_v25 = vld [vmem:[%s1713_s5 + $0x14] ss:$8 sps:$4 sm:$0xff]   ;;  %v1366_v27 = vld [vmem:[%s1713_s5 + $0x10] ss:$8 sps:$4 sm:$0xff]   ;;  %v1368_v29 = vld [vmem:[%s1713_s5 + $0x4] ss:$8 sps:$4 sm:$0xff]  }
  0x53   : > { %v1364_v26 = vld [vmem:[%s1713_s5 + $0x114] ss:$8 sps:$4 sm:$0xff]   ;;  %v1367_v28 = vld [vmem:[%s1713_s5 + $0x110] ss:$8 sps:$4 sm:$0xff]   ;;  %v1370_v30 = vld [vmem:[%s1713_s5 + $0x104] ss:$8 sps:$4 sm:$0xff]  }
  0x54   : > { %956 = vmatpush1.bf16.msra.mxu0 %v1342_v11  ;;  %v1372_v31 = vld [vmem:[%s1713_s5] ss:$8 sps:$4 sm:$0xff]   ;;  %v1374_v33 = vld [vmem:[%s1713_s5 + $0xf4] ss:$8 sps:$4 sm:$0xff]   ;;  %v1378_v35 = vld [vmem:[%s1713_s5 + $0xf0] ss:$8 sps:$4 sm:$0xff]  }
  0x55   : > { %997 = vmatpush1.bf16.msra.mxu1 %v1343_v12  ;;  %957 = vmatprep.subr.bf16.mxu0 %v1344_v13  ;;  %v1373_v32 = vld [vmem:[%s1713_s5 + $0x100] ss:$8 sps:$4 sm:$0xff]   ;;  %v1376_v34 = vld [vmem:[%s1713_s5 + $0x1f4] ss:$8 sps:$4 sm:$0xff]   ;;  %v1379_v36 = vld [vmem:[%s1713_s5 + $0x1f0] ss:$8 sps:$4 sm:$0xff]  }
  0x56   : > { %998 = vmatprep.subr.bf16.mxu1 %v1346_v14  ;;  %v1380_v37 = vld [vmem:[%s1713_s5 + $0xe4] ss:$8 sps:$4 sm:$0xff]   ;;  %v1384_v39 = vld [vmem:[%s1713_s5 + $0xe0] ss:$8 sps:$4 sm:$0xff]   ;;  %v1386_v41 = vld [vmem:[%s1713_s5 + $0xd4] ss:$8 sps:$4 sm:$0xff]  }
  0x57   : > { %v1382_v38 = vld [vmem:[%s1713_s5 + $0x1e4] ss:$8 sps:$4 sm:$0xff]   ;;  %v1385_v40 = vld [vmem:[%s1713_s5 + $0x1e0] ss:$8 sps:$4 sm:$0xff]   ;;  %v1388_v42 = vld [vmem:[%s1713_s5 + $0x1d4] ss:$8 sps:$4 sm:$0xff]  }
  0x58   : > { %958 = vmatpush1.bf16.msra.mxu0 %v1348_v15  ;;  %v1390_v43 = vld [vmem:[%s1713_s5 + $0xd0] ss:$8 sps:$4 sm:$0xff]   ;;  %v1392_v45 = vld [vmem:[%s1713_s5 + $0xc4] ss:$8 sps:$4 sm:$0xff]   ;;  %v1396_v50 = vld [vmem:[%s1713_s5 + $0xc0] ss:$8 sps:$4 sm:$0xff]  }
  0x59   : > { %999 = vmatpush1.bf16.msra.mxu1 %v1349_v16  ;;  %959 = vmatprep.subr.bf16.mxu0 %v1350_v17  ;;  %v1391_v44 = vld [vmem:[%s1713_s5 + $0x1d0] ss:$8 sps:$4 sm:$0xff]   ;;  %v1394_v46 = vld [vmem:[%s1713_s5 + $0x1c4] ss:$8 sps:$4 sm:$0xff]   ;;  %v1397_v51 = vld [vmem:[%s1713_s5 + $0x1c0] ss:$8 sps:$4 sm:$0xff]  }
  0x5a   : > { %1000 = vmatprep.subr.bf16.mxu1 %v1352_v18  ;;  %v560_v47 = vld [vmem:[%s1699_s26 + $0x8] sm:$0xff]  ;;  %v562_v49 = vld [vmem:[%s1699_s26 + $0x18] sm:$0xff]  ;;  %v559_v5 = vld [vmem:[%s1699_s26] sm:$0xff]  ;;  %p1265_p13 = scmp.ne.s32.totalorder %s1460_s14, 8 }
  0x5b   : > { %v564_v48 = vpack.c.bf16 %v560_v47, %v560_v47  ;;  %v566_v52 = vpack.c.bf16 %v562_v49, %v562_v49  ;;  %v1398_v53 = vld [vmem:[%s1713_s5 + $0xb4] ss:$8 sps:$4 sm:$0xff]   ;;  %v1402_v55 = vld [vmem:[%s1713_s5 + $0xb0] ss:$8 sps:$4 sm:$0xff]   ;;  %v1404_v57 = vld [vmem:[%s1713_s5 + $0xa4] ss:$8 sps:$4 sm:$0xff]   ;;  %v563_v7 = vpack.c.bf16 %v559_v5, %v559_v5 }
  0x5c   : > { %960 = vmatpush1.bf16.msra.mxu0 %v1354_v19  ;;  %v1400_v54 = vld [vmem:[%s1713_s5 + $0x1b4] ss:$8 sps:$4 sm:$0xff]   ;;  %v1403_v56 = vld [vmem:[%s1713_s5 + $0x1b0] ss:$8 sps:$4 sm:$0xff]   ;;  %v1406_v58 = vld [vmem:[%s1713_s5 + $0x1a4] ss:$8 sps:$4 sm:$0xff]  }
  0x5d   : > { %1001 = vmatpush1.bf16.msra.mxu1 %v1355_v20  ;;  %961 = vmatprep.subr.bf16.mxu0 %v1356_v21  ;;  %v1408_v59 = vld [vmem:[%s1713_s5 + $0xa0] ss:$8 sps:$4 sm:$0xff]   ;;  %v1410_v61 = vld [vmem:[%s1713_s5 + $0x94] ss:$8 sps:$4 sm:$0xff]   ;;  %v1414_v63 = vld [vmem:[%s1713_s5 + $0x90] ss:$8 sps:$4 sm:$0xff]  }
  0x5e   : > { %1002 = vmatprep.subr.bf16.mxu1 %v1358_v22  ;;  %983 = vmatprep.mubr.bf16.mxu0 %v564_v48  ;;  %v1409_v60 = vld [vmem:[%s1713_s5 + $0x1a0] ss:$8 sps:$4 sm:$0xff]   ;;  %v1412_v62 = vld [vmem:[%s1713_s5 + $0x194] ss:$8 sps:$4 sm:$0xff]   ;;  %v1415_v0 = vld [vmem:[%s1713_s5 + $0x190] ss:$8 sps:$4 sm:$0xff]  }
  0x5f   : > { %1024 = vmatprep.mubr.bf16.mxu1 %v566_v52  ;;  %v1416_v1 = vld [vmem:[%s1713_s5 + $0x84] ss:$8 sps:$4 sm:$0xff]   ;;  %v1420_v3 = vld [vmem:[%s1713_s5 + $0x80] ss:$8 sps:$4 sm:$0xff]   ;;  %v557_v10 = vld [vmem:[#allocation2] sm:$0xff] }
  0x60   : > { %962 = vmatpush1.bf16.msra.mxu0 %v1360_v23  ;;  %v1418_v2 = vld [vmem:[%s1713_s5 + $0x184] ss:$8 sps:$4 sm:$0xff]   ;;  %v1421_v4 = vld [vmem:[%s1713_s5 + $0x180] ss:$8 sps:$4 sm:$0xff]   ;;  %v558_v14 = vld [vmem:[#allocation2 + $0x8] sm:$0xff] }
  0x61   : > { %1003 = vmatpush1.bf16.msra.mxu1 %v1361_v24  ;;  %963 = vmatprep.subr.bf16.mxu0 %v1362_v25  ;;  %v561_v6 = vld [vmem:[%s1699_s26 + $0x10] sm:$0xff] }
  0x62   : > { %1004 = vmatprep.subr.bf16.mxu1 %v1364_v26  ;;  %v565_v8 = vpack.c.bf16 %v561_v6, %v561_v6 }
  0x64   : > { %964 = vmatpush1.bf16.msra.mxu0 %v1366_v27 }
  0x65   : > { %1005 = vmatpush1.bf16.msra.mxu1 %v1367_v28  ;;  %965 = vmatprep.subr.bf16.mxu0 %v1368_v29 }
  0x66   : > { %1006 = vmatprep.subr.bf16.mxu1 %v1370_v30 }
  0x68   : > { %966 = vmatpush1.bf16.msra.mxu0 %v1372_v31 }
  0x69   : > { %1007 = vmatpush1.bf16.msra.mxu1 %v1373_v32  ;;  %967 = vmatprep.subr.bf16.mxu0 %v1374_v33 }
  0x6a   : > { %1008 = vmatprep.subr.bf16.mxu1 %v1376_v34 }
  0x6c   : > { %968 = vmatpush2.bf16.msra.mxu0 %v1378_v35 }
  0x6d   : > { %1009 = vmatpush2.bf16.msra.mxu1 %v1379_v36  ;;  %969 = vmatprep.subr.bf16.mxu0 %v1380_v37 }
  0x6e   : > { %1010 = vmatprep.subr.bf16.mxu1 %v1382_v38 }
  0x70   : > { %970 = vmatpush2.bf16.msra.mxu0 %v1384_v39 }
  0x71   : > { %1011 = vmatpush2.bf16.msra.mxu1 %v1385_v40  ;;  %971 = vmatprep.subr.bf16.mxu0 %v1386_v41 }
  0x72   : > { %1012 = vmatprep.subr.bf16.mxu1 %v1388_v42 }
  0x74   : > { %972 = vmatpush2.bf16.msra.mxu0 %v1390_v43 }
  0x75   : > { %1013 = vmatpush2.bf16.msra.mxu1 %v1391_v44  ;;  %973 = vmatprep.subr.bf16.mxu0 %v1392_v45 }
  0x76   : > { %1014 = vmatprep.subr.bf16.mxu1 %v1394_v46 }
  0x78   : > { %974 = vmatpush2.bf16.msra.mxu0 %v1396_v50 }
  0x79   : > { %1015 = vmatpush2.bf16.msra.mxu1 %v1397_v51  ;;  %975 = vmatprep.subr.bf16.mxu0 %v1398_v53 }
  0x7a   : > { %1016 = vmatprep.subr.bf16.mxu1 %v1400_v54 }
  0x7c   : > { %976 = vmatpush2.bf16.msra.mxu0 %v1402_v55 }
  0x7d   : > { %1017 = vmatpush2.bf16.msra.mxu1 %v1403_v56  ;;  %977 = vmatprep.subr.bf16.mxu0 %v1404_v57 }
  0x7e   : > { %1018 = vmatprep.subr.bf16.mxu1 %v1406_v58 }
  0x80   : > { %978 = vmatpush2.bf16.msra.mxu0 %v1408_v59 }
  0x81   : > { %1019 = vmatpush2.bf16.msra.mxu1 %v1409_v60  ;;  %979 = vmatprep.subr.bf16.mxu0 %v1410_v61 }
  0x82   : > { %1020 = vmatprep.subr.bf16.mxu1 %v1412_v62 }
  0x84   : > { %980 = vmatpush2.bf16.msra.mxu0 %v1414_v63 }
  0x85   : > { %1021 = vmatpush2.bf16.msra.mxu1 %v1415_v0  ;;  %981 = vmatprep.subr.bf16.mxu0 %v1416_v1 }
  0x86   : > { %1022 = vmatprep.subr.bf16.mxu1 %v1418_v2 }
  0x88   : > { %982 = vmatpush2.bf16.msra.mxu0 %v1420_v3 }
  0x89   : > { %1023 = vmatpush2.bf16.msra.mxu1 %v1421_v4 }
  0x8b   : > { %984 = vmatmul.mubr.bf16.vlgmr.msra.gmra.mxu0 %v563_v7 }
  0x8c   : > { %1025 = vmatmul.mubr.bf16.vlgmr.msra.gmra.mxu1 %v565_v8 }
 0x14b   : > { %v985_v9 = vpop.f32.mrf.mxu0 }
 0x14c   : > { %v1026_v11 = vpop.f32.mrf.mxu1 }
 0x14d   : > { %v1027_v12 = vadd.f32 %v1026_v11, %v985_v9  ;;  %v987_v13 = vpop.f32.mrf.mxu0 }
 0x14e   : > { %v1028_v15 = vpop.f32.mrf.mxu1 }
 0x14f   : > { %v1033_v16 = vadd.f32 %v1027_v12, %v557_v10  ;;  %v1029_v17 = vadd.f32 %v1028_v15, %v987_v13  ;;  %v989_v18 = vpop.f32.mrf.mxu0  ;;  %1040 = sbr.rel (%p1265_p13) target bundleno = 353 (0x161), region = 78 }
 0x150   : > { %v1030_v19 = vpop.f32.mrf.mxu1 }
 0x151   : > { %1035 = vst [vmem:[#allocation2] sm:$0xff] %v1033_v16  ;;  %v1034_v20 = vadd.f32 %v1029_v17, %v558_v14  ;;  %v990_v21 = vpop.f32.mrf.mxu0 }
 0x152   : > { %v1031_v22 = vpop.f32.mrf.mxu1 }
 0x153   : > { %1036 = vst [vmem:[#allocation2 + $0x8] sm:$0xff] %v1034_v20 }
 0x154   : > { %v1045_v23 = vlaneseq  ;;  %v1043_v25 = vld [vmem:[%s539_s12] sm:$0x3] }
 0x156   : > { %v1046_v24 = vshrl.u32 %v1045_v23, 7 }
 0x158   : > { %v1047_v26 = vsub.s32 0, %v1046_v24  ;;  %v1051_v27 = vsub.s32 1, %v1046_v24  ;;  %v1041_v28 = vld [vmem:[#allocation2] sm:$0xff] }
 0x15a   : > { %v1042_v29 = vld [vmem:[#allocation2 + $0x8] sm:$0xff]  ;;  %v1048_v30 = vrot.slane %v1043_v25, %v1047_v26  ;;  %v1052_v31 = vrot.slane %v1043_v25, %v1051_v27 }
 0x15c   : > { %v1055_v32 = vadd.f32 %v1048_v30, %v1041_v28  ;;  %v1056_v33 = vadd.f32 %v1052_v31, %v1042_v29 }
 0x15e   : > { %v1057_v34 = vmax.f32 %v1055_v32, 0.0  ;;  %v1058_v35 = vmax.f32 %v1056_v33, 0.0 }
 0x160   : > { %1059 = vst [vmem:[%s1711_s15] sm:$0xff] %v1057_v34  ;;  %1060 = vst [vmem:[%s1711_s15 + $0x8] sm:$0xff] %v1058_v35 }
 0x161 PF: > { %s13_s18 = sadd.s32 1, %s1476_s18   ;;  %s1817_s12 = smov %s1456_s13 }
 0x162   : > { %p10_p0 = scmp.ge.s32.totalorder %s13_s18, 20   ;;  %s1818_s13 = smov %s1550_s25 }
 0x163   : > { %s1819_s14 = smov %s1468_s16  ;;  %s1820_s15 = smov %s1472_s17 }
 0x164   : > { %s1821_s16 = smov %s1824_s19  ;;  %s1822_s17 = smov %s1828_s20 }
 0x165   :  { %12 = sbr.rel (!%p10_p0) target bundleno = 4 (0x4), region = 119 }

// kernel: jvp__.180
= control target key start
LH: loop header
LB: loop body
LE: loop exit
PB: predicated region body
PF: predicated region fallthrough
CT: control target
= control target key end

     0   :  { %s1495_s12 = smov 0   ;;  %s1497_s13 = smov 0   ;;  %s1791_s0 = inlined_call_operand.vmem [shape: f32[2,512], index: 0, kind: input, shape index: {}]   ;;  %s1792_s1 = inlined_call_operand.vmem [shape: bf16[512,768], index: 1, kind: input, shape index: {}]   ;;  %s1793_s2 = inlined_call_operand.vmem [shape: f32[1,768], index: 2, kind: input, shape index: {}]   ;;  %s1794_s3 = inlined_call_operand.vmem [shape: f32[2,768], index: 3, kind: output, shape index: {}]  }
   0x1   :  { %s1499_s14 = smov 0   ;;  %s1501_s15 = smov 0  }
   0x2   :  { %s1503_s16 = smov 0  }
   0x3 LB: > { %s28_s17 = sadd.s32 1, %s1467_s15  ;;  %p76_p1 = scmp.ne.s32.totalorder %s1459_s13, %s1455_s12  ;;  %s1471_s16 = sphi %s1503_s16, %s13_s16   ;;  %s1467_s15 = sphi %s1501_s15, %s1798_s15   ;;  %s1463_s14 = sphi %s1499_s14, %s1797_s14   ;;  %s1459_s13 = sphi %s1497_s13, %s1796_s13   ;;  %s1455_s12 = sphi %s1495_s12, %s1795_s12  }
   0x4   : > { %p30_p0 = scmp.ge.s32.totalorder %s28_s17, 3  ;;  %p77_p2 = scmp.eq.s32.totalorder %s1471_s16, 0 }
   0x5   : > { %s69_s19 = sadd.s32 1, %s1459_s13  ;;  %p1216_p5 = scmp.ge.s32.totalorder %s1471_s16, 3 }
   0x6   : > { %s1800_s17 = smov (%p30_p0, %s28_s17), 0  ;;  %p78_p3 = por %p77_p2, %p76_p1 }
   0x7   : > { %s65_s18 = ssub.s32 %s1467_s15, %s1800_s17  ;;  %169 = sbr.rel (%p1216_p5) target bundleno = 48 (0x30), region = 20 }
   0x8   : > { %p67_p4 = scmp.eq.s32.totalorder %s65_s18, 0 }
   0xa   : > { %s1530_s20 = scalar_select %p67_p4, %s1459_s13, %s69_s19  }
   0xc   : > { %172 = sbr.rel (!%p78_p3) target bundleno = 48 (0x30), region = 24  ;;  %s174_s21 = sand.u32 (%p78_p3), 1, %s1459_s13  }
   0xd   : > { %s1291_s22 = sshll.u32 (%p78_p3), %s1467_s15, 3  ;;  %s1217_s23 = sshll.u32 (%p78_p3), %s174_s21, 9 }
   0xe   : > { %s1538_s26 = scalar_lea.vmem (%p78_p3), %s1792_s1, %s1291_s22  ;;  %s1543_s27 = scalar_lea.vmem (%p78_p3), [#allocation3], %s1217_s23 }
   0xf   : > { %v337_v0 = vld [vmem:[%s1538_s26] sm:$0xff] (%p78_p3)  ;;  %v339_v1 = vld [vmem:[%s1538_s26 + $0x18] sm:$0xff] (%p78_p3)  ;;  %v341_v2 = vld [vmem:[%s1538_s26 + $0x30] sm:$0xff] (%p78_p3) }
  0x10   : > { %338 = vst [vmem:[%s1543_s27] sm:$0xff] (%p78_p3), %v337_v0  ;;  %340 = vst [vmem:[%s1543_s27 + $0x8] sm:$0xff] (%p78_p3), %v339_v1  ;;  %v343_v3 = vld [vmem:[%s1538_s26 + $0x48] sm:$0xff] (%p78_p3)  ;;  %v345_v4 = vld [vmem:[%s1538_s26 + $0x60] sm:$0xff] (%p78_p3) }
  0x11   : > { %342 = vst [vmem:[%s1543_s27 + $0x10] sm:$0xff] %v341_v2  ;;  %v347_v5 = vld [vmem:[%s1538_s26 + $0x78] sm:$0xff]  ;;  %344 = vst [vmem:[%s1543_s27 + $0x18] sm:$0xff] %v343_v3  ;;  %v349_v6 = vld [vmem:[%s1538_s26 + $0x90] sm:$0xff] }
  0x12   : > { %346 = vst [vmem:[%s1543_s27 + $0x20] sm:$0xff] %v345_v4  ;;  %348 = vst [vmem:[%s1543_s27 + $0x28] sm:$0xff] %v347_v5  ;;  %v351_v7 = vld [vmem:[%s1538_s26 + $0xa8] sm:$0xff]  ;;  %v353_v8 = vld [vmem:[%s1538_s26 + $0xc0] sm:$0xff] }
  0x13   : > { %350 = vst [vmem:[%s1543_s27 + $0x30] sm:$0xff] %v349_v6  ;;  %352 = vst [vmem:[%s1543_s27 + $0x38] sm:$0xff] %v351_v7  ;;  %v355_v9 = vld [vmem:[%s1538_s26 + $0xd8] sm:$0xff]  ;;  %v357_v10 = vld [vmem:[%s1538_s26 + $0xf0] sm:$0xff] }
  0x14   : > { %354 = vst [vmem:[%s1543_s27 + $0x40] sm:$0xff] %v353_v8  ;;  %v359_v11 = vld [vmem:[%s1538_s26 + $0x108] sm:$0xff]  ;;  %356 = vst [vmem:[%s1543_s27 + $0x48] sm:$0xff] %v355_v9  ;;  %v361_v12 = vld [vmem:[%s1538_s26 + $0x120] sm:$0xff] }
  0x15   : > { %358 = vst [vmem:[%s1543_s27 + $0x50] sm:$0xff] %v357_v10  ;;  %360 = vst [vmem:[%s1543_s27 + $0x58] sm:$0xff] %v359_v11  ;;  %v363_v13 = vld [vmem:[%s1538_s26 + $0x138] sm:$0xff]  ;;  %v365_v14 = vld [vmem:[%s1538_s26 + $0x150] sm:$0xff] }
  0x16   : > { %362 = vst [vmem:[%s1543_s27 + $0x60] sm:$0xff] %v361_v12  ;;  %364 = vst [vmem:[%s1543_s27 + $0x68] sm:$0xff] %v363_v13  ;;  %v367_v15 = vld [vmem:[%s1538_s26 + $0x168] sm:$0xff]  ;;  %v369_v16 = vld [vmem:[%s1538_s26 + $0x180] sm:$0xff] }
  0x17   : > { %366 = vst [vmem:[%s1543_s27 + $0x70] sm:$0xff] %v365_v14  ;;  %v371_v17 = vld [vmem:[%s1538_s26 + $0x198] sm:$0xff]  ;;  %368 = vst [vmem:[%s1543_s27 + $0x78] sm:$0xff] %v367_v15  ;;  %v373_v18 = vld [vmem:[%s1538_s26 + $0x1b0] sm:$0xff] }
  0x18   : > { %370 = vst [vmem:[%s1543_s27 + $0x80] sm:$0xff] %v369_v16  ;;  %372 = vst [vmem:[%s1543_s27 + $0x88] sm:$0xff] %v371_v17  ;;  %v375_v19 = vld [vmem:[%s1538_s26 + $0x1c8] sm:$0xff]  ;;  %v377_v20 = vld [vmem:[%s1538_s26 + $0x1e0] sm:$0xff] }
  0x19   : > { %374 = vst [vmem:[%s1543_s27 + $0x90] sm:$0xff] %v373_v18  ;;  %376 = vst [vmem:[%s1543_s27 + $0x98] sm:$0xff] %v375_v19  ;;  %v379_v21 = vld [vmem:[%s1538_s26 + $0x1f8] sm:$0xff]  ;;  %v381_v22 = vld [vmem:[%s1538_s26 + $0x210] sm:$0xff] }
  0x1a   : > { %378 = vst [vmem:[%s1543_s27 + $0xa0] sm:$0xff] %v377_v20  ;;  %v383_v23 = vld [vmem:[%s1538_s26 + $0x228] sm:$0xff]  ;;  %380 = vst [vmem:[%s1543_s27 + $0xa8] sm:$0xff] %v379_v21  ;;  %v385_v24 = vld [vmem:[%s1538_s26 + $0x240] sm:$0xff] }
  0x1b   : > { %382 = vst [vmem:[%s1543_s27 + $0xb0] sm:$0xff] %v381_v22  ;;  %384 = vst [vmem:[%s1543_s27 + $0xb8] sm:$0xff] %v383_v23  ;;  %v387_v25 = vld [vmem:[%s1538_s26 + $0x258] sm:$0xff]  ;;  %v389_v26 = vld [vmem:[%s1538_s26 + $0x270] sm:$0xff] }
  0x1c   : > { %386 = vst [vmem:[%s1543_s27 + $0xc0] sm:$0xff] %v385_v24  ;;  %388 = vst [vmem:[%s1543_s27 + $0xc8] sm:$0xff] %v387_v25  ;;  %v391_v27 = vld [vmem:[%s1538_s26 + $0x288] sm:$0xff]  ;;  %v393_v28 = vld [vmem:[%s1538_s26 + $0x2a0] sm:$0xff] }
  0x1d   : > { %390 = vst [vmem:[%s1543_s27 + $0xd0] sm:$0xff] %v389_v26  ;;  %v395_v29 = vld [vmem:[%s1538_s26 + $0x2b8] sm:$0xff]  ;;  %392 = vst [vmem:[%s1543_s27 + $0xd8] sm:$0xff] %v391_v27  ;;  %v397_v30 = vld [vmem:[%s1538_s26 + $0x2d0] sm:$0xff] }
  0x1e   : > { %394 = vst [vmem:[%s1543_s27 + $0xe0] sm:$0xff] %v393_v28  ;;  %396 = vst [vmem:[%s1543_s27 + $0xe8] sm:$0xff] %v395_v29  ;;  %v399_v31 = vld [vmem:[%s1538_s26 + $0x2e8] sm:$0xff]  ;;  %v401_v32 = vld [vmem:[%s1538_s26 + $0x300] sm:$0xff] }
  0x1f   : > { %398 = vst [vmem:[%s1543_s27 + $0xf0] sm:$0xff] %v397_v30  ;;  %400 = vst [vmem:[%s1543_s27 + $0xf8] sm:$0xff] %v399_v31  ;;  %v403_v33 = vld [vmem:[%s1538_s26 + $0x318] sm:$0xff]  ;;  %v405_v34 = vld [vmem:[%s1538_s26 + $0x330] sm:$0xff] }
  0x20   : > { %402 = vst [vmem:[%s1543_s27 + $0x100] sm:$0xff] %v401_v32  ;;  %v407_v35 = vld [vmem:[%s1538_s26 + $0x348] sm:$0xff]  ;;  %404 = vst [vmem:[%s1543_s27 + $0x108] sm:$0xff] %v403_v33  ;;  %v409_v36 = vld [vmem:[%s1538_s26 + $0x360] sm:$0xff] }
  0x21   : > { %406 = vst [vmem:[%s1543_s27 + $0x110] sm:$0xff] %v405_v34  ;;  %408 = vst [vmem:[%s1543_s27 + $0x118] sm:$0xff] %v407_v35  ;;  %v411_v37 = vld [vmem:[%s1538_s26 + $0x378] sm:$0xff]  ;;  %v413_v38 = vld [vmem:[%s1538_s26 + $0x390] sm:$0xff] }
  0x22   : > { %410 = vst [vmem:[%s1543_s27 + $0x120] sm:$0xff] %v409_v36  ;;  %412 = vst [vmem:[%s1543_s27 + $0x128] sm:$0xff] %v411_v37  ;;  %v415_v39 = vld [vmem:[%s1538_s26 + $0x3a8] sm:$0xff]  ;;  %v417_v40 = vld [vmem:[%s1538_s26 + $0x3c0] sm:$0xff] }
  0x23   : > { %414 = vst [vmem:[%s1543_s27 + $0x130] sm:$0xff] %v413_v38  ;;  %v419_v41 = vld [vmem:[%s1538_s26 + $0x3d8] sm:$0xff]  ;;  %416 = vst [vmem:[%s1543_s27 + $0x138] sm:$0xff] %v415_v39  ;;  %v421_v42 = vld [vmem:[%s1538_s26 + $0x3f0] sm:$0xff] }
  0x24   : > { %418 = vst [vmem:[%s1543_s27 + $0x140] sm:$0xff] %v417_v40  ;;  %420 = vst [vmem:[%s1543_s27 + $0x148] sm:$0xff] %v419_v41  ;;  %v423_v43 = vld [vmem:[%s1538_s26 + $0x408] sm:$0xff]  ;;  %v425_v44 = vld [vmem:[%s1538_s26 + $0x420] sm:$0xff] }
  0x25   : > { %422 = vst [vmem:[%s1543_s27 + $0x150] sm:$0xff] %v421_v42  ;;  %424 = vst [vmem:[%s1543_s27 + $0x158] sm:$0xff] %v423_v43  ;;  %v427_v45 = vld [vmem:[%s1538_s26 + $0x438] sm:$0xff]  ;;  %v429_v46 = vld [vmem:[%s1538_s26 + $0x450] sm:$0xff] }
  0x26   : > { %426 = vst [vmem:[%s1543_s27 + $0x160] sm:$0xff] %v425_v44  ;;  %v431_v47 = vld [vmem:[%s1538_s26 + $0x468] sm:$0xff]  ;;  %428 = vst [vmem:[%s1543_s27 + $0x168] sm:$0xff] %v427_v45  ;;  %v433_v48 = vld [vmem:[%s1538_s26 + $0x480] sm:$0xff] }
  0x27   : > { %430 = vst [vmem:[%s1543_s27 + $0x170] sm:$0xff] %v429_v46  ;;  %432 = vst [vmem:[%s1543_s27 + $0x178] sm:$0xff] %v431_v47  ;;  %v435_v49 = vld [vmem:[%s1538_s26 + $0x498] sm:$0xff]  ;;  %v437_v50 = vld [vmem:[%s1538_s26 + $0x4b0] sm:$0xff] }
  0x28   : > { %434 = vst [vmem:[%s1543_s27 + $0x180] sm:$0xff] %v433_v48  ;;  %436 = vst [vmem:[%s1543_s27 + $0x188] sm:$0xff] %v435_v49  ;;  %v439_v51 = vld [vmem:[%s1538_s26 + $0x4c8] sm:$0xff]  ;;  %v441_v52 = vld [vmem:[%s1538_s26 + $0x4e0] sm:$0xff] }
  0x29   : > { %438 = vst [vmem:[%s1543_s27 + $0x190] sm:$0xff] %v437_v50  ;;  %v443_v53 = vld [vmem:[%s1538_s26 + $0x4f8] sm:$0xff]  ;;  %440 = vst [vmem:[%s1543_s27 + $0x198] sm:$0xff] %v439_v51  ;;  %v445_v54 = vld [vmem:[%s1538_s26 + $0x510] sm:$0xff] }
  0x2a   : > { %442 = vst [vmem:[%s1543_s27 + $0x1a0] sm:$0xff] %v441_v52  ;;  %444 = vst [vmem:[%s1543_s27 + $0x1a8] sm:$0xff] %v443_v53  ;;  %v447_v55 = vld [vmem:[%s1538_s26 + $0x528] sm:$0xff]  ;;  %v449_v56 = vld [vmem:[%s1538_s26 + $0x540] sm:$0xff] }
  0x2b   : > { %446 = vst [vmem:[%s1543_s27 + $0x1b0] sm:$0xff] %v445_v54  ;;  %448 = vst [vmem:[%s1543_s27 + $0x1b8] sm:$0xff] %v447_v55  ;;  %v451_v57 = vld [vmem:[%s1538_s26 + $0x558] sm:$0xff]  ;;  %v453_v58 = vld [vmem:[%s1538_s26 + $0x570] sm:$0xff] }
  0x2c   : > { %450 = vst [vmem:[%s1543_s27 + $0x1c0] sm:$0xff] %v449_v56  ;;  %v455_v59 = vld [vmem:[%s1538_s26 + $0x588] sm:$0xff]  ;;  %452 = vst [vmem:[%s1543_s27 + $0x1c8] sm:$0xff] %v451_v57  ;;  %v457_v60 = vld [vmem:[%s1538_s26 + $0x5a0] sm:$0xff] }
  0x2d   : > { %454 = vst [vmem:[%s1543_s27 + $0x1d0] sm:$0xff] %v453_v58  ;;  %456 = vst [vmem:[%s1543_s27 + $0x1d8] sm:$0xff] %v455_v59  ;;  %v459_v61 = vld [vmem:[%s1538_s26 + $0x5b8] sm:$0xff]  ;;  %v461_v62 = vld [vmem:[%s1538_s26 + $0x5d0] sm:$0xff] }
  0x2e   : > { %458 = vst [vmem:[%s1543_s27 + $0x1e0] sm:$0xff] %v457_v60  ;;  %460 = vst [vmem:[%s1543_s27 + $0x1e8] sm:$0xff] %v459_v61  ;;  %v463_v63 = vld [vmem:[%s1538_s26 + $0x5e8] sm:$0xff] }
  0x2f   : > { %462 = vst [vmem:[%s1543_s27 + $0x1f0] sm:$0xff] %v461_v62  ;;  %464 = vst [vmem:[%s1543_s27 + $0x1f8] sm:$0xff] %v463_v63 }
  0x30 PF: > { %p1220_p6 = scmp.ge.s32.totalorder %s1471_s16, 1  ;;  %p477_p7 = scmp.lt.s32.totalorder %s1471_s16, 4 }
  0x32   : > { %p478_p8 = pnand %p1220_p6, %p477_p7 }
  0x33   : > { %s484_s28 = sand.u32 (!%p478_p8), 1, %s1455_s12   ;;  %s1222_s6 = sshll.u32 (!%p478_p8), %s1463_s14, 1 }
  0x34   : > { %481 = sbr.rel (%p478_p8) target bundleno = 352 (0x160), region = 66  ;;  %s1221_s4 = sshll.u32 (!%p478_p8), %s484_s28, 9 }
  0x35   : > { %s1678_s5 = scalar_lea.vmem (!%p478_p8), [#allocation3], %s1221_s4  ;;  %p537_p9 = scmp.lt.s32.totalorder (!%p478_p8), %s1222_s6, 5 }
  0x39   : > { %v557_v0 = vld [vmem:[%s1791_s0] sm:$0xff]  ;;  %v563_v1 = vlaneseq  ;;  %v1473_v2 = vmov 1983009808   ;;  %v1338_v9 = vld [vmem:[%s1678_s5 + $0x70] ss:$8 sps:$4 sm:$0xff]   ;;  %s1802_s6 = smov (!%p537_p9, %s1222_s6), 5 }
  0x3a   : > { %v561_v3 = vunpack.c.l.s4 %v1473_v2  ;;  %v1334_v5 = vld [vmem:[%s1678_s5 + $0x74] ss:$8 sps:$4 sm:$0xff]   ;;  %v559_v7 = vcombine.high %v557_v0, %v557_v0  ;;  %v1339_v10 = vld [vmem:[%s1678_s5 + $0x170] ss:$8 sps:$4 sm:$0xff]   ;;  %v1340_v12 = vld [vmem:[%s1678_s5 + $0x64] ss:$8 sps:$4 sm:$0xff]   ;;  %s539_s9 = scalar_lea.vmem %s1793_s2, %s1802_s6 }
  0x3b   : > { %v1676_v4 = vshrl.u32 %v563_v1, 7  ;;  %v1336_v8 = vld [vmem:[%s1678_s5 + $0x174] ss:$8 sps:$4 sm:$0xff]   ;;  %968 = vmatprep.subr.bf16.mxu0 %v1334_v5  ;;  %v1342_v13 = vld [vmem:[%s1678_s5 + $0x164] ss:$8 sps:$4 sm:$0xff]   ;;  %s1224_s10 = sshll.u32 %s1802_s6, 1 }
  0x3c   : > { %v562_v6 = vunpack.c.0.s8 %v561_v3  ;;  %1009 = vmatprep.subr.bf16.mxu1 %v1336_v8  ;;  %969 = vmatpush1.bf16.msra.mxu0 %v1338_v9  ;;  %v1344_v14 = vld [vmem:[%s1678_s5 + $0x60] ss:$8 sps:$4 sm:$0xff]   ;;  %v1346_v18 = vld [vmem:[%s1678_s5 + $0x54] ss:$8 sps:$4 sm:$0xff]   ;;  %v1350_v22 = vld [vmem:[%s1678_s5 + $0x50] ss:$8 sps:$4 sm:$0xff]   ;;  %s549_s14 = scalar_lea.vmem %s1794_s3, %s1224_s10 }
  0x3d   : > { %1010 = vmatpush1.bf16.msra.mxu1 %v1339_v10  ;;  %970 = vmatprep.subr.bf16.mxu0 %v1340_v12  ;;  %v1345_v17 = vld [vmem:[%s1678_s5 + $0x160] ss:$8 sps:$4 sm:$0xff]   ;;  %v1348_v21 = vld [vmem:[%s1678_s5 + $0x154] ss:$8 sps:$4 sm:$0xff]   ;;  %v1351_v23 = vld [vmem:[%s1678_s5 + $0x150] ss:$8 sps:$4 sm:$0xff]  }
  0x3e   : > { %v1685_v11 = vsub.s32 %v562_v6, %v1676_v4  ;;  %1011 = vmatprep.subr.bf16.mxu1 %v1342_v13  ;;  %v1352_v24 = vld [vmem:[%s1678_s5 + $0x44] ss:$8 sps:$4 sm:$0xff]   ;;  %v1356_v28 = vld [vmem:[%s1678_s5 + $0x40] ss:$8 sps:$4 sm:$0xff]   ;;  %v1358_v30 = vld [vmem:[%s1678_s5 + $0x34] ss:$8 sps:$4 sm:$0xff]  }
  0x3f   : > { %v1354_v27 = vld [vmem:[%s1678_s5 + $0x144] ss:$8 sps:$4 sm:$0xff]   ;;  %v1357_v29 = vld [vmem:[%s1678_s5 + $0x140] ss:$8 sps:$4 sm:$0xff]   ;;  %v1360_v31 = vld [vmem:[%s1678_s5 + $0x134] ss:$8 sps:$4 sm:$0xff]  }
  0x40   : > { %v1691_v15 = vrot.slane %v557_v0, %v1685_v11  ;;  %v1694_v16 = vrot.slane %v559_v7, %v1685_v11  ;;  %971 = vmatpush1.bf16.msra.mxu0 %v1344_v14  ;;  %v1362_v32 = vld [vmem:[%s1678_s5 + $0x30] ss:$8 sps:$4 sm:$0xff]   ;;  %v1364_v34 = vld [vmem:[%s1678_s5 + $0x24] ss:$8 sps:$4 sm:$0xff]   ;;  %v1368_v36 = vld [vmem:[%s1678_s5 + $0x20] ss:$8 sps:$4 sm:$0xff]  }
  0x41   : > { %1012 = vmatpush1.bf16.msra.mxu1 %v1345_v17  ;;  %972 = vmatprep.subr.bf16.mxu0 %v1346_v18  ;;  %v1363_v33 = vld [vmem:[%s1678_s5 + $0x130] ss:$8 sps:$4 sm:$0xff]   ;;  %v1366_v35 = vld [vmem:[%s1678_s5 + $0x124] ss:$8 sps:$4 sm:$0xff]   ;;  %v1369_v37 = vld [vmem:[%s1678_s5 + $0x120] ss:$8 sps:$4 sm:$0xff]  }
  0x42   : > { %v574_v19 = vcombine.high %v1691_v15, %v1691_v15  ;;  %v575_v20 = vcombine.high %v1694_v16, %v1694_v16  ;;  %1013 = vmatprep.subr.bf16.mxu1 %v1348_v21  ;;  %v1370_v38 = vld [vmem:[%s1678_s5 + $0x14] ss:$8 sps:$4 sm:$0xff]   ;;  %v1374_v40 = vld [vmem:[%s1678_s5 + $0x10] ss:$8 sps:$4 sm:$0xff]   ;;  %v1376_v42 = vld [vmem:[%s1678_s5 + $0x4] ss:$8 sps:$4 sm:$0xff]   ;;  %v580_v18 = vpack.c.bf16 %v1691_v15, %v1691_v15 }
  0x43   : > { %v1372_v39 = vld [vmem:[%s1678_s5 + $0x114] ss:$8 sps:$4 sm:$0xff]   ;;  %v1375_v41 = vld [vmem:[%s1678_s5 + $0x110] ss:$8 sps:$4 sm:$0xff]   ;;  %v1378_v43 = vld [vmem:[%s1678_s5 + $0x104] ss:$8 sps:$4 sm:$0xff]  }
  0x44   : > { %v581_v25 = vpack.c.bf16 %v574_v19, %v574_v19  ;;  %v583_v26 = vpack.c.bf16 %v575_v20, %v575_v20  ;;  %973 = vmatpush1.bf16.msra.mxu0 %v1350_v22  ;;  %v1380_v44 = vld [vmem:[%s1678_s5] ss:$8 sps:$4 sm:$0xff]   ;;  %v1382_v46 = vld [vmem:[%s1678_s5 + $0xf4] ss:$8 sps:$4 sm:$0xff]   ;;  %v1386_v48 = vld [vmem:[%s1678_s5 + $0xf0] ss:$8 sps:$4 sm:$0xff]   ;;  %v582_v19 = vpack.c.bf16 %v1694_v16, %v1694_v16 }
  0x45   : > { %1014 = vmatpush1.bf16.msra.mxu1 %v1351_v23  ;;  %974 = vmatprep.subr.bf16.mxu0 %v1352_v24  ;;  %v1381_v45 = vld [vmem:[%s1678_s5 + $0x100] ss:$8 sps:$4 sm:$0xff]   ;;  %v1384_v47 = vld [vmem:[%s1678_s5 + $0x1f4] ss:$8 sps:$4 sm:$0xff]   ;;  %v1387_v49 = vld [vmem:[%s1678_s5 + $0x1f0] ss:$8 sps:$4 sm:$0xff]  }
  0x46   : > { %1000 = vmatprep.mubr.bf16.mxu0 %v581_v25  ;;  %1041 = vmatprep.mubr.bf16.mxu1 %v583_v26  ;;  %v1388_v50 = vld [vmem:[%s1678_s5 + $0xe4] ss:$8 sps:$4 sm:$0xff]   ;;  %v1392_v52 = vld [vmem:[%s1678_s5 + $0xe0] ss:$8 sps:$4 sm:$0xff]   ;;  %v1394_v54 = vld [vmem:[%s1678_s5 + $0xd4] ss:$8 sps:$4 sm:$0xff]  }
  0x47   : > { %1015 = vmatprep.subr.bf16.mxu1 %v1354_v27  ;;  %v1390_v51 = vld [vmem:[%s1678_s5 + $0x1e4] ss:$8 sps:$4 sm:$0xff]   ;;  %v1393_v53 = vld [vmem:[%s1678_s5 + $0x1e0] ss:$8 sps:$4 sm:$0xff]   ;;  %v1396_v55 = vld [vmem:[%s1678_s5 + $0x1d4] ss:$8 sps:$4 sm:$0xff]  }
  0x48   : > { %975 = vmatpush1.bf16.msra.mxu0 %v1356_v28  ;;  %v1398_v56 = vld [vmem:[%s1678_s5 + $0xd0] ss:$8 sps:$4 sm:$0xff]   ;;  %v1400_v58 = vld [vmem:[%s1678_s5 + $0xc4] ss:$8 sps:$4 sm:$0xff]   ;;  %v1404_v60 = vld [vmem:[%s1678_s5 + $0xc0] ss:$8 sps:$4 sm:$0xff]  }
  0x49   : > { %1016 = vmatpush1.bf16.msra.mxu1 %v1357_v29  ;;  %976 = vmatprep.subr.bf16.mxu0 %v1358_v30  ;;  %v1399_v57 = vld [vmem:[%s1678_s5 + $0x1d0] ss:$8 sps:$4 sm:$0xff]   ;;  %v1402_v59 = vld [vmem:[%s1678_s5 + $0x1c4] ss:$8 sps:$4 sm:$0xff]   ;;  %v1405_v61 = vld [vmem:[%s1678_s5 + $0x1c0] ss:$8 sps:$4 sm:$0xff]  }
  0x4a   : > { %1017 = vmatprep.subr.bf16.mxu1 %v1360_v31  ;;  %v1406_v62 = vld [vmem:[%s1678_s5 + $0xb4] ss:$8 sps:$4 sm:$0xff]   ;;  %v1410_v0 = vld [vmem:[%s1678_s5 + $0xb0] ss:$8 sps:$4 sm:$0xff]   ;;  %v1412_v2 = vld [vmem:[%s1678_s5 + $0xa4] ss:$8 sps:$4 sm:$0xff]  }
  0x4b   : > { %v1408_v63 = vld [vmem:[%s1678_s5 + $0x1b4] ss:$8 sps:$4 sm:$0xff]   ;;  %v1411_v1 = vld [vmem:[%s1678_s5 + $0x1b0] ss:$8 sps:$4 sm:$0xff]   ;;  %v1414_v3 = vld [vmem:[%s1678_s5 + $0x1a4] ss:$8 sps:$4 sm:$0xff]  }
  0x4c   : > { %977 = vmatpush1.bf16.msra.mxu0 %v1362_v32  ;;  %v1416_v5 = vld [vmem:[%s1678_s5 + $0xa0] ss:$8 sps:$4 sm:$0xff]   ;;  %v1418_v7 = vld [vmem:[%s1678_s5 + $0x94] ss:$8 sps:$4 sm:$0xff]   ;;  %v1422_v9 = vld [vmem:[%s1678_s5 + $0x90] ss:$8 sps:$4 sm:$0xff]  }
  0x4d   : > { %1018 = vmatpush1.bf16.msra.mxu1 %v1363_v33  ;;  %978 = vmatprep.subr.bf16.mxu0 %v1364_v34  ;;  %v1417_v6 = vld [vmem:[%s1678_s5 + $0x1a0] ss:$8 sps:$4 sm:$0xff]   ;;  %v1420_v8 = vld [vmem:[%s1678_s5 + $0x194] ss:$8 sps:$4 sm:$0xff]   ;;  %v1423_v10 = vld [vmem:[%s1678_s5 + $0x190] ss:$8 sps:$4 sm:$0xff]  }
  0x4e   : > { %1019 = vmatprep.subr.bf16.mxu1 %v1366_v35  ;;  %v1424_v12 = vld [vmem:[%s1678_s5 + $0x84] ss:$8 sps:$4 sm:$0xff]   ;;  %v1428_v14 = vld [vmem:[%s1678_s5 + $0x80] ss:$8 sps:$4 sm:$0xff]   ;;  %v1474_v20 = vmov 0.0   ;;  %v1071_v16 = vsub.s32 0, %v1676_v4 }
  0x4f   : > { %v1426_v13 = vld [vmem:[%s1678_s5 + $0x184] ss:$8 sps:$4 sm:$0xff]   ;;  %v1429_v17 = vld [vmem:[%s1678_s5 + $0x180] ss:$8 sps:$4 sm:$0xff]   ;;  %555 = vst [vmem:[#allocation2] sm:$0xf] %v1474_v20 }
  0x50   : > { %979 = vmatpush1.bf16.msra.mxu0 %v1368_v36  ;;  %v1075_v24 = vsub.s32 1, %v1676_v4  ;;  %v1067_v27 = vld [vmem:[%s539_s9] sm:$0x3] }
  0x51   : > { %1020 = vmatpush1.bf16.msra.mxu1 %v1369_v37  ;;  %980 = vmatprep.subr.bf16.mxu0 %v1370_v38  ;;  %v1072_v34 = vrot.slane %v1067_v27, %v1071_v16 }
  0x52   : > { %1021 = vmatprep.subr.bf16.mxu1 %v1372_v39  ;;  %v1076_v35 = vrot.slane %v1067_v27, %v1075_v24 }
  0x54   : > { %981 = vmatpush1.bf16.msra.mxu0 %v1374_v40  ;;  %v1077_v38 = vcombine.low %v1072_v34, %v1076_v35 }
  0x55   : > { %1022 = vmatpush1.bf16.msra.mxu1 %v1375_v41  ;;  %982 = vmatprep.subr.bf16.mxu0 %v1376_v42 }
  0x56   : > { %1023 = vmatprep.subr.bf16.mxu1 %v1378_v43  ;;  %v556_v31 = vld [vmem:[#allocation2] sm:$0xf]  ;;  %v1084_v39 = vrot.slane %v1077_v38, %v1685_v11 }
  0x58   : > { %983 = vmatpush1.bf16.msra.mxu0 %v1380_v44 }
  0x59   : > { %1024 = vmatpush1.bf16.msra.mxu1 %v1381_v45  ;;  %984 = vmatprep.subr.bf16.mxu0 %v1382_v46 }
  0x5a   : > { %1025 = vmatprep.subr.bf16.mxu1 %v1384_v47 }
  0x5c   : > { %985 = vmatpush2.bf16.msra.mxu0 %v1386_v48 }
  0x5d   : > { %1026 = vmatpush2.bf16.msra.mxu1 %v1387_v49  ;;  %986 = vmatprep.subr.bf16.mxu0 %v1388_v50 }
  0x5e   : > { %1027 = vmatprep.subr.bf16.mxu1 %v1390_v51 }
  0x60   : > { %987 = vmatpush2.bf16.msra.mxu0 %v1392_v52 }
  0x61   : > { %1028 = vmatpush2.bf16.msra.mxu1 %v1393_v53  ;;  %988 = vmatprep.subr.bf16.mxu0 %v1394_v54 }
  0x62   : > { %1029 = vmatprep.subr.bf16.mxu1 %v1396_v55 }
  0x64   : > { %989 = vmatpush2.bf16.msra.mxu0 %v1398_v56 }
  0x65   : > { %1030 = vmatpush2.bf16.msra.mxu1 %v1399_v57  ;;  %990 = vmatprep.subr.bf16.mxu0 %v1400_v58 }
  0x66   : > { %1031 = vmatprep.subr.bf16.mxu1 %v1402_v59 }
  0x68   : > { %991 = vmatpush2.bf16.msra.mxu0 %v1404_v60 }
  0x69   : > { %1032 = vmatpush2.bf16.msra.mxu1 %v1405_v61  ;;  %992 = vmatprep.subr.bf16.mxu0 %v1406_v62 }
  0x6a   : > { %1033 = vmatprep.subr.bf16.mxu1 %v1408_v63 }
  0x6c   : > { %993 = vmatpush2.bf16.msra.mxu0 %v1410_v0 }
  0x6d   : > { %1034 = vmatpush2.bf16.msra.mxu1 %v1411_v1  ;;  %994 = vmatprep.subr.bf16.mxu0 %v1412_v2 }
  0x6e   : > { %1035 = vmatprep.subr.bf16.mxu1 %v1414_v3 }
  0x70   : > { %995 = vmatpush2.bf16.msra.mxu0 %v1416_v5 }
  0x71   : > { %1036 = vmatpush2.bf16.msra.mxu1 %v1417_v6  ;;  %996 = vmatprep.subr.bf16.mxu0 %v1418_v7 }
  0x72   : > { %1037 = vmatprep.subr.bf16.mxu1 %v1420_v8 }
  0x74   : > { %997 = vmatpush2.bf16.msra.mxu0 %v1422_v9 }
  0x75   : > { %1038 = vmatpush2.bf16.msra.mxu1 %v1423_v10  ;;  %998 = vmatprep.subr.bf16.mxu0 %v1424_v12 }
  0x76   : > { %1039 = vmatprep.subr.bf16.mxu1 %v1426_v13 }
  0x78   : > { %999 = vmatpush2.bf16.msra.mxu0 %v1428_v14 }
  0x79   : > { %1040 = vmatpush2.bf16.msra.mxu1 %v1429_v17 }
  0x7b   : > { %1001 = vmatmul.mubr.bf16.vlgmr.msra.gmra.mxu0 %v580_v18 }
  0x7c   : > { %1042 = vmatmul.mubr.bf16.vlgmr.msra.gmra.mxu1 %v582_v19 }
 0x13b   : > { %v1002_v21 = vpop.f32.mrf.mxu0 }
 0x13c   : > { %v1043_v22 = vpop.f32.mrf.mxu1 }
 0x13d   : > { %v1004_v15 = vpop.f32.mrf.mxu0  ;;  %v1044_v25 = vadd.f32 %v1043_v22, %v1002_v21 }
 0x13e   : > { %v1045_v23 = vpop.f32.mrf.mxu1 }
 0x13f   : > { %v1046_v26 = vadd.f32 %v1045_v23, %v1004_v15  ;;  %v1006_v28 = vpop.f32.mrf.mxu0 }
 0x140   : > { %v1047_v29 = vpop.f32.mrf.mxu1 }
 0x141   : > { %v1052_v30 = vcombine.low %v1044_v25, %v1046_v26  ;;  %v1007_v32 = vpop.f32.mrf.mxu0 }
 0x142   : > { %v1048_v33 = vpop.f32.mrf.mxu1 }
 0x143   : > { %v1059_v36 = vrot.slane %v1052_v30, %v1685_v11 }
 0x145   : > { %v1061_v37 = vadd.f32 %v1059_v36, %v556_v31 }
 0x147   : > { %1062 = vst [vmem:[#allocation2] sm:$0xf] %v1061_v37 }
 0x14e   : > { %v1066_v4 = vld [vmem:[#allocation2] sm:$0xf] }
 0x14f   : > { %v1086_v40 = vadd.f32 %v1084_v39, %v1066_v4 }
 0x151   : > { %1431 = vtanh.f32 %v1086_v40 }
 0x15e   : > { %v1432_v41 = vpop.eup %1431 }
 0x15f   : > { %1088 = vst [vmem:[%s549_s14] sm:$0xf] %v1432_v41 }
 0x160 PF: > { %s13_s16 = sadd.s32 1, %s1471_s16   ;;  %s1795_s12 = smov %s1459_s13 }
 0x161   : > { %p10_p10 = scmp.ge.s32.totalorder %s13_s16, 5   ;;  %s1796_s13 = smov %s1530_s20 }
 0x162   : > { %s1797_s14 = smov %s1467_s15  ;;  %s1798_s15 = smov %s1800_s17 }
 0x163   :  { %12 = sbr.rel (!%p10_p10) target bundleno = 3 (0x3), region = 119 }

// kernel: closed_call.23
= control target key start
LH: loop header
LB: loop body
LE: loop exit
PB: predicated region body
PF: predicated region fallthrough
CT: control target
= control target key end

     0   :  { %13 = vsyncpa [#allocation3], 0  ;;  %s172_s0 = inlined_call_operand.vmem [shape: f32[2], index: 0, kind: input, shape index: {}]   ;;  %s173_s1 = inlined_call_operand.vmem [shape: f32[2,512], index: 1, kind: input, shape index: {}]   ;;  %s174_s2 = inlined_call_operand.vmem [shape: f32[2,512], index: 2, kind: input, shape index: {}]   ;;  %s175_s3 = inlined_call_operand.vmem [shape: f32[2,512], index: 3, kind: input, shape index: {}]   ;;  %s176_s4 = inlined_call_operand.vmem [shape: f32[2,512], index: 4, kind: input, shape index: {}]   ;;  %s177_s5 = inlined_call_operand.vmem [shape: f32[2,512], index: 5, kind: output, shape index: {0}]   ;;  %s178_s6 = inlined_call_operand.vmem [shape: f32[2,512], index: 6, kind: output, shape index: {1}]   ;;  %s179_s7 = inlined_call_operand.vmem [shape: f32[2,512], index: 7, kind: output, shape index: {2}]  }
   0x1   :  { %s20_s26 = sshll.u32 %s172_s0, 4  ;;  %s21_s26 = int_to_ptr.vmem [resolvable:$true] %s20_s26 }
   0x2   :  { %s93_s27 = scalar_lea.vmem %s21_s26, 16  ;;  %p98_p1 = scmp.lt.s32.totalorder %s21_s26, %s21_s26 }
   0x3   :  { %p94_p0 = scmp.ne.s32.totalorder %s21_s26, %s93_s27  ;;  %p99_p2 = scmp.lt.s32.totalorder %s93_s27, %s93_s27 }
   0x5   :  { %p100_p3 = por %p99_p2, %p98_p1 }
   0x7   :  { %p101_p4 = pnand %p100_p3, %p94_p0 }
   0x9   :  { %104 = shalt.err (!%p101_p4)
}
   0xa   :  { %s107_s28 = smov [#allocation2]  }
   0xb   :  { %23 = dma.vmem_to_smem %s21_s26, 16, %s107_s28, [#allocation3]  }
   0xc   :  { %105 = dma.done.wait [#allocation3], 16  }
   0xd   :  { %106 = vsyncadd [#allocation3], 4294967280 }
   0xe   :  { %35 = sfence }
   0xf   :  { %v36_v0 = vld [vmem:[%s174_s2] sm:$0xff]  ;;  %s83_s11 = sld [smem:[#allocation2 + $0x1]] }
  0x10   :  { %v37_v1 = vld [vmem:[%s175_s3] sm:$0xff]  ;;  %v39_v4 = vmul.f32 0.1, %v36_v0  ;;  %v43_v6 = vmul.f32 0.001, %v36_v0  ;;  %s46_s3 = sld [smem:[#allocation2]] }
  0x11   :  { %v41_v2 = vld [vmem:[%s176_s4] sm:$0xff]  ;;  %v38_v3 = vmul.f32 0.9, %v37_v1 }
  0x12   :  { %v42_v5 = vmul.f32 0.999, %v41_v2  ;;  %v44_v8 = vmul.f32 %v43_v6, %v36_v0  ;;  %v54_v24 = vld [vmem:[%s173_s1] sm:$0xff] }
  0x13   :  { %v40_v7 = vadd.f32 %v39_v4, %v38_v3 }
  0x14   :  { %v45_v9 = vadd.f32 %v44_v8, %v42_v5 }
  0x15   :  { %68 = vst [vmem:[%s178_s6] sm:$0xff] %v40_v7  ;;  %v51_v10 = vstv %s83_s11 }
  0x16   :  { %69 = vst [vmem:[%s179_s7] sm:$0xff] %v45_v9  ;;  %85 = vrcp.f32 %v51_v10  ;;  %v47_v13 = vstv %s46_s3 }
  0x23   :  { %v86_v11 = vpop.eup %85 }
  0x24   :  { %v53_v12 = vmul.f32 %v86_v11, %v45_v9 }
  0x26   :  { %87 = vrsqrt.f32 %v53_v12  ;;  %vm58_vm0 = vcmp.eq.f32.partialorder %v53_v12, inf  ;;  %v61_v15 = vand.u32 2147483648, %v53_v12  ;;  %vm60_vm1 = vcmp.eq.f32.partialorder %v53_v12, 0.0 }
  0x27   :  { %89 = vrcp.f32 %v47_v13 }
  0x33   :  { %v88_v14 = vpop.eup %87 }
  0x34   :  { %v57_v16 = vmul.f32 %v88_v14, %v53_v12  ;;  %v90_v20 = vpop.eup %89 }
  0x35   :  { %v49_v21 = vmul.f32 %v90_v20, %v40_v7 }
  0x36   :  { %v59_v17 = vsel %vm58_vm0, %v53_v12, %v57_v16 }
  0x37   :  { %v62_v18 = vsel %vm60_vm1, %v61_v15, %v59_v17  ;;  %v55_v22 = vmul.f32 0.01, %v49_v21 }
  0x38   :  { %v63_v19 = vadd.f32 1e-08, %v62_v18 }
  0x3a   :  { %91 = vrcp.f32 %v63_v19 }
  0x47   :  { %v92_v23 = vpop.eup %91 }
  0x48   :  { %v65_v25 = vmul.f32 %v92_v23, %v55_v22 }
  0x4a   :  { %v66_v26 = vsub.f32 %v54_v24, %v65_v25 }
  0x4c   :  { %67 = vst [vmem:[%s177_s5] sm:$0xff] %v66_v26 }
  0x4d   :  { %82 = vsyncpa [#allocation3], 1 }

</bundles_post_ra>
